<compile_context>
chip_gen: v7x
topology: tpu7x:2x2x1
jax: 0.10.0
libtpu: 0.0.40
codegen_flags: <defaults>
</compile_context>

<pallas_src>
import functools
import math

import jax
import jax.numpy as jnp
import numpy as np
from jax.experimental import pallas as pl
from jax.experimental.pallas import tpu as pltpu


# ------------------------------ fused kernel --------------------------------

def _fused_rdb_kernel(x_ref, w1_ref, w2_ref, w3_ref, w4_ref, w5_ref,
                      o_ref, buf_ref, *, width, scale_ratio, compute_dtype):
    """All five convs of one ResidualDenseBlock for one batch element.

    x_ref   : (H*W, Cin)            flattened NHWC input rows
    w*_ref  : (9*Cin_k, Cout_k)     im2col-ordered weights (dy, dx, ci) rows
    o_ref   : (H*W, Cin)            conv5 * scale + x
    buf_ref : (H*W + 2*(W+1), Cin+4*GC) f32 VMEM activation slab (zero-padded)
    """
    m, cin = x_ref.shape
    c_total = buf_ref.shape[1]
    gc = w1_ref.shape[1]
    off = width + 1                      # zero rows above/below the image

    # Fresh zero-padding bands + input slab for this batch element.  The slab
    # is tiny, so re-zeroing each grid step is free and keeps every core's
    # scratch well defined under "parallel" grid semantics.
    buf_ref[...] = jnp.zeros_like(buf_ref)
    buf_ref[off:off + m, 0:cin] = x_ref[...].astype(buf_ref.dtype)

    # Output-pixel column index (w coordinate): flattened row shifts would
    # wrap horizontally across image rows, so taps with dx != 1 mask the
    # first / last column of the image.
    col = jax.lax.broadcasted_iota(jnp.int32, (m, 1), 0) % width
    not_left = col >= 1                  # dx == 0 invalid at w == 0
    not_right = col <= width - 2         # dx == 2 invalid at w == W-1

    def conv3x3(w_ref, c_in):
        """3x3 / stride 1 / pad 1 conv over buffer channels [0, c_in)."""
        cout = w_ref.shape[1]
        acc = jnp.zeros((m, cout), jnp.float32)
        tap = 0
        for dy in range(3):
            for dx in range(3):
                shift = (dy - 1) * width + (dx - 1)
                a = buf_ref[off + shift:off + shift + m, 0:c_in]
                if dx == 0:
                    a = jnp.where(not_left, a, 0.0)
                elif dx == 2:
                    a = jnp.where(not_right, a, 0.0)
                wt = w_ref[tap * c_in:(tap + 1) * c_in, :]
                acc += jnp.dot(a.astype(compute_dtype), wt,
                               preferred_element_type=jnp.float32)
                tap += 1
        return acc

    # conv1..conv4: LeakyReLU(0.2); result appended as the next channel slab
    # of the shared buffer (this *is* the dense concatenation - no copies).
    for k, w_ref in enumerate((w1_ref, w2_ref, w3_ref, w4_ref)):
        c_in_k = cin + k * gc
        y = conv3x3(w_ref, c_in_k)
        buf_ref[off:off + m, c_in_k:c_in_k + gc] = jnp.where(y >= 0.0, y, 0.2 * y)

    # conv5: no activation; fused residual epilogue in f32.
    y5 = conv3x3(w5_ref, c_total)
    o_ref[...] = (y5 * scale_ratio
                  + x_ref[...].astype(jnp.float32)).astype(o_ref.dtype)


# --------------------------------- wrapper ----------------------------------

def residual_dense_block(x_nchw, weights, scale_ratio, *,
                         compute_dtype=jnp.bfloat16):
    """Forward pass matching the PyTorch ResidualDenseBlock (NCHW in/out)."""
    n, cin, h, w = x_nchw.shape
    gc = weights[0].shape[0]
    m = h * w
    c_total = cin + 4 * gc
    off = w + 1

    # NCHW -> flattened NHWC rows (one tiny boundary copy; the heavy path is
    # all inside the fused kernel).
    x_flat = jnp.transpose(x_nchw, (0, 2, 3, 1)).reshape(n, m, cin)
    # (Cout, Cin_k, 3, 3) -> (9*Cin_k, Cout) with row order (dy, dx, ci),
    # matching the kernel's tap slicing; cast to the matmul compute dtype.
    wmats = [jnp.transpose(wk, (2, 3, 1, 0)).reshape(9 * wk.shape[1], wk.shape[0])
             .astype(compute_dtype) for wk in weights]

    flops = 2 * n * m * sum(9 * wk.shape[1] * wk.shape[0] for wk in weights)
    bytes_accessed = (x_flat.size * x_flat.dtype.itemsize
                      + sum(wm.size * wm.dtype.itemsize for wm in wmats)
                      + n * m * cin * x_nchw.dtype.itemsize)

    kernel = functools.partial(_fused_rdb_kernel, width=w,
                               scale_ratio=float(scale_ratio),
                               compute_dtype=compute_dtype)

    # TODO(synk): for large images (H*W*C_total exceeding the scoped VMEM
    # budget) add a second grid axis of spatial row-tiles with a 5-row halo
    # (manual DMA from pl.ANY) instead of one whole image per grid step.
    out_flat = pl.pallas_call(
        kernel,
        grid=(n,),
        in_specs=[pl.BlockSpec((None, m, cin), lambda b: (b, 0, 0))]
                 + [pl.BlockSpec(wm.shape, lambda b: (0, 0)) for wm in wmats],
        out_specs=pl.BlockSpec((None, m, cin), lambda b: (b, 0, 0)),
        out_shape=jax.ShapeDtypeStruct((n, m, cin), x_nchw.dtype),
        scratch_shapes=[pltpu.VMEM((m + 2 * off, c_total), jnp.float32)],
        compiler_params=pltpu.CompilerParams(
            dimension_semantics=("parallel",),
            vmem_limit_bytes=32 * 1024 * 1024),
        cost_estimate=pl.CostEstimate(flops=flops, transcendentals=0,
                                      bytes_accessed=bytes_accessed),
    )(x_flat, *wmats)

    # flattened NHWC -> NCHW (tiny; kept only to match the PyTorch interface).
    return jnp.transpose(out_flat.reshape(n, h, w, cin), (0, 3, 1, 2))


# ------------------------- parameter initialization -------------------------

def init_weights(key, in_channels, growth_channels):
    """Deterministic kaiming_normal_ (gain=sqrt(2), fan_in) * 0.1, no bias."""
    shapes = [
        (growth_channels, in_channels + 0 * growth_channels, 3, 3),
        (growth_channels, in_channels + 1 * growth_channels, 3, 3),
        (growth_channels, in_channels + 2 * growth_channels, 3, 3),
        (growth_channels, in_channels + 3 * growth_channels, 3, 3),
        (in_channels, in_channels + 4 * growth_channels, 3, 3),
    ]
    keys = jax.random.split(key, len(shapes))
    ws = []
    for k, shp in zip(keys, shapes):
        fan_in = shp[1] * shp[2] * shp[3]
        std = math.sqrt(2.0 / fan_in)
        ws.append(jax.random.normal(k, shp, jnp.float32) * std * 0.1)
    return ws


# ------------------------------ JAX reference --------------------------------

def _ref_block(x, weights, scale_ratio):
    def conv(inp, wt):
        return jax.lax.conv_general_dilated(
            inp, wt, window_strides=(1, 1), padding=((1, 1), (1, 1)),
            dimension_numbers=("NCHW", "OIHW", "NCHW"))

    def lrelu(y):
        return jnp.where(y >= 0, y, 0.2 * y)

    w1, w2, w3, w4, w5 = weights
    c1 = lrelu(conv(x, w1))
    c2 = lrelu(conv(jnp.concatenate([x, c1], 1), w2))
    c3 = lrelu(conv(jnp.concatenate([x, c1, c2], 1), w3))
    c4 = lrelu(conv(jnp.concatenate([x, c1, c2, c3], 1), w4))
    c5 = conv(jnp.concatenate([x, c1, c2, c3, c4], 1), w5)
    return c5 * scale_ratio + x


# ----------------------------------- main ------------------------------------

if __name__ == "__main__":
    in_channels = 4
    growth_channels = 4
    scale_ratio = 0.2
    N, H, W = 2, 16, 16

    key = jax.random.PRNGKey(0)
    kx, kw = jax.random.split(key)
    x = jax.random.normal(kx, (N, in_channels, H, W), jnp.float32)
    weights = init_weights(kw, in_channels, growth_channels)

    ref = jax.block_until_ready(_ref_block(x, weights, scale_ratio))

    # Exact-precision path (f32 matmul operands) -> tight correctness check.
    out_f32 = jax.block_until_ready(
        residual_dense_block(x, weights, scale_ratio,
                             compute_dtype=jnp.float32))
    np.testing.assert_allclose(np.asarray(out_f32), np.asarray(ref),
                               rtol=1e-4, atol=1e-5)

    # Production path (bf16 matmul operands, f32 accumulation + epilogue).
    out_bf16 = jax.block_until_ready(
        residual_dense_block(x, weights, scale_ratio,
                             compute_dtype=jnp.bfloat16))
    np.testing.assert_allclose(np.asarray(out_bf16), np.asarray(ref),
                               rtol=1e-2, atol=1e-2)

    print("KERNEL_OK")
</pallas_src>

<mosaic_0001>
module attributes {stable_mosaic.version = 11 : i64} {
  func.func @_fused_rdb_kernel(%arg0: i32, %arg1: memref<1x256x4xf32, #tpu.memory_space<vmem>>, %arg2: memref<36x4xf32, #tpu.memory_space<vmem>>, %arg3: memref<72x4xf32, #tpu.memory_space<vmem>>, %arg4: memref<108x4xf32, #tpu.memory_space<vmem>>, %arg5: memref<144x4xf32, #tpu.memory_space<vmem>>, %arg6: memref<180x4xf32, #tpu.memory_space<vmem>>, %arg7: memref<1x256x4xf32, #tpu.memory_space<vmem>>, %arg8: memref<290x20xf32, #tpu.memory_space<vmem>>) attributes {dimension_semantics = [#tpu.dimension_semantics<parallel>], iteration_bounds = array<i64: 2>, scalar_prefetch = 0 : i64, scratch_operands = 1 : i64, tpu.core_type = #tpu.core_type<tc>, window_params = [{transform_indices = @transform_0, window_bounds = array<i64: 1, 256, 4>}, {pipeline_mode = #tpu.pipeline_mode<synchronous>, transform_indices = @transform_1, window_bounds = array<i64: 36, 4>}, {pipeline_mode = #tpu.pipeline_mode<synchronous>, transform_indices = @transform_2, window_bounds = array<i64: 72, 4>}, {pipeline_mode = #tpu.pipeline_mode<synchronous>, transform_indices = @transform_3, window_bounds = array<i64: 108, 4>}, {pipeline_mode = #tpu.pipeline_mode<synchronous>, transform_indices = @transform_4, window_bounds = array<i64: 144, 4>}, {pipeline_mode = #tpu.pipeline_mode<synchronous>, transform_indices = @transform_5, window_bounds = array<i64: 180, 4>}, {transform_indices = @transform_6, window_bounds = array<i64: 1, 256, 4>}]} {
    %cst = arith.constant 0.000000e+00 : f32
    %0 = vector.broadcast %cst : f32 to vector<290x20xf32>
    %c0 = arith.constant 0 : index
    %c0_0 = arith.constant 0 : index
    %1 = vector.load %arg8[%c0, %c0_0] : memref<290x20xf32, #tpu.memory_space<vmem>>, vector<290x20xf32>
    tpu.vector_store %arg8[%c0, %c0_0], %0 {strides = array<i32>} : memref<290x20xf32, #tpu.memory_space<vmem>>, vector<290x20xf32>,
    %c0_1 = arith.constant 0 : index
    %c0_2 = arith.constant 0 : index
    %c0_3 = arith.constant 0 : index
    %2 = vector.load %arg1[%c0_1, %c0_2, %c0_3] : memref<1x256x4xf32, #tpu.memory_space<vmem>>, vector<1x256x4xf32>
    %3 = vector.shape_cast %2 : vector<1x256x4xf32> to vector<256x4xf32>
    %c17 = arith.constant 17 : index
    %c0_4 = arith.constant 0 : index
    %4 = vector.load %arg8[%c17, %c0_4] : memref<290x20xf32, #tpu.memory_space<vmem>>, vector<256x4xf32>
    tpu.vector_store %arg8[%c17, %c0_4], %3 {strides = array<i32>} : memref<290x20xf32, #tpu.memory_space<vmem>>, vector<256x4xf32>,
    %5 = tpu.iota {dimensions = array<i32: 0>} : vector<256x1xi32>
    %c16_i32 = arith.constant 16 : i32
    %c0_i32 = arith.constant 0 : i32
    %6 = arith.cmpi eq, %c16_i32, %c0_i32 : i32
    %c1_i32 = arith.constant 1 : i32
    %7 = arith.select %6, %c1_i32, %c16_i32 : i32
    %8 = vector.broadcast %7 : i32 to vector<256x1xi32>
    %9 = arith.remsi %5, %8 : vector<256x1xi32>
    %c0_i32_5 = arith.constant 0 : i32
    %10 = vector.broadcast %c0_i32_5 : i32 to vector<256x1xi32>
    %11 = arith.cmpi ne, %9, %10 : vector<256x1xi32>
    %c0_i32_6 = arith.constant 0 : i32
    %12 = vector.broadcast %c0_i32_6 : i32 to vector<256x1xi32>
    %13 = arith.cmpi slt, %9, %12 : vector<256x1xi32>
    %c0_i32_7 = arith.constant 0 : i32
    %14 = arith.cmpi slt, %7, %c0_i32_7 : i32
    %15 = vector.broadcast %14 : i1 to vector<256x1xi1>
    %16 = vector.broadcast %15 : vector<256x1xi1> to vector<256x1xi1>
    %17 = arith.xori %13, %16 : vector<256x1xi1>
    %18 = arith.andi %17, %11 : vector<256x1xi1>
    %19 = vector.broadcast %7 : i32 to vector<256x1xi32>
    %20 = arith.addi %9, %19 : vector<256x1xi32>
    %21 = arith.select %18, %20, %9 : vector<256x1xi1>, vector<256x1xi32>
    %c1_i32_8 = arith.constant 1 : i32
    %22 = vector.broadcast %c1_i32_8 : i32 to vector<256x1xi32>
    %23 = arith.cmpi sge, %21, %22 : vector<256x1xi32>
    %c14_i32 = arith.constant 14 : i32
    %24 = vector.broadcast %c14_i32 : i32 to vector<256x1xi32>
    %25 = arith.cmpi sle, %21, %24 : vector<256x1xi32>
    %cst_9 = arith.constant 0.000000e+00 : f32
    %26 = vector.broadcast %cst_9 : f32 to vector<256x4xf32>
    %c0_10 = arith.constant 0 : index
    %c0_11 = arith.constant 0 : index
    %27 = vector.load %arg8[%c0_10, %c0_11] : memref<290x20xf32, #tpu.memory_space<vmem>>, vector<256x4xf32>
    %cst_12 = arith.constant 0.000000e+00 : f32
    %28 = vector.shape_cast %23 : vector<256x1xi1> to vector<256x1xi1>
    %29 = vector.broadcast %28 : vector<256x1xi1> to vector<256x4xi1>
    %30 = vector.broadcast %cst_12 : f32 to vector<256x4xf32>
    %31 = arith.select %29, %27, %30 : vector<256x4xi1>, vector<256x4xf32>
    %c0_13 = arith.constant 0 : index
    %c0_14 = arith.constant 0 : index
    %32 = vector.load %arg2[%c0_13, %c0_14] : memref<36x4xf32, #tpu.memory_space<vmem>>, vector<4x4xf32>
    %cst_15 = arith.constant dense<0.000000e+00> : vector<256x4xf32>
    %33 = tpu.matmul %31, %32, %cst_15 {dimension_numbers = #tpu.dot_dimension_numbers<[1], [0], [0], [1], [0, 0, 1, 1], [], []>} : vector<256x4xf32>, vector<4x4xf32>, vector<256x4xf32> -> vector<256x4xf32>
    %34 = arith.addf %26, %33 : vector<256x4xf32>
    %c1 = arith.constant 1 : index
    %c0_16 = arith.constant 0 : index
    %35 = vector.load %arg8[%c1, %c0_16] : memref<290x20xf32, #tpu.memory_space<vmem>>, vector<256x4xf32>
    %c4 = arith.constant 4 : index
    %c0_17 = arith.constant 0 : index
    %36 = vector.load %arg2[%c4, %c0_17] : memref<36x4xf32, #tpu.memory_space<vmem>>, vector<4x4xf32>
    %cst_18 = arith.constant dense<0.000000e+00> : vector<256x4xf32>
    %37 = tpu.matmul %35, %36, %cst_18 {dimension_numbers = #tpu.dot_dimension_numbers<[1], [0], [0], [1], [0, 0, 1, 1], [], []>} : vector<256x4xf32>, vector<4x4xf32>, vector<256x4xf32> -> vector<256x4xf32>
    %38 = arith.addf %34, %37 : vector<256x4xf32>
    %c2 = arith.constant 2 : index
    %c0_19 = arith.constant 0 : index
    %39 = vector.load %arg8[%c2, %c0_19] : memref<290x20xf32, #tpu.memory_space<vmem>>, vector<256x4xf32>
    %cst_20 = arith.constant 0.000000e+00 : f32
    %40 = vector.shape_cast %25 : vector<256x1xi1> to vector<256x1xi1>
    %41 = vector.broadcast %40 : vector<256x1xi1> to vector<256x4xi1>
    %42 = vector.broadcast %cst_20 : f32 to vector<256x4xf32>
    %43 = arith.select %41, %39, %42 : vector<256x4xi1>, vector<256x4xf32>
    %c8 = arith.constant 8 : index
    %c0_21 = arith.constant 0 : index
    %44 = vector.load %arg2[%c8, %c0_21] : memref<36x4xf32, #tpu.memory_space<vmem>>, vector<4x4xf32>
    %cst_22 = arith.constant dense<0.000000e+00> : vector<256x4xf32>
    %45 = tpu.matmul %43, %44, %cst_22 {dimension_numbers = #tpu.dot_dimension_numbers<[1], [0], [0], [1], [0, 0, 1, 1], [], []>} : vector<256x4xf32>, vector<4x4xf32>, vector<256x4xf32> -> vector<256x4xf32>
    %46 = arith.addf %38, %45 : vector<256x4xf32>
    %c16 = arith.constant 16 : index
    %c0_23 = arith.constant 0 : index
    %47 = vector.load %arg8[%c16, %c0_23] : memref<290x20xf32, #tpu.memory_space<vmem>>, vector<256x4xf32>
    %cst_24 = arith.constant 0.000000e+00 : f32
    %48 = vector.shape_cast %23 : vector<256x1xi1> to vector<256x1xi1>
    %49 = vector.broadcast %48 : vector<256x1xi1> to vector<256x4xi1>
    %50 = vector.broadcast %cst_24 : f32 to vector<256x4xf32>
    %51 = arith.select %49, %47, %50 : vector<256x4xi1>, vector<256x4xf32>
    %c12 = arith.constant 12 : index
    %c0_25 = arith.constant 0 : index
    %52 = vector.load %arg2[%c12, %c0_25] : memref<36x4xf32, #tpu.memory_space<vmem>>, vector<4x4xf32>
    %cst_26 = arith.constant dense<0.000000e+00> : vector<256x4xf32>
    %53 = tpu.matmul %51, %52, %cst_26 {dimension_numbers = #tpu.dot_dimension_numbers<[1], [0], [0], [1], [0, 0, 1, 1], [], []>} : vector<256x4xf32>, vector<4x4xf32>, vector<256x4xf32> -> vector<256x4xf32>
    %54 = arith.addf %46, %53 : vector<256x4xf32>
    %c17_27 = arith.constant 17 : index
    %c0_28 = arith.constant 0 : index
    %55 = vector.load %arg8[%c17_27, %c0_28] : memref<290x20xf32, #tpu.memory_space<vmem>>, vector<256x4xf32>
    %c16_29 = arith.constant 16 : index
    %c0_30 = arith.constant 0 : index
    %56 = vector.load %arg2[%c16_29, %c0_30] : memref<36x4xf32, #tpu.memory_space<vmem>>, vector<4x4xf32>
    %cst_31 = arith.constant dense<0.000000e+00> : vector<256x4xf32>
    %57 = tpu.matmul %55, %56, %cst_31 {dimension_numbers = #tpu.dot_dimension_numbers<[1], [0], [0], [1], [0, 0, 1, 1], [], []>} : vector<256x4xf32>, vector<4x4xf32>, vector<256x4xf32> -> vector<256x4xf32>
    %58 = arith.addf %54, %57 : vector<256x4xf32>
    %c18 = arith.constant 18 : index
    %c0_32 = arith.constant 0 : index
    %59 = vector.load %arg8[%c18, %c0_32] : memref<290x20xf32, #tpu.memory_space<vmem>>, vector<256x4xf32>
    %cst_33 = arith.constant 0.000000e+00 : f32
    %60 = vector.shape_cast %25 : vector<256x1xi1> to vector<256x1xi1>
    %61 = vector.broadcast %60 : vector<256x1xi1> to vector<256x4xi1>
    %62 = vector.broadcast %cst_33 : f32 to vector<256x4xf32>
    %63 = arith.select %61, %59, %62 : vector<256x4xi1>, vector<256x4xf32>
    %c20 = arith.constant 20 : index
    %c0_34 = arith.constant 0 : index
    %64 = vector.load %arg2[%c20, %c0_34] : memref<36x4xf32, #tpu.memory_space<vmem>>, vector<4x4xf32>
    %cst_35 = arith.constant dense<0.000000e+00> : vector<256x4xf32>
    %65 = tpu.matmul %63, %64, %cst_35 {dimension_numbers = #tpu.dot_dimension_numbers<[1], [0], [0], [1], [0, 0, 1, 1], [], []>} : vector<256x4xf32>, vector<4x4xf32>, vector<256x4xf32> -> vector<256x4xf32>
    %66 = arith.addf %58, %65 : vector<256x4xf32>
    %c32 = arith.constant 32 : index
    %c0_36 = arith.constant 0 : index
    %67 = vector.load %arg8[%c32, %c0_36] : memref<290x20xf32, #tpu.memory_space<vmem>>, vector<256x4xf32>
    %cst_37 = arith.constant 0.000000e+00 : f32
    %68 = vector.shape_cast %23 : vector<256x1xi1> to vector<256x1xi1>
    %69 = vector.broadcast %68 : vector<256x1xi1> to vector<256x4xi1>
    %70 = vector.broadcast %cst_37 : f32 to vector<256x4xf32>
    %71 = arith.select %69, %67, %70 : vector<256x4xi1>, vector<256x4xf32>
    %c24 = arith.constant 24 : index
    %c0_38 = arith.constant 0 : index
    %72 = vector.load %arg2[%c24, %c0_38] : memref<36x4xf32, #tpu.memory_space<vmem>>, vector<4x4xf32>
    %cst_39 = arith.constant dense<0.000000e+00> : vector<256x4xf32>
    %73 = tpu.matmul %71, %72, %cst_39 {dimension_numbers = #tpu.dot_dimension_numbers<[1], [0], [0], [1], [0, 0, 1, 1], [], []>} : vector<256x4xf32>, vector<4x4xf32>, vector<256x4xf32> -> vector<256x4xf32>
    %74 = arith.addf %66, %73 : vector<256x4xf32>
    %c33 = arith.constant 33 : index
    %c0_40 = arith.constant 0 : index
    %75 = vector.load %arg8[%c33, %c0_40] : memref<290x20xf32, #tpu.memory_space<vmem>>, vector<256x4xf32>
    %c28 = arith.constant 28 : index
    %c0_41 = arith.constant 0 : index
    %76 = vector.load %arg2[%c28, %c0_41] : memref<36x4xf32, #tpu.memory_space<vmem>>, vector<4x4xf32>
    %cst_42 = arith.constant dense<0.000000e+00> : vector<256x4xf32>
    %77 = tpu.matmul %75, %76, %cst_42 {dimension_numbers = #tpu.dot_dimension_numbers<[1], [0], [0], [1], [0, 0, 1, 1], [], []>} : vector<256x4xf32>, vector<4x4xf32>, vector<256x4xf32> -> vector<256x4xf32>
    %78 = arith.addf %74, %77 : vector<256x4xf32>
    %c34 = arith.constant 34 : index
    %c0_43 = arith.constant 0 : index
    %79 = vector.load %arg8[%c34, %c0_43] : memref<290x20xf32, #tpu.memory_space<vmem>>, vector<256x4xf32>
    %cst_44 = arith.constant 0.000000e+00 : f32
    %80 = vector.shape_cast %25 : vector<256x1xi1> to vector<256x1xi1>
    %81 = vector.broadcast %80 : vector<256x1xi1> to vector<256x4xi1>
    %82 = vector.broadcast %cst_44 : f32 to vector<256x4xf32>
    %83 = arith.select %81, %79, %82 : vector<256x4xi1>, vector<256x4xf32>
    %c32_45 = arith.constant 32 : index
    %c0_46 = arith.constant 0 : index
    %84 = vector.load %arg2[%c32_45, %c0_46] : memref<36x4xf32, #tpu.memory_space<vmem>>, vector<4x4xf32>
    %cst_47 = arith.constant dense<0.000000e+00> : vector<256x4xf32>
    %85 = tpu.matmul %83, %84, %cst_47 {dimension_numbers = #tpu.dot_dimension_numbers<[1], [0], [0], [1], [0, 0, 1, 1], [], []>} : vector<256x4xf32>, vector<4x4xf32>, vector<256x4xf32> -> vector<256x4xf32>
    %86 = arith.addf %78, %85 : vector<256x4xf32>
    %cst_48 = arith.constant 0.000000e+00 : f32
    %87 = vector.broadcast %cst_48 : f32 to vector<256x4xf32>
    %88 = arith.cmpf oge, %86, %87 : vector<256x4xf32>
    %cst_49 = arith.constant 2.000000e-01 : f32
    %89 = vector.broadcast %cst_49 : f32 to vector<256x4xf32>
    %90 = arith.mulf %89, %86 : vector<256x4xf32>
    %91 = arith.select %88, %86, %90 : vector<256x4xi1>, vector<256x4xf32>
    %c17_50 = arith.constant 17 : index
    %c4_51 = arith.constant 4 : index
    %92 = vector.load %arg8[%c17_50, %c4_51] : memref<290x20xf32, #tpu.memory_space<vmem>>, vector<256x4xf32>
    tpu.vector_store %arg8[%c17_50, %c4_51], %91 {strides = array<i32>} : memref<290x20xf32, #tpu.memory_space<vmem>>, vector<256x4xf32>,
    %cst_52 = arith.constant 0.000000e+00 : f32
    %93 = vector.broadcast %cst_52 : f32 to vector<256x4xf32>
    %c0_53 = arith.constant 0 : index
    %c0_54 = arith.constant 0 : index
    %94 = vector.load %arg8[%c0_53, %c0_54] : memref<290x20xf32, #tpu.memory_space<vmem>>, vector<256x8xf32>
    %cst_55 = arith.constant 0.000000e+00 : f32
    %95 = vector.shape_cast %23 : vector<256x1xi1> to vector<256x1xi1>
    %96 = vector.broadcast %95 : vector<256x1xi1> to vector<256x8xi1>
    %97 = vector.broadcast %cst_55 : f32 to vector<256x8xf32>
    %98 = arith.select %96, %94, %97 : vector<256x8xi1>, vector<256x8xf32>
    %c0_56 = arith.constant 0 : index
    %c0_57 = arith.constant 0 : index
    %99 = vector.load %arg3[%c0_56, %c0_57] : memref<72x4xf32, #tpu.memory_space<vmem>>, vector<8x4xf32>
    %cst_58 = arith.constant dense<0.000000e+00> : vector<256x4xf32>
    %100 = tpu.matmul %98, %99, %cst_58 {dimension_numbers = #tpu.dot_dimension_numbers<[1], [0], [0], [1], [0, 0, 1, 1], [], []>} : vector<256x8xf32>, vector<8x4xf32>, vector<256x4xf32> -> vector<256x4xf32>
    %101 = arith.addf %93, %100 : vector<256x4xf32>
    %c1_59 = arith.constant 1 : index
    %c0_60 = arith.constant 0 : index
    %102 = vector.load %arg8[%c1_59, %c0_60] : memref<290x20xf32, #tpu.memory_space<vmem>>, vector<256x8xf32>
    %c8_61 = arith.constant 8 : index
    %c0_62 = arith.constant 0 : index
    %103 = vector.load %arg3[%c8_61, %c0_62] : memref<72x4xf32, #tpu.memory_space<vmem>>, vector<8x4xf32>
    %cst_63 = arith.constant dense<0.000000e+00> : vector<256x4xf32>
    %104 = tpu.matmul %102, %103, %cst_63 {dimension_numbers = #tpu.dot_dimension_numbers<[1], [0], [0], [1], [0, 0, 1, 1], [], []>} : vector<256x8xf32>, vector<8x4xf32>, vector<256x4xf32> -> vector<256x4xf32>
    %105 = arith.addf %101, %104 : vector<256x4xf32>
    %c2_64 = arith.constant 2 : index
    %c0_65 = arith.constant 0 : index
    %106 = vector.load %arg8[%c2_64, %c0_65] : memref<290x20xf32, #tpu.memory_space<vmem>>, vector<256x8xf32>
    %cst_66 = arith.constant 0.000000e+00 : f32
    %107 = vector.shape_cast %25 : vector<256x1xi1> to vector<256x1xi1>
    %108 = vector.broadcast %107 : vector<256x1xi1> to vector<256x8xi1>
    %109 = vector.broadcast %cst_66 : f32 to vector<256x8xf32>
    %110 = arith.select %108, %106, %109 : vector<256x8xi1>, vector<256x8xf32>
    %c16_67 = arith.constant 16 : index
    %c0_68 = arith.constant 0 : index
    %111 = vector.load %arg3[%c16_67, %c0_68] : memref<72x4xf32, #tpu.memory_space<vmem>>, vector<8x4xf32>
    %cst_69 = arith.constant dense<0.000000e+00> : vector<256x4xf32>
    %112 = tpu.matmul %110, %111, %cst_69 {dimension_numbers = #tpu.dot_dimension_numbers<[1], [0], [0], [1], [0, 0, 1, 1], [], []>} : vector<256x8xf32>, vector<8x4xf32>, vector<256x4xf32> -> vector<256x4xf32>
    %113 = arith.addf %105, %112 : vector<256x4xf32>
    %c16_70 = arith.constant 16 : index
    %c0_71 = arith.constant 0 : index
    %114 = vector.load %arg8[%c16_70, %c0_71] : memref<290x20xf32, #tpu.memory_space<vmem>>, vector<256x8xf32>
    %cst_72 = arith.constant 0.000000e+00 : f32
    %115 = vector.shape_cast %23 : vector<256x1xi1> to vector<256x1xi1>
    %116 = vector.broadcast %115 : vector<256x1xi1> to vector<256x8xi1>
    %117 = vector.broadcast %cst_72 : f32 to vector<256x8xf32>
    %118 = arith.select %116, %114, %117 : vector<256x8xi1>, vector<256x8xf32>
    %c24_73 = arith.constant 24 : index
    %c0_74 = arith.constant 0 : index
    %119 = vector.load %arg3[%c24_73, %c0_74] : memref<72x4xf32, #tpu.memory_space<vmem>>, vector<8x4xf32>
    %cst_75 = arith.constant dense<0.000000e+00> : vector<256x4xf32>
    %120 = tpu.matmul %118, %119, %cst_75 {dimension_numbers = #tpu.dot_dimension_numbers<[1], [0], [0], [1], [0, 0, 1, 1], [], []>} : vector<256x8xf32>, vector<8x4xf32>, vector<256x4xf32> -> vector<256x4xf32>
    %121 = arith.addf %113, %120 : vector<256x4xf32>
    %c17_76 = arith.constant 17 : index
    %c0_77 = arith.constant 0 : index
    %122 = vector.load %arg8[%c17_76, %c0_77] : memref<290x20xf32, #tpu.memory_space<vmem>>, vector<256x8xf32>
    %c32_78 = arith.constant 32 : index
    %c0_79 = arith.constant 0 : index
    %123 = vector.load %arg3[%c32_78, %c0_79] : memref<72x4xf32, #tpu.memory_space<vmem>>, vector<8x4xf32>
    %cst_80 = arith.constant dense<0.000000e+00> : vector<256x4xf32>
    %124 = tpu.matmul %122, %123, %cst_80 {dimension_numbers = #tpu.dot_dimension_numbers<[1], [0], [0], [1], [0, 0, 1, 1], [], []>} : vector<256x8xf32>, vector<8x4xf32>, vector<256x4xf32> -> vector<256x4xf32>
    %125 = arith.addf %121, %124 : vector<256x4xf32>
    %c18_81 = arith.constant 18 : index
    %c0_82 = arith.constant 0 : index
    %126 = vector.load %arg8[%c18_81, %c0_82] : memref<290x20xf32, #tpu.memory_space<vmem>>, vector<256x8xf32>
    %cst_83 = arith.constant 0.000000e+00 : f32
    %127 = vector.shape_cast %25 : vector<256x1xi1> to vector<256x1xi1>
    %128 = vector.broadcast %127 : vector<256x1xi1> to vector<256x8xi1>
    %129 = vector.broadcast %cst_83 : f32 to vector<256x8xf32>
    %130 = arith.select %128, %126, %129 : vector<256x8xi1>, vector<256x8xf32>
    %c40 = arith.constant 40 : index
    %c0_84 = arith.constant 0 : index
    %131 = vector.load %arg3[%c40, %c0_84] : memref<72x4xf32, #tpu.memory_space<vmem>>, vector<8x4xf32>
    %cst_85 = arith.constant dense<0.000000e+00> : vector<256x4xf32>
    %132 = tpu.matmul %130, %131, %cst_85 {dimension_numbers = #tpu.dot_dimension_numbers<[1], [0], [0], [1], [0, 0, 1, 1], [], []>} : vector<256x8xf32>, vector<8x4xf32>, vector<256x4xf32> -> vector<256x4xf32>
    %133 = arith.addf %125, %132 : vector<256x4xf32>
    %c32_86 = arith.constant 32 : index
    %c0_87 = arith.constant 0 : index
    %134 = vector.load %arg8[%c32_86, %c0_87] : memref<290x20xf32, #tpu.memory_space<vmem>>, vector<256x8xf32>
    %cst_88 = arith.constant 0.000000e+00 : f32
    %135 = vector.shape_cast %23 : vector<256x1xi1> to vector<256x1xi1>
    %136 = vector.broadcast %135 : vector<256x1xi1> to vector<256x8xi1>
    %137 = vector.broadcast %cst_88 : f32 to vector<256x8xf32>
    %138 = arith.select %136, %134, %137 : vector<256x8xi1>, vector<256x8xf32>
    %c48 = arith.constant 48 : index
    %c0_89 = arith.constant 0 : index
    %139 = vector.load %arg3[%c48, %c0_89] : memref<72x4xf32, #tpu.memory_space<vmem>>, vector<8x4xf32>
    %cst_90 = arith.constant dense<0.000000e+00> : vector<256x4xf32>
    %140 = tpu.matmul %138, %139, %cst_90 {dimension_numbers = #tpu.dot_dimension_numbers<[1], [0], [0], [1], [0, 0, 1, 1], [], []>} : vector<256x8xf32>, vector<8x4xf32>, vector<256x4xf32> -> vector<256x4xf32>
    %141 = arith.addf %133, %140 : vector<256x4xf32>
    %c33_91 = arith.constant 33 : index
    %c0_92 = arith.constant 0 : index
    %142 = vector.load %arg8[%c33_91, %c0_92] : memref<290x20xf32, #tpu.memory_space<vmem>>, vector<256x8xf32>
    %c56 = arith.constant 56 : index
    %c0_93 = arith.constant 0 : index
    %143 = vector.load %arg3[%c56, %c0_93] : memref<72x4xf32, #tpu.memory_space<vmem>>, vector<8x4xf32>
    %cst_94 = arith.constant dense<0.000000e+00> : vector<256x4xf32>
    %144 = tpu.matmul %142, %143, %cst_94 {dimension_numbers = #tpu.dot_dimension_numbers<[1], [0], [0], [1], [0, 0, 1, 1], [], []>} : vector<256x8xf32>, vector<8x4xf32>, vector<256x4xf32> -> vector<256x4xf32>
    %145 = arith.addf %141, %144 : vector<256x4xf32>
    %c34_95 = arith.constant 34 : index
    %c0_96 = arith.constant 0 : index
    %146 = vector.load %arg8[%c34_95, %c0_96] : memref<290x20xf32, #tpu.memory_space<vmem>>, vector<256x8xf32>
    %cst_97 = arith.constant 0.000000e+00 : f32
    %147 = vector.shape_cast %25 : vector<256x1xi1> to vector<256x1xi1>
    %148 = vector.broadcast %147 : vector<256x1xi1> to vector<256x8xi1>
    %149 = vector.broadcast %cst_97 : f32 to vector<256x8xf32>
    %150 = arith.select %148, %146, %149 : vector<256x8xi1>, vector<256x8xf32>
    %c64 = arith.constant 64 : index
    %c0_98 = arith.constant 0 : index
    %151 = vector.load %arg3[%c64, %c0_98] : memref<72x4xf32, #tpu.memory_space<vmem>>, vector<8x4xf32>
    %cst_99 = arith.constant dense<0.000000e+00> : vector<256x4xf32>
    %152 = tpu.matmul %150, %151, %cst_99 {dimension_numbers = #tpu.dot_dimension_numbers<[1], [0], [0], [1], [0, 0, 1, 1], [], []>} : vector<256x8xf32>, vector<8x4xf32>, vector<256x4xf32> -> vector<256x4xf32>
    %153 = arith.addf %145, %152 : vector<256x4xf32>
    %cst_100 = arith.constant 0.000000e+00 : f32
    %154 = vector.broadcast %cst_100 : f32 to vector<256x4xf32>
    %155 = arith.cmpf oge, %153, %154 : vector<256x4xf32>
    %cst_101 = arith.constant 2.000000e-01 : f32
    %156 = vector.broadcast %cst_101 : f32 to vector<256x4xf32>
    %157 = arith.mulf %156, %153 : vector<256x4xf32>
    %158 = arith.select %155, %153, %157 : vector<256x4xi1>, vector<256x4xf32>
    %c17_102 = arith.constant 17 : index
    %c8_103 = arith.constant 8 : index
    %159 = vector.load %arg8[%c17_102, %c8_103] : memref<290x20xf32, #tpu.memory_space<vmem>>, vector<256x4xf32>
    tpu.vector_store %arg8[%c17_102, %c8_103], %158 {strides = array<i32>} : memref<290x20xf32, #tpu.memory_space<vmem>>, vector<256x4xf32>,
    %cst_104 = arith.constant 0.000000e+00 : f32
    %160 = vector.broadcast %cst_104 : f32 to vector<256x4xf32>
    %c0_105 = arith.constant 0 : index
    %c0_106 = arith.constant 0 : index
    %161 = vector.load %arg8[%c0_105, %c0_106] : memref<290x20xf32, #tpu.memory_space<vmem>>, vector<256x12xf32>
    %cst_107 = arith.constant 0.000000e+00 : f32
    %162 = vector.shape_cast %23 : vector<256x1xi1> to vector<256x1xi1>
    %163 = vector.broadcast %162 : vector<256x1xi1> to vector<256x12xi1>
    %164 = vector.broadcast %cst_107 : f32 to vector<256x12xf32>
    %165 = arith.select %163, %161, %164 : vector<256x12xi1>, vector<256x12xf32>
    %c0_108 = arith.constant 0 : index
    %c0_109 = arith.constant 0 : index
    %166 = vector.load %arg4[%c0_108, %c0_109] : memref<108x4xf32, #tpu.memory_space<vmem>>, vector<12x4xf32>
    %cst_110 = arith.constant dense<0.000000e+00> : vector<256x4xf32>
    %167 = tpu.matmul %165, %166, %cst_110 {dimension_numbers = #tpu.dot_dimension_numbers<[1], [0], [0], [1], [0, 0, 1, 1], [], []>} : vector<256x12xf32>, vector<12x4xf32>, vector<256x4xf32> -> vector<256x4xf32>
    %168 = arith.addf %160, %167 : vector<256x4xf32>
    %c1_111 = arith.constant 1 : index
    %c0_112 = arith.constant 0 : index
    %169 = vector.load %arg8[%c1_111, %c0_112] : memref<290x20xf32, #tpu.memory_space<vmem>>, vector<256x12xf32>
    %c12_113 = arith.constant 12 : index
    %c0_114 = arith.constant 0 : index
    %170 = vector.load %arg4[%c12_113, %c0_114] : memref<108x4xf32, #tpu.memory_space<vmem>>, vector<12x4xf32>
    %cst_115 = arith.constant dense<0.000000e+00> : vector<256x4xf32>
    %171 = tpu.matmul %169, %170, %cst_115 {dimension_numbers = #tpu.dot_dimension_numbers<[1], [0], [0], [1], [0, 0, 1, 1], [], []>} : vector<256x12xf32>, vector<12x4xf32>, vector<256x4xf32> -> vector<256x4xf32>
    %172 = arith.addf %168, %171 : vector<256x4xf32>
    %c2_116 = arith.constant 2 : index
    %c0_117 = arith.constant 0 : index
    %173 = vector.load %arg8[%c2_116, %c0_117] : memref<290x20xf32, #tpu.memory_space<vmem>>, vector<256x12xf32>
    %cst_118 = arith.constant 0.000000e+00 : f32
    %174 = vector.shape_cast %25 : vector<256x1xi1> to vector<256x1xi1>
    %175 = vector.broadcast %174 : vector<256x1xi1> to vector<256x12xi1>
    %176 = vector.broadcast %cst_118 : f32 to vector<256x12xf32>
    %177 = arith.select %175, %173, %176 : vector<256x12xi1>, vector<256x12xf32>
    %c24_119 = arith.constant 24 : index
    %c0_120 = arith.constant 0 : index
    %178 = vector.load %arg4[%c24_119, %c0_120] : memref<108x4xf32, #tpu.memory_space<vmem>>, vector<12x4xf32>
    %cst_121 = arith.constant dense<0.000000e+00> : vector<256x4xf32>
    %179 = tpu.matmul %177, %178, %cst_121 {dimension_numbers = #tpu.dot_dimension_numbers<[1], [0], [0], [1], [0, 0, 1, 1], [], []>} : vector<256x12xf32>, vector<12x4xf32>, vector<256x4xf32> -> vector<256x4xf32>
    %180 = arith.addf %172, %179 : vector<256x4xf32>
    %c16_122 = arith.constant 16 : index
    %c0_123 = arith.constant 0 : index
    %181 = vector.load %arg8[%c16_122, %c0_123] : memref<290x20xf32, #tpu.memory_space<vmem>>, vector<256x12xf32>
    %cst_124 = arith.constant 0.000000e+00 : f32
    %182 = vector.shape_cast %23 : vector<256x1xi1> to vector<256x1xi1>
    %183 = vector.broadcast %182 : vector<256x1xi1> to vector<256x12xi1>
    %184 = vector.broadcast %cst_124 : f32 to vector<256x12xf32>
    %185 = arith.select %183, %181, %184 : vector<256x12xi1>, vector<256x12xf32>
    %c36 = arith.constant 36 : index
    %c0_125 = arith.constant 0 : index
    %186 = vector.load %arg4[%c36, %c0_125] : memref<108x4xf32, #tpu.memory_space<vmem>>, vector<12x4xf32>
    %cst_126 = arith.constant dense<0.000000e+00> : vector<256x4xf32>
    %187 = tpu.matmul %185, %186, %cst_126 {dimension_numbers = #tpu.dot_dimension_numbers<[1], [0], [0], [1], [0, 0, 1, 1], [], []>} : vector<256x12xf32>, vector<12x4xf32>, vector<256x4xf32> -> vector<256x4xf32>
    %188 = arith.addf %180, %187 : vector<256x4xf32>
    %c17_127 = arith.constant 17 : index
    %c0_128 = arith.constant 0 : index
    %189 = vector.load %arg8[%c17_127, %c0_128] : memref<290x20xf32, #tpu.memory_space<vmem>>, vector<256x12xf32>
    %c48_129 = arith.constant 48 : index
    %c0_130 = arith.constant 0 : index
    %190 = vector.load %arg4[%c48_129, %c0_130] : memref<108x4xf32, #tpu.memory_space<vmem>>, vector<12x4xf32>
    %cst_131 = arith.constant dense<0.000000e+00> : vector<256x4xf32>
    %191 = tpu.matmul %189, %190, %cst_131 {dimension_numbers = #tpu.dot_dimension_numbers<[1], [0], [0], [1], [0, 0, 1, 1], [], []>} : vector<256x12xf32>, vector<12x4xf32>, vector<256x4xf32> -> vector<256x4xf32>
    %192 = arith.addf %188, %191 : vector<256x4xf32>
    %c18_132 = arith.constant 18 : index
    %c0_133 = arith.constant 0 : index
    %193 = vector.load %arg8[%c18_132, %c0_133] : memref<290x20xf32, #tpu.memory_space<vmem>>, vector<256x12xf32>
    %cst_134 = arith.constant 0.000000e+00 : f32
    %194 = vector.shape_cast %25 : vector<256x1xi1> to vector<256x1xi1>
    %195 = vector.broadcast %194 : vector<256x1xi1> to vector<256x12xi1>
    %196 = vector.broadcast %cst_134 : f32 to vector<256x12xf32>
    %197 = arith.select %195, %193, %196 : vector<256x12xi1>, vector<256x12xf32>
    %c60 = arith.constant 60 : index
    %c0_135 = arith.constant 0 : index
    %198 = vector.load %arg4[%c60, %c0_135] : memref<108x4xf32, #tpu.memory_space<vmem>>, vector<12x4xf32>
    %cst_136 = arith.constant dense<0.000000e+00> : vector<256x4xf32>
    %199 = tpu.matmul %197, %198, %cst_136 {dimension_numbers = #tpu.dot_dimension_numbers<[1], [0], [0], [1], [0, 0, 1, 1], [], []>} : vector<256x12xf32>, vector<12x4xf32>, vector<256x4xf32> -> vector<256x4xf32>
    %200 = arith.addf %192, %199 : vector<256x4xf32>
    %c32_137 = arith.constant 32 : index
    %c0_138 = arith.constant 0 : index
    %201 = vector.load %arg8[%c32_137, %c0_138] : memref<290x20xf32, #tpu.memory_space<vmem>>, vector<256x12xf32>
    %cst_139 = arith.constant 0.000000e+00 : f32
    %202 = vector.shape_cast %23 : vector<256x1xi1> to vector<256x1xi1>
    %203 = vector.broadcast %202 : vector<256x1xi1> to vector<256x12xi1>
    %204 = vector.broadcast %cst_139 : f32 to vector<256x12xf32>
    %205 = arith.select %203, %201, %204 : vector<256x12xi1>, vector<256x12xf32>
    %c72 = arith.constant 72 : index
    %c0_140 = arith.constant 0 : index
    %206 = vector.load %arg4[%c72, %c0_140] : memref<108x4xf32, #tpu.memory_space<vmem>>, vector<12x4xf32>
    %cst_141 = arith.constant dense<0.000000e+00> : vector<256x4xf32>
    %207 = tpu.matmul %205, %206, %cst_141 {dimension_numbers = #tpu.dot_dimension_numbers<[1], [0], [0], [1], [0, 0, 1, 1], [], []>} : vector<256x12xf32>, vector<12x4xf32>, vector<256x4xf32> -> vector<256x4xf32>
    %208 = arith.addf %200, %207 : vector<256x4xf32>
    %c33_142 = arith.constant 33 : index
    %c0_143 = arith.constant 0 : index
    %209 = vector.load %arg8[%c33_142, %c0_143] : memref<290x20xf32, #tpu.memory_space<vmem>>, vector<256x12xf32>
    %c84 = arith.constant 84 : index
    %c0_144 = arith.constant 0 : index
    %210 = vector.load %arg4[%c84, %c0_144] : memref<108x4xf32, #tpu.memory_space<vmem>>, vector<12x4xf32>
    %cst_145 = arith.constant dense<0.000000e+00> : vector<256x4xf32>
    %211 = tpu.matmul %209, %210, %cst_145 {dimension_numbers = #tpu.dot_dimension_numbers<[1], [0], [0], [1], [0, 0, 1, 1], [], []>} : vector<256x12xf32>, vector<12x4xf32>, vector<256x4xf32> -> vector<256x4xf32>
    %212 = arith.addf %208, %211 : vector<256x4xf32>
    %c34_146 = arith.constant 34 : index
    %c0_147 = arith.constant 0 : index
    %213 = vector.load %arg8[%c34_146, %c0_147] : memref<290x20xf32, #tpu.memory_space<vmem>>, vector<256x12xf32>
    %cst_148 = arith.constant 0.000000e+00 : f32
    %214 = vector.shape_cast %25 : vector<256x1xi1> to vector<256x1xi1>
    %215 = vector.broadcast %214 : vector<256x1xi1> to vector<256x12xi1>
    %216 = vector.broadcast %cst_148 : f32 to vector<256x12xf32>
    %217 = arith.select %215, %213, %216 : vector<256x12xi1>, vector<256x12xf32>
    %c96 = arith.constant 96 : index
    %c0_149 = arith.constant 0 : index
    %218 = vector.load %arg4[%c96, %c0_149] : memref<108x4xf32, #tpu.memory_space<vmem>>, vector<12x4xf32>
    %cst_150 = arith.constant dense<0.000000e+00> : vector<256x4xf32>
    %219 = tpu.matmul %217, %218, %cst_150 {dimension_numbers = #tpu.dot_dimension_numbers<[1], [0], [0], [1], [0, 0, 1, 1], [], []>} : vector<256x12xf32>, vector<12x4xf32>, vector<256x4xf32> -> vector<256x4xf32>
    %220 = arith.addf %212, %219 : vector<256x4xf32>
    %cst_151 = arith.constant 0.000000e+00 : f32
    %221 = vector.broadcast %cst_151 : f32 to vector<256x4xf32>
    %222 = arith.cmpf oge, %220, %221 : vector<256x4xf32>
    %cst_152 = arith.constant 2.000000e-01 : f32
    %223 = vector.broadcast %cst_152 : f32 to vector<256x4xf32>
    %224 = arith.mulf %223, %220 : vector<256x4xf32>
    %225 = arith.select %222, %220, %224 : vector<256x4xi1>, vector<256x4xf32>
    %c17_153 = arith.constant 17 : index
    %c12_154 = arith.constant 12 : index
    %226 = vector.load %arg8[%c17_153, %c12_154] : memref<290x20xf32, #tpu.memory_space<vmem>>, vector<256x4xf32>
    tpu.vector_store %arg8[%c17_153, %c12_154], %225 {strides = array<i32>} : memref<290x20xf32, #tpu.memory_space<vmem>>, vector<256x4xf32>,
    %cst_155 = arith.constant 0.000000e+00 : f32
    %227 = vector.broadcast %cst_155 : f32 to vector<256x4xf32>
    %c0_156 = arith.constant 0 : index
    %c0_157 = arith.constant 0 : index
    %228 = vector.load %arg8[%c0_156, %c0_157] : memref<290x20xf32, #tpu.memory_space<vmem>>, vector<256x16xf32>
    %cst_158 = arith.constant 0.000000e+00 : f32
    %229 = vector.shape_cast %23 : vector<256x1xi1> to vector<256x1xi1>
    %230 = vector.broadcast %229 : vector<256x1xi1> to vector<256x16xi1>
    %231 = vector.broadcast %cst_158 : f32 to vector<256x16xf32>
    %232 = arith.select %230, %228, %231 : vector<256x16xi1>, vector<256x16xf32>
    %c0_159 = arith.constant 0 : index
    %c0_160 = arith.constant 0 : index
    %233 = vector.load %arg5[%c0_159, %c0_160] : memref<144x4xf32, #tpu.memory_space<vmem>>, vector<16x4xf32>
    %cst_161 = arith.constant dense<0.000000e+00> : vector<256x4xf32>
    %234 = tpu.matmul %232, %233, %cst_161 {dimension_numbers = #tpu.dot_dimension_numbers<[1], [0], [0], [1], [0, 0, 1, 1], [], []>} : vector<256x16xf32>, vector<16x4xf32>, vector<256x4xf32> -> vector<256x4xf32>
    %235 = arith.addf %227, %234 : vector<256x4xf32>
    %c1_162 = arith.constant 1 : index
    %c0_163 = arith.constant 0 : index
    %236 = vector.load %arg8[%c1_162, %c0_163] : memref<290x20xf32, #tpu.memory_space<vmem>>, vector<256x16xf32>
    %c16_164 = arith.constant 16 : index
    %c0_165 = arith.constant 0 : index
    %237 = vector.load %arg5[%c16_164, %c0_165] : memref<144x4xf32, #tpu.memory_space<vmem>>, vector<16x4xf32>
    %cst_166 = arith.constant dense<0.000000e+00> : vector<256x4xf32>
    %238 = tpu.matmul %236, %237, %cst_166 {dimension_numbers = #tpu.dot_dimension_numbers<[1], [0], [0], [1], [0, 0, 1, 1], [], []>} : vector<256x16xf32>, vector<16x4xf32>, vector<256x4xf32> -> vector<256x4xf32>
    %239 = arith.addf %235, %238 : vector<256x4xf32>
    %c2_167 = arith.constant 2 : index
    %c0_168 = arith.constant 0 : index
    %240 = vector.load %arg8[%c2_167, %c0_168] : memref<290x20xf32, #tpu.memory_space<vmem>>, vector<256x16xf32>
    %cst_169 = arith.constant 0.000000e+00 : f32
    %241 = vector.shape_cast %25 : vector<256x1xi1> to vector<256x1xi1>
    %242 = vector.broadcast %241 : vector<256x1xi1> to vector<256x16xi1>
    %243 = vector.broadcast %cst_169 : f32 to vector<256x16xf32>
    %244 = arith.select %242, %240, %243 : vector<256x16xi1>, vector<256x16xf32>
    %c32_170 = arith.constant 32 : index
    %c0_171 = arith.constant 0 : index
    %245 = vector.load %arg5[%c32_170, %c0_171] : memref<144x4xf32, #tpu.memory_space<vmem>>, vector<16x4xf32>
    %cst_172 = arith.constant dense<0.000000e+00> : vector<256x4xf32>
    %246 = tpu.matmul %244, %245, %cst_172 {dimension_numbers = #tpu.dot_dimension_numbers<[1], [0], [0], [1], [0, 0, 1, 1], [], []>} : vector<256x16xf32>, vector<16x4xf32>, vector<256x4xf32> -> vector<256x4xf32>
    %247 = arith.addf %239, %246 : vector<256x4xf32>
    %c16_173 = arith.constant 16 : index
    %c0_174 = arith.constant 0 : index
    %248 = vector.load %arg8[%c16_173, %c0_174] : memref<290x20xf32, #tpu.memory_space<vmem>>, vector<256x16xf32>
    %cst_175 = arith.constant 0.000000e+00 : f32
    %249 = vector.shape_cast %23 : vector<256x1xi1> to vector<256x1xi1>
    %250 = vector.broadcast %249 : vector<256x1xi1> to vector<256x16xi1>
    %251 = vector.broadcast %cst_175 : f32 to vector<256x16xf32>
    %252 = arith.select %250, %248, %251 : vector<256x16xi1>, vector<256x16xf32>
    %c48_176 = arith.constant 48 : index
    %c0_177 = arith.constant 0 : index
    %253 = vector.load %arg5[%c48_176, %c0_177] : memref<144x4xf32, #tpu.memory_space<vmem>>, vector<16x4xf32>
    %cst_178 = arith.constant dense<0.000000e+00> : vector<256x4xf32>
    %254 = tpu.matmul %252, %253, %cst_178 {dimension_numbers = #tpu.dot_dimension_numbers<[1], [0], [0], [1], [0, 0, 1, 1], [], []>} : vector<256x16xf32>, vector<16x4xf32>, vector<256x4xf32> -> vector<256x4xf32>
    %255 = arith.addf %247, %254 : vector<256x4xf32>
    %c17_179 = arith.constant 17 : index
    %c0_180 = arith.constant 0 : index
    %256 = vector.load %arg8[%c17_179, %c0_180] : memref<290x20xf32, #tpu.memory_space<vmem>>, vector<256x16xf32>
    %c64_181 = arith.constant 64 : index
    %c0_182 = arith.constant 0 : index
    %257 = vector.load %arg5[%c64_181, %c0_182] : memref<144x4xf32, #tpu.memory_space<vmem>>, vector<16x4xf32>
    %cst_183 = arith.constant dense<0.000000e+00> : vector<256x4xf32>
    %258 = tpu.matmul %256, %257, %cst_183 {dimension_numbers = #tpu.dot_dimension_numbers<[1], [0], [0], [1], [0, 0, 1, 1], [], []>} : vector<256x16xf32>, vector<16x4xf32>, vector<256x4xf32> -> vector<256x4xf32>
    %259 = arith.addf %255, %258 : vector<256x4xf32>
    %c18_184 = arith.constant 18 : index
    %c0_185 = arith.constant 0 : index
    %260 = vector.load %arg8[%c18_184, %c0_185] : memref<290x20xf32, #tpu.memory_space<vmem>>, vector<256x16xf32>
    %cst_186 = arith.constant 0.000000e+00 : f32
    %261 = vector.shape_cast %25 : vector<256x1xi1> to vector<256x1xi1>
    %262 = vector.broadcast %261 : vector<256x1xi1> to vector<256x16xi1>
    %263 = vector.broadcast %cst_186 : f32 to vector<256x16xf32>
    %264 = arith.select %262, %260, %263 : vector<256x16xi1>, vector<256x16xf32>
    %c80 = arith.constant 80 : index
    %c0_187 = arith.constant 0 : index
    %265 = vector.load %arg5[%c80, %c0_187] : memref<144x4xf32, #tpu.memory_space<vmem>>, vector<16x4xf32>
    %cst_188 = arith.constant dense<0.000000e+00> : vector<256x4xf32>
    %266 = tpu.matmul %264, %265, %cst_188 {dimension_numbers = #tpu.dot_dimension_numbers<[1], [0], [0], [1], [0, 0, 1, 1], [], []>} : vector<256x16xf32>, vector<16x4xf32>, vector<256x4xf32> -> vector<256x4xf32>
    %267 = arith.addf %259, %266 : vector<256x4xf32>
    %c32_189 = arith.constant 32 : index
    %c0_190 = arith.constant 0 : index
    %268 = vector.load %arg8[%c32_189, %c0_190] : memref<290x20xf32, #tpu.memory_space<vmem>>, vector<256x16xf32>
    %cst_191 = arith.constant 0.000000e+00 : f32
    %269 = vector.shape_cast %23 : vector<256x1xi1> to vector<256x1xi1>
    %270 = vector.broadcast %269 : vector<256x1xi1> to vector<256x16xi1>
    %271 = vector.broadcast %cst_191 : f32 to vector<256x16xf32>
    %272 = arith.select %270, %268, %271 : vector<256x16xi1>, vector<256x16xf32>
    %c96_192 = arith.constant 96 : index
    %c0_193 = arith.constant 0 : index
    %273 = vector.load %arg5[%c96_192, %c0_193] : memref<144x4xf32, #tpu.memory_space<vmem>>, vector<16x4xf32>
    %cst_194 = arith.constant dense<0.000000e+00> : vector<256x4xf32>
    %274 = tpu.matmul %272, %273, %cst_194 {dimension_numbers = #tpu.dot_dimension_numbers<[1], [0], [0], [1], [0, 0, 1, 1], [], []>} : vector<256x16xf32>, vector<16x4xf32>, vector<256x4xf32> -> vector<256x4xf32>
    %275 = arith.addf %267, %274 : vector<256x4xf32>
    %c33_195 = arith.constant 33 : index
    %c0_196 = arith.constant 0 : index
    %276 = vector.load %arg8[%c33_195, %c0_196] : memref<290x20xf32, #tpu.memory_space<vmem>>, vector<256x16xf32>
    %c112 = arith.constant 112 : index
    %c0_197 = arith.constant 0 : index
    %277 = vector.load %arg5[%c112, %c0_197] : memref<144x4xf32, #tpu.memory_space<vmem>>, vector<16x4xf32>
    %cst_198 = arith.constant dense<0.000000e+00> : vector<256x4xf32>
    %278 = tpu.matmul %276, %277, %cst_198 {dimension_numbers = #tpu.dot_dimension_numbers<[1], [0], [0], [1], [0, 0, 1, 1], [], []>} : vector<256x16xf32>, vector<16x4xf32>, vector<256x4xf32> -> vector<256x4xf32>
    %279 = arith.addf %275, %278 : vector<256x4xf32>
    %c34_199 = arith.constant 34 : index
    %c0_200 = arith.constant 0 : index
    %280 = vector.load %arg8[%c34_199, %c0_200] : memref<290x20xf32, #tpu.memory_space<vmem>>, vector<256x16xf32>
    %cst_201 = arith.constant 0.000000e+00 : f32
    %281 = vector.shape_cast %25 : vector<256x1xi1> to vector<256x1xi1>
    %282 = vector.broadcast %281 : vector<256x1xi1> to vector<256x16xi1>
    %283 = vector.broadcast %cst_201 : f32 to vector<256x16xf32>
    %284 = arith.select %282, %280, %283 : vector<256x16xi1>, vector<256x16xf32>
    %c128 = arith.constant 128 : index
    %c0_202 = arith.constant 0 : index
    %285 = vector.load %arg5[%c128, %c0_202] : memref<144x4xf32, #tpu.memory_space<vmem>>, vector<16x4xf32>
    %cst_203 = arith.constant dense<0.000000e+00> : vector<256x4xf32>
    %286 = tpu.matmul %284, %285, %cst_203 {dimension_numbers = #tpu.dot_dimension_numbers<[1], [0], [0], [1], [0, 0, 1, 1], [], []>} : vector<256x16xf32>, vector<16x4xf32>, vector<256x4xf32> -> vector<256x4xf32>
    %287 = arith.addf %279, %286 : vector<256x4xf32>
    %cst_204 = arith.constant 0.000000e+00 : f32
    %288 = vector.broadcast %cst_204 : f32 to vector<256x4xf32>
    %289 = arith.cmpf oge, %287, %288 : vector<256x4xf32>
    %cst_205 = arith.constant 2.000000e-01 : f32
    %290 = vector.broadcast %cst_205 : f32 to vector<256x4xf32>
    %291 = arith.mulf %290, %287 : vector<256x4xf32>
    %292 = arith.select %289, %287, %291 : vector<256x4xi1>, vector<256x4xf32>
    %c17_206 = arith.constant 17 : index
    %c16_207 = arith.constant 16 : index
    %293 = vector.load %arg8[%c17_206, %c16_207] : memref<290x20xf32, #tpu.memory_space<vmem>>, vector<256x4xf32>
    tpu.vector_store %arg8[%c17_206, %c16_207], %292 {strides = array<i32>} : memref<290x20xf32, #tpu.memory_space<vmem>>, vector<256x4xf32>,
    %cst_208 = arith.constant 0.000000e+00 : f32
    %294 = vector.broadcast %cst_208 : f32 to vector<256x4xf32>
    %c0_209 = arith.constant 0 : index
    %c0_210 = arith.constant 0 : index
    %295 = vector.load %arg8[%c0_209, %c0_210] : memref<290x20xf32, #tpu.memory_space<vmem>>, vector<256x20xf32>
    %cst_211 = arith.constant 0.000000e+00 : f32
    %296 = vector.shape_cast %23 : vector<256x1xi1> to vector<256x1xi1>
    %297 = vector.broadcast %296 : vector<256x1xi1> to vector<256x20xi1>
    %298 = vector.broadcast %cst_211 : f32 to vector<256x20xf32>
    %299 = arith.select %297, %295, %298 : vector<256x20xi1>, vector<256x20xf32>
    %c0_212 = arith.constant 0 : index
    %c0_213 = arith.constant 0 : index
    %300 = vector.load %arg6[%c0_212, %c0_213] : memref<180x4xf32, #tpu.memory_space<vmem>>, vector<20x4xf32>
    %cst_214 = arith.constant dense<0.000000e+00> : vector<256x4xf32>
    %301 = tpu.matmul %299, %300, %cst_214 {dimension_numbers = #tpu.dot_dimension_numbers<[1], [0], [0], [1], [0, 0, 1, 1], [], []>} : vector<256x20xf32>, vector<20x4xf32>, vector<256x4xf32> -> vector<256x4xf32>
    %302 = arith.addf %294, %301 : vector<256x4xf32>
    %c1_215 = arith.constant 1 : index
    %c0_216 = arith.constant 0 : index
    %303 = vector.load %arg8[%c1_215, %c0_216] : memref<290x20xf32, #tpu.memory_space<vmem>>, vector<256x20xf32>
    %c20_217 = arith.constant 20 : index
    %c0_218 = arith.constant 0 : index
    %304 = vector.load %arg6[%c20_217, %c0_218] : memref<180x4xf32, #tpu.memory_space<vmem>>, vector<20x4xf32>
    %cst_219 = arith.constant dense<0.000000e+00> : vector<256x4xf32>
    %305 = tpu.matmul %303, %304, %cst_219 {dimension_numbers = #tpu.dot_dimension_numbers<[1], [0], [0], [1], [0, 0, 1, 1], [], []>} : vector<256x20xf32>, vector<20x4xf32>, vector<256x4xf32> -> vector<256x4xf32>
    %306 = arith.addf %302, %305 : vector<256x4xf32>
    %c2_220 = arith.constant 2 : index
    %c0_221 = arith.constant 0 : index
    %307 = vector.load %arg8[%c2_220, %c0_221] : memref<290x20xf32, #tpu.memory_space<vmem>>, vector<256x20xf32>
    %cst_222 = arith.constant 0.000000e+00 : f32
    %308 = vector.shape_cast %25 : vector<256x1xi1> to vector<256x1xi1>
    %309 = vector.broadcast %308 : vector<256x1xi1> to vector<256x20xi1>
    %310 = vector.broadcast %cst_222 : f32 to vector<256x20xf32>
    %311 = arith.select %309, %307, %310 : vector<256x20xi1>, vector<256x20xf32>
    %c40_223 = arith.constant 40 : index
    %c0_224 = arith.constant 0 : index
    %312 = vector.load %arg6[%c40_223, %c0_224] : memref<180x4xf32, #tpu.memory_space<vmem>>, vector<20x4xf32>
    %cst_225 = arith.constant dense<0.000000e+00> : vector<256x4xf32>
    %313 = tpu.matmul %311, %312, %cst_225 {dimension_numbers = #tpu.dot_dimension_numbers<[1], [0], [0], [1], [0, 0, 1, 1], [], []>} : vector<256x20xf32>, vector<20x4xf32>, vector<256x4xf32> -> vector<256x4xf32>
    %314 = arith.addf %306, %313 : vector<256x4xf32>
    %c16_226 = arith.constant 16 : index
    %c0_227 = arith.constant 0 : index
    %315 = vector.load %arg8[%c16_226, %c0_227] : memref<290x20xf32, #tpu.memory_space<vmem>>, vector<256x20xf32>
    %cst_228 = arith.constant 0.000000e+00 : f32
    %316 = vector.shape_cast %23 : vector<256x1xi1> to vector<256x1xi1>
    %317 = vector.broadcast %316 : vector<256x1xi1> to vector<256x20xi1>
    %318 = vector.broadcast %cst_228 : f32 to vector<256x20xf32>
    %319 = arith.select %317, %315, %318 : vector<256x20xi1>, vector<256x20xf32>
    %c60_229 = arith.constant 60 : index
    %c0_230 = arith.constant 0 : index
    %320 = vector.load %arg6[%c60_229, %c0_230] : memref<180x4xf32, #tpu.memory_space<vmem>>, vector<20x4xf32>
    %cst_231 = arith.constant dense<0.000000e+00> : vector<256x4xf32>
    %321 = tpu.matmul %319, %320, %cst_231 {dimension_numbers = #tpu.dot_dimension_numbers<[1], [0], [0], [1], [0, 0, 1, 1], [], []>} : vector<256x20xf32>, vector<20x4xf32>, vector<256x4xf32> -> vector<256x4xf32>
    %322 = arith.addf %314, %321 : vector<256x4xf32>
    %c17_232 = arith.constant 17 : index
    %c0_233 = arith.constant 0 : index
    %323 = vector.load %arg8[%c17_232, %c0_233] : memref<290x20xf32, #tpu.memory_space<vmem>>, vector<256x20xf32>
    %c80_234 = arith.constant 80 : index
    %c0_235 = arith.constant 0 : index
    %324 = vector.load %arg6[%c80_234, %c0_235] : memref<180x4xf32, #tpu.memory_space<vmem>>, vector<20x4xf32>
    %cst_236 = arith.constant dense<0.000000e+00> : vector<256x4xf32>
    %325 = tpu.matmul %323, %324, %cst_236 {dimension_numbers = #tpu.dot_dimension_numbers<[1], [0], [0], [1], [0, 0, 1, 1], [], []>} : vector<256x20xf32>, vector<20x4xf32>, vector<256x4xf32> -> vector<256x4xf32>
    %326 = arith.addf %322, %325 : vector<256x4xf32>
    %c18_237 = arith.constant 18 : index
    %c0_238 = arith.constant 0 : index
    %327 = vector.load %arg8[%c18_237, %c0_238] : memref<290x20xf32, #tpu.memory_space<vmem>>, vector<256x20xf32>
    %cst_239 = arith.constant 0.000000e+00 : f32
    %328 = vector.shape_cast %25 : vector<256x1xi1> to vector<256x1xi1>
    %329 = vector.broadcast %328 : vector<256x1xi1> to vector<256x20xi1>
    %330 = vector.broadcast %cst_239 : f32 to vector<256x20xf32>
    %331 = arith.select %329, %327, %330 : vector<256x20xi1>, vector<256x20xf32>
    %c100 = arith.constant 100 : index
    %c0_240 = arith.constant 0 : index
    %332 = vector.load %arg6[%c100, %c0_240] : memref<180x4xf32, #tpu.memory_space<vmem>>, vector<20x4xf32>
    %cst_241 = arith.constant dense<0.000000e+00> : vector<256x4xf32>
    %333 = tpu.matmul %331, %332, %cst_241 {dimension_numbers = #tpu.dot_dimension_numbers<[1], [0], [0], [1], [0, 0, 1, 1], [], []>} : vector<256x20xf32>, vector<20x4xf32>, vector<256x4xf32> -> vector<256x4xf32>
    %334 = arith.addf %326, %333 : vector<256x4xf32>
    %c32_242 = arith.constant 32 : index
    %c0_243 = arith.constant 0 : index
    %335 = vector.load %arg8[%c32_242, %c0_243] : memref<290x20xf32, #tpu.memory_space<vmem>>, vector<256x20xf32>
    %cst_244 = arith.constant 0.000000e+00 : f32
    %336 = vector.shape_cast %23 : vector<256x1xi1> to vector<256x1xi1>
    %337 = vector.broadcast %336 : vector<256x1xi1> to vector<256x20xi1>
    %338 = vector.broadcast %cst_244 : f32 to vector<256x20xf32>
    %339 = arith.select %337, %335, %338 : vector<256x20xi1>, vector<256x20xf32>
    %c120 = arith.constant 120 : index
    %c0_245 = arith.constant 0 : index
    %340 = vector.load %arg6[%c120, %c0_245] : memref<180x4xf32, #tpu.memory_space<vmem>>, vector<20x4xf32>
    %cst_246 = arith.constant dense<0.000000e+00> : vector<256x4xf32>
    %341 = tpu.matmul %339, %340, %cst_246 {dimension_numbers = #tpu.dot_dimension_numbers<[1], [0], [0], [1], [0, 0, 1, 1], [], []>} : vector<256x20xf32>, vector<20x4xf32>, vector<256x4xf32> -> vector<256x4xf32>
    %342 = arith.addf %334, %341 : vector<256x4xf32>
    %c33_247 = arith.constant 33 : index
    %c0_248 = arith.constant 0 : index
    %343 = vector.load %arg8[%c33_247, %c0_248] : memref<290x20xf32, #tpu.memory_space<vmem>>, vector<256x20xf32>
    %c140 = arith.constant 140 : index
    %c0_249 = arith.constant 0 : index
    %344 = vector.load %arg6[%c140, %c0_249] : memref<180x4xf32, #tpu.memory_space<vmem>>, vector<20x4xf32>
    %cst_250 = arith.constant dense<0.000000e+00> : vector<256x4xf32>
    %345 = tpu.matmul %343, %344, %cst_250 {dimension_numbers = #tpu.dot_dimension_numbers<[1], [0], [0], [1], [0, 0, 1, 1], [], []>} : vector<256x20xf32>, vector<20x4xf32>, vector<256x4xf32> -> vector<256x4xf32>
    %346 = arith.addf %342, %345 : vector<256x4xf32>
    %c34_251 = arith.constant 34 : index
    %c0_252 = arith.constant 0 : index
    %347 = vector.load %arg8[%c34_251, %c0_252] : memref<290x20xf32, #tpu.memory_space<vmem>>, vector<256x20xf32>
    %cst_253 = arith.constant 0.000000e+00 : f32
    %348 = vector.shape_cast %25 : vector<256x1xi1> to vector<256x1xi1>
    %349 = vector.broadcast %348 : vector<256x1xi1> to vector<256x20xi1>
    %350 = vector.broadcast %cst_253 : f32 to vector<256x20xf32>
    %351 = arith.select %349, %347, %350 : vector<256x20xi1>, vector<256x20xf32>
    %c160 = arith.constant 160 : index
    %c0_254 = arith.constant 0 : index
    %352 = vector.load %arg6[%c160, %c0_254] : memref<180x4xf32, #tpu.memory_space<vmem>>, vector<20x4xf32>
    %cst_255 = arith.constant dense<0.000000e+00> : vector<256x4xf32>
    %353 = tpu.matmul %351, %352, %cst_255 {dimension_numbers = #tpu.dot_dimension_numbers<[1], [0], [0], [1], [0, 0, 1, 1], [], []>} : vector<256x20xf32>, vector<20x4xf32>, vector<256x4xf32> -> vector<256x4xf32>
    %354 = arith.addf %346, %353 : vector<256x4xf32>
    %cst_256 = arith.constant 2.000000e-01 : f32
    %355 = vector.broadcast %cst_256 : f32 to vector<256x4xf32>
    %356 = arith.mulf %354, %355 : vector<256x4xf32>
    %c0_257 = arith.constant 0 : index
    %c0_258 = arith.constant 0 : index
    %c0_259 = arith.constant 0 : index
    %357 = vector.load %arg1[%c0_257, %c0_258, %c0_259] : memref<1x256x4xf32, #tpu.memory_space<vmem>>, vector<1x256x4xf32>
    %358 = vector.shape_cast %357 : vector<1x256x4xf32> to vector<256x4xf32>
    %359 = arith.addf %356, %358 : vector<256x4xf32>
    %c0_260 = arith.constant 0 : index
    %c0_261 = arith.constant 0 : index
    %c0_262 = arith.constant 0 : index
    %360 = vector.load %arg7[%c0_260, %c0_261, %c0_262] : memref<1x256x4xf32, #tpu.memory_space<vmem>>, vector<1x256x4xf32>
    %361 = vector.shape_cast %360 : vector<1x256x4xf32> to vector<256x4xf32>
    %362 = vector.shape_cast %359 : vector<256x4xf32> to vector<1x256x4xf32>
    tpu.vector_store %arg7[%c0_260, %c0_261, %c0_262], %362 {strides = array<i32>} : memref<1x256x4xf32, #tpu.memory_space<vmem>>, vector<1x256x4xf32>,
    return
  }
  func.func @transform_0(%arg0: i32) -> (i32, i32, i32) {
    %c0_i32 = arith.constant 0 : i32
    %c0_i32_0 = arith.constant 0 : i32
    %c0_i32_1 = arith.constant 0 : i32
    return %arg0, %c0_i32, %c0_i32_0 : i32, i32, i32
  }
  func.func @transform_1(%arg0: i32) -> (i32, i32) {
    %c0_i32 = arith.constant 0 : i32
    %c0_i32_0 = arith.constant 0 : i32
    %c0_i32_1 = arith.constant 0 : i32
    return %c0_i32, %c0_i32_0 : i32, i32
  }
  func.func @transform_2(%arg0: i32) -> (i32, i32) {
    %c0_i32 = arith.constant 0 : i32
    %c0_i32_0 = arith.constant 0 : i32
    %c0_i32_1 = arith.constant 0 : i32
    return %c0_i32, %c0_i32_0 : i32, i32
  }
  func.func @transform_3(%arg0: i32) -> (i32, i32) {
    %c0_i32 = arith.constant 0 : i32
    %c0_i32_0 = arith.constant 0 : i32
    %c0_i32_1 = arith.constant 0 : i32
    return %c0_i32, %c0_i32_0 : i32, i32
  }
  func.func @transform_4(%arg0: i32) -> (i32, i32) {
    %c0_i32 = arith.constant 0 : i32
    %c0_i32_0 = arith.constant 0 : i32
    %c0_i32_1 = arith.constant 0 : i32
    return %c0_i32, %c0_i32_0 : i32, i32
  }
  func.func @transform_5(%arg0: i32) -> (i32, i32) {
    %c0_i32 = arith.constant 0 : i32
    %c0_i32_0 = arith.constant 0 : i32
    %c0_i32_1 = arith.constant 0 : i32
    return %c0_i32, %c0_i32_0 : i32, i32
  }
  func.func @transform_6(%arg0: i32) -> (i32, i32, i32) {
    %c0_i32 = arith.constant 0 : i32
    %c0_i32_0 = arith.constant 0 : i32
    %c0_i32_1 = arith.constant 0 : i32
    return %arg0, %c0_i32, %c0_i32_0 : i32, i32, i32
  }
}

</mosaic_0001>

<bundles_post_ra>
// kernel: tpu_custom_call.1
= control target key start
LH: loop header
LB: loop body
LE: loop exit
PB: predicated region body
PF: predicated region fallthrough
CT: control target
= control target key end

     0   :  { %s27102_s21 = smov 0   ;;  %s32721_s0 = inlined_call_operand.vmem [shape: f32[2,256,4], index: 0, kind: input, shape index: {}]   ;;  %s32722_s1 = inlined_call_operand.vmem [shape: f32[36,4], index: 1, kind: input, shape index: {}]   ;;  %s32723_s2 = inlined_call_operand.vmem [shape: f32[72,4], index: 2, kind: input, shape index: {}]   ;;  %s32724_s3 = inlined_call_operand.vmem [shape: f32[108,4], index: 3, kind: input, shape index: {}]   ;;  %s32725_s4 = inlined_call_operand.vmem [shape: f32[144,4], index: 4, kind: input, shape index: {}]   ;;  %s32726_s5 = inlined_call_operand.vmem [shape: f32[180,4], index: 5, kind: input, shape index: {}]   ;;  %s32727_s6 = inlined_call_operand.vmem [shape: f32[2,256,4], index: 6, kind: output, shape index: {}]  }
   0x1 LB: > { %s20307_s22 = sadd.s32 4294967295, %s27059_s21   ;;  %p20311_p0 = scmp.ge.s32.totalorder %s27059_s21, 1  ;;  %s27059_s21 = sphi %s27102_s21, %s16_s21  }
   0x2   : > { %p212_p1 = scmp.lt.s32.totalorder %s27059_s21, 3 }
   0x4   : > { %p213_p2 = pnand %p20311_p0, %p212_p1 }
   0x6   : > { %216 = sbr.rel (%p213_p2) target bundleno = 3941 (0xf65), region = 44 }
   0xd   : > { %v998_v0 = vld [vmem:[%s32722_s1 + $0x4] sm:$0xf]  ;;  %vm32730_vm0 = vcmask 1043456   ;;  %vm32728_vm1 = vcmask 162816   ;;  %v32729_v1 = vmov 0.0   ;;  %p242_p3 = scmp.lt.s32.totalorder %s20307_s22, 1  ;;  %v356_v44 = vlaneseq }
   0xe   : > { %23308 = vmatprep.subr.msk.mxu1 %vm32730_vm0, %v998_v0  ;;  %253 = vst.msk [vmem:[#allocation2] sm:$0xff] %vm32728_vm1, %v32729_v1  ;;  %254 = vst.msk [vmem:[#allocation2 + $0x8] sm:$0xff] %vm32728_vm1, %v32729_v1  ;;  %v27189_v2 = vld [vmem:[%s32722_s1 + $0x10] sm:$0xf]  ;;  %v27196_v3 = vld [vmem:[%s32722_s1 + $0x14] sm:$0xf] }
   0xf   : > { %255 = vst.msk [vmem:[#allocation2 + $0x10] sm:$0xff] %vm32728_vm1, %v32729_v1  ;;  %256 = vst.msk [vmem:[#allocation2 + $0x18] sm:$0xff] %vm32728_vm1, %v32729_v1  ;;  %23309 = vmatpush3.msk.msra.mxu1 %vm32730_vm0, %v998_v0  ;;  %23508 = vmatprep.subr.msk.mxu0 %vm32730_vm0, %v27189_v2  ;;  %v965_v4 = vld [vmem:[%s32722_s1] sm:$0xf]  ;;  %s35375_s22 = smov (!%p242_p3, %s20307_s22), 1  ;;  %vm32733_vm2 = vcmask 31744  }
  0x10   : > { %257 = vst.msk [vmem:[#allocation2 + $0x20] sm:$0xff] %vm32728_vm1, %v32729_v1  ;;  %258 = vst.msk [vmem:[#allocation2 + $0x28] sm:$0xff] %vm32728_vm1, %v32729_v1  ;;  %23509 = vmatpush3.msk.msra.mxu0 %vm32730_vm0, %v27189_v2  ;;  %23358 = vmatprep.subr.msk.mxu1 %vm32730_vm0, %v965_v4  ;;  %s21785_s7 = sshll.u32 %s35375_s22, 8  ;;  %v27227_v8 = vld [vmem:[%s32722_s1 + $0x8] sm:$0xf]  ;;  %v27322_v53 = vshrl.u32 %v356_v44, 7 }
  0x11   : > { %259 = vst.msk [vmem:[#allocation2 + $0x30] sm:$0xff] %vm32728_vm1, %v32729_v1  ;;  %260 = vst.msk [vmem:[#allocation2 + $0x38] sm:$0xff] %vm32728_vm1, %v32729_v1  ;;  %23558 = vmatprep.subr.msk.mxu0 %vm32730_vm0, %v27196_v3  ;;  %s27219_s10 = scalar_lea.vmem %s32721_s0, %s21785_s7  ;;  %v27280_v33 = vld [vmem:[%s32722_s1 + $0x18] sm:$0xf]  ;;  %v33302_v0 = vmov 0  ;;  %v33326_v44 = vmov 0  ;;  %s32622_s13 = scalar_lea.vmem %s32727_s6, %s21785_s7 }
  0x12   : > { %261 = vst.msk [vmem:[#allocation2 + $0x40] sm:$0xff] %vm32728_vm1, %v32729_v1  ;;  %262 = vst.msk [vmem:[#allocation2 + $0x48] sm:$0xff] %vm32728_vm1, %v32729_v1  ;;  %v291_v5 = vld [vmem:[%s27219_s10] sm:$0xff]  ;;  %v292_v6 = vld [vmem:[%s27219_s10 + $0x8] sm:$0xff]  ;;  %v358_v56 = vadd.s32 8, %v27322_v53  ;;  %v360_v60 = vadd.s32 24, %v27322_v53 }
  0x13   : > { %263 = vst.msk [vmem:[#allocation2 + $0x50] sm:$0xff] %vm32728_vm1, %v32729_v1  ;;  %264 = vst.msk [vmem:[#allocation2 + $0x58] sm:$0xff] %vm32728_vm1, %v32729_v1  ;;  %v293_v7 = vld [vmem:[%s27219_s10 + $0x10] sm:$0xff]  ;;  %v294_v11 = vld [vmem:[%s27219_s10 + $0x18] sm:$0xff]  ;;  %s27062_s29 = smov 4   ;;  %s27064_s9 = smov 8  }
  0x14   : > { %265 = vst.msk [vmem:[#allocation2 + $0x60] sm:$0xff] %vm32728_vm1, %v32729_v1  ;;  %266 = vst.msk [vmem:[#allocation2 + $0x68] sm:$0xff] %vm32728_vm1, %v32729_v1  ;;  %v295_v12 = vld [vmem:[%s27219_s10 + $0x20] sm:$0xff]  ;;  %v296_v13 = vld [vmem:[%s27219_s10 + $0x28] sm:$0xff]  ;;  %v400_v59 = vand.u32 15, %v358_v56  ;;  %s27066_s28 = smov 16  }
  0x15   : > { %267 = vst.msk [vmem:[#allocation2 + $0x70] sm:$0xff] %vm32728_vm1, %v32729_v1  ;;  %268 = vst.msk [vmem:[#allocation2 + $0x78] sm:$0xff] %vm32728_vm1, %v32729_v1  ;;  %v966_v9 = vld [vmem:[#allocation2 + $0x1] sm:$0xff]  ;;  %v297_v14 = vld [vmem:[%s27219_s10 + $0x30] sm:$0xff] }
  0x16   : > { %269 = vst.msk [vmem:[#allocation2 + $0x80] sm:$0xff] %vm32728_vm1, %v32729_v1  ;;  %270 = vst.msk [vmem:[#allocation2 + $0x88] sm:$0xff] %vm32728_vm1, %v32729_v1  ;;  %v967_v10 = vld [vmem:[#allocation2 + $0x9] sm:$0xff]  ;;  %23310 = vmatprep.mubr.msk.f32.mxu1 %vm32733_vm2, %v966_v9  ;;  %v298_v15 = vld [vmem:[%s27219_s10 + $0x38] sm:$0xff]  ;;  %vm27340_vm3 = vcmp.le.s32.totalorder %v400_v59, 14  ;;  %v33334_v59 = vmov 0 }
  0x17   : > { %271 = vst.msk [vmem:[#allocation2 + $0x90] sm:$0xff] %vm32728_vm1, %v32729_v1  ;;  %272 = vst.msk [vmem:[#allocation2 + $0x98] sm:$0xff] %vm32728_vm1, %v32729_v1  ;;  %23311 = vmatmul.mubr.msk.f32.vlgmr.msra.gmra.mrb[0].mxu1 %vm32733_vm2, %v967_v10  ;;  %v299_v16 = vld [vmem:[%s27219_s10 + $0x40] sm:$0xff]  ;;  %v300_v17 = vld [vmem:[%s27219_s10 + $0x48] sm:$0xff]  ;;  %v33303_v0 = vsel %vm27340_vm3, 4294967295, %v33302_v0  ;;  %v33306_v10 = vmov 0 }
  0x18   : > { %273 = vst.msk [vmem:[#allocation2 + $0xa0] sm:$0xff] %vm32728_vm1, %v32729_v1  ;;  %274 = vst.msk [vmem:[#allocation2 + $0xa8] sm:$0xff] %vm32728_vm1, %v32729_v1  ;;  %23359 = vmatpush3.msk.msra.mxu1 %vm32730_vm0, %v965_v4  ;;  %v301_v18 = vld [vmem:[%s27219_s10 + $0x50] sm:$0xff]  ;;  %v302_v19 = vld [vmem:[%s27219_s10 + $0x58] sm:$0xff]  ;;  %v414_v4 = vand.u32 15, %v360_v60 }
  0x19   : > { %275 = vst.msk [vmem:[#allocation2 + $0xb0] sm:$0xff] %vm32728_vm1, %v32729_v1  ;;  %276 = vst.msk [vmem:[#allocation2 + $0xb8] sm:$0xff] %vm32728_vm1, %v32729_v1  ;;  %v303_v20 = vld [vmem:[%s27219_s10 + $0x60] sm:$0xff]  ;;  %v304_v21 = vld [vmem:[%s27219_s10 + $0x68] sm:$0xff]  ;;  %23408 = vmatprep.subr.msk.mxu1 %vm32730_vm0, %v27227_v8 }
  0x1a   : > { %277 = vst.msk [vmem:[#allocation2 + $0xc0] sm:$0xff] %vm32728_vm1, %v32729_v1  ;;  %278 = vst.msk [vmem:[#allocation2 + $0xc8] sm:$0xff] %vm32728_vm1, %v32729_v1  ;;  %v305_v22 = vld [vmem:[%s27219_s10 + $0x70] sm:$0xff]  ;;  %v306_v23 = vld [vmem:[%s27219_s10 + $0x78] sm:$0xff]  ;;  %vm27357_vm4 = vcmp.le.s32.totalorder %v414_v4, 14 }
  0x1b   : > { %279 = vst.msk [vmem:[#allocation2 + $0xd0] sm:$0xff] %vm32728_vm1, %v32729_v1  ;;  %280 = vst.msk [vmem:[#allocation2 + $0xd8] sm:$0xff] %vm32728_vm1, %v32729_v1  ;;  %v307_v24 = vld [vmem:[%s27219_s10 + $0x80] sm:$0xff]  ;;  %v308_v25 = vld [vmem:[%s27219_s10 + $0x88] sm:$0xff]  ;;  %v33307_v10 = vsel %vm27357_vm4, 4294967295, %v33306_v10 }
  0x1c   : > { %281 = vst.msk [vmem:[#allocation2 + $0xe0] sm:$0xff] %vm32728_vm1, %v32729_v1  ;;  %282 = vst.msk [vmem:[#allocation2 + $0xe8] sm:$0xff] %vm32728_vm1, %v32729_v1  ;;  %v309_v26 = vld [vmem:[%s27219_s10 + $0x90] sm:$0xff]  ;;  %v310_v27 = vld [vmem:[%s27219_s10 + $0x98] sm:$0xff] }
  0x1d   : > { %283 = vst.msk [vmem:[#allocation2 + $0xf0] sm:$0xff] %vm32728_vm1, %v32729_v1  ;;  %284 = vst.msk [vmem:[#allocation2 + $0xf8] sm:$0xff] %vm32728_vm1, %v32729_v1  ;;  %v311_v28 = vld [vmem:[%s27219_s10 + $0xa0] sm:$0xff]  ;;  %v312_v29 = vld [vmem:[%s27219_s10 + $0xa8] sm:$0xff] }
  0x1e   : > { %285 = vst.msk [vmem:[#allocation2 + $0x100] sm:$0xff] %vm32728_vm1, %v32729_v1  ;;  %286 = vst.msk [vmem:[#allocation2 + $0x108] sm:$0xff] %vm32728_vm1, %v32729_v1  ;;  %v313_v38 = vld [vmem:[%s27219_s10 + $0xb0] sm:$0xff]  ;;  %v314_v39 = vld [vmem:[%s27219_s10 + $0xb8] sm:$0xff] }
  0x1f   : > { %287 = vst.msk [vmem:[#allocation2 + $0x110] sm:$0xff] %vm32728_vm1, %v32729_v1  ;;  %288 = vst.msk [vmem:[#allocation2 + $0x118] sm:$0xff] %vm32728_vm1, %v32729_v1  ;;  %v315_v40 = vld [vmem:[%s27219_s10 + $0xc0] sm:$0xff]  ;;  %v316_v42 = vld [vmem:[%s27219_s10 + $0xc8] sm:$0xff] }
  0x20   : > { %324 = vst.msk [vmem:[#allocation2 + $0x11] sm:$0xff] %vm32733_vm2, %v291_v5  ;;  %325 = vst.msk [vmem:[#allocation2 + $0x19] sm:$0xff] %vm32733_vm2, %v292_v6  ;;  %v317_v45 = vld [vmem:[%s27219_s10 + $0xd0] sm:$0xff]  ;;  %v318_v46 = vld [vmem:[%s27219_s10 + $0xd8] sm:$0xff]  ;;  %v362_v5 = vadd.s32 40, %v27322_v53 }
  0x21   : > { %326 = vst.msk [vmem:[#allocation2 + $0x21] sm:$0xff] %vm32733_vm2, %v293_v7  ;;  %327 = vst.msk [vmem:[#allocation2 + $0x29] sm:$0xff] %vm32733_vm2, %v294_v11  ;;  %v319_v47 = vld [vmem:[%s27219_s10 + $0xe0] sm:$0xff]  ;;  %v320_v48 = vld [vmem:[%s27219_s10 + $0xe8] sm:$0xff] }
  0x22   : > { %328 = vst.msk [vmem:[#allocation2 + $0x31] sm:$0xff] %vm32733_vm2, %v295_v12  ;;  %329 = vst.msk [vmem:[#allocation2 + $0x39] sm:$0xff] %vm32733_vm2, %v296_v13  ;;  %v321_v49 = vld [vmem:[%s27219_s10 + $0xf0] sm:$0xff]  ;;  %v322_v50 = vld [vmem:[%s27219_s10 + $0xf8] sm:$0xff]  ;;  %v428_v12 = vand.u32 15, %v362_v5  ;;  %v364_v13 = vadd.s32 56, %v27322_v53 }
  0x23   : > { %330 = vst.msk [vmem:[#allocation2 + $0x41] sm:$0xff] %vm32733_vm2, %v297_v14  ;;  %331 = vst.msk [vmem:[#allocation2 + $0x49] sm:$0xff] %vm32733_vm2, %v298_v15  ;;  %v27369_v15 = vld [vmem:[%s32722_s1 + $0x1c] sm:$0xf]  ;;  %v837_v60 = vld [vmem:[#allocation2] sm:$0xff] }
  0x24   : > { %332 = vst.msk [vmem:[#allocation2 + $0x51] sm:$0xff] %vm32733_vm2, %v299_v16  ;;  %333 = vst.msk [vmem:[#allocation2 + $0x59] sm:$0xff] %vm32733_vm2, %v300_v17  ;;  %vm27388_vm5 = vcmp.le.s32.totalorder %v428_v12, 14  ;;  %v33338_v12 = vmov 0 }
  0x25   : > { %334 = vst.msk [vmem:[#allocation2 + $0x61] sm:$0xff] %vm32733_vm2, %v301_v18  ;;  %335 = vst.msk [vmem:[#allocation2 + $0x69] sm:$0xff] %vm32733_vm2, %v302_v19 }
  0x26   : > { %336 = vst.msk [vmem:[#allocation2 + $0x71] sm:$0xff] %vm32733_vm2, %v303_v20  ;;  %337 = vst.msk [vmem:[#allocation2 + $0x79] sm:$0xff] %vm32733_vm2, %v304_v21  ;;  %v33311_v20 = vmov 0 }
  0x27   : > { %338 = vst.msk [vmem:[#allocation2 + $0x81] sm:$0xff] %vm32733_vm2, %v305_v22  ;;  %339 = vst.msk [vmem:[#allocation2 + $0x89] sm:$0xff] %vm32733_vm2, %v306_v23  ;;  %v968_v30 = vld [vmem:[#allocation2 + $0x11] sm:$0xff]  ;;  %v969_v31 = vld [vmem:[#allocation2 + $0x19] sm:$0xff]  ;;  %v33312_v20 = vsel %vm27388_vm5, 4294967295, %v33311_v20  ;;  %v442_v22 = vand.u32 15, %v364_v13 }
  0x28   : > { %340 = vst.msk [vmem:[#allocation2 + $0x91] sm:$0xff] %vm32733_vm2, %v307_v24  ;;  %341 = vst.msk [vmem:[#allocation2 + $0x99] sm:$0xff] %vm32733_vm2, %v308_v25  ;;  %v970_v32 = vld [vmem:[#allocation2 + $0x21] sm:$0xff]  ;;  %23313 = vmatprep.mubr.msk.f32.mxu1 %vm32733_vm2, %v968_v30  ;;  %23510 = vmatprep.mubr.msk.f32.mxu0 %vm32733_vm2, %v968_v30  ;;  %v971_v34 = vld [vmem:[#allocation2 + $0x29] sm:$0xff]  ;;  %v366_v23 = vadd.s32 72, %v27322_v53 }
  0x29   : > { %342 = vst.msk [vmem:[#allocation2 + $0xa1] sm:$0xff] %vm32733_vm2, %v309_v26  ;;  %343 = vst.msk [vmem:[#allocation2 + $0xa9] sm:$0xff] %vm32733_vm2, %v310_v27  ;;  %23314 = vmatmul.mubr.msk.f32.gmra.mrb[2].mxu1 %vm32733_vm2, %v969_v31  ;;  %23511 = vmatmul.mubr.msk.f32.vlgmr.msra.gmra.mrb[0].mxu0 %vm32733_vm2, %v969_v31  ;;  %v972_v35 = vld [vmem:[#allocation2 + $0x31] sm:$0xff]  ;;  %v973_v36 = vld [vmem:[#allocation2 + $0x39] sm:$0xff]  ;;  %vm27413_vm6 = vcmp.le.s32.totalorder %v442_v22, 14  ;;  %v368_v31 = vadd.s32 88, %v27322_v53 }
  0x2a   : > { %344 = vst.msk [vmem:[#allocation2 + $0xb1] sm:$0xff] %vm32733_vm2, %v311_v28  ;;  %345 = vst.msk [vmem:[#allocation2 + $0xb9] sm:$0xff] %vm32733_vm2, %v312_v29  ;;  %23559 = vmatpush3.msk.msra.mxu0 %vm32730_vm0, %v27196_v3  ;;  %23316 = vmatprep.mubr.msk.f32.mxu1 %vm32733_vm2, %v970_v32  ;;  %v974_v37 = vld [vmem:[#allocation2 + $0x41] sm:$0xff]  ;;  %v975_v41 = vld [vmem:[#allocation2 + $0x49] sm:$0xff]  ;;  %v33316_v28 = vmov 0  ;;  %v456_v30 = vand.u32 15, %v366_v23 }
  0x2b   : > { %23513 = vmatprep.mubr.msk.f32.mxu0 %vm32733_vm2, %v970_v32  ;;  %23608 = vmatprep.subr.msk.mxu0 %vm32730_vm0, %v27280_v33  ;;  %346 = vst.msk [vmem:[#allocation2 + $0xc1] sm:$0xff] %vm32733_vm2, %v313_v38  ;;  %347 = vst.msk [vmem:[#allocation2 + $0xc9] sm:$0xff] %vm32733_vm2, %v314_v39  ;;  %v976_v43 = vld [vmem:[#allocation2 + $0x51] sm:$0xff]  ;;  %v977_v51 = vld [vmem:[#allocation2 + $0x59] sm:$0xff]  ;;  %v33317_v28 = vsel %vm27413_vm6, 4294967295, %v33316_v28  ;;  %v470_v38 = vand.u32 15, %v368_v31 }
  0x2c   : > { %348 = vst.msk [vmem:[#allocation2 + $0xd1] sm:$0xff] %vm32733_vm2, %v315_v40  ;;  %349 = vst.msk [vmem:[#allocation2 + $0xd9] sm:$0xff] %vm32733_vm2, %v316_v42  ;;  %v978_v52 = vld [vmem:[#allocation2 + $0x61] sm:$0xff]  ;;  %v979_v54 = vld [vmem:[#allocation2 + $0x69] sm:$0xff]  ;;  %vm27436_vm7 = vcmp.le.s32.totalorder %v456_v30, 14  ;;  %v370_v39 = vadd.s32 104, %v27322_v53 }
  0x2d   : > { %23317 = vmatmul.mubr.msk.f32.gmra.mrb[4].mxu1 %vm32733_vm2, %v971_v34  ;;  %23514 = vmatmul.mubr.msk.f32.gmra.mrb[2].mxu0 %vm32733_vm2, %v971_v34  ;;  %350 = vst.msk [vmem:[#allocation2 + $0xe1] sm:$0xff] %vm32733_vm2, %v317_v45  ;;  %351 = vst.msk [vmem:[#allocation2 + $0xe9] sm:$0xff] %vm32733_vm2, %v318_v46  ;;  %v980_v55 = vld [vmem:[#allocation2 + $0x71] sm:$0xff]  ;;  %v981_v57 = vld [vmem:[#allocation2 + $0x79] sm:$0xff]  ;;  %vm27459_vm8 = vcmp.le.s32.totalorder %v470_v38, 14  ;;  %v376_v22 = vadd.s32 152, %v27322_v53 }
  0x2e   : > { %23319 = vmatprep.mubr.msk.f32.mxu1 %vm32733_vm2, %v972_v35  ;;  %23516 = vmatprep.mubr.msk.f32.mxu0 %vm32733_vm2, %v972_v35  ;;  %352 = vst.msk [vmem:[#allocation2 + $0xf1] sm:$0xff] %vm32733_vm2, %v319_v47  ;;  %353 = vst.msk [vmem:[#allocation2 + $0xf9] sm:$0xff] %vm32733_vm2, %v320_v48  ;;  %v982_v58 = vld [vmem:[#allocation2 + $0x81] sm:$0xff]  ;;  %v983_v61 = vld [vmem:[#allocation2 + $0x89] sm:$0xff]  ;;  %v33327_v44 = vsel %vm27459_vm8, 4294967295, %v33326_v44  ;;  %v484_v46 = vand.u32 15, %v370_v39 }
  0x2f   : > { %354 = vst.msk [vmem:[#allocation2 + $0x101] sm:$0xff] %vm32733_vm2, %v321_v49  ;;  %355 = vst.msk [vmem:[#allocation2 + $0x109] sm:$0xff] %vm32733_vm2, %v322_v50  ;;  %v984_v62 = vld [vmem:[#allocation2 + $0x91] sm:$0xff]  ;;  %v27344_v3 = vld [vmem:[#allocation2 + $0x1a] sm:$0xff]  ;;  %v372_v47 = vadd.s32 120, %v27322_v53  ;;  %v393_v48 = vand.u32 15, %v27322_v53 }
  0x30   : > { %v27338_v63 = vld [vmem:[#allocation2 + $0x12] sm:$0xff]  ;;  %33304 = vst [vmem:[#allocation3_spill] sm:$0xff] %v33303_v0  ;;  %v2976_v7 = vsel %vm27340_vm3, %v27344_v3, 0.0  ;;  %v27355_v9 = vld [vmem:[#allocation2 + $0xa1] sm:$0xff]  ;;  %33308 = vst [vmem:[#allocation5_spill] sm:$0xff] %v33307_v10  ;;  %v359_v49 = vadd.s32 16, %v27322_v53 }
  0x31   : > { %23320 = vmatmul.mubr.msk.f32.gmra.mrb[6].mxu1 %vm32733_vm2, %v973_v36  ;;  %23517 = vmatmul.mubr.msk.f32.gmra.mrb[4].mxu0 %vm32733_vm2, %v973_v36  ;;  %v985_v6 = vld [vmem:[#allocation2 + $0x99] sm:$0xff]  ;;  %33305 = vst [vmem:[#allocation4_spill] sm:$0xff] %v27355_v9  ;;  %v27361_v11 = vld [vmem:[#allocation2 + $0x2a] sm:$0xff]  ;;  %v27364_v14 = vld [vmem:[#allocation2 + $0x22] sm:$0xff]  ;;  %v33321_v36 = vmov 0  ;;  %vm27484_vm9 = vcmp.le.s32.totalorder %v484_v46, 14 }
  0x32   : > { %23322 = vmatprep.mubr.msk.f32.mxu1 %vm32733_vm2, %v974_v37  ;;  %23519 = vmatprep.mubr.msk.f32.mxu0 %vm32733_vm2, %v974_v37  ;;  %v27377_v16 = vld [vmem:[#allocation2 + $0xa9] sm:$0xff]  ;;  %v2978_v17 = vsel %vm27357_vm4, %v27361_v11, 0.0  ;;  %v27384_v18 = vld [vmem:[#allocation2 + $0xb1] sm:$0xff]  ;;  %33313 = vst [vmem:[#allocation8_spill] sm:$0xff] %v33312_v20  ;;  %v27392_v21 = vld [vmem:[#allocation2 + $0x3a] sm:$0xff]  ;;  %v33322_v36 = vsel %vm27436_vm7, 4294967295, %v33321_v36 }
  0x33   : > { %33309 = vst [vmem:[#allocation6_spill] sm:$0xff] %v27377_v16  ;;  %33310 = vst [vmem:[#allocation7_spill] sm:$0xff] %v27384_v18  ;;  %v27386_v19 = vld [vmem:[#allocation2 + $0x32] sm:$0xff]  ;;  %v2980_v25 = vsel %vm27388_vm5, %v27392_v21, 0.0  ;;  %v27409_v26 = vld [vmem:[#allocation2 + $0xc1] sm:$0xff]  ;;  %vm27491_vm10 = vcmp.ge.s32.totalorder %v393_v48, 1 }
  0x34   : > { %v27404_v24 = vld [vmem:[#allocation2 + $0xb9] sm:$0xff]  ;;  %33315 = vst [vmem:[#allocation10_spill] sm:$0xff] %v27409_v26  ;;  %v27411_v27 = vld [vmem:[#allocation2 + $0x42] sm:$0xff]  ;;  %33318 = vst [vmem:[#allocation11_spill] sm:$0xff] %v33317_v28  ;;  %v33335_v59 = vsel %vm27491_vm10, 4294967295, %v33334_v59  ;;  %v33341_v23 = vmov 0 }
  0x35   : > { %23323 = vmatmul.mubr.msk.f32.gmra.mrb[8].mxu1 %vm32733_vm2, %v975_v41  ;;  %23520 = vmatmul.mubr.msk.f32.gmra.mrb[6].mxu0 %vm32733_vm2, %v975_v41  ;;  %33314 = vst [vmem:[#allocation9_spill] sm:$0xff] %v27404_v24  ;;  %v27417_v29 = vld [vmem:[#allocation2 + $0x4a] sm:$0xff]  ;;  %v27434_v35 = vld [vmem:[#allocation2 + $0x52] sm:$0xff]  ;;  %33323 = vst [vmem:[#allocation14_spill] sm:$0xff] %v33322_v36  ;;  %v363_v31 = vadd.s32 48, %v27322_v53  ;;  %v33346_v46 = vmov 0 }
  0x36   : > { %23325 = vmatprep.mubr.msk.f32.mxu1 %vm32733_vm2, %v976_v43  ;;  %23522 = vmatprep.mubr.msk.f32.mxu0 %vm32733_vm2, %v976_v43  ;;  %v27427_v32 = vld [vmem:[#allocation2 + $0xc9] sm:$0xff]  ;;  %v27432_v34 = vld [vmem:[#allocation2 + $0xd1] sm:$0xff]  ;;  %v27440_v37 = vld [vmem:[#allocation2 + $0x5a] sm:$0xff]  ;;  %33328 = vst [vmem:[#allocation17_spill] sm:$0xff] %v33327_v44  ;;  %v526_v48 = vand.u32 15, %v376_v22  ;;  %v33356_v22 = vmov 0 }
  0x37   : > { %33319 = vst [vmem:[#allocation12_spill] sm:$0xff] %v27427_v32  ;;  %33320 = vst [vmem:[#allocation13_spill] sm:$0xff] %v27432_v34  ;;  %v27450_v40 = vld [vmem:[#allocation2 + $0xd9] sm:$0xff]  ;;  %v2984_v41 = vsel %vm27436_vm7, %v27440_v37, 0.0  ;;  %v27455_v42 = vld [vmem:[#allocation2 + $0xe1] sm:$0xff] }
  0x38   : > { %33324 = vst [vmem:[#allocation15_spill] sm:$0xff] %v27450_v40  ;;  %33325 = vst [vmem:[#allocation16_spill] sm:$0xff] %v27455_v42  ;;  %v27457_v43 = vld [vmem:[#allocation2 + $0x62] sm:$0xff]  ;;  %v27463_v45 = vld [vmem:[#allocation2 + $0x6a] sm:$0xff]  ;;  %vm27576_vm15 = vcmp.le.s32.totalorder %v526_v48, 14 }
  0x39   : > { %23326 = vmatmul.mubr.msk.f32.gmra.mrb[10].mxu1 %vm32733_vm2, %v977_v51  ;;  %23523 = vmatmul.mubr.msk.f32.gmra.mrb[8].mxu0 %vm32733_vm2, %v977_v51  ;;  %v27475_v50 = vld [vmem:[#allocation2 + $0xe9] sm:$0xff]  ;;  %v2986_v51 = vsel %vm27459_vm8, %v27463_v45, 0.0  ;;  %v27488_v56 = vld [vmem:[#allocation2 + $0x7a] sm:$0xff]  ;;  %33336 = vst [vmem:[#allocation21_spill] sm:$0xff] %v33335_v59  ;;  %v33357_v22 = vsel %vm27576_vm15, 4294967295, %v33356_v22  ;;  %v33438_v59 = vmov 0 }
  0x3a   : > { %23328 = vmatprep.mubr.msk.f32.mxu1 %vm32733_vm2, %v978_v52  ;;  %23525 = vmatprep.mubr.msk.f32.mxu0 %vm32733_vm2, %v978_v52  ;;  %33329 = vst [vmem:[#allocation18_spill] sm:$0xff] %v27475_v50  ;;  %v27480_v52 = vld [vmem:[#allocation2 + $0xf1] sm:$0xff]  ;;  %v27503_v4 = vld [vmem:[#allocation2 + $0xf9] sm:$0xff]  ;;  %v2988_v5 = vsel %vm27484_vm9, %v27488_v56, 0.0  ;;  %33358 = vst [vmem:[#allocation33_spill] sm:$0xff] %v33357_v22 }
  0x3b   : > { %33330 = vst [vmem:[#allocation19_spill] sm:$0xff] %v27480_v52  ;;  %33337 = vst [vmem:[#allocation22_spill] sm:$0xff] %v27503_v4  ;;  %v27516_v13 = vld [vmem:[#allocation2 + $0x8a] sm:$0xff]  ;;  %v27738_v22 = vld [vmem:[#allocation2 + $0x80] sm:$0xff] }
  0x3c   : > { %v27598_v48 = vld [vmem:[#allocation2 + $0x28] sm:$0xff] }
  0x3d   : > { %23329 = vmatmul.mubr.msk.f32.gmra.mrb[12].mxu1 %vm32733_vm2, %v979_v54  ;;  %23526 = vmatmul.mubr.msk.f32.gmra.mrb[10].mxu0 %vm32733_vm2, %v979_v54  ;;  %v27482_v54 = vld [vmem:[#allocation2 + $0x72] sm:$0xff]  ;;  %33363 = vst [vmem:[#allocation36_spill] sm:$0xff] %v27598_v48 }
  0x3e   : > { %23331 = vmatprep.mubr.msk.f32.mxu1 %vm32733_vm2, %v980_v55  ;;  %23528 = vmatprep.mubr.msk.f32.mxu0 %vm32733_vm2, %v980_v55  ;;  %v33331_v55 = vmov 0 }
  0x3f   : > { %v33332_v55 = vsel %vm27484_vm9, 4294967295, %v33331_v55 }
  0x40   : > { %33333 = vst [vmem:[#allocation20_spill] sm:$0xff] %v33332_v55 }
  0x41   : > { %23332 = vmatmul.mubr.msk.f32.gmra.mrb[14].mxu1 %vm32733_vm2, %v981_v57  ;;  %23529 = vmatmul.mubr.msk.f32.gmra.mrb[12].mxu0 %vm32733_vm2, %v981_v57  ;;  %v498_v57 = vand.u32 15, %v372_v47  ;;  %v27544_v47 = vld [vmem:[#allocation2 + $0x9a] sm:$0xff] }
  0x42   : > { %23334 = vmatprep.mubr.msk.f32.mxu1 %vm32733_vm2, %v982_v58  ;;  %23531 = vmatprep.mubr.msk.f32.mxu0 %vm32733_vm2, %v982_v58  ;;  %v374_v58 = vadd.s32 136, %v27322_v53  ;;  %33349 = vst [vmem:[#allocation28_spill] sm:$0xff] %v27544_v47 }
  0x43   : > { %vm27512_vm11 = vcmp.le.s32.totalorder %v498_v57, 14  ;;  %v27551_v57 = vld [vmem:[#allocation2 + $0x20] sm:$0xff] }
  0x44   : > { %v33339_v12 = vsel %vm27512_vm11, 4294967295, %v33338_v12  ;;  %v2990_v38 = vsel %vm27512_vm11, %v27516_v13, 0.0  ;;  %33353 = vst [vmem:[#allocation30_spill] sm:$0xff] %v27551_v57 }
  0x45   : > { %23335 = vmatmul.mubr.msk.f32.gmra.mrb[16].mxu1 %vm32733_vm2, %v983_v61  ;;  %23532 = vmatmul.mubr.msk.f32.gmra.mrb[14].mxu0 %vm32733_vm2, %v983_v61  ;;  %v407_v61 = vand.u32 15, %v359_v49  ;;  %33340 = vst [vmem:[#allocation23_spill] sm:$0xff] %v33339_v12  ;;  %v378_v49 = vadd.s32 168, %v27322_v53 }
  0x46   : > { %23337 = vmatprep.mubr.msk.f32.mxu1 %vm32733_vm2, %v984_v62  ;;  %23560 = vmatprep.mubr.msk.f32.mxu0 %vm32733_vm2, %v27338_v63  ;;  %v361_v62 = vadd.s32 32, %v27322_v53 }
  0x47   : > { %vm27519_vm12 = vcmp.ge.s32.totalorder %v407_v61, 1  ;;  %v27559_v61 = vld [vmem:[%s32722_s1 + $0xc] sm:$0xf] }
  0x48   : > { %v33342_v23 = vsel %vm27519_vm12, 4294967295, %v33341_v23  ;;  %v421_v30 = vand.u32 15, %v361_v62  ;;  %v27564_v62 = vld [vmem:[#allocation2 + $0x18] sm:$0xff] }
  0x49   : > { %23338 = vmatmul.mubr.msk.f32.gmra.mrb[18].mxu1 %vm32733_vm2, %v985_v6  ;;  %23561 = vmatmul.mubr.msk.f32.vlgmr.msra.gmra.mrb[0].mxu0 %vm32733_vm2, %v2976_v7  ;;  %v933_v6 = vsel %vm27491_vm10, %v837_v60, 0.0  ;;  %v27510_v7 = vld [vmem:[#allocation2 + $0x82] sm:$0xff]  ;;  %33343 = vst [vmem:[#allocation24_spill] sm:$0xff] %v33342_v23  ;;  %v365_v60 = vadd.s32 64, %v27322_v53  ;;  %33354 = vst [vmem:[#allocation31_spill] sm:$0xff] %v27564_v62  ;;  %v27863_v23 = vld [vmem:[#allocation2 + $0xd0] sm:$0xff] }
  0x4a   : > { %23609 = vmatpush3.msk.msra.mxu0 %vm32730_vm0, %v27280_v33  ;;  %23340 = vmatprep.mubr.msk.f32.mxu1 %vm32733_vm2, %v27355_v9  ;;  %v2982_v33 = vsel %vm27413_vm6, %v27417_v29, 0.0  ;;  %vm27547_vm14 = vcmp.ge.s32.totalorder %v421_v30, 1  ;;  %v27580_v30 = vld [vmem:[#allocation2 + $0xaa] sm:$0xff]  ;;  %v371_v9 = vadd.s32 112, %v27322_v53 }
  0x4b   : > { %23563 = vmatprep.mubr.msk.f32.mxu0 %vm32733_vm2, %v27364_v14  ;;  %23658 = vmatprep.subr.msk.mxu0 %vm32730_vm0, %v27369_v15  ;;  %33359 = vst [vmem:[#allocation34_spill] sm:$0xff] %v27580_v30  ;;  %v449_v1 = vand.u32 15, %v365_v60  ;;  %v27606_v60 = vld [vmem:[#allocation2 + $0xb2] sm:$0xff] }
  0x4c   : > { %33364 = vst [vmem:[#allocation37_spill] sm:$0xff] %v27606_v60 }
  0x4d   : > { %23341 = vmatmul.mubr.msk.f32.gmra.mrb[20].mxu1 %vm32733_vm2, %v27377_v16  ;;  %23564 = vmatmul.mubr.msk.f32.gmra.mrb[2].mxu0 %vm32733_vm2, %v2978_v17  ;;  %v512_v17 = vand.u32 15, %v374_v58  ;;  %v435_v58 = vand.u32 15, %v363_v31  ;;  %v540_v31 = vand.u32 15, %v378_v49  ;;  %v2994_v49 = vsel %vm27576_vm15, %v27580_v30, 0.0 }
  0x4e   : > { %23343 = vmatprep.mubr.msk.f32.mxu1 %vm32733_vm2, %v27384_v18  ;;  %23566 = vmatprep.mubr.msk.f32.mxu0 %vm32733_vm2, %v27386_v19  ;;  %vm33372_vm15 = vcmask 31744   ;;  %v27649_v18 = vld [vmem:[#allocation2 + $0x50] sm:$0xff]  ;;  %v375_v30 = vadd.s32 144, %v27322_v53 }
  0x4f   : > { %vm27540_vm13 = vcmp.le.s32.totalorder %v512_v17, 14  ;;  %v27574_v17 = vld [vmem:[#allocation2 + $0xa2] sm:$0xff]  ;;  %vm27583_vm1 = vcmp.ge.s32.totalorder %v435_v58, 1  ;;  %33384 = vst [vmem:[#allocation45_spill] sm:$0xff] %v27649_v18 }
  0x50   : > { %v33347_v46 = vsel %vm27540_vm13, 4294967295, %v33346_v46  ;;  %33355 = vst [vmem:[#allocation32_spill] sm:$0xff] %v27574_v17 }
  0x51   : > { %23344 = vmatmul.mubr.msk.f32.gmra.mrb[22].mxu1 %vm32733_vm2, %v27404_v24  ;;  %23567 = vmatmul.mubr.msk.f32.gmra.mrb[4].mxu0 %vm32733_vm2, %v2980_v25  ;;  %v27523_v25 = vld [vmem:[#allocation2 + $0x10] sm:$0xff]  ;;  %33348 = vst [vmem:[#allocation27_spill] sm:$0xff] %v33347_v46  ;;  %v33382_v24 = vmov 0  ;;  %v381_v46 = vadd.s32 192, %v27322_v53 }
  0x52   : > { %23346 = vmatprep.mubr.msk.f32.mxu1 %vm32733_vm2, %v27409_v26  ;;  %23569 = vmatprep.mubr.msk.f32.mxu0 %vm32733_vm2, %v27411_v27  ;;  %33344 = vst [vmem:[#allocation25_spill] sm:$0xff] %v27523_v25  ;;  %v935_v39 = vsel %vm27519_vm12, %v27523_v25, 0.0  ;;  %v384_v26 = vadd.s32 216, %v27322_v53  ;;  %v386_v25 = vadd.s32 232, %v27322_v53 }
  0x55   : > { %23347 = vmatmul.mubr.msk.f32.gmra.mrb[24].mxu1 %vm32733_vm2, %v27427_v32  ;;  %23570 = vmatmul.mubr.msk.f32.gmra.mrb[6].mxu0 %vm32733_vm2, %v2982_v33  ;;  %v838_v33 = vld [vmem:[#allocation2 + $0x8] sm:$0xff]  ;;  %v33378_v32 = vmov 0 }
  0x56   : > { %23349 = vmatprep.mubr.msk.f32.mxu1 %vm32733_vm2, %v27432_v34  ;;  %23572 = vmatprep.mubr.msk.f32.mxu0 %vm32733_vm2, %v27434_v35  ;;  %v369_v34 = vadd.s32 96, %v27322_v53 }
  0x58   : > { %v477_v16 = vand.u32 15, %v369_v34 }
  0x59   : > { %23350 = vmatmul.mubr.msk.f32.gmra.mrb[26].mxu1 %vm32733_vm2, %v27450_v40  ;;  %23573 = vmatmul.mubr.msk.f32.gmra.mrb[8].mxu0 %vm32733_vm2, %v2984_v41  ;;  %v27538_v41 = vld [vmem:[#allocation2 + $0x92] sm:$0xff] }
  0x5a   : > { %23352 = vmatprep.mubr.msk.f32.mxu1 %vm32733_vm2, %v27455_v42  ;;  %23575 = vmatprep.mubr.msk.f32.mxu0 %vm32733_vm2, %v27457_v43  ;;  %33345 = vst [vmem:[#allocation26_spill] sm:$0xff] %v27538_v41  ;;  %v27619_v42 = vld [vmem:[#allocation2 + $0x40] sm:$0xff] }
  0x5b   : > { %33371 = vst [vmem:[#allocation40_spill] sm:$0xff] %v27619_v42 }
  0x5d   : > { %23353 = vmatmul.mubr.msk.f32.gmra.mrb[28].mxu1 %vm32733_vm2, %v27475_v50  ;;  %23576 = vmatmul.mubr.msk.f32.gmra.mrb[10].mxu0 %vm32733_vm2, %v2986_v51  ;;  %v33350_v51 = vmov 0  ;;  %v33369_v50 = vmov 0 }
  0x5e   : > { %23355 = vmatprep.mubr.msk.f32.mxu1 %vm32733_vm2, %v27480_v52  ;;  %23578 = vmatprep.mubr.msk.f32.mxu0 %vm32733_vm2, %v27482_v54  ;;  %v33351_v51 = vsel %vm27547_vm14, 4294967295, %v33350_v51  ;;  %v382_v52 = vadd.s32 200, %v27322_v53 }
  0x5f   : > { %33352 = vst [vmem:[#allocation29_spill] sm:$0xff] %v33351_v51  ;;  %v33452_v51 = vmov 0 }
  0x61   : > { %23356 = vmatmul.mubr.msk.f32.gmra.mrb[30].mxu1 %vm32733_vm2, %v27503_v4  ;;  %23579 = vmatmul.mubr.msk.f32.gmra.mrb[12].mxu0 %vm32733_vm2, %v2988_v5  ;;  %v2992_v5 = vsel %vm27540_vm13, %v27544_v47, 0.0  ;;  %v33365_v4 = vmov 0  ;;  %vm33373_vm13 = vmmov %vm33372_vm15  ;;  %v27756_v47 = vld [vmem:[#allocation2 + $0x102] sm:$0xff] }
  0x62   : > { %23360 = vmatprep.mubr.msk.f32.mxu1 %vm32733_vm2, %v933_v6  ;;  %23581 = vmatprep.mubr.msk.f32.mxu0 %vm32733_vm2, %v27510_v7  ;;  %v937_v6 = vsel %vm27547_vm14, %v27551_v57, 0.0  ;;  %vm33374_vm11 = vmmov %vm33373_vm13  ;;  %33423 = vst [vmem:[#allocation59_spill] sm:$0xff] %v27756_v47 }
  0x63   : > { %vm33375_vm9 = vmmov %vm33374_vm11 }
  0x65   : > { %23361 = vmatmul.mubr.msk.f32.vlgmr.msra.gmra.mrb[0].mxu1 %vm32733_vm2, %v838_v33  ;;  %23582 = vmatmul.mubr.msk.f32.gmra.mrb[14].mxu0 %vm32733_vm2, %v2990_v38  ;;  %v380_v33 = vadd.s32 184, %v27322_v53  ;;  %v33360_v38 = vmov 0 }
  0x66   : > { %23363 = vmatprep.mubr.msk.f32.mxu1 %vm32733_vm2, %v935_v39  ;;  %23584 = vmatprep.mubr.msk.f32.mxu0 %vm32733_vm2, %v27538_v41  ;;  %v33361_v38 = vsel %vm27583_vm1, 4294967295, %v33360_v38  ;;  %v27587_v39 = vld [vmem:[#allocation2 + $0x30] sm:$0xff]  ;;  %v3396_v41 = vsel %vm27491_vm10, %v27551_v57, 0.0  ;;  %v383_v57 = vadd.s32 208, %v27322_v53 }
  0x67   : > { %23409 = vmatpush3.msk.msra.mxu1 %vm32730_vm0, %v27227_v8  ;;  %33362 = vst [vmem:[#allocation35_spill] sm:$0xff] %v27587_v39  ;;  %v367_v8 = vadd.s32 80, %v27322_v53  ;;  %v939_v58 = vsel %vm27583_vm1, %v27587_v39, 0.0 }
  0x68   : > { %23458 = vmatprep.subr.msk.mxu1 %vm32730_vm0, %v27559_v61  ;;  %vm27608_vm0 = vcmp.le.s32.totalorder %v540_v31, 14  ;;  %v27628_v31 = vld [vmem:[#allocation2 + $0x38] sm:$0xff] }
  0x69   : > { %23364 = vmatmul.mubr.msk.f32.gmra.mrb[2].mxu1 %vm32733_vm2, %v27564_v62  ;;  %23585 = vmatmul.mubr.msk.f32.gmra.mrb[16].mxu0 %vm32733_vm2, %v2992_v5  ;;  %v33366_v4 = vsel %vm27608_vm0, 4294967295, %v33365_v4  ;;  %v27612_v5 = vld [vmem:[#allocation2 + $0xba] sm:$0xff]  ;;  %v463_v40 = vand.u32 15, %v367_v8  ;;  %33376 = vst [vmem:[#allocation41_spill] sm:$0xff] %v27628_v31  ;;  %v27636_v8 = vld [vmem:[#allocation2 + $0xc2] sm:$0xff]  ;;  %v33390_v62 = vmov 0 }
  0x6a   : > { %23366 = vmatprep.mubr.msk.f32.mxu1 %vm32733_vm2, %v937_v6  ;;  %23587 = vmatprep.mubr.msk.f32.mxu0 %vm32733_vm2, %v27574_v17  ;;  %33367 = vst [vmem:[#allocation38_spill] sm:$0xff] %v33366_v4  ;;  %33368 = vst [vmem:[#allocation39_spill] sm:$0xff] %v27612_v5  ;;  %v554_v6 = vand.u32 15, %v380_v33  ;;  %vm27615_vm2 = vcmp.ge.s32.totalorder %v449_v1, 1  ;;  %v2996_v1 = vsel %vm27608_vm0, %v27612_v5, 0.0  ;;  %v373_v5 = vadd.s32 128, %v27322_v53 }
  0x6b   : > { %v33370_v50 = vsel %vm27615_vm2, 4294967295, %v33369_v50  ;;  %v941_v33 = vsel %vm27615_vm2, %v27619_v42, 0.0  ;;  %33377 = vst [vmem:[#allocation42_spill] sm:$0xff] %v27636_v8  ;;  %vm33386_vm0 = vmmov %vm33374_vm11  ;;  %v33405_v4 = vmov 0  ;;  %v33413_v17 = vmov 0 }
  0x6c   : > { %vm33387_vm8 = vmmov %vm33386_vm0 }
  0x6d   : > { %23367 = vmatmul.mubr.msk.f32.gmra.mrb[4].mxu1 %vm33372_vm15, %v27598_v48  ;;  %23588 = vmatmul.mubr.msk.f32.gmra.mrb[18].mxu0 %vm33373_vm13, %v2994_v49  ;;  %vm27638_vm15 = vcmp.le.s32.totalorder %v554_v6, 14  ;;  %v27642_v49 = vld [vmem:[#allocation2 + $0xca] sm:$0xff]  ;;  %vm33385_vm13 = vmmov %vm33374_vm11  ;;  %v27666_v6 = vld [vmem:[#allocation2 + $0xd2] sm:$0xff] }
  0x6e   : > { %23369 = vmatprep.mubr.msk.f32.mxu1 %vm33374_vm11, %v939_v58  ;;  %23590 = vmatprep.mubr.msk.f32.mxu0 %vm33375_vm9, %v27606_v60  ;;  %v33379_v32 = vsel %vm27638_vm15, 4294967295, %v33378_v32  ;;  %33381 = vst [vmem:[#allocation44_spill] sm:$0xff] %v27642_v49  ;;  %v568_v58 = vand.u32 15, %v382_v52  ;;  %vm27645_vm9 = vcmp.ge.s32.totalorder %v463_v40, 1  ;;  %v27658_v52 = vld [vmem:[#allocation2 + $0x48] sm:$0xff]  ;;  %v2998_v40 = vsel %vm27638_vm15, %v27642_v49, 0.0  ;;  %vm33398_vm15 = vmmov %vm33387_vm8 }
  0x6f   : > { %33380 = vst [vmem:[#allocation43_spill] sm:$0xff] %v33379_v32  ;;  %v33383_v24 = vsel %vm27645_vm9, 4294967295, %v33382_v24  ;;  %33388 = vst [vmem:[#allocation46_spill] sm:$0xff] %v27658_v52  ;;  %v943_v34 = vsel %vm27645_vm9, %v27649_v18, 0.0  ;;  %v27679_v49 = vld [vmem:[#allocation2 + $0x60] sm:$0xff]  ;;  %v491_v32 = vand.u32 15, %v371_v9 }
  0x70   : > { %33389 = vst [vmem:[#allocation47_spill] sm:$0xff] %v27666_v6  ;;  %33396 = vst [vmem:[#allocation50_spill] sm:$0xff] %v27679_v49  ;;  %v33401_v60 = vmov 0 }
  0x71   : > { %23370 = vmatmul.mubr.msk.f32.gmra.mrb[6].mxu1 %vm33374_vm11, %v27628_v31  ;;  %23591 = vmatmul.mubr.msk.f32.gmra.mrb[20].mxu0 %vm33385_vm13, %v2996_v1  ;;  %vm27668_vm11 = vcmp.le.s32.totalorder %v568_v58, 14  ;;  %v27672_v1 = vld [vmem:[#allocation2 + $0xda] sm:$0xff]  ;;  %vm33397_vm13 = vmmov %vm33387_vm8  ;;  %v27696_v58 = vld [vmem:[#allocation2 + $0xe2] sm:$0xff] }
  0x72   : > { %23372 = vmatprep.mubr.msk.f32.mxu1 %vm33386_vm0, %v941_v33  ;;  %23593 = vmatprep.mubr.msk.f32.mxu0 %vm33387_vm8, %v27636_v8  ;;  %v33391_v62 = vsel %vm27668_vm11, 4294967295, %v33390_v62  ;;  %33393 = vst [vmem:[#allocation49_spill] sm:$0xff] %v27672_v1  ;;  %v582_v33 = vand.u32 15, %v384_v26  ;;  %vm27675_vm0 = vcmp.ge.s32.totalorder %v477_v16, 1  ;;  %v33394_v8 = vmov 0  ;;  %vm33399_vm7 = vmmov %vm33387_vm8  ;;  %v27688_v26 = vld [vmem:[#allocation2 + $0x58] sm:$0xff] }
  0x73   : > { %33392 = vst [vmem:[#allocation48_spill] sm:$0xff] %v33391_v62  ;;  %v33395_v8 = vsel %vm27675_vm0, 4294967295, %v33394_v8  ;;  %v3000_v16 = vsel %vm27668_vm11, %v27672_v1, 0.0  ;;  %v945_v9 = vsel %vm27675_vm0, %v27679_v49, 0.0  ;;  %33400 = vst [vmem:[#allocation51_spill] sm:$0xff] %v27696_v58  ;;  %v27709_v1 = vld [vmem:[#allocation2 + $0x70] sm:$0xff] }
  0x74   : > { %33407 = vst [vmem:[#allocation54_spill] sm:$0xff] %v27709_v1  ;;  %v505_v62 = vand.u32 15, %v373_v5  ;;  %vm33409_vm11 = vmmov %vm33397_vm13 }
  0x75   : > { %23373 = vmatmul.mubr.msk.f32.gmra.mrb[8].mxu1 %vm33387_vm8, %v27658_v52  ;;  %23594 = vmatmul.mubr.msk.f32.gmra.mrb[22].mxu0 %vm33397_vm13, %v2998_v40  ;;  %vm27698_vm8 = vcmp.le.s32.totalorder %v582_v33, 14  ;;  %v27702_v40 = vld [vmem:[#allocation2 + $0xea] sm:$0xff]  ;;  %vm33410_vm6 = vmmov %vm33409_vm11  ;;  %v27726_v33 = vld [vmem:[#allocation2 + $0xf2] sm:$0xff] }
  0x76   : > { %23375 = vmatprep.mubr.msk.f32.mxu1 %vm33398_vm15, %v943_v34  ;;  %23596 = vmatprep.mubr.msk.f32.mxu0 %vm33399_vm7, %v27666_v6  ;;  %v33402_v60 = vsel %vm27698_vm8, 4294967295, %v33401_v60  ;;  %33404 = vst [vmem:[#allocation53_spill] sm:$0xff] %v27702_v40  ;;  %v596_v34 = vand.u32 15, %v386_v25  ;;  %v388_v6 = vadd.s32 248, %v27322_v53  ;;  %vm27705_vm7 = vcmp.ge.s32.totalorder %v491_v32, 1  ;;  %vm33408_vm15 = vmmov %vm33397_vm13  ;;  %v27718_v25 = vld [vmem:[#allocation2 + $0x68] sm:$0xff] }
  0x77   : > { %33403 = vst [vmem:[#allocation52_spill] sm:$0xff] %v33402_v60  ;;  %v33406_v4 = vsel %vm27705_vm7, 4294967295, %v33405_v4  ;;  %33411 = vst [vmem:[#allocation55_spill] sm:$0xff] %v27718_v25  ;;  %v3002_v32 = vsel %vm27698_vm8, %v27702_v40, 0.0  ;;  %v947_v5 = vsel %vm27705_vm7, %v27709_v1, 0.0  ;;  %v519_v40 = vand.u32 15, %v375_v30 }
  0x78   : > { %33412 = vst [vmem:[#allocation56_spill] sm:$0xff] %v27726_v33  ;;  %v377_v60 = vadd.s32 160, %v27322_v53  ;;  %vm33419_vm8 = vmmov %vm33397_vm13 }
  0x79   : > { %23376 = vmatmul.mubr.msk.f32.gmra.mrb[10].mxu1 %vm33408_vm15, %v27688_v26  ;;  %23597 = vmatmul.mubr.msk.f32.gmra.mrb[24].mxu0 %vm33397_vm13, %v3000_v16  ;;  %vm27728_vm15 = vcmp.le.s32.totalorder %v596_v34, 14  ;;  %v27732_v16 = vld [vmem:[#allocation2 + $0xfa] sm:$0xff]  ;;  %v33420_v34 = vmov 0.0   ;;  %vm33421_vm5 = vmmov %vm33419_vm8 }
  0x7a   : > { %23378 = vmatprep.mubr.msk.f32.mxu1 %vm33409_vm11, %v945_v9  ;;  %23599 = vmatprep.mubr.msk.f32.mxu0 %vm33410_vm6, %v27696_v58  ;;  %v33414_v17 = vsel %vm27728_vm15, 4294967295, %v33413_v17  ;;  %33416 = vst [vmem:[#allocation58_spill] sm:$0xff] %v27732_v16  ;;  %v610_v9 = vand.u32 15, %v388_v6  ;;  %vm27734_vm6 = vcmp.ge.s32.totalorder %v505_v62, 1  ;;  %v33417_v58 = vmov 0  ;;  %vm33422_vm4 = vmmov %vm33421_vm5  ;;  %v27748_v62 = vld [vmem:[#allocation2 + $0x78] sm:$0xff] }
  0x7b   : > { %33415 = vst [vmem:[#allocation57_spill] sm:$0xff] %v33414_v17  ;;  %v33418_v58 = vsel %vm27734_vm6, 4294967295, %v33417_v58  ;;  %vm289_vm11 = vcmask 156672   ;;  %v3004_v30 = vsel %vm27728_vm15, %v27732_v16, 0.0  ;;  %v949_v6 = vsel %vm27734_vm6, %v27738_v22, 0.0  ;;  %vm33432_vm15 = vmmov %vm33422_vm4 }
  0x7c   : > { %290 = vst.msk [vmem:[#allocation2 + $0x120] sm:$0x3] %vm289_vm11, %v33420_v34  ;;  %v33428_v34 = vmov 0  ;;  %v533_v17 = vand.u32 15, %v377_v60  ;;  %v379_v16 = vadd.s32 176, %v27322_v53  ;;  %vm33430_vm11 = vmmov %vm33422_vm4 }
  0x7d   : > { %23379 = vmatmul.mubr.msk.f32.gmra.mrb[12].mxu1 %vm33397_vm13, %v27718_v25  ;;  %23600 = vmatmul.mubr.msk.f32.gmra.mrb[26].mxu0 %vm33419_vm8, %v3002_v32  ;;  %vm27758_vm8 = vcmp.le.s32.totalorder %v610_v9, 14  ;;  %v33424_v32 = vmov 0  ;;  %vm33431_vm13 = vmmov %vm33422_vm4  ;;  %v27777_v9 = vld [vmem:[#allocation2 + $0x88] sm:$0xff] }
  0x7e   : > { %23381 = vmatprep.mubr.msk.f32.mxu1 %vm33421_vm5, %v947_v5  ;;  %23602 = vmatprep.mubr.msk.f32.mxu0 %vm33422_vm4, %v27726_v33  ;;  %v33425_v32 = vsel %vm27758_vm8, 4294967295, %v33424_v32  ;;  %v27762_v5 = vld [vmem:[#allocation2 + $0x10a] sm:$0xff]  ;;  %vm27764_vm5 = vcmp.ge.s32.totalorder %v519_v40, 1 }
  0x7f   : > { %33426 = vst [vmem:[#allocation60_spill] sm:$0xff] %v33425_v32  ;;  %33427 = vst [vmem:[#allocation61_spill] sm:$0xff] %v27762_v5  ;;  %v33429_v34 = vsel %vm27764_vm5, 4294967295, %v33428_v34  ;;  %v27768_v33 = vld [vmem:[#allocation2 + $0x90] sm:$0xff]  ;;  %v3006_v40 = vsel %vm27758_vm8, %v27762_v5, 0.0  ;;  %v27800_v5 = vld [vmem:[#allocation2 + $0x98] sm:$0xff] }
  0x80   : > { %v951_v60 = vsel %vm27764_vm5, %v27768_v33, 0.0  ;;  %vm33437_vm8 = vmmov %vm33430_vm11 }
  0x81   : > { %23382 = vmatmul.mubr.msk.f32.gmra.mrb[14].mxu1 %vm33422_vm4, %v27748_v62  ;;  %23603 = vmatmul.mubr.msk.f32.gmra.mrb[28].mxu0 %vm33430_vm11, %v3004_v30  ;;  %vm27788_vm4 = vcmp.ge.s32.totalorder %v533_v17, 1  ;;  %v33433_v30 = vmov 0 }
  0x82   : > { %23384 = vmatprep.mubr.msk.f32.mxu1 %vm33431_vm13, %v949_v6  ;;  %23605 = vmatprep.mubr.msk.f32.mxu0 %vm33432_vm15, %v27756_v47  ;;  %v33434_v30 = vsel %vm27788_vm4, 4294967295, %v33433_v30  ;;  %v27792_v6 = vld [vmem:[#allocation2 + $0xa0] sm:$0xff]  ;;  %v547_v47 = vand.u32 15, %v379_v16  ;;  %vm33435_vm15 = vmmov %vm33430_vm11  ;;  %v3398_v16 = vsel %vm27519_vm12, %v27587_v39, 0.0  ;;  %v3400_v39 = vsel %vm27547_vm14, %v27619_v42, 0.0  ;;  %v27851_v42 = vld [vmem:[#allocation2 + $0xb8] sm:$0xff] }
  0x83   : > { %vm33436_vm13 = vmmov %vm33430_vm11  ;;  %v953_v17 = vsel %vm27788_vm4, %v27792_v6, 0.0 }
  0x84   : > { %vm27809_vm10 = vcmp.ge.s32.totalorder %v547_v47, 1  ;;  %v27827_v47 = vld [vmem:[#allocation2 + $0xa8] sm:$0xff]  ;;  %vm33444_vm12 = vmmov %vm33437_vm8 }
  0x85   : > { %23385 = vmatmul.mubr.msk.f32.gmra.mrb[16].mxu1 %vm33435_vm15, %v27777_v9  ;;  %23606 = vmatmul.mubr.msk.f32.gmra.mrb[30].mxu0 %vm33430_vm11, %v3006_v40  ;;  %v33439_v59 = vsel %vm27809_vm10, 4294967295, %v33438_v59  ;;  %v27813_v40 = vld [vmem:[#allocation2 + $0xb0] sm:$0xff]  ;;  %vm33441_vm15 = vmmov %vm33437_vm8  ;;  %vm33442_vm11 = vcmask 1043456  }
  0x86   : > { %23387 = vmatprep.mubr.msk.f32.mxu1 %vm33436_vm13, %v951_v60  ;;  %23610 = vmatprep.mubr.msk.f32.mxu0 %vm33437_vm8, %v3396_v41  ;;  %33440 = vst [vmem:[#allocation62_spill] sm:$0xff] %v33439_v59  ;;  %v561_v60 = vand.u32 15, %v381_v46  ;;  %v27818_v41 = vld [vmem:[%s32722_s1 + $0x20] sm:$0xf]  ;;  %vm33443_vm13 = vmmov %vm33437_vm8  ;;  %v955_v46 = vsel %vm27809_vm10, %v27813_v40, 0.0 }
  0x89   : > { %23388 = vmatmul.mubr.msk.f32.gmra.mrb[18].mxu1 %vm33437_vm8, %v27800_v5  ;;  %23611 = vmatmul.mubr.msk.f32.vlgmr.msra.gmra.mrb[0].mxu0 %vm33441_vm15, %v27598_v48  ;;  %vm33445_vm8 = vmmov %vm33442_vm11  ;;  %vm27838_vm15 = vcmp.ge.s32.totalorder %v561_v60, 1  ;;  %v33446_v48 = vmov 0 }
  0x8a   : > { %23659 = vmatpush3.msk.msra.mxu0 %vm33442_vm11, %v27369_v15  ;;  %23390 = vmatprep.mubr.msk.f32.mxu1 %vm33443_vm13, %v953_v17  ;;  %v33447_v48 = vsel %vm27838_vm15, 4294967295, %v33446_v48  ;;  %v27842_v15 = vld [vmem:[#allocation2 + $0xc0] sm:$0xff]  ;;  %v575_v17 = vand.u32 15, %v383_v57  ;;  %vm33449_vm11 = vmmov %vm33444_vm12  ;;  %v3402_v57 = vsel %vm27583_vm1, %v27649_v18, 0.0 }
  0x8b   : > { %23613 = vmatprep.mubr.msk.f32.mxu0 %vm33444_vm12, %v3398_v16  ;;  %23708 = vmatprep.subr.msk.mxu0 %vm33445_vm8, %v27818_v41  ;;  %33448 = vst [vmem:[#allocation63_spill] sm:$0xff] %v33447_v48  ;;  %v385_v16 = vadd.s32 224, %v27322_v53  ;;  %vm33450_vm13 = vmmov %vm33449_vm11  ;;  %v957_v60 = vsel %vm27838_vm15, %v27842_v15, 0.0  ;;  %v27884_v18 = vld [vmem:[#allocation2 + $0xe0] sm:$0xff] }
  0x8c   : > { %vm33451_vm14 = vmmov %vm33449_vm11  ;;  %vm27859_vm8 = vcmp.ge.s32.totalorder %v575_v17, 1 }
  0x8d   : > { %23391 = vmatmul.mubr.msk.f32.gmra.mrb[20].mxu1 %vm33444_vm12, %v27827_v47  ;;  %23614 = vmatmul.mubr.msk.f32.gmra.mrb[2].mxu0 %vm33449_vm11, %v27628_v31  ;;  %v33453_v51 = vsel %vm27859_vm8, 4294967295, %v33452_v51  ;;  %v589_v31 = vand.u32 15, %v385_v16  ;;  %vm33456_vm12 = vmmov %vm33449_vm11  ;;  %v959_v17 = vsel %vm27859_vm8, %v27863_v23, 0.0  ;;  %v33458_v16 = vmov 0 }
  0x8e   : > { %23393 = vmatprep.mubr.msk.f32.mxu1 %vm33450_vm13, %v955_v46  ;;  %23616 = vmatprep.mubr.msk.f32.mxu0 %vm33451_vm14, %v3400_v39  ;;  %33454 = vst [vmem:[#allocation64_spill] sm:$0xff] %v33453_v51  ;;  %v387_v46 = vadd.s32 240, %v27322_v53  ;;  %vm33455_vm14 = vmmov %vm33449_vm11  ;;  %v27872_v39 = vld [vmem:[#allocation2 + $0xc8] sm:$0xff]  ;;  %v3404_v53 = vsel %vm27615_vm2, %v27679_v49, 0.0  ;;  %v27904_v49 = vld [vmem:[#allocation2 + $0xf0] sm:$0xff] }
  0x8f   : > { %vm33457_vm13 = vmmov %vm33449_vm11  ;;  %vm27880_vm1 = vcmp.ge.s32.totalorder %v589_v31, 1 }
  0x90   : > { %v33459_v16 = vsel %vm27880_vm1, 4294967295, %v33458_v16  ;;  %v961_v31 = vsel %vm27880_vm1, %v27884_v18, 0.0 }
  0x91   : > { %23394 = vmatmul.mubr.msk.f32.gmra.mrb[22].mxu1 %vm33455_vm14, %v27851_v42  ;;  %23617 = vmatmul.mubr.msk.f32.gmra.mrb[4].mxu0 %vm33456_vm12, %v27658_v52  ;;  %33460 = vst [vmem:[#allocation65_spill] sm:$0xff] %v33459_v16  ;;  %v603_v52 = vand.u32 15, %v387_v46  ;;  %vm33461_vm14 = vmmov %vm33449_vm11  ;;  %v33464_v46 = vmov 0 }
  0x92   : > { %23396 = vmatprep.mubr.msk.f32.mxu1 %vm33449_vm11, %v957_v60  ;;  %23619 = vmatprep.mubr.msk.f32.mxu0 %vm33457_vm13, %v3402_v57  ;;  %vm33462_vm12 = vmmov %vm33449_vm11  ;;  %v27892_v60 = vld [vmem:[#allocation2 + $0xd8] sm:$0xff]  ;;  %v3406_v57 = vsel %vm27645_vm9, %v27709_v1, 0.0  ;;  %v1649_v1 = vld [vmem:[#allocation2 + $0xa] sm:$0xff] }
  0x93   : > { %vm33463_vm13 = vmmov %vm33449_vm11  ;;  %vm27900_vm2 = vcmp.ge.s32.totalorder %v603_v52, 1 }
  0x94   : > { %v33465_v46 = vsel %vm27900_vm2, 4294967295, %v33464_v46  ;;  %v963_v52 = vsel %vm27900_vm2, %v27904_v49, 0.0  ;;  %vm33470_vm9 = vmmov %vm33449_vm11 }
  0x95   : > { %23397 = vmatmul.mubr.msk.f32.gmra.mrb[24].mxu1 %vm33461_vm14, %v27872_v39  ;;  %23620 = vmatmul.mubr.msk.f32.gmra.mrb[6].mxu0 %vm33462_vm12, %v27688_v26  ;;  %33466 = vst [vmem:[#allocation66_spill] sm:$0xff] %v33465_v46  ;;  %vm33467_vm14 = vmmov %vm33449_vm11 }
  0x96   : > { %23399 = vmatprep.mubr.msk.f32.mxu1 %vm33449_vm11, %v959_v17  ;;  %23622 = vmatprep.mubr.msk.f32.mxu0 %vm33463_vm13, %v3404_v53  ;;  %vm33468_vm12 = vmmov %vm33449_vm11  ;;  %v27912_v17 = vld [vmem:[#allocation2 + $0xe8] sm:$0xff]  ;;  %v3408_v53 = vsel %vm27675_vm0, %v27738_v22, 0.0 }
  0x97   : > { %vm33469_vm13 = vmmov %vm33449_vm11 }
  0x98   : > { %vm33475_vm0 = vmmov %vm33470_vm9 }
  0x99   : > { %23400 = vmatmul.mubr.msk.f32.gmra.mrb[26].mxu1 %vm33467_vm14, %v27892_v60  ;;  %23623 = vmatmul.mubr.msk.f32.gmra.mrb[8].mxu0 %vm33468_vm12, %v27718_v25  ;;  %vm33471_vm14 = vmmov %vm33470_vm9  ;;  %v3410_v25 = vsel %vm27705_vm7, %v27768_v33, 0.0 }
  0x9a   : > { %23402 = vmatprep.mubr.msk.f32.mxu1 %vm33449_vm11, %v961_v31  ;;  %23625 = vmatprep.mubr.msk.f32.mxu0 %vm33469_vm13, %v3406_v57  ;;  %vm33472_vm12 = vmmov %vm33470_vm9  ;;  %v27926_v31 = vld [vmem:[#allocation2 + $0xf8] sm:$0xff]  ;;  %v1648_v57 = vld [vmem:[#allocation2 + $0x2] sm:$0xff] }
  0x9b   : > { %vm33473_vm11 = vmmov %vm33470_vm9 }
  0x9c   : > { %vm33474_vm13 = vmmov %vm33470_vm9 }
  0x9d   : > { %23403 = vmatmul.mubr.msk.f32.gmra.mrb[28].mxu1 %vm33470_vm9, %v27912_v17  ;;  %23626 = vmatmul.mubr.msk.f32.gmra.mrb[10].mxu0 %vm33471_vm14, %v27748_v62  ;;  %vm33476_vm14 = vmmov %vm33475_vm0 }
  0x9e   : > { %23405 = vmatprep.mubr.msk.f32.mxu1 %vm33472_vm12, %v963_v52  ;;  %23628 = vmatprep.mubr.msk.f32.mxu0 %vm33473_vm11, %v3408_v53  ;;  %v1745_v52 = vsel %vm27340_vm3, %v1649_v1, 0.0  ;;  %v3412_v53 = vsel %vm27734_vm6, %v27792_v6, 0.0  ;;  %vm33477_vm12 = vmmov %vm33475_vm0  ;;  %v3414_v1 = vsel %vm27764_vm5, %v27813_v40, 0.0 }
  0x9f   : > { %vm33478_vm11 = vmmov %vm33475_vm0 }
  0xa1   : > { %23406 = vmatmul.mubr.msk.f32.gmra.mrb[30].mxu1 %vm33474_vm13, %v27926_v31  ;;  %23629 = vmatmul.mubr.msk.f32.gmra.mrb[12].mxu0 %vm33470_vm9, %v27777_v9  ;;  %vm33479_vm13 = vmmov %vm33475_vm0 }
  0xa2   : > { %23410 = vmatprep.mubr.msk.f32.mxu1 %vm33475_vm0, %v1648_v57  ;;  %23631 = vmatprep.mubr.msk.f32.mxu0 %vm33476_vm14, %v3410_v25  ;;  %vm33480_vm9 = vmmov %vm33475_vm0  ;;  %vm33481_vm0 = vnez %v33307_v10  ;;  %vm33482_vm14 = vcmask 1043456  }
  0xa3   : > { %v1747_v25 = vsel %vm33481_vm0, %v27344_v3, 0.0  ;;  %vm33486_vm3 = vmmov %vm33480_vm9  ;;  %v3416_v3 = vsel %vm27788_vm4, %v27842_v15, 0.0 }
  0xa4   : > { %vm33488_vm0 = vmmov %vm33486_vm3 }
  0xa5   : > { %23411 = vmatmul.mubr.msk.f32.vlgmr.msra.gmra.mrb[0].mxu1 %vm33477_vm12, %v1745_v52  ;;  %23632 = vmatmul.mubr.msk.f32.gmra.mrb[14].mxu0 %vm33478_vm11, %v27800_v5  ;;  %vm33483_vm12 = vmmov %vm33482_vm14 }
  0xa6   : > { %23413 = vmatprep.mubr.msk.f32.mxu1 %vm33479_vm13, %v27338_v63  ;;  %23634 = vmatprep.mubr.msk.f32.mxu0 %vm33480_vm9, %v3412_v53  ;;  %vm33484_vm11 = vmmov %vm33480_vm9  ;;  %v3785_v53 = vld [vmem:[#allocation2 + $0x21] sm:$0xff] }
  0xa7   : > { %23459 = vmatpush3.msk.msra.mxu1 %vm33482_vm14, %v27559_v61  ;;  %vm33485_vm13 = vmmov %vm33480_vm9  ;;  %vm33487_vm14 = vnez %v33312_v20  ;;  %v3394_v61 = vld [vmem:[#allocation2 + $0x110] sm:$0xff] }
  0xa8   : > { %25756 = vmatprep.subr.msk.mxu1 %vm33483_vm12, %v27189_v2  ;;  %v1749_v63 = vsel %vm33487_vm14, %v27361_v11, 0.0  ;;  %vm33489_vm12 = vmmov %vm33488_vm0  ;;  %v3418_v11 = vsel %vm27809_vm10, %v27863_v23, 0.0  ;;  %v3426_v57 = vsel %vm27900_vm2, %v3394_v61, 0.0 }
  0xa9   : > { %23414 = vmatmul.mubr.msk.f32.gmra.mrb[2].mxu1 %vm33484_vm11, %v1747_v25  ;;  %23635 = vmatmul.mubr.msk.f32.gmra.mrb[16].mxu0 %vm33485_vm13, %v27827_v47  ;;  %vm33490_vm11 = vmmov %vm33488_vm0  ;;  %v33518_v25 = vld [vmem:[#allocation26_spill] sm:$0xff] }
  0xaa   : > { %23416 = vmatprep.mubr.msk.f32.mxu1 %vm33480_vm9, %v27364_v14  ;;  %23637 = vmatprep.mubr.msk.f32.mxu0 %vm33486_vm3, %v3414_v1  ;;  %vm33491_vm13 = vmmov %vm33488_vm0  ;;  %vm33492_vm3 = vnez %v33317_v28  ;;  %v33521_v1 = vld [vmem:[#allocation28_spill] sm:$0xff] }
  0xab   : > { %v1751_v2 = vsel %vm33492_vm3, %v27392_v21, 0.0  ;;  %vm33493_vm9 = vmmov %vm33488_vm0 }
  0xac   : > { %vm33495_vm14 = vmmov %vm33488_vm0 }
  0xad   : > { %23417 = vmatmul.mubr.msk.f32.gmra.mrb[4].mxu1 %vm33488_vm0, %v1749_v63  ;;  %23638 = vmatmul.mubr.msk.f32.gmra.mrb[18].mxu0 %vm33489_vm12, %v27851_v42  ;;  %vm33494_vm12 = vmmov %vm33488_vm0  ;;  %v33522_v63 = vld [vmem:[#allocation33_spill] sm:$0xff] }
  0xae   : > { %23419 = vmatprep.mubr.msk.f32.mxu1 %vm33490_vm11, %v27386_v19  ;;  %23640 = vmatprep.mubr.msk.f32.mxu0 %vm33491_vm13, %v3416_v3  ;;  %vm33496_vm11 = vnez %v33322_v36  ;;  %v3420_v19 = vsel %vm27838_vm15, %v27884_v18, 0.0  ;;  %vm33497_vm13 = vmmov %vm33488_vm0  ;;  %v3786_v3 = vld [vmem:[#allocation2 + $0x29] sm:$0xff] }
  0xaf   : > { %v1753_v14 = vsel %vm33496_vm11, %v27417_v29, 0.0  ;;  %vm33499_vm3 = vmmov %vm33488_vm0  ;;  %v28006_v29 = vld [vmem:[#allocation2 + $0x100] sm:$0xff] }
  0xb1   : > { %23420 = vmatmul.mubr.msk.f32.gmra.mrb[6].mxu1 %vm33493_vm9, %v1751_v2  ;;  %23641 = vmatmul.mubr.msk.f32.gmra.mrb[20].mxu0 %vm33488_vm0, %v27872_v39  ;;  %vm33498_vm9 = vmmov %vm33488_vm0  ;;  %v3787_v2 = vld [vmem:[#allocation2 + $0x31] sm:$0xff] }
  0xb2   : > { %23422 = vmatprep.mubr.msk.f32.mxu1 %vm33494_vm12, %v27411_v27  ;;  %23643 = vmatprep.mubr.msk.f32.mxu0 %vm33495_vm14, %v3418_v11  ;;  %vm33500_vm14 = vnez %v33327_v44  ;;  %v3422_v27 = vsel %vm27859_vm8, %v27904_v49, 0.0  ;;  %vm33501_vm12 = vmmov %vm33488_vm0  ;;  %v33529_v11 = vld [vmem:[#allocation34_spill] sm:$0xff] }
  0xb3   : > { %v1755_v21 = vsel %vm33500_vm14, %v27440_v37, 0.0  ;;  %v3424_v37 = vsel %vm27880_vm1, %v28006_v29, 0.0  ;;  %vm33505_vm14 = vmmov %vm33488_vm0 }
  0xb5   : > { %23423 = vmatmul.mubr.msk.f32.gmra.mrb[8].mxu1 %vm33497_vm13, %v1753_v14  ;;  %23644 = vmatmul.mubr.msk.f32.gmra.mrb[22].mxu0 %vm33498_vm9, %v27892_v60  ;;  %vm33502_vm13 = vmmov %vm33488_vm0  ;;  %v33530_v14 = vld [vmem:[#allocation38_spill] sm:$0xff] }
  0xb6   : > { %23425 = vmatprep.mubr.msk.f32.mxu1 %vm33488_vm0, %v27434_v35  ;;  %23646 = vmatprep.mubr.msk.f32.mxu0 %vm33499_vm3, %v3420_v19  ;;  %vm33503_vm9 = vmmov %vm33488_vm0  ;;  %vm33504_vm3 = vnez %v33332_v55 }
  0xb7   : > { %v1757_v35 = vsel %vm33504_vm3, %v27463_v45, 0.0  ;;  %v28029_v45 = vld [vmem:[#allocation2 + $0x108] sm:$0xff] }
  0xb9   : > { %23426 = vmatmul.mubr.msk.f32.gmra.mrb[10].mxu1 %vm33501_vm12, %v1755_v21  ;;  %23647 = vmatmul.mubr.msk.f32.gmra.mrb[24].mxu0 %vm33502_vm13, %v27912_v17  ;;  %vm33506_vm12 = vmmov %vm33488_vm0  ;;  %v3788_v21 = vld [vmem:[#allocation2 + $0x39] sm:$0xff] }
  0xba   : > { %23428 = vmatprep.mubr.msk.f32.mxu1 %vm33503_vm9, %v27457_v43  ;;  %23649 = vmatprep.mubr.msk.f32.mxu0 %vm33488_vm0, %v3422_v27  ;;  %vm33507_vm13 = vmmov %vm33488_vm0  ;;  %v3789_v27 = vld [vmem:[#allocation2 + $0x41] sm:$0xff] }
  0xbb   : > { %vm33508_vm9 = vmmov %vm33488_vm0  ;;  %vm33509_vm0 = vnez %v33339_v12 }
  0xbc   : > { %v1759_v43 = vsel %vm33509_vm0, %v27488_v56, 0.0  ;;  %vm33510_vm3 = vmmov %vm33508_vm9  ;;  %v3395_v56 = vld [vmem:[#allocation2 + $0x118] sm:$0xff] }
  0xbd   : > { %23429 = vmatmul.mubr.msk.f32.gmra.mrb[12].mxu1 %vm33505_vm14, %v1757_v35  ;;  %23650 = vmatmul.mubr.msk.f32.gmra.mrb[26].mxu0 %vm33506_vm12, %v27926_v31  ;;  %vm33511_vm14 = vmmov %vm33510_vm3  ;;  %v33535_v35 = vld [vmem:[#allocation37_spill] sm:$0xff] }
  0xbe   : > { %23431 = vmatprep.mubr.msk.f32.mxu1 %vm33507_vm13, %v27482_v54  ;;  %23652 = vmatprep.mubr.msk.f32.mxu0 %vm33508_vm9, %v3424_v37  ;;  %vm33512_vm12 = vmmov %vm33510_vm3  ;;  %v33514_v54 = vld [vmem:[#allocation27_spill] sm:$0xff] }
  0xbf   : > { %vm33513_vm13 = vmmov %vm33510_vm3  ;;  %vm33515_vm9 = vnez %v33514_v54  ;;  %v33539_v37 = vld [vmem:[#allocation43_spill] sm:$0xff] }
  0xc0   : > { %v1761_v52 = vsel %vm33515_vm9, %v27516_v13, 0.0  ;;  %vm33516_vm0 = vmmov %vm33510_vm3  ;;  %vm33526_vm9 = vcmask 1043456   ;;  %v33527_v13 = vld [vmem:[#allocation32_spill] sm:$0xff] }
  0xc1   : > { %23432 = vmatmul.mubr.msk.f32.gmra.mrb[14].mxu1 %vm33510_vm3, %v1759_v43  ;;  %23653 = vmatmul.mubr.msk.f32.gmra.mrb[28].mxu0 %vm33511_vm14, %v28029_v45  ;;  %vm33517_vm1 = vmmov %vm33516_vm0  ;;  %vm33523_vm14 = vnez %v33522_v63  ;;  %v3790_v43 = vld [vmem:[#allocation2 + $0x49] sm:$0xff] }
  0xc2   : > { %23434 = vmatprep.mubr.msk.f32.mxu1 %vm33512_vm12, %v27510_v7  ;;  %23655 = vmatprep.mubr.msk.f32.mxu0 %vm33513_vm13, %v3426_v57  ;;  %vm33519_vm3 = vmmov %vm33516_vm0  ;;  %v1763_v7 = vsel %vm33523_vm14, %v33521_v1, 0.0  ;;  %v3791_v57 = vld [vmem:[#allocation2 + $0x51] sm:$0xff]  ;;  %v3792_v1 = vld [vmem:[#allocation2 + $0x59] sm:$0xff] }
  0xc3   : > { %vm33520_vm2 = vmmov %vm33516_vm0 }
  0xc4   : > { %vm33524_vm12 = vmmov %vm33516_vm0 }
  0xc5   : > { %23435 = vmatmul.mubr.msk.f32.gmra.mrb[16].mxu1 %vm33516_vm0, %v1761_v52  ;;  %23656 = vmatmul.mubr.msk.f32.gmra.mrb[30].mxu0 %vm33517_vm1, %v3395_v56  ;;  %vm33525_vm13 = vmmov %vm33516_vm0  ;;  %v33542_v52 = vld [vmem:[#allocation42_spill] sm:$0xff]  ;;  %v33545_v56 = vld [vmem:[#allocation44_spill] sm:$0xff] }
  0xc6   : > { %23437 = vmatprep.mubr.msk.f32.mxu1 %vm33519_vm3, %v33518_v25  ;;  %23660 = vmatprep.mubr.msk.f32.mxu0 %vm33520_vm2, %v3785_v53  ;;  %vm33528_vm1 = vmmov %vm33516_vm0  ;;  %vm33531_vm0 = vnez %v33530_v14  ;;  %v33546_v53 = vld [vmem:[#allocation48_spill] sm:$0xff] }
  0xc7   : > { %v1765_v19 = vsel %vm33531_vm0, %v33529_v11, 0.0  ;;  %vm33532_vm2 = vmmov %vm33528_vm1 }
  0xc8   : > { %vm33533_vm3 = vmmov %vm33528_vm1 }
  0xc9   : > { %23438 = vmatmul.mubr.msk.f32.gmra.mrb[18].mxu1 %vm33524_vm12, %v1763_v7  ;;  %23661 = vmatmul.mubr.msk.f32.vlgmr.msra.gmra.mrb[0].mxu0 %vm33525_vm13, %v3786_v3  ;;  %vm33534_vm14 = vmmov %vm33528_vm1  ;;  %v3793_v7 = vld [vmem:[#allocation2 + $0x61] sm:$0xff] }
  0xca   : > { %23709 = vmatpush3.msk.msra.mxu0 %vm33526_vm9, %v27818_v41  ;;  %23440 = vmatprep.mubr.msk.f32.mxu1 %vm33528_vm1, %v33527_v13  ;;  %vm33536_vm12 = vmmov %vm33528_vm1  ;;  %v33538_v41 = vld [vmem:[#allocation39_spill] sm:$0xff]  ;;  %vm33540_vm9 = vnez %v33539_v37  ;;  %v33554_v13 = vld [vmem:[#allocation52_spill] sm:$0xff] }
  0xcb   : > { %23663 = vmatprep.mubr.msk.f32.mxu0 %vm33532_vm2, %v3787_v2  ;;  %vm33537_vm13 = vmmov %vm33528_vm1  ;;  %v1767_v61 = vsel %vm33540_vm9, %v33538_v41, 0.0  ;;  %v33550_v3 = vld [vmem:[#allocation47_spill] sm:$0xff]  ;;  %v33553_v2 = vld [vmem:[#allocation49_spill] sm:$0xff] }
  0xcc   : > { %vm33541_vm0 = vmmov %vm33528_vm1  ;;  %v33562_v41 = vld [vmem:[#allocation57_spill] sm:$0xff] }
  0xcd   : > { %23441 = vmatmul.mubr.msk.f32.gmra.mrb[20].mxu1 %vm33533_vm3, %v1765_v19  ;;  %23664 = vmatmul.mubr.msk.f32.gmra.mrb[2].mxu0 %vm33534_vm14, %v3788_v21  ;;  %vm33543_vm2 = vmmov %vm33541_vm0  ;;  %vm33547_vm14 = vnez %v33546_v53  ;;  %v3794_v19 = vld [vmem:[#allocation2 + $0x69] sm:$0xff]  ;;  %v3795_v21 = vld [vmem:[#allocation2 + $0x71] sm:$0xff] }
  0xce   : > { %23443 = vmatprep.mubr.msk.f32.mxu1 %vm33536_vm12, %v33535_v35  ;;  %23666 = vmatprep.mubr.msk.f32.mxu0 %vm33537_vm13, %v3789_v27  ;;  %vm33544_vm3 = vmmov %vm33541_vm0  ;;  %v1769_v25 = vsel %vm33547_vm14, %v33545_v56, 0.0  ;;  %v33558_v27 = vld [vmem:[#allocation51_spill] sm:$0xff]  ;;  %v33561_v35 = vld [vmem:[#allocation53_spill] sm:$0xff] }
  0xcf   : > { %vm33548_vm12 = vmmov %vm33541_vm0 }
  0xd0   : > { %vm33549_vm13 = vmmov %vm33541_vm0 }
  0xd1   : > { %23444 = vmatmul.mubr.msk.f32.gmra.mrb[22].mxu1 %vm33528_vm1, %v1767_v61  ;;  %23667 = vmatmul.mubr.msk.f32.gmra.mrb[4].mxu0 %vm33541_vm0, %v3790_v43  ;;  %vm33551_vm9 = vmmov %vm33541_vm0  ;;  %v3796_v43 = vld [vmem:[#allocation2 + $0x79] sm:$0xff] }
  0xd2   : > { %23446 = vmatprep.mubr.msk.f32.mxu1 %vm33543_vm2, %v33542_v52  ;;  %23669 = vmatprep.mubr.msk.f32.mxu0 %vm33544_vm3, %v3791_v57  ;;  %vm33552_vm1 = vmmov %vm33541_vm0  ;;  %vm33555_vm0 = vnez %v33554_v13  ;;  %v3797_v57 = vld [vmem:[#allocation2 + $0x81] sm:$0xff]  ;;  %v28103_v13 = vld [vmem:[#allocation2 + $0x91] sm:$0xff] }
  0xd3   : > { %v1771_v11 = vsel %vm33555_vm0, %v33553_v2, 0.0  ;;  %vm33556_vm2 = vmmov %vm33552_vm1 }
  0xd4   : > { %vm33557_vm3 = vmmov %vm33552_vm1 }
  0xd5   : > { %23447 = vmatmul.mubr.msk.f32.gmra.mrb[24].mxu1 %vm33548_vm12, %v1769_v25  ;;  %23670 = vmatmul.mubr.msk.f32.gmra.mrb[6].mxu0 %vm33549_vm13, %v3792_v1  ;;  %vm33559_vm14 = vmmov %vm33552_vm1  ;;  %v33565_v25 = vld [vmem:[#allocation56_spill] sm:$0xff]  ;;  %v33568_v1 = vld [vmem:[#allocation58_spill] sm:$0xff] }
  0xd6   : > { %23449 = vmatprep.mubr.msk.f32.mxu1 %vm33551_vm9, %v33550_v3  ;;  %23672 = vmatprep.mubr.msk.f32.mxu0 %vm33552_vm1, %v3793_v7  ;;  %vm33560_vm12 = vmmov %vm33552_vm1  ;;  %vm33563_vm9 = vnez %v33562_v41 }
  0xd7   : > { %v1773_v61 = vsel %vm33563_vm9, %v33561_v35, 0.0  ;;  %vm33564_vm13 = vmmov %vm33552_vm1 }
  0xd8   : > { %vm33566_vm0 = vmmov %vm33552_vm1 }
  0xd9   : > { %23450 = vmatmul.mubr.msk.f32.gmra.mrb[26].mxu1 %vm33556_vm2, %v1771_v11  ;;  %23673 = vmatmul.mubr.msk.f32.gmra.mrb[8].mxu0 %vm33557_vm3, %v3794_v19  ;;  %vm33567_vm2 = vmmov %vm33566_vm0  ;;  %v3798_v11 = vld [vmem:[#allocation2 + $0x89] sm:$0xff]  ;;  %v33570_v19 = vld [vmem:[#allocation25_spill] sm:$0xff] }
  0xda   : > { %23452 = vmatprep.mubr.msk.f32.mxu1 %vm33559_vm14, %v33558_v27  ;;  %23675 = vmatprep.mubr.msk.f32.mxu0 %vm33560_vm12, %v3795_v21  ;;  %vm33569_vm14 = vnez %v33425_v32  ;;  %v33571_v21 = vld [vmem:[#allocation21_spill] sm:$0xff]  ;;  %vm33573_vm12 = vmmov %vm33566_vm0 }
  0xdb   : > { %v1775_v7 = vsel %vm33569_vm14, %v33568_v1, 0.0  ;;  %vm33572_vm3 = vnez %v33571_v21  ;;  %v33579_v1 = vld [vmem:[#allocation31_spill] sm:$0xff]  ;;  %vm33580_vm14 = vmmov %vm33566_vm0  ;;  %v33599_v21 = vld [vmem:[#allocation9_spill] sm:$0xff] }
  0xdc   : > { %v2165_v41 = vsel %vm33572_vm3, %v33570_v19, 0.0  ;;  %vm33581_vm3 = vmmov %vm33566_vm0 }
  0xdd   : > { %23453 = vmatmul.mubr.msk.f32.gmra.mrb[28].mxu1 %vm33564_vm13, %v1773_v61  ;;  %23676 = vmatmul.mubr.msk.f32.gmra.mrb[10].mxu0 %vm33552_vm1, %v3796_v43  ;;  %vm33574_vm13 = vmmov %vm33566_vm0  ;;  %v28110_v61 = vld [vmem:[#allocation2 + $0x99] sm:$0xff] }
  0xde   : > { %23455 = vmatprep.mubr.msk.f32.mxu1 %vm33566_vm0, %v33565_v25  ;;  %23678 = vmatprep.mubr.msk.f32.mxu0 %vm33567_vm2, %v3797_v57  ;;  %vm33575_vm1 = vmmov %vm33566_vm0  ;;  %v33576_v43 = vld [vmem:[#allocation30_spill] sm:$0xff]  ;;  %v33577_v57 = vld [vmem:[#allocation24_spill] sm:$0xff] }
  0xdf   : > { %vm33578_vm2 = vnez %v33577_v57  ;;  %v27052_v57 = vld [vmem:[%s32722_s1 + $0x10] sm:$0xf] }
  0xe0   : > { %v2167_v32 = vsel %vm33578_vm2, %v33576_v43, 0.0  ;;  %v33589_v43 = vld [vmem:[#allocation36_spill] sm:$0xff]  ;;  %vm33598_vm2 = vmmov %vm33581_vm3 }
  0xe1   : > { %23456 = vmatmul.mubr.msk.f32.gmra.mrb[30].mxu1 %vm33573_vm12, %v1775_v7  ;;  %23679 = vmatmul.mubr.msk.f32.gmra.mrb[12].mxu0 %vm33574_vm13, %v3798_v11  ;;  %vm33582_vm12 = vmmov %vm33566_vm0  ;;  %v33583_v7 = vld [vmem:[#allocation4_spill] sm:$0xff]  ;;  %v33586_v11 = vld [vmem:[#allocation29_spill] sm:$0xff] }
  0xe2   : > { %23460 = vmatprep.mubr.msk.f32.mxu1 %vm33575_vm1, %v2165_v41  ;;  %23681 = vmatprep.mubr.msk.f32.mxu0 %vm33566_vm0, %v28103_v13  ;;  %vm33584_vm13 = vmmov %vm33566_vm0  ;;  %v33585_v41 = vld [vmem:[#allocation35_spill] sm:$0xff]  ;;  %vm33587_vm1 = vnez %v33586_v11  ;;  %vm33588_vm0 = vcmask 1043456   ;;  %v33597_v11 = vld [vmem:[#allocation41_spill] sm:$0xff] }
  0xe3   : > { %v2169_v19 = vsel %vm33587_vm1, %v33585_v41, 0.0  ;;  %vm33596_vm1 = vnez %v33361_v38 }
  0xe5   : > { %23461 = vmatmul.mubr.msk.f32.vlgmr.msra.gmra.mrb[0].mxu1 %vm33580_vm14, %v33579_v1  ;;  %23682 = vmatmul.mubr.msk.f32.gmra.mrb[14].mxu0 %vm33581_vm3, %v28110_v61  ;;  %vm33590_vm14 = vmmov %vm33581_vm3  ;;  %v33591_v1 = vld [vmem:[#allocation6_spill] sm:$0xff] }
  0xe6   : > { %23463 = vmatprep.mubr.msk.f32.mxu1 %vm33582_vm12, %v2167_v32  ;;  %23684 = vmatprep.mubr.msk.f32.mxu0 %vm33584_vm13, %v33583_v7  ;;  %vm33592_vm12 = vmmov %vm33581_vm3  ;;  %v33593_v32 = vld [vmem:[#allocation7_spill] sm:$0xff]  ;;  %v33595_v7 = vld [vmem:[#allocation40_spill] sm:$0xff] }
  0xe7   : > { %25757 = vmatpush3.msk.msra.mxu1 %vm33588_vm0, %v27052_v57  ;;  %vm33594_vm13 = vmmov %vm33581_vm3  ;;  %v2171_v41 = vsel %vm33596_vm1, %v33595_v7, 0.0  ;;  %v33602_v57 = vld [vmem:[#allocation10_spill] sm:$0xff] }
  0xe8   : > { %vm33600_vm0 = vmmov %vm33598_vm2 }
  0xe9   : > { %23464 = vmatmul.mubr.msk.f32.gmra.mrb[2].mxu1 %vm33590_vm14, %v33589_v43  ;;  %23685 = vmatmul.mubr.msk.f32.gmra.mrb[16].mxu0 %vm33581_vm3, %v33591_v1  ;;  %vm33601_vm9 = vmmov %vm33600_vm0  ;;  %v33604_v43 = vld [vmem:[#allocation45_spill] sm:$0xff]  ;;  %vm33605_vm3 = vnez %v33370_v50  ;;  %v33606_v1 = vld [vmem:[#allocation46_spill] sm:$0xff] }
  0xea   : > { %23466 = vmatprep.mubr.msk.f32.mxu1 %vm33592_vm12, %v2169_v19  ;;  %23687 = vmatprep.mubr.msk.f32.mxu0 %vm33594_vm13, %v33593_v32  ;;  %vm33603_vm14 = vmmov %vm33600_vm0  ;;  %v2173_v19 = vsel %vm33605_vm3, %v33604_v43, 0.0  ;;  %v33608_v32 = vld [vmem:[#allocation12_spill] sm:$0xff]  ;;  %v33620_v43 = vld [vmem:[#allocation54_spill] sm:$0xff] }
  0xeb   : > { %vm33607_vm12 = vmmov %vm33600_vm0 }
  0xec   : > { %vm33609_vm13 = vmmov %vm33600_vm0 }
  0xed   : > { %23467 = vmatmul.mubr.msk.f32.gmra.mrb[4].mxu1 %vm33598_vm2, %v33597_v11  ;;  %23688 = vmatmul.mubr.msk.f32.gmra.mrb[18].mxu0 %vm33600_vm0, %v33599_v21  ;;  %vm33610_vm1 = vmmov %vm33600_vm0  ;;  %v33611_v11 = vld [vmem:[#allocation13_spill] sm:$0xff]  ;;  %v33613_v21 = vld [vmem:[#allocation50_spill] sm:$0xff] }
  0xee   : > { %23469 = vmatprep.mubr.msk.f32.mxu1 %vm33601_vm9, %v2171_v41  ;;  %23690 = vmatprep.mubr.msk.f32.mxu0 %vm33603_vm14, %v33602_v57  ;;  %vm33612_vm2 = vmmov %vm33600_vm0  ;;  %vm33614_vm9 = vnez %v33383_v24  ;;  %v33615_v41 = vld [vmem:[#allocation15_spill] sm:$0xff]  ;;  %v33618_v57 = vld [vmem:[#allocation16_spill] sm:$0xff] }
  0xef   : > { %v2175_v7 = vsel %vm33614_vm9, %v33613_v21, 0.0  ;;  %vm33616_vm14 = vmmov %vm33600_vm0  ;;  %v28179_v21 = vld [vmem:[#allocation2 + $0x101] sm:$0xff] }
  0xf0   : > { %vm33617_vm3 = vmmov %vm33600_vm0 }
  0xf1   : > { %23470 = vmatmul.mubr.msk.f32.gmra.mrb[6].mxu1 %vm33607_vm12, %v33606_v1  ;;  %23691 = vmatmul.mubr.msk.f32.gmra.mrb[20].mxu0 %vm33609_vm13, %v33608_v32  ;;  %vm33619_vm12 = vmmov %vm33600_vm0  ;;  %v33622_v1 = vld [vmem:[#allocation55_spill] sm:$0xff]  ;;  %v33624_v32 = vld [vmem:[#allocation18_spill] sm:$0xff] }
  0xf2   : > { %23472 = vmatprep.mubr.msk.f32.mxu1 %vm33610_vm1, %v2173_v19  ;;  %23693 = vmatprep.mubr.msk.f32.mxu0 %vm33612_vm2, %v33611_v11  ;;  %vm33621_vm1 = vnez %v33395_v8  ;;  %vm33623_vm13 = vmmov %vm33600_vm0  ;;  %v2179_v11 = vsel %vm27705_vm7, %v27738_v22, 0.0  ;;  %v3815_v22 = vld [vmem:[#allocation2 + $0x111] sm:$0xff] }
  0xf3   : > { %v2177_v19 = vsel %vm33621_vm1, %v33620_v43, 0.0  ;;  %vm33625_vm2 = vmmov %vm33600_vm0  ;;  %v2183_v43 = vsel %vm27764_vm5, %v27792_v6, 0.0  ;;  %v4177_v6 = vld [vmem:[#allocation2 + $0x3a] sm:$0xff] }
  0xf4   : > { %vm33626_vm9 = vmmov %vm33600_vm0 }
  0xf5   : > { %23473 = vmatmul.mubr.msk.f32.gmra.mrb[8].mxu1 %vm33600_vm0, %v27688_v26  ;;  %23694 = vmatmul.mubr.msk.f32.gmra.mrb[22].mxu0 %vm33616_vm14, %v33615_v41  ;;  %v33627_v26 = vld [vmem:[#allocation19_spill] sm:$0xff]  ;;  %vm33630_vm14 = vmmov %vm33600_vm0 }
  0xf6   : > { %23475 = vmatprep.mubr.msk.f32.mxu1 %vm33617_vm3, %v2175_v7  ;;  %23696 = vmatprep.mubr.msk.f32.mxu0 %vm33619_vm12, %v33618_v57  ;;  %vm33628_vm3 = vmmov %vm33600_vm0  ;;  %v33629_v7 = vld [vmem:[#allocation22_spill] sm:$0xff]  ;;  %v28188_v41 = vld [vmem:[#allocation2 + $0x109] sm:$0xff]  ;;  %v2181_v57 = vsel %vm27734_vm6, %v27768_v33, 0.0 }
  0xf7   : > { %vm33631_vm12 = vmmov %vm33600_vm0 }
  0xf9   : > { %23476 = vmatmul.mubr.msk.f32.gmra.mrb[10].mxu1 %vm33623_vm13, %v33622_v1  ;;  %23697 = vmatmul.mubr.msk.f32.gmra.mrb[24].mxu0 %vm33625_vm2, %v33624_v32  ;;  %vm33632_vm13 = vmmov %vm33600_vm0  ;;  %v4175_v1 = vld [vmem:[#allocation2 + $0x2a] sm:$0xff]  ;;  %v4176_v32 = vld [vmem:[#allocation2 + $0x32] sm:$0xff] }
  0xfa   : > { %23478 = vmatprep.mubr.msk.f32.mxu1 %vm33626_vm9, %v2177_v19  ;;  %23699 = vmatprep.mubr.msk.f32.mxu0 %vm33600_vm0, %v33627_v26  ;;  %vm33633_vm9 = vmmov %vm33600_vm0  ;;  %v4174_v19 = vld [vmem:[#allocation2 + $0x22] sm:$0xff]  ;;  %v2187_v26 = vsel %vm27809_vm10, %v27842_v15, 0.0  ;;  %v4181_v15 = vld [vmem:[#allocation2 + $0x5a] sm:$0xff] }
  0xfb   : > { %vm33634_vm2 = vmmov %vm33600_vm0 }
  0xfd   : > { %23479 = vmatmul.mubr.msk.f32.gmra.mrb[12].mxu1 %vm33628_vm3, %v27748_v62  ;;  %23700 = vmatmul.mubr.msk.f32.gmra.mrb[26].mxu0 %vm33630_vm14, %v33629_v7  ;;  %vm33635_vm3 = vmmov %vm33600_vm0  ;;  %v3816_v62 = vld [vmem:[#allocation2 + $0x119] sm:$0xff]  ;;  %v2189_v7 = vsel %vm27838_vm15, %v27863_v23, 0.0  ;;  %v4183_v23 = vld [vmem:[#allocation2 + $0x6a] sm:$0xff] }
  0xfe   : > { %23481 = vmatprep.mubr.msk.f32.mxu1 %vm33631_vm12, %v2179_v11  ;;  %23702 = vmatprep.mubr.msk.f32.mxu0 %vm33632_vm13, %v28179_v21  ;;  %vm33636_vm14 = vmmov %vm33600_vm0  ;;  %v4178_v11 = vld [vmem:[#allocation2 + $0x42] sm:$0xff] }
  0xff   : > { %vm33637_vm12 = vmmov %vm33600_vm0 }
 0x100   : > { %vm33638_vm13 = vmmov %vm33600_vm0 }
 0x101   : > { %23482 = vmatmul.mubr.msk.f32.gmra.mrb[14].mxu1 %vm33633_vm9, %v27777_v9  ;;  %23703 = vmatmul.mubr.msk.f32.gmra.mrb[28].mxu0 %vm33634_vm2, %v28188_v41  ;;  %vm33639_vm9 = vmmov %vm33600_vm0  ;;  %vm33640_vm2 = vnez %v33303_v0  ;;  %v2185_v9 = vsel %vm27788_vm4, %v27813_v40, 0.0  ;;  %v4179_v40 = vld [vmem:[#allocation2 + $0x4a] sm:$0xff] }
 0x102   : > { %23484 = vmatprep.mubr.msk.f32.mxu1 %vm33600_vm0, %v2181_v57  ;;  %23705 = vmatprep.mubr.msk.f32.mxu0 %vm33635_vm3, %v3815_v22  ;;  %v4207_v33 = vsel %vm33640_vm2, %v4175_v1, 0.0  ;;  %vm33641_vm3 = vmmov %vm33600_vm0  ;;  %v4180_v57 = vld [vmem:[#allocation2 + $0x52] sm:$0xff]  ;;  %v2191_v22 = vsel %vm27859_vm8, %v27884_v18, 0.0  ;;  %v4185_v18 = vld [vmem:[#allocation2 + $0x7a] sm:$0xff] }
 0x103   : > { %vm33646_vm2 = vmmov %vm33600_vm0 }
 0x105   : > { %23485 = vmatmul.mubr.msk.f32.gmra.mrb[16].mxu1 %vm33636_vm14, %v27800_v5  ;;  %23706 = vmatmul.mubr.msk.f32.gmra.mrb[30].mxu0 %vm33637_vm12, %v3816_v62  ;;  %vm33642_vm14 = vmmov %vm33600_vm0  ;;  %v4182_v62 = vld [vmem:[#allocation2 + $0x62] sm:$0xff] }
 0x106   : > { %23487 = vmatprep.mubr.msk.f32.mxu1 %vm33638_vm13, %v2183_v43  ;;  %23710 = vmatprep.mubr.msk.f32.mxu0 %vm33639_vm9, %v4174_v19  ;;  %vm33643_vm12 = vmmov %vm33600_vm0  ;;  %vm33644_vm13 = vnez %v33307_v10  ;;  %v4184_v19 = vld [vmem:[#allocation2 + $0x72] sm:$0xff] }
 0x107   : > { %v4209_v5 = vsel %vm33644_vm13, %v4177_v6, 0.0  ;;  %vm33645_vm9 = vmmov %vm33600_vm0  ;;  %v4190_v6 = vld [vmem:[#allocation2 + $0xa2] sm:$0xff] }
 0x108   : > { %vm33650_vm13 = vmmov %vm33600_vm0 }
 0x109   : > { %23488 = vmatmul.mubr.msk.f32.gmra.mrb[18].mxu1 %vm33600_vm0, %v27827_v47  ;;  %23711 = vmatmul.mubr.msk.f32.vlgmr.msra.gmra.mrb[0].mxu0 %vm33641_vm3, %v4207_v33  ;;  %vm33647_vm3 = vmmov %vm33600_vm0  ;;  %v4186_v33 = vld [vmem:[#allocation2 + $0x82] sm:$0xff] }
 0x10a   : > { %23490 = vmatprep.mubr.msk.f32.mxu1 %vm33642_vm14, %v2185_v9  ;;  %23713 = vmatprep.mubr.msk.f32.mxu0 %vm33643_vm12, %v4176_v32  ;;  %vm33648_vm14 = vnez %v33312_v20  ;;  %vm33649_vm12 = vmmov %vm33600_vm0  ;;  %v4188_v9 = vld [vmem:[#allocation2 + $0x92] sm:$0xff]  ;;  %v4189_v32 = vld [vmem:[#allocation2 + $0x9a] sm:$0xff] }
 0x10b   : > { %v4211_v47 = vsel %vm33648_vm14, %v4179_v40, 0.0  ;;  %v4193_v40 = vld [vmem:[#allocation2 + $0xba] sm:$0xff] }
 0x10d   : > { %23491 = vmatmul.mubr.msk.f32.gmra.mrb[20].mxu1 %vm33645_vm9, %v27851_v42  ;;  %23714 = vmatmul.mubr.msk.f32.gmra.mrb[2].mxu0 %vm33646_vm2, %v4209_v5  ;;  %vm33651_vm9 = vmmov %vm33600_vm0  ;;  %v4191_v5 = vld [vmem:[#allocation2 + $0xaa] sm:$0xff] }
 0x10e   : > { %23493 = vmatprep.mubr.msk.f32.mxu1 %vm33600_vm0, %v2187_v26  ;;  %23716 = vmatprep.mubr.msk.f32.mxu0 %vm33647_vm3, %v4178_v11  ;;  %vm33652_vm2 = vmmov %vm33600_vm0  ;;  %vm33653_vm0 = vnez %v33317_v28  ;;  %v2574_v26 = vld [vmem:[#allocation2 + $0xb1] sm:$0xff] }
 0x10f   : > { %v4213_v42 = vsel %vm33653_vm0, %v4181_v15, 0.0  ;;  %vm33654_vm3 = vmmov %vm33652_vm2  ;;  %v4192_v11 = vld [vmem:[#allocation2 + $0xb2] sm:$0xff] }
 0x110   : > { %vm33655_vm14 = vmmov %vm33652_vm2 }
 0x111   : > { %23494 = vmatmul.mubr.msk.f32.gmra.mrb[22].mxu1 %vm33649_vm12, %v27872_v39  ;;  %23717 = vmatmul.mubr.msk.f32.gmra.mrb[4].mxu0 %vm33650_vm13, %v4211_v47  ;;  %vm33656_vm12 = vmmov %vm33652_vm2  ;;  %v4215_v39 = vsel %vm33496_vm11, %v4183_v23, 0.0  ;;  %v2582_v23 = vld [vmem:[#allocation2 + $0xf1] sm:$0xff] }
 0x112   : > { %23496 = vmatprep.mubr.msk.f32.mxu1 %vm33651_vm9, %v2189_v7  ;;  %23719 = vmatprep.mubr.msk.f32.mxu0 %vm33652_vm2, %v4180_v57  ;;  %vm33657_vm13 = vmmov %vm33652_vm2  ;;  %vm33658_vm9 = vnez %v33459_v16  ;;  %v2576_v7 = vld [vmem:[#allocation2 + $0xc1] sm:$0xff]  ;;  %v2577_v57 = vld [vmem:[#allocation2 + $0xc9] sm:$0xff] }
 0x113   : > { %v2193_v43 = vsel %vm33658_vm9, %v27904_v49, 0.0  ;;  %vm33659_vm0 = vmmov %vm33652_vm2  ;;  %v4187_v49 = vld [vmem:[#allocation2 + $0x8a] sm:$0xff] }
 0x114   : > { %vm33664_vm11 = vmmov %vm33659_vm0 }
 0x115   : > { %23497 = vmatmul.mubr.msk.f32.gmra.mrb[24].mxu1 %vm33654_vm3, %v27892_v60  ;;  %23720 = vmatmul.mubr.msk.f32.gmra.mrb[6].mxu0 %vm33655_vm14, %v4213_v42  ;;  %vm33660_vm3 = vmmov %vm33659_vm0  ;;  %v2578_v42 = vld [vmem:[#allocation2 + $0xd1] sm:$0xff] }
 0x116   : > { %23499 = vmatprep.mubr.msk.f32.mxu1 %vm33656_vm12, %v2191_v22  ;;  %23722 = vmatprep.mubr.msk.f32.mxu0 %vm33657_vm13, %v4182_v62  ;;  %vm33661_vm14 = vmmov %vm33659_vm0  ;;  %vm33662_vm12 = vnez %v33327_v44  ;;  %vm33663_vm13 = vnez %v33465_v46  ;;  %v2579_v22 = vld [vmem:[#allocation2 + $0xd9] sm:$0xff]  ;;  %v2580_v62 = vld [vmem:[#allocation2 + $0xe1] sm:$0xff] }
 0x117   : > { %v4217_v60 = vsel %vm33662_vm12, %v4185_v18, 0.0  ;;  %v2195_v1 = vsel %vm33663_vm13, %v28006_v29, 0.0  ;;  %vm33665_vm9 = vmmov %vm33659_vm0  ;;  %v2572_v29 = vld [vmem:[#allocation2 + $0xa1] sm:$0xff]  ;;  %v33707_v18 = vld [vmem:[#allocation57_spill] sm:$0xff] }
 0x118   : > { %vm33669_vm12 = vmmov %vm33659_vm0 }
 0x119   : > { %23500 = vmatmul.mubr.msk.f32.gmra.mrb[26].mxu1 %vm33652_vm2, %v27912_v17  ;;  %23723 = vmatmul.mubr.msk.f32.gmra.mrb[8].mxu0 %vm33659_vm0, %v4215_v39  ;;  %vm33666_vm2 = vmmov %vm33659_vm0  ;;  %v33698_v39 = vld [vmem:[#allocation58_spill] sm:$0xff] }
 0x11a   : > { %23502 = vmatprep.mubr.msk.f32.mxu1 %vm33660_vm3, %v2193_v43  ;;  %23725 = vmatprep.mubr.msk.f32.mxu0 %vm33661_vm14, %v4184_v19  ;;  %vm33667_vm3 = vnez %v33332_v55  ;;  %vm33668_vm14 = vmmov %vm33659_vm0  ;;  %v33699_v43 = vld [vmem:[#allocation52_spill] sm:$0xff]  ;;  %v33706_v19 = vld [vmem:[#allocation61_spill] sm:$0xff] }
 0x11b   : > { %v4219_v17 = vsel %vm33667_vm3, %v4187_v49, 0.0  ;;  %vm33670_vm13 = vmmov %vm33659_vm0 }
 0x11c   : > { %vm33674_vm3 = vmmov %vm33659_vm0 }
 0x11d   : > { %23503 = vmatmul.mubr.msk.f32.gmra.mrb[28].mxu1 %vm33664_vm11, %v27926_v31  ;;  %23726 = vmatmul.mubr.msk.f32.gmra.mrb[10].mxu0 %vm33665_vm9, %v4217_v60  ;;  %vm33671_vm11 = vmmov %vm33659_vm0  ;;  %vm33672_vm9 = vnez %v33339_v12 }
 0x11e   : > { %23505 = vmatprep.mubr.msk.f32.mxu1 %vm33666_vm2, %v2195_v1  ;;  %23728 = vmatprep.mubr.msk.f32.mxu0 %vm33659_vm0, %v4186_v33  ;;  %v4221_v31 = vsel %vm33672_vm9, %v4189_v32, 0.0  ;;  %vm33673_vm2 = vmmov %vm33659_vm0  ;;  %v4205_v1 = vld [vmem:[#allocation2 + $0x11a] sm:$0xff]  ;;  %v33711_v33 = vld [vmem:[#allocation60_spill] sm:$0xff] }
 0x11f   : > { %vm33679_vm9 = vmmov %vm33659_vm0 }
 0x120   : > { %vm33684_vm8 = vmmov %vm33659_vm0 }
 0x121   : > { %23506 = vmatmul.mubr.msk.f32.gmra.mrb[30].mxu1 %vm33668_vm14, %v28029_v45  ;;  %23729 = vmatmul.mubr.msk.f32.gmra.mrb[12].mxu0 %vm33669_vm12, %v4219_v17  ;;  %vm33675_vm14 = vmmov %vm33659_vm0  ;;  %v2573_v45 = vld [vmem:[#allocation2 + $0xa9] sm:$0xff]  ;;  %vm33676_vm12 = vnez %v33514_v54 }
 0x122   : > { %23534 = vmatprep.mubr.msk.f32.mxu1 %vm33670_vm13, %v28103_v13  ;;  %23731 = vmatprep.mubr.msk.f32.mxu0 %vm33671_vm11, %v4188_v9  ;;  %v4223_v13 = vsel %vm33676_vm12, %v4191_v5, 0.0  ;;  %vm33677_vm13 = vmmov %vm33659_vm0 }
 0x123   : > { %vm33678_vm11 = vmmov %vm33659_vm0 }
 0x124   : > { %vm33683_vm12 = vmmov %vm33659_vm0 }
 0x125   : > { %23535 = vmatmul.mubr.msk.f32.vlgmr.msra.gmra.mrb[16].mxu1 %vm33673_vm2, %v28110_v61  ;;  %23732 = vmatmul.mubr.msk.f32.gmra.mrb[14].mxu0 %vm33659_vm0, %v4221_v31  ;;  %vm33680_vm2 = vmmov %vm33659_vm0  ;;  %v2575_v61 = vld [vmem:[#allocation2 + $0xb9] sm:$0xff] }
 0x126   : > { %23537 = vmatprep.mubr.msk.f32.mxu1 %vm33674_vm3, %v2572_v29  ;;  %23734 = vmatprep.mubr.msk.f32.mxu0 %vm33675_vm14, %v4190_v6  ;;  %vm33681_vm3 = vnez %v33522_v63  ;;  %vm33682_vm14 = vmmov %vm33659_vm0 }
 0x127   : > { %v4225_v47 = vsel %vm33681_vm3, %v4193_v40, 0.0 }
 0x129   : > { %23538 = vmatmul.mubr.msk.f32.gmra.mrb[18].mxu1 %vm33677_vm13, %v2573_v45  ;;  %23735 = vmatmul.mubr.msk.f32.gmra.mrb[16].mxu0 %vm33678_vm11, %v4223_v13  ;;  %vm33686_vm13 = vmmov %vm33659_vm0 }
 0x12a   : > { %23540 = vmatprep.mubr.msk.f32.mxu1 %vm33679_vm9, %v2574_v26  ;;  %23737 = vmatprep.mubr.msk.f32.mxu0 %vm33680_vm2, %v4192_v11  ;;  %vm33685_vm9 = vnez %v33530_v14  ;;  %vm33687_vm11 = vmmov %vm33659_vm0 }
 0x12b   : > { %v4227_v15 = vsel %vm33685_vm9, %v33545_v56, 0.0  ;;  %vm33688_vm2 = vmmov %vm33659_vm0  ;;  %v2581_v56 = vld [vmem:[#allocation2 + $0xe9] sm:$0xff] }
 0x12c   : > { %vm33692_vm9 = vmmov %vm33659_vm0 }
 0x12d   : > { %23541 = vmatmul.mubr.msk.f32.gmra.mrb[20].mxu1 %vm33659_vm0, %v2575_v61  ;;  %23738 = vmatmul.mubr.msk.f32.gmra.mrb[18].mxu0 %vm33682_vm14, %v4225_v47  ;;  %vm33691_vm14 = vmmov %vm33659_vm0 }
 0x12e   : > { %23543 = vmatprep.mubr.msk.f32.mxu1 %vm33683_vm12, %v2576_v7  ;;  %23740 = vmatprep.mubr.msk.f32.mxu0 %vm33684_vm8, %v33542_v52  ;;  %vm33689_vm12 = vnez %v33539_v37  ;;  %vm33690_vm8 = vmmov %vm33659_vm0 }
 0x12f   : > { %v4229_v52 = vsel %vm33689_vm12, %v33553_v2, 0.0  ;;  %vm33696_vm12 = vmmov %vm33659_vm0  ;;  %v2583_v2 = vld [vmem:[#allocation2 + $0xf9] sm:$0xff] }
 0x131   : > { %23544 = vmatmul.mubr.msk.f32.gmra.mrb[22].mxu1 %vm33686_vm13, %v2577_v57  ;;  %23741 = vmatmul.mubr.msk.f32.gmra.mrb[20].mxu0 %vm33687_vm11, %v4227_v15  ;;  %vm33693_vm13 = vmmov %vm33659_vm0  ;;  %vm33694_vm11 = vnez %v33546_v53  ;;  %v4917_v57 = vld [vmem:[#allocation2 + $0x1] sm:$0xff]  ;;  %v4918_v15 = vld [vmem:[#allocation2 + $0x9] sm:$0xff] }
 0x132   : > { %23546 = vmatprep.mubr.msk.f32.mxu1 %vm33688_vm2, %v2578_v42  ;;  %23743 = vmatprep.mubr.msk.f32.mxu0 %vm33659_vm0, %v33550_v3  ;;  %v4231_v3 = vsel %vm33694_vm11, %v33561_v35, 0.0  ;;  %vm33695_vm2 = vmmov %vm33659_vm0  ;;  %v33704_v35 = vld [vmem:[#allocation59_spill] sm:$0xff]  ;;  %v4916_v42 = vld [vmem:[%s32723_s2] sm:$0xff] }
 0x133   : > { %vm33703_vm11 = vmmov %vm33659_vm0 }
 0x135   : > { %23547 = vmatmul.mubr.msk.f32.gmra.mrb[24].mxu1 %vm33690_vm8, %v2579_v22  ;;  %23744 = vmatmul.mubr.msk.f32.gmra.mrb[22].mxu0 %vm33691_vm14, %v4229_v52  ;;  %vm33697_vm8 = vmmov %vm33659_vm0 }
 0x136   : > { %23549 = vmatprep.mubr.msk.f32.mxu1 %vm33692_vm9, %v2580_v62  ;;  %23746 = vmatprep.mubr.msk.f32.mxu0 %vm33693_vm13, %v33558_v27  ;;  %vm33700_vm9 = vnez %v33699_v43  ;;  %vm33701_vm14 = vmmov %vm33659_vm0 }
 0x137   : > { %v4233_v27 = vsel %vm33700_vm9, %v33698_v39, 0.0  ;;  %vm33702_vm13 = vmmov %vm33659_vm0 }
 0x139   : > { %23550 = vmatmul.mubr.msk.f32.gmra.mrb[26].mxu1 %vm33695_vm2, %v2581_v56  ;;  %23747 = vmatmul.mubr.msk.f32.gmra.mrb[24].mxu0 %vm33659_vm0, %v4231_v3  ;;  %vm33705_vm2 = vmmov %vm33659_vm0 }
 0x13a   : > { %23552 = vmatprep.mubr.msk.f32.mxu1 %vm33696_vm12, %v2582_v23  ;;  %23749 = vmatprep.mubr.msk.f32.mxu0 %vm33697_vm8, %v33565_v25  ;;  %vm33708_vm12 = vnez %v33707_v18  ;;  %v4204_v25 = vld [vmem:[#allocation2 + $0x112] sm:$0xff]  ;;  %vm33709_vm8 = vmmov %vm33659_vm0 }
 0x13b   : > { %v4235_v60 = vsel %vm33708_vm12, %v33706_v19, 0.0 }
 0x13d   : > { %23553 = vmatmul.mubr.msk.f32.gmra.mrb[28].mxu1 %vm33701_vm14, %v2583_v2  ;;  %23750 = vmatmul.mubr.msk.f32.gmra.mrb[26].mxu0 %vm33702_vm13, %v4233_v27  ;;  %vm33710_vm14 = vmmov %vm33659_vm0  ;;  %vm33712_vm13 = vnez %v33711_v33 }
 0x13e   : > { %23555 = vmatprep.mubr.msk.f32.mxu1 %vm33703_vm11, %v28179_v21  ;;  %23752 = vmatprep.mubr.msk.f32.mxu0 %vm33705_vm2, %v33704_v35  ;;  %v4237_v49 = vsel %vm33712_vm13, %v4205_v1, 0.0  ;;  %vm33713_vm11 = vmmov %vm33659_vm0  ;;  %v4949_v21 = vld [vmem:[%s32723_s2 + $0x8] sm:$0xff]  ;;  %vm4950_vm2 = vcmask 64512  }
 0x13f   : > { %23758 = vmatprep.subr.mxu1 %v4949_v21 }
 0x140   : > { %23759 = vmatpush3.msra.mxu1 %v4949_v21 }
 0x141   : > { %23556 = vmatmul.mubr.msk.f32.gmra.mrb[30].mxu1 %vm33659_vm0, %v28188_v41  ;;  %23753 = vmatmul.mubr.msk.f32.gmra.mrb[28].mxu0 %vm33709_vm8, %v4235_v60 }
 0x142   : > { %23755 = vmatprep.mubr.msk.f32.mxu0 %vm33710_vm14, %v4204_v25  ;;  %23760 = vmatprep.mubr.msk.f32.mxu1 %vm4950_vm2, %v4917_v57 }
 0x143   : > { %23808 = vmatprep.subr.mxu1 %v4916_v42 }
 0x145   : > { %23756 = vmatmul.mubr.msk.f32.gmra.mrb[30].mxu0 %vm33713_vm11, %v4237_v49  ;;  %23761 = vmatmul.mubr.msk.f32.vlgmr.msra.gmra.mrb[32].mxu1 %vm4950_vm2, %v4918_v15 }
 0x146   : > { %23809 = vmatpush3.msra.mxu1 %v4916_v42 }
 0x1b8   : > { %v23462_v17 = vpop.f32.mrb[0].mxu1 }
 0x1b9   : > { %v2363_v9 = vpop.f32.mrb[1].mxu1 }
 0x1bc   : > { %v23465_v32 = vpop.f32.mrb[2].mxu1 }
 0x1bd   : > { %v2373_v31 = vpop.f32.mrb[3].mxu1 }
 0x1c0   : > { %v23468_v41 = vpop.f32.mrb[4].mxu1 }
 0x1c1   : > { %v2383_v29 = vpop.f32.mrb[5].mxu1 }
 0x1c4   : > { %v23471_v6 = vpop.f32.mrb[6].mxu1 }
 0x1c5   : > { %v2393_v5 = vpop.f32.mrb[7].mxu1 }
 0x1c8   : > { %v23474_v45 = vpop.f32.mrb[8].mxu1 }
 0x1c9   : > { %v2403_v13 = vpop.f32.mrb[9].mxu1 }
 0x1cc   : > { %v28341_v26 = vpop.f32.mrb[10].mxu1 }
 0x1cd   : > { %v28343_v11 = vpop.f32.mrb[11].mxu1 }
 0x1d0   : > { %v28345_v40 = vpop.f32.mrb[12].mxu1 }
 0x1d1   : > { %v28347_v61 = vpop.f32.mrb[13].mxu1 }
 0x1d4   : > { %v28349_v47 = vpop.f32.mrb[14].mxu1 }
 0x1d5   : > { %v28351_v7 = vpop.f32.mrb[15].mxu1 }
 0x1dc   : > { %v23712_v22 = vpop.f32.mrb[0].mxu0 }
 0x1dd   : > { %v25758_v52 = vadd.f32 %v23712_v22, %v23462_v17  ;;  %v4404_v62 = vpop.f32.mrb[1].mxu0 }
 0x1de   : > { %v25759_v56 = vadd.f32 %v4404_v62, %v2363_v9 }
 0x1df   : > { %v4628_v27 = vmul.f32 0.2, %v25758_v52  ;;  %vm4596_vm8 = vcmp.ge.f32.partialorder %v25758_v52, 0.0 }
 0x1e0   : > { %v23715_v3 = vpop.f32.mrb[2].mxu0  ;;  %vm4595_vm0 = vcmp.ge.f32.partialorder %v25759_v56, 0.0  ;;  %v4627_v23 = vmul.f32 0.2, %v25759_v56 }
 0x1e1   : > { %v25760_v2 = vadd.f32 %v23715_v3, %v23465_v32  ;;  %v4414_v39 = vpop.f32.mrb[3].mxu0  ;;  %v4660_v9 = vsel %vm4596_vm8, %v25758_v52, %v4628_v27 }
 0x1e2   : > { %v25761_v35 = vadd.f32 %v4414_v39, %v2373_v31  ;;  %v4659_v19 = vsel %vm4595_vm0, %v25759_v56, %v4627_v23 }
 0x1e3   : > { %4723 = vrot.lane.b32.xlu0 %v4659_v19, %s27062_s29  ;;  %v4630_v21 = vmul.f32 0.2, %v25760_v2  ;;  %vm4598_vm11 = vcmp.ge.f32.partialorder %v25760_v2, 0.0 }
 0x1e4   : > { %v23718_v60 = vpop.f32.mrb[4].mxu0  ;;  %vm4597_vm14 = vcmp.ge.f32.partialorder %v25761_v35, 0.0  ;;  %v4629_v25 = vmul.f32 0.2, %v25761_v35 }
 0x1e5   : > { %v25762_v1 = vadd.f32 %v23718_v60, %v23468_v41  ;;  %v4424_v49 = vpop.f32.mrb[5].mxu0  ;;  %v4662_v56 = vsel %vm4598_vm11, %v25760_v2, %v4630_v21 }
 0x1e6   : > { %v25763_v17 = vadd.f32 %v4424_v49, %v2383_v29  ;;  %v4661_v57 = vsel %vm4597_vm14, %v25761_v35, %v4629_v25 }
 0x1e7   : > { %4725 = vrot.lane.b32.xlu0 %v4660_v9, %s27062_s29  ;;  %4727 = vrot.lane.b32.xlu1 %v4661_v57, %s27062_s29  ;;  %v4632_v22 = vmul.f32 0.2, %v25762_v1  ;;  %vm4600_vm8 = vcmp.ge.f32.partialorder %v25762_v1, 0.0 }
 0x1e8   : > { %v4631_v32 = vmul.f32 0.2, %v25763_v17  ;;  %v23721_v31 = vpop.f32.mrb[6].mxu0  ;;  %vm4599_vm0 = vcmp.ge.f32.partialorder %v25763_v17, 0.0 }
 0x1e9   : > { %v25764_v15 = vadd.f32 %v23721_v31, %v23471_v6  ;;  %v4434_v42 = vpop.f32.mrb[7].mxu0  ;;  %v4664_v35 = vsel %vm4600_vm8, %v25762_v1, %v4632_v22 }
 0x1ea   : > { %v25765_v62 = vadd.f32 %v4434_v42, %v2393_v5  ;;  %v4663_v3 = vsel %vm4599_vm0, %v25763_v17, %v4631_v32 }
 0x1eb   : > { %4729 = vrot.lane.b32.xlu1 %v4662_v56, %s27062_s29  ;;  %4731 = vrot.lane.b32.xlu0 %v4663_v3, %s27062_s29  ;;  %v4634_v39 = vmul.f32 0.2, %v25764_v15  ;;  %vm4602_vm11 = vcmp.ge.f32.partialorder %v25764_v15, 0.0 }
 0x1ec   : > { %v4633_v41 = vmul.f32 0.2, %v25765_v62  ;;  %v23724_v29 = vpop.f32.mrb[8].mxu0  ;;  %vm4601_vm14 = vcmp.ge.f32.partialorder %v25765_v62, 0.0 }
 0x1ed   : > { %v25766_v52 = vadd.f32 %v23724_v29, %v23474_v45  ;;  %v4444_v23 = vpop.f32.mrb[9].mxu0  ;;  %v4666_v45 = vsel %vm4602_vm11, %v25764_v15, %v4634_v39 }
 0x1ee   : > { %v25767_v27 = vadd.f32 %v4444_v23, %v2403_v13  ;;  %v4665_v19 = vsel %vm4601_vm14, %v25765_v62, %v4633_v41 }
 0x1ef   : > { %4733 = vrot.lane.b32.xlu1 %v4664_v35, %s27062_s29  ;;  %4735 = vrot.lane.b32.xlu0 %v4665_v19, %s27062_s29  ;;  %v4636_v25 = vmul.f32 0.2, %v25766_v52  ;;  %vm4604_vm8 = vcmp.ge.f32.partialorder %v25766_v52, 0.0 }
 0x1f0   : > { %v4635_v6 = vmul.f32 0.2, %v25767_v27  ;;  %v23727_v5 = vpop.f32.mrb[10].mxu0  ;;  %vm4603_vm0 = vcmp.ge.f32.partialorder %v25767_v27, 0.0 }
 0x1f1   : > { %v25768_v2 = vadd.f32 %v23727_v5, %v28341_v26  ;;  %v4454_v60 = vpop.f32.mrb[11].mxu0  ;;  %v4668_v32 = vsel %vm4604_vm8, %v25766_v52, %v4636_v25 }
 0x1f2   : > { %v25769_v49 = vadd.f32 %v4454_v60, %v28343_v11  ;;  %v4667_v21 = vsel %vm4603_vm0, %v25767_v27, %v4635_v6 }
 0x1f3   : > { %4737 = vrot.lane.b32.xlu1 %v4666_v45, %s27062_s29  ;;  %4739 = vrot.lane.b32.xlu0 %v4667_v21, %s27062_s29  ;;  %v4638_v57 = vmul.f32 0.2, %v25768_v2  ;;  %vm4606_vm11 = vcmp.ge.f32.partialorder %v25768_v2, 0.0 }
 0x1f4   : > { %v4637_v13 = vmul.f32 0.2, %v25769_v49  ;;  %v23730_v1 = vpop.f32.mrb[12].mxu0  ;;  %vm4605_vm14 = vcmp.ge.f32.partialorder %v25769_v49, 0.0 }
 0x1f5   : > { %v25770_v17 = vadd.f32 %v23730_v1, %v28345_v40  ;;  %v4464_v9 = vpop.f32.mrb[13].mxu0  ;;  %v4670_v41 = vsel %vm4606_vm11, %v25768_v2, %v4638_v57 }
 0x1f6   : > { %v25771_v26 = vadd.f32 %v4464_v9, %v28347_v61  ;;  %v4669_v31 = vsel %vm4605_vm14, %v25769_v49, %v4637_v13 }
 0x1f7   : > { %4741 = vrot.lane.b32.xlu1 %v4668_v32, %s27062_s29  ;;  %4743 = vrot.lane.b32.xlu0 %v4669_v31, %s27062_s29  ;;  %v4640_v40 = vmul.f32 0.2, %v25770_v17  ;;  %vm4608_vm8 = vcmp.ge.f32.partialorder %v25770_v17, 0.0 }
 0x1f8   : > { %v4639_v11 = vmul.f32 0.2, %v25771_v26  ;;  %v23536_v15 = vpop.f32.mrb[16].mxu1  ;;  %v23733_v42 = vpop.f32.mrb[14].mxu0  ;;  %vm4607_vm0 = vcmp.ge.f32.partialorder %v25771_v26, 0.0 }
 0x1f9   : > { %v25772_v22 = vadd.f32 %v23733_v42, %v28349_v47  ;;  %v2832_v62 = vpop.f32.mrb[17].mxu1  ;;  %v4474_v56 = vpop.f32.mrb[15].mxu0  ;;  %v4672_v6 = vsel %vm4608_vm8, %v25770_v17, %v4640_v40 }
 0x1fa   : > { %v25773_v3 = vadd.f32 %v4474_v56, %v28351_v7  ;;  %v4671_v61 = vsel %vm4607_vm0, %v25771_v26, %v4639_v11 }
 0x1fb   : > { %4745 = vrot.lane.b32.xlu1 %v4670_v41, %s27062_s29  ;;  %4747 = vrot.lane.b32.xlu0 %v4671_v61, %s27062_s29  ;;  %v4642_v47 = vmul.f32 0.2, %v25772_v22  ;;  %vm4610_vm11 = vcmp.ge.f32.partialorder %v25772_v22, 0.0 }
 0x1fc   : > { %v4641_v29 = vmul.f32 0.2, %v25773_v3  ;;  %v23539_v52 = vpop.f32.mrb[18].mxu1  ;;  %v23736_v23 = vpop.f32.mrb[16].mxu0  ;;  %vm4609_vm14 = vcmp.ge.f32.partialorder %v25773_v3, 0.0 }
 0x1fd   : > { %v25774_v39 = vadd.f32 %v23736_v23, %v23536_v15  ;;  %v2842_v27 = vpop.f32.mrb[19].mxu1  ;;  %v4484_v35 = vpop.f32.mrb[17].mxu0  ;;  %v4674_v1 = vsel %vm4610_vm11, %v25772_v22, %v4642_v47 }
 0x1fe   : > { %v25775_v19 = vadd.f32 %v4484_v35, %v2832_v62  ;;  %v4673_v5 = vsel %vm4609_vm14, %v25773_v3, %v4641_v29 }
 0x1ff   : > { %4749 = vrot.lane.b32.xlu1 %v4672_v6, %s27062_s29  ;;  %4751 = vrot.lane.b32.xlu0 %v4673_v5, %s27062_s29  ;;  %v4644_v21 = vmul.f32 0.2, %v25774_v39  ;;  %vm4612_vm8 = vcmp.ge.f32.partialorder %v25774_v39, 0.0 }
 0x200   : > { %v4643_v7 = vmul.f32 0.2, %v25775_v19  ;;  %v23542_v2 = vpop.f32.mrb[20].mxu1  ;;  %v23739_v60 = vpop.f32.mrb[18].mxu0  ;;  %vm4611_vm0 = vcmp.ge.f32.partialorder %v25775_v19, 0.0 }
 0x201   : > { %v25776_v25 = vadd.f32 %v23739_v60, %v23539_v52  ;;  %v2852_v49 = vpop.f32.mrb[21].mxu1  ;;  %v4494_v45 = vpop.f32.mrb[19].mxu0  ;;  %v4676_v62 = vsel %vm4612_vm8, %v25774_v39, %v4644_v21 }
 0x202   : > { %v25777_v13 = vadd.f32 %v4494_v45, %v2842_v27  ;;  %v4675_v9 = vsel %vm4611_vm0, %v25775_v19, %v4643_v7 }
 0x203   : > { %4753 = vrot.lane.b32.xlu1 %v4674_v1, %s27062_s29  ;;  %4755 = vrot.lane.b32.xlu0 %v4675_v9, %s27062_s29  ;;  %v4646_v15 = vmul.f32 0.2, %v25776_v25  ;;  %vm4614_vm11 = vcmp.ge.f32.partialorder %v25776_v25, 0.0 }
 0x204   : > { %v4645_v17 = vmul.f32 0.2, %v25777_v13  ;;  %v23545_v57 = vpop.f32.mrb[22].mxu1  ;;  %v23742_v26 = vpop.f32.mrb[20].mxu0  ;;  %vm4613_vm14 = vcmp.ge.f32.partialorder %v25777_v13, 0.0 }
 0x205   : > { %v25778_v32 = vadd.f32 %v23742_v26, %v23542_v2  ;;  %v2862_v31 = vpop.f32.mrb[23].mxu1  ;;  %v4504_v11 = vpop.f32.mrb[21].mxu0  ;;  %v4678_v27 = vsel %vm4614_vm11, %v25776_v25, %v4646_v15 }
 0x206   : > { %v25779_v42 = vadd.f32 %v4504_v11, %v2852_v49  ;;  %v4677_v56 = vsel %vm4613_vm14, %v25777_v13, %v4645_v17 }
 0x207   : > { %4757 = vrot.lane.b32.xlu1 %v4676_v62, %s27062_s29  ;;  %4759 = vrot.lane.b32.xlu0 %v4677_v56, %s27062_s29  ;;  %v4648_v52 = vmul.f32 0.2, %v25778_v32  ;;  %vm4616_vm8 = vcmp.ge.f32.partialorder %v25778_v32, 0.0 }
 0x208   : > { %v4647_v22 = vmul.f32 0.2, %v25779_v42  ;;  %v23548_v40 = vpop.f32.mrb[24].mxu1  ;;  %v23745_v3 = vpop.f32.mrb[22].mxu0  ;;  %vm4615_vm0 = vcmp.ge.f32.partialorder %v25779_v42, 0.0 }
 0x209   : > { %v25780_v41 = vadd.f32 %v23745_v3, %v23545_v57  ;;  %v2872_v61 = vpop.f32.mrb[25].mxu1  ;;  %v4514_v29 = vpop.f32.mrb[23].mxu0  ;;  %v4680_v49 = vsel %vm4616_vm8, %v25778_v32, %v4648_v52 }
 0x20a   : > { %v25781_v23 = vadd.f32 %v4514_v29, %v2862_v31  ;;  %v4679_v35 = vsel %vm4615_vm0, %v25779_v42, %v4647_v22 }
 0x20b   : > { %4761 = vrot.lane.b32.xlu1 %v4678_v27, %s27062_s29  ;;  %4763 = vrot.lane.b32.xlu0 %v4679_v35, %s27062_s29  ;;  %v4650_v2 = vmul.f32 0.2, %v25780_v41  ;;  %vm4618_vm11 = vcmp.ge.f32.partialorder %v25780_v41, 0.0 }
 0x20c   : > { %v4649_v39 = vmul.f32 0.2, %v25781_v23  ;;  %v23551_v47 = vpop.f32.mrb[26].mxu1  ;;  %v23748_v19 = vpop.f32.mrb[24].mxu0  ;;  %vm4617_vm14 = vcmp.ge.f32.partialorder %v25781_v23, 0.0 }
 0x20d   : > { %v25782_v6 = vadd.f32 %v23748_v19, %v23548_v40  ;;  %v2882_v5 = vpop.f32.mrb[27].mxu1  ;;  %v4524_v7 = vpop.f32.mrb[25].mxu0  ;;  %v4682_v31 = vsel %vm4618_vm11, %v25780_v41, %v4650_v2 }
 0x20e   : > { %v25783_v60 = vadd.f32 %v4524_v7, %v2872_v61  ;;  %v4681_v45 = vsel %vm4617_vm14, %v25781_v23, %v4649_v39 }
 0x20f   : > { %4765 = vrot.lane.b32.xlu1 %v4680_v49, %s27062_s29  ;;  %4767 = vrot.lane.b32.xlu0 %v4681_v45, %s27062_s29  ;;  %v4652_v57 = vmul.f32 0.2, %v25782_v6  ;;  %vm4620_vm8 = vcmp.ge.f32.partialorder %v25782_v6, 0.0 }
 0x210   : > { %v4651_v25 = vmul.f32 0.2, %v25783_v60  ;;  %v23554_v21 = vpop.f32.mrb[28].mxu1  ;;  %v23751_v13 = vpop.f32.mrb[26].mxu0  ;;  %vm4619_vm0 = vcmp.ge.f32.partialorder %v25783_v60, 0.0 }
 0x211   : > { %v25784_v1 = vadd.f32 %v23751_v13, %v23551_v47  ;;  %v2892_v9 = vpop.f32.mrb[29].mxu1  ;;  %v4534_v17 = vpop.f32.mrb[27].mxu0  ;;  %v4684_v61 = vsel %vm4620_vm8, %v25782_v6, %v4652_v57  ;;  %v28396_v6 = vld [vmem:[%s32723_s2 + $0x10] sm:$0xff] }
 0x212   : > { %v25785_v26 = vadd.f32 %v4534_v17, %v2882_v5  ;;  %v4683_v11 = vsel %vm4619_vm0, %v25783_v60, %v4651_v25  ;;  %23858 = vmatprep.subr.mxu1 %v28396_v6 }
 0x213   : > { %4769 = vrot.lane.b32.xlu1 %v4682_v31, %s27062_s29  ;;  %4771 = vrot.lane.b32.xlu0 %v4683_v11, %s27062_s29  ;;  %v4654_v40 = vmul.f32 0.2, %v25784_v1  ;;  %vm4622_vm11 = vcmp.ge.f32.partialorder %v25784_v1, 0.0 }
 0x214   : > { %v4653_v32 = vmul.f32 0.2, %v25785_v26  ;;  %v23557_v15 = vpop.f32.mrb[30].mxu1  ;;  %v23754_v42 = vpop.f32.mrb[28].mxu0  ;;  %vm4621_vm14 = vcmp.ge.f32.partialorder %v25785_v26, 0.0 }
 0x215   : > { %v25786_v62 = vadd.f32 %v23754_v42, %v23554_v21  ;;  %v2902_v56 = vpop.f32.mrb[31].mxu1  ;;  %v4544_v22 = vpop.f32.mrb[29].mxu0  ;;  %v4686_v47 = vsel %vm4622_vm11, %v25784_v1, %v4654_v40 }
 0x216   : > { %v25787_v3 = vadd.f32 %v4544_v22, %v2892_v9  ;;  %v4685_v29 = vsel %vm4621_vm14, %v25785_v26, %v4653_v32 }
 0x217   : > { %4773 = vrot.lane.b32.xlu1 %v4684_v61, %s27062_s29  ;;  %4775 = vrot.lane.b32.xlu0 %v4685_v29, %s27062_s29  ;;  %v4656_v35 = vmul.f32 0.2, %v25786_v62  ;;  %vm4624_vm8 = vcmp.ge.f32.partialorder %v25786_v62, 0.0 }
 0x218   : > { %v4655_v41 = vmul.f32 0.2, %v25787_v3  ;;  %v23757_v52 = vpop.f32.mrb[30].mxu0  ;;  %vm4623_vm0 = vcmp.ge.f32.partialorder %v25787_v3, 0.0 }
 0x219   : > { %v25788_v23 = vadd.f32 %v23757_v52, %v23557_v15  ;;  %v4554_v27 = vpop.f32.mrb[31].mxu0  ;;  %v4688_v2 = vsel %vm4624_vm8, %v25786_v62, %v4656_v35 }
 0x21a   : > { %v25789_v39 = vadd.f32 %v4554_v27, %v2902_v56  ;;  %v4687_v19 = vsel %vm4623_vm0, %v25787_v3, %v4655_v41  ;;  %vm4819_vm0 = vcmask 64544  }
 0x21b   : > { %4777 = vrot.lane.b32.xlu1 %v4686_v47, %s27062_s29  ;;  %4779 = vrot.lane.b32.xlu0 %v4687_v19, %s27062_s29  ;;  %v4658_v7 = vmul.f32 0.2, %v25788_v23  ;;  %vm4626_vm11 = vcmp.ge.f32.partialorder %v25788_v23, 0.0 }
 0x21c   : > { %v4657_v5 = vmul.f32 0.2, %v25789_v39  ;;  %vm4625_vm14 = vcmp.ge.f32.partialorder %v25789_v39, 0.0 }
 0x21d   : > { %v4690_v49 = vsel %vm4626_vm11, %v25788_v23, %v4658_v7 }
 0x21e   : > { %v4689_v60 = vsel %vm4625_vm14, %v25789_v39, %v4657_v5 }
 0x21f   : > { %4781 = vrot.lane.b32.xlu1 %v4688_v2, %s27062_s29  ;;  %4783 = vrot.lane.b32.xlu0 %v4689_v60, %s27062_s29 }
 0x223   : > { %4785 = vrot.lane.b32.xlu1 %v4690_v49, %s27062_s29  ;;  %s27065_s29 = smov 12  }
 0x255   : > { %v4724_v45 = vpop.permute.xlu0 %4723 }
 0x256   : > { %4820 = vst.msk [vmem:[#allocation2 + $0x11] sm:$0xff] %vm4819_vm0, %v4724_v45 }
 0x259   : > { %v4726_v25 = vpop.permute.xlu0 %4725  ;;  %v4728_v21 = vpop.permute.xlu1 %4727 }
 0x25a   : > { %4821 = vst.msk [vmem:[#allocation2 + $0x19] sm:$0xff] %vm4819_vm0, %v4726_v25  ;;  %4822 = vst.msk [vmem:[#allocation2 + $0x21] sm:$0xff] %vm4819_vm0, %v4728_v21 }
 0x25d   : > { %v4730_v13 = vpop.permute.xlu1 %4729  ;;  %v4732_v1 = vpop.permute.xlu0 %4731  ;;  %v28405_v9 = vld [vmem:[#allocation2 + $0x11] sm:$0xff] }
 0x25e   : > { %33714 = vst [vmem:[#allocation26_spill] sm:$0xff] %v28405_v9  ;;  %23763 = vmatprep.mubr.msk.f32.mxu1 %vm4950_vm2, %v28405_v9  ;;  %4823 = vst.msk [vmem:[#allocation2 + $0x29] sm:$0xff] %vm4819_vm0, %v4730_v13 }
 0x25f   : > { %4824 = vst.msk [vmem:[#allocation2 + $0x31] sm:$0xff] %vm4819_vm0, %v4732_v1 }
 0x261   : > { %v4734_v17 = vpop.permute.xlu1 %4733  ;;  %v4736_v57 = vpop.permute.xlu0 %4735  ;;  %v28411_v26 = vld [vmem:[#allocation2 + $0x19] sm:$0xff]  ;;  %v28413_v31 = vld [vmem:[#allocation2 + $0x21] sm:$0xff] }
 0x262   : > { %33715 = vst [vmem:[#allocation28_spill] sm:$0xff] %v28411_v26  ;;  %33716 = vst [vmem:[#allocation32_spill] sm:$0xff] %v28413_v31  ;;  %23764 = vmatmul.mubr.msk.f32.gmra.mrb[34].mxu1 %vm4950_vm2, %v28411_v26 }
 0x263   : > { %4825 = vst.msk [vmem:[#allocation2 + $0x39] sm:$0xff] %vm4819_vm0, %v4734_v17  ;;  %4826 = vst.msk [vmem:[#allocation2 + $0x41] sm:$0xff] %vm4819_vm0, %v4736_v57  ;;  %23766 = vmatprep.mubr.msk.f32.mxu1 %vm4950_vm2, %v28413_v31 }
 0x265   : > { %v4738_v11 = vpop.permute.xlu1 %4737  ;;  %v4740_v32 = vpop.permute.xlu0 %4739  ;;  %v28421_v15 = vld [vmem:[#allocation2 + $0x29] sm:$0xff] }
 0x266   : > { %33717 = vst [vmem:[#allocation34_spill] sm:$0xff] %v28421_v15  ;;  %v28423_v42 = vld [vmem:[#allocation2 + $0x31] sm:$0xff]  ;;  %4827 = vst.msk [vmem:[#allocation2 + $0x49] sm:$0xff] %vm4819_vm0, %v4738_v11  ;;  %23767 = vmatmul.mubr.msk.f32.gmra.mrb[36].mxu1 %vm4950_vm2, %v28421_v15 }
 0x267   : > { %33718 = vst [vmem:[#allocation37_spill] sm:$0xff] %v28423_v42  ;;  %4828 = vst.msk [vmem:[#allocation2 + $0x51] sm:$0xff] %vm4819_vm0, %v4740_v32  ;;  %23769 = vmatprep.mubr.msk.f32.mxu1 %vm4950_vm2, %v28423_v42 }
 0x269   : > { %v4742_v62 = vpop.permute.xlu1 %4741  ;;  %v4744_v56 = vpop.permute.xlu0 %4743 }
 0x26a   : > { %v28431_v22 = vld [vmem:[#allocation2 + $0x39] sm:$0xff]  ;;  %v28433_v40 = vld [vmem:[#allocation2 + $0x41] sm:$0xff]  ;;  %4829 = vst.msk [vmem:[#allocation2 + $0x59] sm:$0xff] %vm4819_vm0, %v4742_v62  ;;  %4830 = vst.msk [vmem:[#allocation2 + $0x61] sm:$0xff] %vm4819_vm0, %v4744_v56 }
 0x26b   : > { %33719 = vst [vmem:[#allocation39_spill] sm:$0xff] %v28431_v22  ;;  %33720 = vst [vmem:[#allocation42_spill] sm:$0xff] %v28433_v40  ;;  %23770 = vmatmul.mubr.msk.f32.gmra.mrb[38].mxu1 %vm4950_vm2, %v28431_v22 }
 0x26c   : > { %23772 = vmatprep.mubr.msk.f32.mxu1 %vm4950_vm2, %v28433_v40 }
 0x26d   : > { %v4746_v3 = vpop.permute.xlu1 %4745  ;;  %v4748_v61 = vpop.permute.xlu0 %4747  ;;  %v28441_v29 = vld [vmem:[#allocation2 + $0x49] sm:$0xff] }
 0x26e   : > { %33721 = vst [vmem:[#allocation44_spill] sm:$0xff] %v28441_v29  ;;  %v28443_v41 = vld [vmem:[#allocation2 + $0x51] sm:$0xff]  ;;  %4831 = vst.msk [vmem:[#allocation2 + $0x69] sm:$0xff] %vm4819_vm0, %v4746_v3 }
 0x26f   : > { %33722 = vst [vmem:[#allocation47_spill] sm:$0xff] %v28443_v41  ;;  %4832 = vst.msk [vmem:[#allocation2 + $0x71] sm:$0xff] %vm4819_vm0, %v4748_v61  ;;  %23773 = vmatmul.mubr.msk.f32.gmra.mrb[40].mxu1 %vm4950_vm2, %v28441_v29 }
 0x270   : > { %23775 = vmatprep.mubr.msk.f32.mxu1 %vm4950_vm2, %v28443_v41 }
 0x271   : > { %v4750_v52 = vpop.permute.xlu1 %4749  ;;  %v4752_v23 = vpop.permute.xlu0 %4751  ;;  %v28451_v27 = vld [vmem:[#allocation2 + $0x59] sm:$0xff]  ;;  %v28453_v35 = vld [vmem:[#allocation2 + $0x61] sm:$0xff] }
 0x272   : > { %33723 = vst [vmem:[#allocation49_spill] sm:$0xff] %v28451_v27  ;;  %33724 = vst [vmem:[#allocation51_spill] sm:$0xff] %v28453_v35 }
 0x273   : > { %4833 = vst.msk [vmem:[#allocation2 + $0x79] sm:$0xff] %vm4819_vm0, %v4750_v52  ;;  %4834 = vst.msk [vmem:[#allocation2 + $0x81] sm:$0xff] %vm4819_vm0, %v4752_v23  ;;  %23776 = vmatmul.mubr.msk.f32.gmra.mrb[42].mxu1 %vm4950_vm2, %v28451_v27 }
 0x274   : > { %23778 = vmatprep.mubr.msk.f32.mxu1 %vm4950_vm2, %v28453_v35 }
 0x275   : > { %v4754_v39 = vpop.permute.xlu1 %4753  ;;  %v4756_v47 = vpop.permute.xlu0 %4755  ;;  %v28461_v19 = vld [vmem:[#allocation2 + $0x69] sm:$0xff] }
 0x276   : > { %33725 = vst [vmem:[#allocation53_spill] sm:$0xff] %v28461_v19  ;;  %v28463_v5 = vld [vmem:[#allocation2 + $0x71] sm:$0xff]  ;;  %4835 = vst.msk [vmem:[#allocation2 + $0x89] sm:$0xff] %vm4819_vm0, %v4754_v39 }
 0x277   : > { %33726 = vst [vmem:[#allocation56_spill] sm:$0xff] %v28463_v5  ;;  %4836 = vst.msk [vmem:[#allocation2 + $0x91] sm:$0xff] %vm4819_vm0, %v4756_v47  ;;  %23779 = vmatmul.mubr.msk.f32.gmra.mrb[44].mxu1 %vm4950_vm2, %v28461_v19 }
 0x278   : > { %23781 = vmatprep.mubr.msk.f32.mxu1 %vm4950_vm2, %v28463_v5 }
 0x279   : > { %v4758_v7 = vpop.permute.xlu1 %4757  ;;  %v4760_v2 = vpop.permute.xlu0 %4759 }
 0x27a   : > { %v28471_v60 = vld [vmem:[#allocation2 + $0x79] sm:$0xff]  ;;  %v28473_v49 = vld [vmem:[#allocation2 + $0x81] sm:$0xff]  ;;  %4837 = vst.msk [vmem:[#allocation2 + $0x99] sm:$0xff] %vm4819_vm0, %v4758_v7  ;;  %4838 = vst.msk [vmem:[#allocation2 + $0xa1] sm:$0xff] %vm4819_vm0, %v4760_v2 }
 0x27b   : > { %33727 = vst [vmem:[#allocation25_spill] sm:$0xff] %v28471_v60  ;;  %33728 = vst [vmem:[#allocation30_spill] sm:$0xff] %v28473_v49  ;;  %23782 = vmatmul.mubr.msk.f32.gmra.mrb[46].mxu1 %vm4950_vm2, %v28471_v60 }
 0x27c   : > { %23784 = vmatprep.mubr.msk.f32.mxu1 %vm4950_vm2, %v28473_v49  ;;  %v28633_v49 = vld [vmem:[#allocation2 + $0x78] sm:$0xff] }
 0x27d   : > { %v4762_v45 = vpop.permute.xlu1 %4761  ;;  %v4764_v25 = vpop.permute.xlu0 %4763  ;;  %v28481_v21 = vld [vmem:[#allocation2 + $0x89] sm:$0xff] }
 0x27e   : > { %33729 = vst [vmem:[#allocation31_spill] sm:$0xff] %v28481_v21  ;;  %v28483_v13 = vld [vmem:[#allocation2 + $0x91] sm:$0xff]  ;;  %4839 = vst.msk [vmem:[#allocation2 + $0xa9] sm:$0xff] %vm4819_vm0, %v4762_v45  ;;  %v28643_v5 = vld [vmem:[#allocation2 + $0x88] sm:$0xff] }
 0x27f   : > { %33730 = vst [vmem:[#allocation4_spill] sm:$0xff] %v28483_v13  ;;  %4840 = vst.msk [vmem:[#allocation2 + $0xb1] sm:$0xff] %vm4819_vm0, %v4764_v25  ;;  %23785 = vmatmul.mubr.msk.f32.gmra.mrb[48].mxu1 %vm4950_vm2, %v28481_v21  ;;  %v28631_v21 = vld [vmem:[#allocation2 + $0x80] sm:$0xff]  ;;  %v28641_v60 = vld [vmem:[#allocation2 + $0x90] sm:$0xff] }
 0x280   : > { %23787 = vmatprep.mubr.msk.f32.mxu1 %vm4950_vm2, %v28483_v13  ;;  %v28623_v13 = vld [vmem:[#allocation2 + $0x68] sm:$0xff] }
 0x281   : > { %v4766_v1 = vpop.permute.xlu1 %4765  ;;  %v4768_v17 = vpop.permute.xlu0 %4767  ;;  %v28491_v57 = vld [vmem:[#allocation2 + $0x99] sm:$0xff]  ;;  %v28493_v11 = vld [vmem:[#allocation2 + $0xa1] sm:$0xff] }
 0x282   : > { %33731 = vst [vmem:[#allocation35_spill] sm:$0xff] %v28491_v57  ;;  %33732 = vst [vmem:[#allocation36_spill] sm:$0xff] %v28493_v11  ;;  %v28651_v19 = vld [vmem:[#allocation2 + $0xa0] sm:$0xff]  ;;  %v28653_v35 = vld [vmem:[#allocation2 + $0x98] sm:$0xff] }
 0x283   : > { %4841 = vst.msk [vmem:[#allocation2 + $0xb9] sm:$0xff] %vm4819_vm0, %v4766_v1  ;;  %4842 = vst.msk [vmem:[#allocation2 + $0xc1] sm:$0xff] %vm4819_vm0, %v4768_v17  ;;  %23788 = vmatmul.mubr.msk.f32.gmra.mrb[50].mxu1 %vm4950_vm2, %v28491_v57  ;;  %v28621_v57 = vld [vmem:[#allocation2 + $0x70] sm:$0xff] }
 0x284   : > { %23790 = vmatprep.mubr.msk.f32.mxu1 %vm4950_vm2, %v28493_v11  ;;  %v28613_v11 = vld [vmem:[#allocation2 + $0x58] sm:$0xff] }
 0x285   : > { %v4770_v32 = vpop.permute.xlu1 %4769  ;;  %v4772_v62 = vpop.permute.xlu0 %4771  ;;  %v28501_v56 = vld [vmem:[#allocation2 + $0xa9] sm:$0xff] }
 0x286   : > { %33733 = vst [vmem:[#allocation6_spill] sm:$0xff] %v28501_v56  ;;  %v28503_v3 = vld [vmem:[#allocation2 + $0xb1] sm:$0xff]  ;;  %4843 = vst.msk [vmem:[#allocation2 + $0xc9] sm:$0xff] %vm4819_vm0, %v4770_v32  ;;  %v28663_v41 = vld [vmem:[#allocation2 + $0xa8] sm:$0xff] }
 0x287   : > { %33734 = vst [vmem:[#allocation7_spill] sm:$0xff] %v28503_v3  ;;  %4844 = vst.msk [vmem:[#allocation2 + $0xd1] sm:$0xff] %vm4819_vm0, %v4772_v62  ;;  %23791 = vmatmul.mubr.msk.f32.gmra.mrb[52].mxu1 %vm4950_vm2, %v28501_v56  ;;  %v28611_v56 = vld [vmem:[#allocation2 + $0x60] sm:$0xff]  ;;  %v28661_v27 = vld [vmem:[#allocation2 + $0xb0] sm:$0xff] }
 0x288   : > { %23793 = vmatprep.mubr.msk.f32.mxu1 %vm4950_vm2, %v28503_v3  ;;  %v28603_v3 = vld [vmem:[#allocation2 + $0x48] sm:$0xff] }
 0x289   : > { %v4774_v61 = vpop.permute.xlu1 %4773  ;;  %v4776_v52 = vpop.permute.xlu0 %4775 }
 0x28a   : > { %v28511_v23 = vld [vmem:[#allocation2 + $0xb9] sm:$0xff]  ;;  %v28513_v39 = vld [vmem:[#allocation2 + $0xc1] sm:$0xff]  ;;  %4845 = vst.msk [vmem:[#allocation2 + $0xd9] sm:$0xff] %vm4819_vm0, %v4774_v61  ;;  %4846 = vst.msk [vmem:[#allocation2 + $0xe1] sm:$0xff] %vm4819_vm0, %v4776_v52 }
 0x28b   : > { %33735 = vst [vmem:[#allocation40_spill] sm:$0xff] %v28511_v23  ;;  %33736 = vst [vmem:[#allocation41_spill] sm:$0xff] %v28513_v39  ;;  %23794 = vmatmul.mubr.msk.f32.gmra.mrb[54].mxu1 %vm4950_vm2, %v28511_v23  ;;  %v28601_v23 = vld [vmem:[#allocation2 + $0x50] sm:$0xff]  ;;  %v28671_v29 = vld [vmem:[#allocation2 + $0xc0] sm:$0xff] }
 0x28c   : > { %23796 = vmatprep.mubr.msk.f32.mxu1 %vm4950_vm2, %v28513_v39  ;;  %v28593_v39 = vld [vmem:[#allocation2 + $0x38] sm:$0xff] }
 0x28d   : > { %v4778_v47 = vpop.permute.xlu1 %4777  ;;  %v4780_v7 = vpop.permute.xlu0 %4779  ;;  %v28521_v2 = vld [vmem:[#allocation2 + $0xc9] sm:$0xff]  ;;  %v28673_v40 = vld [vmem:[#allocation2 + $0xb8] sm:$0xff] }
 0x28e   : > { %33737 = vst [vmem:[#allocation9_spill] sm:$0xff] %v28521_v2  ;;  %v28523_v45 = vld [vmem:[#allocation2 + $0xd1] sm:$0xff]  ;;  %4847 = vst.msk [vmem:[#allocation2 + $0xe9] sm:$0xff] %vm4819_vm0, %v4778_v47  ;;  %v4852_v47 = vld [vmem:[#allocation2] sm:$0xff] }
 0x28f   : > { %33738 = vst [vmem:[#allocation10_spill] sm:$0xff] %v28523_v45  ;;  %4848 = vst.msk [vmem:[#allocation2 + $0xf1] sm:$0xff] %vm4819_vm0, %v4780_v7  ;;  %23797 = vmatmul.mubr.msk.f32.gmra.mrb[56].mxu1 %vm4950_vm2, %v28521_v2  ;;  %v33743_v7 = vld [vmem:[#allocation21_spill] sm:$0xff]  ;;  %v28591_v2 = vld [vmem:[#allocation2 + $0x40] sm:$0xff] }
 0x290   : > { %23799 = vmatprep.mubr.msk.f32.mxu1 %vm4950_vm2, %v28523_v45  ;;  %vm33744_vm8 = vnez %v33743_v7  ;;  %v28581_v45 = vld [vmem:[#allocation2 + $0x30] sm:$0xff]  ;;  %v28683_v42 = vld [vmem:[#allocation2 + $0xc8] sm:$0xff] }
 0x291   : > { %v4782_v25 = vpop.permute.xlu1 %4781  ;;  %v4784_v1 = vpop.permute.xlu0 %4783  ;;  %v28531_v17 = vld [vmem:[#allocation2 + $0xd9] sm:$0xff]  ;;  %v28533_v32 = vld [vmem:[#allocation2 + $0xe1] sm:$0xff]  ;;  %v28681_v22 = vld [vmem:[#allocation2 + $0xd0] sm:$0xff] }
 0x292   : > { %33739 = vst [vmem:[#allocation45_spill] sm:$0xff] %v28531_v17  ;;  %33740 = vst [vmem:[#allocation46_spill] sm:$0xff] %v28533_v32  ;;  %v28691_v15 = vld [vmem:[#allocation2 + $0xe0] sm:$0xff]  ;;  %v28693_v31 = vld [vmem:[#allocation2 + $0xd8] sm:$0xff] }
 0x293   : > { %4849 = vst.msk [vmem:[#allocation2 + $0xf9] sm:$0xff] %vm4819_vm0, %v4782_v25  ;;  %4850 = vst.msk [vmem:[#allocation2 + $0x101] sm:$0xff] %vm4819_vm0, %v4784_v1  ;;  %23800 = vmatmul.mubr.msk.f32.gmra.mrb[58].mxu1 %vm4950_vm2, %v28531_v17  ;;  %v4884_v25 = vsel %vm33744_vm8, %v4852_v47, 0.0  ;;  %v28557_v17 = vld [vmem:[#allocation2 + $0x10] sm:$0xff]  ;;  %v28836_v63 = vld [vmem:[#allocation2 + $0xc2] sm:$0xff] }
 0x294   : > { %23802 = vmatprep.mubr.msk.f32.mxu1 %vm4950_vm2, %v28533_v32  ;;  %v4853_v32 = vld [vmem:[#allocation2 + $0x8] sm:$0xff]  ;;  %33754 = vst [vmem:[#allocation15_spill] sm:$0xff] %v28693_v31  ;;  %33782 = vst [vmem:[#allocation69_spill] sm:$0xff] %v28836_v63  ;;  %v6043_v18 = vsel %vm33744_vm8, %v28557_v17, 0.0 }
 0x295   : > { %v4786_v62 = vpop.permute.xlu1 %4785  ;;  %v28541_v61 = vld [vmem:[#allocation2 + $0xe9] sm:$0xff] }
 0x296   : > { %33741 = vst [vmem:[#allocation12_spill] sm:$0xff] %v28541_v61  ;;  %v28543_v52 = vld [vmem:[#allocation2 + $0xf1] sm:$0xff]  ;;  %4851 = vst.msk [vmem:[#allocation2 + $0x109] sm:$0xff] %vm4819_vm0, %v4786_v62  ;;  %vm33750_vm0 = vnez %v33361_v38  ;;  %v28703_v9 = vld [vmem:[#allocation2 + $0xe8] sm:$0xff] }
 0x297   : > { %33742 = vst [vmem:[#allocation13_spill] sm:$0xff] %v28543_v52  ;;  %23803 = vmatmul.mubr.msk.f32.gmra.mrb[60].mxu1 %vm4950_vm2, %v28541_v61  ;;  %v28562_v62 = vld [vmem:[%s32723_s2 + $0x18] sm:$0xff]  ;;  %v28701_v26 = vld [vmem:[#allocation2 + $0xf0] sm:$0xff]  ;;  %33757 = vst [vmem:[#allocation54_spill] sm:$0xff] %v28703_v9 }
 0x298   : > { %23805 = vmatprep.mubr.msk.f32.mxu1 %vm4950_vm2, %v28543_v52  ;;  %v33746_v52 = vld [vmem:[#allocation24_spill] sm:$0xff]  ;;  %v33748_v61 = vld [vmem:[#allocation29_spill] sm:$0xff]  ;;  %33756 = vst [vmem:[#allocation16_spill] sm:$0xff] %v28701_v26 }
 0x299   : > { %vm33747_vm14 = vnez %v33746_v52  ;;  %vm33749_vm11 = vnez %v33748_v61  ;;  %vm33785_vm8 = vnez %v33748_v61 }
 0x29a   : > { %v28552_v1 = vld [vmem:[#allocation2 + $0xf9] sm:$0xff]  ;;  %v4886_v47 = vsel %vm33747_vm14, %v28557_v17, 0.0 }
 0x29b   : > { %33745 = vst [vmem:[#allocation50_spill] sm:$0xff] %v28552_v1  ;;  %23806 = vmatmul.mubr.msk.f32.gmra.mrb[62].mxu1 %vm4950_vm2, %v28552_v1  ;;  %v28570_v1 = vld [vmem:[#allocation2 + $0x20] sm:$0xff] }
 0x29c   : > { %23810 = vmatprep.mubr.msk.f32.mxu1 %vm4950_vm2, %v4884_v25  ;;  %v28573_v25 = vld [vmem:[#allocation2 + $0x18] sm:$0xff]  ;;  %v6045_v33 = vsel %vm33747_vm14, %v28570_v1, 0.0  ;;  %vm33786_vm14 = vnez %v33361_v38 }
 0x29d   : > { %v6049_v17 = vsel %vm33786_vm14, %v28591_v2, 0.0 }
 0x29f   : > { %23811 = vmatmul.mubr.msk.f32.vlgmr.msra.gmra.mrb[32].mxu1 %vm4950_vm2, %v4853_v32  ;;  %v4888_v32 = vsel %vm33749_vm11, %v28570_v1, 0.0  ;;  %vm33751_vm11 = vnez %v33370_v50 }
 0x2a0   : > { %23859 = vmatpush3.msra.mxu1 %v28396_v6  ;;  %23813 = vmatprep.mubr.msk.f32.mxu1 %vm4950_vm2, %v4886_v47  ;;  %v28583_v6 = vld [vmem:[#allocation2 + $0x28] sm:$0xff]  ;;  %v4890_v47 = vsel %vm33750_vm0, %v28581_v45, 0.0  ;;  %vm33752_vm0 = vnez %v33383_v24 }
 0x2a1   : > { %23908 = vmatprep.subr.mxu1 %v28562_v62 }
 0x2a3   : > { %23814 = vmatmul.mubr.msk.f32.gmra.mrb[34].mxu1 %vm4950_vm2, %v28573_v25 }
 0x2a4   : > { %23816 = vmatprep.mubr.msk.f32.mxu1 %vm4950_vm2, %v4888_v32  ;;  %v4892_v32 = vsel %vm33751_vm11, %v28591_v2, 0.0 }
 0x2a7   : > { %23817 = vmatmul.mubr.msk.f32.gmra.mrb[36].mxu1 %vm4950_vm2, %v28583_v6 }
 0x2a8   : > { %23819 = vmatprep.mubr.msk.f32.mxu1 %vm4950_vm2, %v4890_v47  ;;  %v4894_v47 = vsel %vm33752_vm0, %v28601_v23, 0.0 }
 0x2ab   : > { %23820 = vmatmul.mubr.msk.f32.gmra.mrb[38].mxu1 %vm4950_vm2, %v28593_v39 }
 0x2ac   : > { %23822 = vmatprep.mubr.msk.f32.mxu1 %vm4950_vm2, %v4892_v32  ;;  %v4896_v32 = vsel %vm33621_vm1, %v28611_v56, 0.0 }
 0x2af   : > { %23823 = vmatmul.mubr.msk.f32.gmra.mrb[40].mxu1 %vm4950_vm2, %v28603_v3 }
 0x2b0   : > { %23825 = vmatprep.mubr.msk.f32.mxu1 %vm4950_vm2, %v4894_v47  ;;  %v4898_v47 = vsel %vm27705_vm7, %v28621_v57, 0.0 }
 0x2b3   : > { %23826 = vmatmul.mubr.msk.f32.gmra.mrb[42].mxu1 %vm4950_vm2, %v28613_v11 }
 0x2b4   : > { %23828 = vmatprep.mubr.msk.f32.mxu1 %vm4950_vm2, %v4896_v32  ;;  %v4900_v32 = vsel %vm27734_vm6, %v28631_v21, 0.0 }
 0x2b7   : > { %23829 = vmatmul.mubr.msk.f32.gmra.mrb[44].mxu1 %vm4950_vm2, %v28623_v13 }
 0x2b8   : > { %23831 = vmatprep.mubr.msk.f32.mxu1 %vm4950_vm2, %v4898_v47  ;;  %v4902_v47 = vsel %vm27764_vm5, %v28641_v60, 0.0 }
 0x2bb   : > { %23832 = vmatmul.mubr.msk.f32.gmra.mrb[46].mxu1 %vm4950_vm2, %v28633_v49 }
 0x2bc   : > { %23834 = vmatprep.mubr.msk.f32.mxu1 %vm4950_vm2, %v4900_v32  ;;  %v4904_v32 = vsel %vm27788_vm4, %v28651_v19, 0.0 }
 0x2bf   : > { %23835 = vmatmul.mubr.msk.f32.gmra.mrb[48].mxu1 %vm4950_vm2, %v28643_v5 }
 0x2c0   : > { %23837 = vmatprep.mubr.msk.f32.mxu1 %vm4950_vm2, %v4902_v47  ;;  %v4906_v47 = vsel %vm27809_vm10, %v28661_v27, 0.0  ;;  %vm33753_vm10 = vnez %v33453_v51  ;;  %v5593_v51 = vld [vmem:[#allocation2 + $0x2] sm:$0xff] }
 0x2c3   : > { %23838 = vmatmul.mubr.msk.f32.gmra.mrb[50].mxu1 %vm4950_vm2, %v28653_v35 }
 0x2c4   : > { %23840 = vmatprep.mubr.msk.f32.mxu1 %vm4950_vm2, %v4904_v32  ;;  %v4908_v32 = vsel %vm27838_vm15, %v28671_v29, 0.0  ;;  %vm33755_vm15 = vnez %v33459_v16 }
 0x2c7   : > { %23841 = vmatmul.mubr.msk.f32.gmra.mrb[52].mxu1 %vm4950_vm2, %v28663_v41 }
 0x2c8   : > { %23843 = vmatprep.mubr.msk.f32.mxu1 %vm4950_vm2, %v4906_v47  ;;  %v4910_v47 = vsel %vm33753_vm10, %v28681_v22, 0.0  ;;  %vm33758_vm10 = vnez %v33465_v46  ;;  %v28726_v46 = vld [vmem:[#allocation2 + $0x1a] sm:$0xff] }
 0x2cb   : > { %23844 = vmatmul.mubr.msk.f32.gmra.mrb[54].mxu1 %vm4950_vm2, %v28673_v40 }
 0x2cc   : > { %23846 = vmatprep.mubr.msk.f32.mxu1 %vm4950_vm2, %v4908_v32  ;;  %v4912_v32 = vsel %vm33755_vm15, %v28691_v15, 0.0  ;;  %vm33760_vm15 = vnez %v33303_v0  ;;  %v28746_v0 = vld [vmem:[#allocation2 + $0x32] sm:$0xff] }
 0x2cd   : > { %33765 = vst [vmem:[#allocation22_spill] sm:$0xff] %v28746_v0 }
 0x2cf   : > { %23847 = vmatmul.mubr.msk.f32.gmra.mrb[56].mxu1 %vm4950_vm2, %v28683_v42 }
 0x2d0   : > { %23849 = vmatprep.mubr.msk.f32.mxu1 %vm4950_vm2, %v4910_v47  ;;  %v4914_v47 = vsel %vm33758_vm10, %v28701_v26, 0.0  ;;  %vm33764_vm10 = vnez %v33312_v20  ;;  %v28766_v20 = vld [vmem:[#allocation2 + $0x52] sm:$0xff] }
 0x2d1   : > { %33769 = vst [vmem:[#allocation59_spill] sm:$0xff] %v28766_v20 }
 0x2d3   : > { %23850 = vmatmul.mubr.msk.f32.gmra.mrb[58].mxu1 %vm4950_vm2, %v28693_v31  ;;  %v28711_v31 = vld [vmem:[#allocation2 + $0xf8] sm:$0xff] }
 0x2d4   : > { %23852 = vmatprep.mubr.msk.f32.mxu1 %vm4950_vm2, %v4912_v32  ;;  %33759 = vst [vmem:[#allocation55_spill] sm:$0xff] %v28711_v31  ;;  %v5594_v32 = vld [vmem:[#allocation2 + $0xa] sm:$0xff] }
 0x2d5   : > { %v5626_v16 = vsel %vm33760_vm15, %v5594_v32, 0.0  ;;  %vm33762_vm15 = vnez %v33307_v10  ;;  %v28736_v32 = vld [vmem:[#allocation2 + $0x22] sm:$0xff] }
 0x2d6   : > { %33763 = vst [vmem:[#allocation19_spill] sm:$0xff] %v28736_v32  ;;  %v28756_v10 = vld [vmem:[#allocation2 + $0x42] sm:$0xff] }
 0x2d7   : > { %23853 = vmatmul.mubr.msk.f32.gmra.mrb[60].mxu1 %vm4950_vm2, %v28703_v9  ;;  %v28721_v9 = vld [vmem:[%s32723_s2 + $0x20] sm:$0xff]  ;;  %33767 = vst [vmem:[#allocation58_spill] sm:$0xff] %v28756_v10 }
 0x2d8   : > { %23855 = vmatprep.mubr.msk.f32.mxu1 %vm4950_vm2, %v4914_v47  ;;  %v28724_v47 = vld [vmem:[#allocation2 + $0x12] sm:$0xff] }
 0x2d9   : > { %33761 = vst [vmem:[#allocation18_spill] sm:$0xff] %v28724_v47 }
 0x2db   : > { %23856 = vmatmul.mubr.msk.f32.gmra.mrb[62].mxu1 %vm4950_vm2, %v28711_v31 }
 0x2dc   : > { %23860 = vmatprep.mubr.msk.f32.mxu1 %vm4950_vm2, %v5593_v51  ;;  %v5628_v51 = vsel %vm33762_vm15, %v28726_v46, 0.0  ;;  %vm33766_vm15 = vnez %v33317_v28  ;;  %v28776_v28 = vld [vmem:[#allocation2 + $0x62] sm:$0xff] }
 0x2dd   : > { %33771 = vst [vmem:[#allocation61_spill] sm:$0xff] %v28776_v28 }
 0x2df   : > { %23861 = vmatmul.mubr.msk.f32.vlgmr.msra.gmra.mrb[32].mxu1 %vm4950_vm2, %v5626_v16  ;;  %v28738_v16 = vld [vmem:[#allocation2 + $0x2a] sm:$0xff] }
 0x2e0   : > { %23909 = vmatpush3.msra.mxu1 %v28562_v62  ;;  %23863 = vmatprep.mubr.msk.f32.mxu1 %vm4950_vm2, %v28724_v47  ;;  %v5630_v62 = vsel %vm33764_vm10, %v28738_v16, 0.0  ;;  %v28748_v47 = vld [vmem:[#allocation2 + $0x3a] sm:$0xff]  ;;  %vm33768_vm10 = vnez %v33322_v36  ;;  %v28786_v36 = vld [vmem:[#allocation2 + $0x72] sm:$0xff] }
 0x2e1   : > { %23958 = vmatprep.subr.mxu1 %v28721_v9  ;;  %33773 = vst [vmem:[#allocation21_spill] sm:$0xff] %v28786_v36 }
 0x2e3   : > { %23864 = vmatmul.mubr.msk.f32.gmra.mrb[34].mxu1 %vm4950_vm2, %v5628_v51  ;;  %v5632_v51 = vsel %vm33766_vm15, %v28748_v47, 0.0  ;;  %vm33770_vm15 = vnez %v33327_v44  ;;  %v28796_v44 = vld [vmem:[#allocation2 + $0x82] sm:$0xff] }
 0x2e4   : > { %23866 = vmatprep.mubr.msk.f32.mxu1 %vm4950_vm2, %v28736_v32  ;;  %v28758_v32 = vld [vmem:[#allocation2 + $0x4a] sm:$0xff]  ;;  %33775 = vst [vmem:[#allocation24_spill] sm:$0xff] %v28796_v44 }
 0x2e7   : > { %23867 = vmatmul.mubr.msk.f32.gmra.mrb[36].mxu1 %vm4950_vm2, %v5630_v62  ;;  %v5634_v62 = vsel %vm33768_vm10, %v28758_v32, 0.0  ;;  %vm33772_vm10 = vnez %v33332_v55  ;;  %v28806_v55 = vld [vmem:[#allocation2 + $0x92] sm:$0xff] }
 0x2e8   : > { %23869 = vmatprep.mubr.msk.f32.mxu1 %vm4950_vm2, %v28746_v0  ;;  %v28768_v0 = vld [vmem:[#allocation2 + $0x5a] sm:$0xff]  ;;  %33777 = vst [vmem:[#allocation29_spill] sm:$0xff] %v28806_v55 }
 0x2eb   : > { %23870 = vmatmul.mubr.msk.f32.gmra.mrb[38].mxu1 %vm4950_vm2, %v5632_v51  ;;  %v5636_v51 = vsel %vm33770_vm15, %v28768_v0, 0.0  ;;  %vm33774_vm15 = vnez %v33339_v12  ;;  %v28816_v12 = vld [vmem:[#allocation2 + $0xa2] sm:$0xff] }
 0x2ec   : > { %23872 = vmatprep.mubr.msk.f32.mxu1 %vm4950_vm2, %v28756_v10  ;;  %v28778_v10 = vld [vmem:[#allocation2 + $0x6a] sm:$0xff]  ;;  %33778 = vst [vmem:[#allocation67_spill] sm:$0xff] %v28816_v12 }
 0x2ef   : > { %23873 = vmatmul.mubr.msk.f32.gmra.mrb[40].mxu1 %vm4950_vm2, %v5634_v62  ;;  %v5638_v62 = vsel %vm33772_vm10, %v28778_v10, 0.0  ;;  %vm33776_vm10 = vnez %v33514_v54  ;;  %v28826_v54 = vld [vmem:[#allocation2 + $0xb2] sm:$0xff] }
 0x2f0   : > { %23875 = vmatprep.mubr.msk.f32.mxu1 %vm4950_vm2, %v28766_v20  ;;  %v28788_v20 = vld [vmem:[#allocation2 + $0x7a] sm:$0xff]  ;;  %33780 = vst [vmem:[#allocation68_spill] sm:$0xff] %v28826_v54 }
 0x2f3   : > { %23876 = vmatmul.mubr.msk.f32.gmra.mrb[42].mxu1 %vm4950_vm2, %v5636_v51  ;;  %v5640_v51 = vsel %vm33774_vm15, %v28788_v20, 0.0 }
 0x2f4   : > { %23878 = vmatprep.mubr.msk.f32.mxu1 %vm4950_vm2, %v28776_v28  ;;  %v28798_v28 = vld [vmem:[#allocation2 + $0x8a] sm:$0xff] }
 0x2f7   : > { %23879 = vmatmul.mubr.msk.f32.gmra.mrb[44].mxu1 %vm4950_vm2, %v5638_v62  ;;  %v5642_v62 = vsel %vm33776_vm10, %v28798_v28, 0.0  ;;  %vm33779_vm10 = vnez %v33530_v14  ;;  %v28846_v14 = vld [vmem:[#allocation2 + $0xd2] sm:$0xff] }
 0x2f8   : > { %23881 = vmatprep.mubr.msk.f32.mxu1 %vm4950_vm2, %v28786_v36  ;;  %v28808_v36 = vld [vmem:[#allocation2 + $0x9a] sm:$0xff]  ;;  %33784 = vst [vmem:[#allocation70_spill] sm:$0xff] %v28846_v14 }
 0x2fb   : > { %23882 = vmatmul.mubr.msk.f32.gmra.mrb[46].mxu1 %vm4950_vm2, %v5640_v51  ;;  %v5644_v51 = vsel %vm33681_vm3, %v28808_v36, 0.0  ;;  %vm33781_vm3 = vnez %v33539_v37  ;;  %v28856_v37 = vld [vmem:[#allocation2 + $0xe2] sm:$0xff] }
 0x2fc   : > { %23884 = vmatprep.mubr.msk.f32.mxu1 %vm4950_vm2, %v28796_v44  ;;  %v28818_v44 = vld [vmem:[#allocation2 + $0xaa] sm:$0xff] }
 0x2ff   : > { %23885 = vmatmul.mubr.msk.f32.gmra.mrb[48].mxu1 %vm4950_vm2, %v5642_v62  ;;  %v5646_v62 = vsel %vm33779_vm10, %v28818_v44, 0.0  ;;  %vm33783_vm10 = vnez %v33546_v53  ;;  %v28866_v53 = vld [vmem:[#allocation2 + $0xf2] sm:$0xff] }
 0x300   : > { %23887 = vmatprep.mubr.msk.f32.mxu1 %vm4950_vm2, %v28806_v55  ;;  %v28828_v55 = vld [vmem:[#allocation2 + $0xba] sm:$0xff] }
 0x303   : > { %23888 = vmatmul.mubr.msk.f32.gmra.mrb[50].mxu1 %vm4950_vm2, %v5644_v51  ;;  %v5648_v51 = vsel %vm33781_vm3, %v28828_v55, 0.0 }
 0x304   : > { %23890 = vmatprep.mubr.msk.f32.mxu1 %vm4950_vm2, %v28816_v12  ;;  %v28838_v12 = vld [vmem:[#allocation2 + $0xca] sm:$0xff] }
 0x307   : > { %23891 = vmatmul.mubr.msk.f32.gmra.mrb[52].mxu1 %vm4950_vm2, %v5646_v62  ;;  %v5650_v62 = vsel %vm33783_vm10, %v28838_v12, 0.0 }
 0x308   : > { %23893 = vmatprep.mubr.msk.f32.mxu1 %vm4950_vm2, %v28826_v54  ;;  %v28848_v54 = vld [vmem:[#allocation2 + $0xda] sm:$0xff] }
 0x30b   : > { %23894 = vmatmul.mubr.msk.f32.gmra.mrb[54].mxu1 %vm4950_vm2, %v5648_v51  ;;  %v5652_v51 = vsel %vm33700_vm9, %v28848_v54, 0.0 }
 0x30c   : > { %23896 = vmatprep.mubr.msk.f32.mxu1 %vm4950_vm2, %v28836_v63  ;;  %v28858_v63 = vld [vmem:[#allocation2 + $0xea] sm:$0xff] }
 0x30f   : > { %23897 = vmatmul.mubr.msk.f32.gmra.mrb[56].mxu1 %vm4950_vm2, %v5650_v62  ;;  %v5654_v62 = vsel %vm33708_vm12, %v28858_v63, 0.0 }
 0x310   : > { %23899 = vmatprep.mubr.msk.f32.mxu1 %vm4950_vm2, %v28846_v14  ;;  %v28868_v14 = vld [vmem:[#allocation2 + $0xfa] sm:$0xff] }
 0x313   : > { %23900 = vmatmul.mubr.msk.f32.gmra.mrb[58].mxu1 %vm4950_vm2, %v5652_v51  ;;  %v5656_v51 = vsel %vm33712_vm13, %v28868_v14, 0.0 }
 0x314   : > { %23902 = vmatprep.mubr.msk.f32.mxu1 %vm4950_vm2, %v28856_v37 }
 0x317   : > { %23903 = vmatmul.mubr.msk.f32.gmra.mrb[60].mxu1 %vm4950_vm2, %v5654_v62  ;;  %v6879_v62 = vld [vmem:[%s32723_s2 + $0x28] sm:$0xff] }
 0x318   : > { %23905 = vmatprep.mubr.msk.f32.mxu1 %vm4950_vm2, %v28866_v53 }
 0x31b   : > { %23906 = vmatmul.mubr.msk.f32.gmra.mrb[62].mxu1 %vm4950_vm2, %v5656_v51  ;;  %v6057_v51 = vsel %vm27705_vm7, %v28631_v21, 0.0 }
 0x31c   : > { %23910 = vmatprep.mubr.msk.f32.mxu1 %vm4950_vm2, %v6043_v18  ;;  %v6047_v18 = vsel %vm33785_vm8, %v28581_v45, 0.0 }
 0x31f   : > { %23911 = vmatmul.mubr.msk.f32.vlgmr.msra.gmra.mrb[32].mxu1 %vm4950_vm2, %v28573_v25  ;;  %v6055_v25 = vsel %vm33621_vm1, %v28621_v57, 0.0 }
 0x320   : > { %23959 = vmatpush3.msra.mxu1 %v28721_v9  ;;  %23913 = vmatprep.mubr.msk.f32.mxu1 %vm4950_vm2, %v6045_v33  ;;  %v6051_v33 = vsel %vm33751_vm11, %v28601_v23, 0.0  ;;  %v6053_v9 = vsel %vm33752_vm0, %v28611_v56, 0.0 }
 0x321   : > { %24008 = vmatprep.subr.mxu1 %v6879_v62 }
 0x323   : > { %23914 = vmatmul.mubr.msk.f32.gmra.mrb[34].mxu1 %vm4950_vm2, %v28583_v6 }
 0x324   : > { %23916 = vmatprep.mubr.msk.f32.mxu1 %vm4950_vm2, %v6047_v18  ;;  %v6059_v18 = vsel %vm27734_vm6, %v28641_v60, 0.0  ;;  %vm33787_vm6 = vnez %v33439_v59 }
 0x327   : > { %23917 = vmatmul.mubr.msk.f32.gmra.mrb[36].mxu1 %vm4950_vm2, %v28593_v39 }
 0x328   : > { %23919 = vmatprep.mubr.msk.f32.mxu1 %vm4950_vm2, %v6049_v17  ;;  %v6061_v17 = vsel %vm27764_vm5, %v28651_v19, 0.0  ;;  %vm33788_vm5 = vnez %v33447_v48  ;;  %v28968_v48 = vld [vmem:[#allocation2 + $0x100] sm:$0xff] }
 0x32b   : > { %23920 = vmatmul.mubr.msk.f32.gmra.mrb[38].mxu1 %vm4950_vm2, %v28603_v3 }
 0x32c   : > { %23922 = vmatprep.mubr.msk.f32.mxu1 %vm4950_vm2, %v6051_v33  ;;  %v6063_v33 = vsel %vm27788_vm4, %v28661_v27, 0.0 }
 0x32f   : > { %23923 = vmatmul.mubr.msk.f32.gmra.mrb[40].mxu1 %vm4950_vm2, %v28613_v11 }
 0x330   : > { %23925 = vmatprep.mubr.msk.f32.mxu1 %vm4950_vm2, %v6053_v9  ;;  %v6065_v9 = vsel %vm33787_vm6, %v28671_v29, 0.0 }
 0x333   : > { %23926 = vmatmul.mubr.msk.f32.gmra.mrb[42].mxu1 %vm4950_vm2, %v28623_v13 }
 0x334   : > { %23928 = vmatprep.mubr.msk.f32.mxu1 %vm4950_vm2, %v6055_v25  ;;  %v6067_v25 = vsel %vm33788_vm5, %v28681_v22, 0.0 }
 0x337   : > { %23929 = vmatmul.mubr.msk.f32.gmra.mrb[44].mxu1 %vm4950_vm2, %v28633_v49 }
 0x338   : > { %23931 = vmatprep.mubr.msk.f32.mxu1 %vm4950_vm2, %v6057_v51  ;;  %v33789_v51 = vld [vmem:[#allocation15_spill] sm:$0xff] }
 0x339   : > { %33795 = vst [vmem:[#allocation15_spill] sm:$0xff] %v28968_v48 }
 0x33b   : > { %23932 = vmatmul.mubr.msk.f32.gmra.mrb[46].mxu1 %vm4950_vm2, %v28643_v5 }
 0x33c   : > { %23934 = vmatprep.mubr.msk.f32.mxu1 %vm4950_vm2, %v6059_v18  ;;  %v33790_v18 = vld [vmem:[#allocation64_spill] sm:$0xff] }
 0x33d   : > { %vm33791_vm4 = vnez %v33790_v18 }
 0x33f   : > { %23935 = vmatmul.mubr.msk.f32.gmra.mrb[48].mxu1 %vm4950_vm2, %v28653_v35 }
 0x340   : > { %23937 = vmatprep.mubr.msk.f32.mxu1 %vm4950_vm2, %v6061_v17  ;;  %v6069_v17 = vsel %vm33791_vm4, %v28691_v15, 0.0 }
 0x343   : > { %23938 = vmatmul.mubr.msk.f32.gmra.mrb[50].mxu1 %vm4950_vm2, %v28663_v41 }
 0x344   : > { %23940 = vmatprep.mubr.msk.f32.mxu1 %vm4950_vm2, %v6063_v33  ;;  %v33792_v33 = vld [vmem:[#allocation54_spill] sm:$0xff] }
 0x347   : > { %23941 = vmatmul.mubr.msk.f32.gmra.mrb[52].mxu1 %vm4950_vm2, %v28673_v40 }
 0x348   : > { %23943 = vmatprep.mubr.msk.f32.mxu1 %vm4950_vm2, %v6065_v9  ;;  %v33793_v9 = vld [vmem:[#allocation65_spill] sm:$0xff] }
 0x349   : > { %vm33794_vm6 = vnez %v33793_v9  ;;  %v33799_v9 = vld [vmem:[#allocation26_spill] sm:$0xff] }
 0x34a   : > { %v6071_v59 = vsel %vm33794_vm6, %v28701_v26, 0.0  ;;  %v33800_v26 = vld [vmem:[#allocation28_spill] sm:$0xff] }
 0x34b   : > { %23944 = vmatmul.mubr.msk.f32.gmra.mrb[54].mxu1 %vm4950_vm2, %v28683_v42 }
 0x34c   : > { %23946 = vmatprep.mubr.msk.f32.mxu1 %vm4950_vm2, %v6067_v25  ;;  %v33796_v25 = vld [vmem:[#allocation66_spill] sm:$0xff] }
 0x34d   : > { %vm33797_vm5 = vnez %v33796_v25  ;;  %v33801_v25 = vld [vmem:[#allocation32_spill] sm:$0xff] }
 0x34e   : > { %v6073_v18 = vsel %vm33797_vm5, %v28968_v48, 0.0  ;;  %v33803_v48 = vld [vmem:[#allocation37_spill] sm:$0xff] }
 0x34f   : > { %23947 = vmatmul.mubr.msk.f32.gmra.mrb[56].mxu1 %vm4950_vm2, %v33789_v51 }
 0x350   : > { %23949 = vmatprep.mubr.msk.f32.mxu1 %vm4950_vm2, %v6069_v17  ;;  %v28976_v17 = vld [vmem:[#allocation2 + $0x108] sm:$0xff] }
 0x351   : > { %33798 = vst [vmem:[#allocation54_spill] sm:$0xff] %v28976_v17 }
 0x353   : > { %23950 = vmatmul.mubr.msk.f32.gmra.mrb[58].mxu1 %vm4950_vm2, %v33792_v33 }
 0x354   : > { %23952 = vmatprep.mubr.msk.f32.mxu1 %vm4950_vm2, %v6071_v59  ;;  %v7297_v59 = vld [vmem:[%s32723_s2 + $0x30] sm:$0xff] }
 0x357   : > { %23953 = vmatmul.mubr.msk.f32.gmra.mrb[60].mxu1 %vm4950_vm2, %v28711_v31  ;;  %v33806_v31 = vld [vmem:[#allocation44_spill] sm:$0xff] }
 0x358   : > { %23955 = vmatprep.mubr.msk.f32.mxu1 %vm4950_vm2, %v6073_v18  ;;  %v33802_v18 = vld [vmem:[#allocation34_spill] sm:$0xff] }
 0x35b   : > { %23956 = vmatmul.mubr.msk.f32.gmra.mrb[62].mxu1 %vm4950_vm2, %v28976_v17  ;;  %v33804_v17 = vld [vmem:[#allocation39_spill] sm:$0xff] }
 0x35c   : > { %23960 = vmatprep.mubr.msk.f32.mxu1 %vm4950_vm2, %v33799_v9  ;;  %v33805_v9 = vld [vmem:[#allocation42_spill] sm:$0xff] }
 0x35f   : > { %23961 = vmatmul.mubr.msk.f32.vlgmr.msra.gmra.mrb[32].mxu1 %vm4950_vm2, %v33800_v26  ;;  %v33807_v26 = vld [vmem:[#allocation47_spill] sm:$0xff] }
 0x360   : > { %24009 = vmatpush3.msra.mxu1 %v6879_v62  ;;  %23963 = vmatprep.mubr.msk.f32.mxu1 %vm4950_vm2, %v33801_v25  ;;  %v33808_v62 = vld [vmem:[#allocation49_spill] sm:$0xff]  ;;  %v33809_v25 = vld [vmem:[#allocation51_spill] sm:$0xff] }
 0x361   : > { %24058 = vmatprep.subr.mxu1 %v7297_v59 }
 0x363   : > { %23964 = vmatmul.mubr.msk.f32.gmra.mrb[34].mxu1 %vm4950_vm2, %v33802_v18  ;;  %v33810_v18 = vld [vmem:[#allocation53_spill] sm:$0xff] }
 0x364   : > { %23966 = vmatprep.mubr.msk.f32.mxu1 %vm4950_vm2, %v33803_v48  ;;  %v33811_v48 = vld [vmem:[#allocation56_spill] sm:$0xff] }
 0x367   : > { %23967 = vmatmul.mubr.msk.f32.gmra.mrb[36].mxu1 %vm4950_vm2, %v33804_v17  ;;  %v33812_v17 = vld [vmem:[#allocation25_spill] sm:$0xff] }
 0x368   : > { %23969 = vmatprep.mubr.msk.f32.mxu1 %vm4950_vm2, %v33805_v9  ;;  %v33813_v9 = vld [vmem:[#allocation30_spill] sm:$0xff] }
 0x36b   : > { %23970 = vmatmul.mubr.msk.f32.gmra.mrb[38].mxu1 %vm4950_vm2, %v33806_v31  ;;  %v33814_v31 = vld [vmem:[#allocation31_spill] sm:$0xff] }
 0x36c   : > { %23972 = vmatprep.mubr.msk.f32.mxu1 %vm4950_vm2, %v33807_v26  ;;  %v33815_v26 = vld [vmem:[#allocation4_spill] sm:$0xff] }
 0x36f   : > { %23973 = vmatmul.mubr.msk.f32.gmra.mrb[40].mxu1 %vm4950_vm2, %v33808_v62  ;;  %v33816_v62 = vld [vmem:[#allocation35_spill] sm:$0xff] }
 0x370   : > { %23975 = vmatprep.mubr.msk.f32.mxu1 %vm4950_vm2, %v33809_v25  ;;  %v33817_v25 = vld [vmem:[#allocation36_spill] sm:$0xff] }
 0x373   : > { %23976 = vmatmul.mubr.msk.f32.gmra.mrb[42].mxu1 %vm4950_vm2, %v33810_v18  ;;  %v33818_v18 = vld [vmem:[#allocation6_spill] sm:$0xff] }
 0x374   : > { %23978 = vmatprep.mubr.msk.f32.mxu1 %vm4950_vm2, %v33811_v48  ;;  %v33819_v48 = vld [vmem:[#allocation7_spill] sm:$0xff] }
 0x377   : > { %23979 = vmatmul.mubr.msk.f32.gmra.mrb[44].mxu1 %vm4950_vm2, %v33812_v17  ;;  %v33820_v17 = vld [vmem:[#allocation40_spill] sm:$0xff] }
 0x378   : > { %23981 = vmatprep.mubr.msk.f32.mxu1 %vm4950_vm2, %v33813_v9  ;;  %v33821_v9 = vld [vmem:[#allocation41_spill] sm:$0xff] }
 0x37b   : > { %23982 = vmatmul.mubr.msk.f32.gmra.mrb[46].mxu1 %vm4950_vm2, %v33814_v31  ;;  %v33822_v31 = vld [vmem:[#allocation9_spill] sm:$0xff] }
 0x37c   : > { %23984 = vmatprep.mubr.msk.f32.mxu1 %vm4950_vm2, %v33815_v26  ;;  %v33823_v26 = vld [vmem:[#allocation10_spill] sm:$0xff] }
 0x37f   : > { %23985 = vmatmul.mubr.msk.f32.gmra.mrb[48].mxu1 %vm4950_vm2, %v33816_v62  ;;  %v33824_v62 = vld [vmem:[#allocation45_spill] sm:$0xff] }
 0x380   : > { %23987 = vmatprep.mubr.msk.f32.mxu1 %vm4950_vm2, %v33817_v25  ;;  %v33825_v25 = vld [vmem:[#allocation46_spill] sm:$0xff] }
 0x383   : > { %23988 = vmatmul.mubr.msk.f32.gmra.mrb[50].mxu1 %vm4950_vm2, %v33818_v18  ;;  %v33826_v18 = vld [vmem:[#allocation12_spill] sm:$0xff] }
 0x384   : > { %23990 = vmatprep.mubr.msk.f32.mxu1 %vm4950_vm2, %v33819_v48  ;;  %v33827_v48 = vld [vmem:[#allocation13_spill] sm:$0xff] }
 0x387   : > { %23991 = vmatmul.mubr.msk.f32.gmra.mrb[52].mxu1 %vm4950_vm2, %v33820_v17  ;;  %v33828_v17 = vld [vmem:[#allocation50_spill] sm:$0xff] }
 0x388   : > { %23993 = vmatprep.mubr.msk.f32.mxu1 %vm4950_vm2, %v33821_v9  ;;  %v29043_v9 = vld [vmem:[#allocation2 + $0x101] sm:$0xff] }
 0x38b   : > { %23994 = vmatmul.mubr.msk.f32.gmra.mrb[54].mxu1 %vm4950_vm2, %v33822_v31  ;;  %v29047_v31 = vld [vmem:[#allocation2 + $0x109] sm:$0xff] }
 0x38c   : > { %23996 = vmatprep.mubr.msk.f32.mxu1 %vm4950_vm2, %v33823_v26  ;;  %33829 = vst [vmem:[#allocation26_spill] sm:$0xff] %v29047_v31  ;;  %v33830_v26 = vld [vmem:[#allocation18_spill] sm:$0xff] }
 0x38f   : > { %23997 = vmatmul.mubr.msk.f32.gmra.mrb[56].mxu1 %vm4950_vm2, %v33824_v62  ;;  %v33831_v62 = vld [vmem:[#allocation3_spill] sm:$0xff] }
 0x390   : > { %23999 = vmatprep.mubr.msk.f32.mxu1 %vm4950_vm2, %v33825_v25  ;;  %vm33832_vm5 = vnez %v33831_v62 }
 0x391   : > { %v6848_v25 = vsel %vm33832_vm5, %v28726_v46, 0.0  ;;  %v33837_v46 = vld [vmem:[#allocation8_spill] sm:$0xff] }
 0x392   : > { %vm33838_vm5 = vnez %v33837_v46  ;;  %v33845_v46 = vld [vmem:[#allocation61_spill] sm:$0xff] }
 0x393   : > { %24000 = vmatmul.mubr.msk.f32.gmra.mrb[58].mxu1 %vm4950_vm2, %v33826_v18  ;;  %v7683_v18 = vld [vmem:[%s32723_s2 + $0x38] sm:$0xff]  ;;  %v6852_v62 = vsel %vm33838_vm5, %v28748_v47, 0.0 }
 0x394   : > { %24002 = vmatprep.mubr.msk.f32.mxu1 %vm4950_vm2, %v33827_v48  ;;  %v33833_v48 = vld [vmem:[#allocation19_spill] sm:$0xff] }
 0x397   : > { %24003 = vmatmul.mubr.msk.f32.gmra.mrb[60].mxu1 %vm4950_vm2, %v33828_v17  ;;  %v33834_v17 = vld [vmem:[#allocation5_spill] sm:$0xff] }
 0x398   : > { %24005 = vmatprep.mubr.msk.f32.mxu1 %vm4950_vm2, %v29043_v9  ;;  %vm33835_vm6 = vnez %v33834_v17  ;;  %v33842_v17 = vld [vmem:[#allocation59_spill] sm:$0xff] }
 0x39b   : > { %24006 = vmatmul.mubr.msk.f32.gmra.mrb[62].mxu1 %vm4950_vm2, %v29047_v31  ;;  %v6850_v31 = vsel %vm33835_vm6, %v28738_v16, 0.0 }
 0x39c   : > { %24010 = vmatprep.mubr.msk.f32.mxu1 %vm4950_vm2, %v33830_v26  ;;  %v33836_v26 = vld [vmem:[#allocation22_spill] sm:$0xff] }
 0x39f   : > { %24011 = vmatmul.mubr.msk.f32.vlgmr.msra.gmra.mrb[32].mxu1 %vm4950_vm2, %v6848_v25  ;;  %v33840_v25 = vld [vmem:[#allocation11_spill] sm:$0xff] }
 0x3a0   : > { %24059 = vmatpush3.msra.mxu1 %v7297_v59  ;;  %24013 = vmatprep.mubr.msk.f32.mxu1 %vm4950_vm2, %v33833_v48  ;;  %v33839_v59 = vld [vmem:[#allocation58_spill] sm:$0xff]  ;;  %vm33841_vm4 = vnez %v33840_v25  ;;  %v33848_v25 = vld [vmem:[#allocation21_spill] sm:$0xff] }
 0x3a1   : > { %24108 = vmatprep.subr.mxu1 %v7683_v18  ;;  %v6854_v48 = vsel %vm33841_vm4, %v28758_v32, 0.0 }
 0x3a3   : > { %24014 = vmatmul.mubr.msk.f32.gmra.mrb[34].mxu1 %vm4950_vm2, %v6850_v31  ;;  %v33843_v31 = vld [vmem:[#allocation14_spill] sm:$0xff] }
 0x3a4   : > { %24016 = vmatprep.mubr.msk.f32.mxu1 %vm4950_vm2, %v33836_v26  ;;  %vm33844_vm6 = vnez %v33843_v31  ;;  %v33851_v31 = vld [vmem:[#allocation24_spill] sm:$0xff] }
 0x3a5   : > { %v6856_v26 = vsel %vm33844_vm6, %v28768_v0, 0.0 }
 0x3a7   : > { %24017 = vmatmul.mubr.msk.f32.gmra.mrb[36].mxu1 %vm4950_vm2, %v6852_v62  ;;  %v33846_v62 = vld [vmem:[#allocation17_spill] sm:$0xff] }
 0x3a8   : > { %24019 = vmatprep.mubr.msk.f32.mxu1 %vm4950_vm2, %v33839_v59  ;;  %vm33847_vm5 = vnez %v33846_v62  ;;  %v33853_v62 = vld [vmem:[#allocation29_spill] sm:$0xff] }
 0x3a9   : > { %v6858_v59 = vsel %vm33847_vm5, %v28778_v10, 0.0 }
 0x3ab   : > { %24020 = vmatmul.mubr.msk.f32.gmra.mrb[38].mxu1 %vm4950_vm2, %v6854_v48  ;;  %v33849_v48 = vld [vmem:[#allocation20_spill] sm:$0xff] }
 0x3ac   : > { %24022 = vmatprep.mubr.msk.f32.mxu1 %vm4950_vm2, %v33842_v17  ;;  %vm33850_vm4 = vnez %v33849_v48  ;;  %v33856_v48 = vld [vmem:[#allocation67_spill] sm:$0xff] }
 0x3ad   : > { %v6860_v17 = vsel %vm33850_vm4, %v28788_v20, 0.0 }
 0x3af   : > { %24023 = vmatmul.mubr.msk.f32.gmra.mrb[40].mxu1 %vm4950_vm2, %v6856_v26  ;;  %v33859_v26 = vld [vmem:[#allocation68_spill] sm:$0xff] }
 0x3b0   : > { %24025 = vmatprep.mubr.msk.f32.mxu1 %vm4950_vm2, %v33845_v46  ;;  %v6862_v46 = vsel %vm33774_vm15, %v28798_v28, 0.0 }
 0x3b3   : > { %24026 = vmatmul.mubr.msk.f32.gmra.mrb[42].mxu1 %vm4950_vm2, %v6858_v59  ;;  %v33854_v59 = vld [vmem:[#allocation27_spill] sm:$0xff] }
 0x3b4   : > { %24028 = vmatprep.mubr.msk.f32.mxu1 %vm4950_vm2, %v33848_v25  ;;  %vm33855_vm5 = vnez %v33854_v59  ;;  %v33862_v59 = vld [vmem:[#allocation69_spill] sm:$0xff] }
 0x3b5   : > { %v6864_v25 = vsel %vm33855_vm5, %v28808_v36, 0.0 }
 0x3b7   : > { %24029 = vmatmul.mubr.msk.f32.gmra.mrb[44].mxu1 %vm4950_vm2, %v6860_v17  ;;  %v33857_v17 = vld [vmem:[#allocation33_spill] sm:$0xff] }
 0x3b8   : > { %24031 = vmatprep.mubr.msk.f32.mxu1 %vm4950_vm2, %v33851_v31  ;;  %vm33858_vm4 = vnez %v33857_v17  ;;  %v33864_v17 = vld [vmem:[#allocation70_spill] sm:$0xff] }
 0x3b9   : > { %v6866_v31 = vsel %vm33858_vm4, %v28818_v44, 0.0 }
 0x3bb   : > { %24032 = vmatmul.mubr.msk.f32.gmra.mrb[46].mxu1 %vm4950_vm2, %v6862_v46  ;;  %v33860_v46 = vld [vmem:[#allocation38_spill] sm:$0xff] }
 0x3bc   : > { %24034 = vmatprep.mubr.msk.f32.mxu1 %vm4950_vm2, %v33853_v62  ;;  %vm33861_vm15 = vnez %v33860_v46 }
 0x3bd   : > { %v6868_v62 = vsel %vm33861_vm15, %v28828_v55, 0.0 }
 0x3bf   : > { %24035 = vmatmul.mubr.msk.f32.gmra.mrb[48].mxu1 %vm4950_vm2, %v6864_v25  ;;  %v6876_v25 = vsel %vm33708_vm12, %v28868_v14, 0.0  ;;  %vm33869_vm12 = vnez %v33746_v52 }
 0x3c0   : > { %24037 = vmatprep.mubr.msk.f32.mxu1 %vm4950_vm2, %v33856_v48  ;;  %v6870_v48 = vsel %vm33781_vm3, %v28838_v12, 0.0  ;;  %v7267_v43 = vsel %vm33869_vm12, %v28581_v45, 0.0  ;;  %v7271_v45 = vsel %vm33786_vm14, %v28601_v23, 0.0  ;;  %v33884_v23 = vld [vmem:[#allocation54_spill] sm:$0xff] }
 0x3c3   : > { %24038 = vmatmul.mubr.msk.f32.gmra.mrb[50].mxu1 %vm4950_vm2, %v6866_v31  ;;  %v29144_v31 = vld [vmem:[#allocation2 + $0x102] sm:$0xff] }
 0x3c4   : > { %24040 = vmatprep.mubr.msk.f32.mxu1 %vm4950_vm2, %v33859_v26  ;;  %v6872_v26 = vsel %vm33783_vm10, %v28848_v54, 0.0 }
 0x3c7   : > { %24041 = vmatmul.mubr.msk.f32.gmra.mrb[52].mxu1 %vm4950_vm2, %v6868_v62  ;;  %v6874_v62 = vsel %vm33700_vm9, %v28858_v63, 0.0  ;;  %vm33868_vm9 = vnez %v33743_v7 }
 0x3c8   : > { %24043 = vmatprep.mubr.msk.f32.mxu1 %vm4950_vm2, %v33862_v59 }
 0x3cb   : > { %24044 = vmatmul.mubr.msk.f32.gmra.mrb[54].mxu1 %vm4950_vm2, %v6870_v48  ;;  %v7265_v48 = vsel %vm33868_vm9, %v28570_v1, 0.0  ;;  %v7269_v1 = vsel %vm33785_vm8, %v28591_v2, 0.0 }
 0x3cc   : > { %24046 = vmatprep.mubr.msk.f32.mxu1 %vm4950_vm2, %v33864_v17 }
 0x3cf   : > { %24047 = vmatmul.mubr.msk.f32.gmra.mrb[56].mxu1 %vm4950_vm2, %v6872_v26  ;;  %v29146_v26 = vld [vmem:[#allocation2 + $0x10a] sm:$0xff] }
 0x3d0   : > { %24049 = vmatprep.mubr.msk.f32.mxu1 %vm4950_vm2, %v28856_v37 }
 0x3d3   : > { %24050 = vmatmul.mubr.msk.f32.gmra.mrb[58].mxu1 %vm4950_vm2, %v6874_v62  ;;  %v6878_v62 = vsel %vm33712_vm13, %v29146_v26, 0.0 }
 0x3d4   : > { %24052 = vmatprep.mubr.msk.f32.mxu1 %vm4950_vm2, %v28866_v53 }
 0x3d7   : > { %24053 = vmatmul.mubr.msk.f32.gmra.mrb[60].mxu1 %vm4950_vm2, %v6876_v25  ;;  %v8101_v25 = vld [vmem:[%s32723_s2 + $0x40] sm:$0xff] }
 0x3d8   : > { %24055 = vmatprep.mubr.msk.f32.mxu1 %vm4950_vm2, %v29144_v31 }
 0x3db   : > { %24056 = vmatmul.mubr.msk.f32.gmra.mrb[62].mxu1 %vm4950_vm2, %v6878_v62  ;;  %v7655_v62 = vld [vmem:[#allocation2 + $0x41] sm:$0xff] }
 0x3dc   : > { %24060 = vmatprep.mubr.msk.f32.mxu1 %vm4950_vm2, %v7265_v48  ;;  %v7654_v48 = vld [vmem:[#allocation2 + $0x39] sm:$0xff] }
 0x3df   : > { %24061 = vmatmul.mubr.msk.f32.vlgmr.msra.gmra.mrb[32].mxu1 %vm4950_vm2, %v28583_v6  ;;  %v7264_v6 = vld [vmem:[#allocation2 + $0x118] sm:$0xff] }
 0x3e0   : > { %24109 = vmatpush3.msra.mxu1 %v7683_v18  ;;  %24063 = vmatprep.mubr.msk.f32.mxu1 %vm4950_vm2, %v7267_v43  ;;  %v7273_v43 = vsel %vm33751_vm11, %v28611_v56, 0.0  ;;  %v7653_v18 = vld [vmem:[#allocation2 + $0x31] sm:$0xff] }
 0x3e1   : > { %24158 = vmatprep.subr.mxu1 %v8101_v25 }
 0x3e3   : > { %24064 = vmatmul.mubr.msk.f32.gmra.mrb[34].mxu1 %vm4950_vm2, %v28593_v39  ;;  %v33885_v39 = vld [vmem:[#allocation66_spill] sm:$0xff] }
 0x3e4   : > { %24066 = vmatprep.mubr.msk.f32.mxu1 %vm4950_vm2, %v7269_v1  ;;  %v7656_v1 = vld [vmem:[#allocation2 + $0x49] sm:$0xff] }
 0x3e7   : > { %24067 = vmatmul.mubr.msk.f32.gmra.mrb[36].mxu1 %vm4950_vm2, %v28603_v3  ;;  %v7275_v3 = vsel %vm33752_vm0, %v28621_v57, 0.0  ;;  %vm33870_vm0 = vnez %v33418_v58  ;;  %v33882_v57 = vld [vmem:[#allocation65_spill] sm:$0xff] }
 0x3e8   : > { %24069 = vmatprep.mubr.msk.f32.mxu1 %vm4950_vm2, %v7271_v45  ;;  %v7657_v45 = vld [vmem:[#allocation2 + $0x51] sm:$0xff] }
 0x3eb   : > { %24070 = vmatmul.mubr.msk.f32.gmra.mrb[38].mxu1 %vm4950_vm2, %v28613_v11  ;;  %v7277_v11 = vsel %vm33621_vm1, %v28631_v21, 0.0  ;;  %vm33871_vm1 = vnez %v33429_v34  ;;  %v33881_v21 = vld [vmem:[#allocation15_spill] sm:$0xff] }
 0x3ec   : > { %24072 = vmatprep.mubr.msk.f32.mxu1 %vm4950_vm2, %v7273_v43  ;;  %v7658_v43 = vld [vmem:[#allocation2 + $0x59] sm:$0xff] }
 0x3ef   : > { %24073 = vmatmul.mubr.msk.f32.gmra.mrb[40].mxu1 %vm4950_vm2, %v28623_v13  ;;  %v7279_v13 = vsel %vm27705_vm7, %v28641_v60, 0.0  ;;  %vm33872_vm7 = vnez %v33434_v30 }
 0x3f0   : > { %24075 = vmatprep.mubr.msk.f32.mxu1 %vm4950_vm2, %v7275_v3  ;;  %v7659_v3 = vld [vmem:[#allocation2 + $0x61] sm:$0xff] }
 0x3f3   : > { %24076 = vmatmul.mubr.msk.f32.gmra.mrb[42].mxu1 %vm4950_vm2, %v28633_v49  ;;  %v7281_v49 = vsel %vm33870_vm0, %v28651_v19, 0.0 }
 0x3f4   : > { %24078 = vmatprep.mubr.msk.f32.mxu1 %vm4950_vm2, %v7277_v11  ;;  %v7661_v11 = vld [vmem:[#allocation2 + $0x71] sm:$0xff] }
 0x3f7   : > { %24079 = vmatmul.mubr.msk.f32.gmra.mrb[44].mxu1 %vm4950_vm2, %v28643_v5  ;;  %v7283_v5 = vsel %vm33871_vm1, %v28661_v27, 0.0 }
 0x3f8   : > { %24081 = vmatprep.mubr.msk.f32.mxu1 %vm4950_vm2, %v7279_v13  ;;  %v7662_v13 = vld [vmem:[#allocation2 + $0x79] sm:$0xff] }
 0x3fb   : > { %24082 = vmatmul.mubr.msk.f32.gmra.mrb[46].mxu1 %vm4950_vm2, %v28653_v35  ;;  %v7285_v35 = vsel %vm33872_vm7, %v28671_v29, 0.0  ;;  %v33877_v29 = vld [vmem:[#allocation16_spill] sm:$0xff] }
 0x3fc   : > { %24084 = vmatprep.mubr.msk.f32.mxu1 %vm4950_vm2, %v7281_v49  ;;  %v7663_v49 = vld [vmem:[#allocation2 + $0x81] sm:$0xff] }
 0x3ff   : > { %24085 = vmatmul.mubr.msk.f32.gmra.mrb[48].mxu1 %vm4950_vm2, %v28663_v41  ;;  %v33873_v41 = vld [vmem:[#allocation62_spill] sm:$0xff] }
 0x400   : > { %24087 = vmatprep.mubr.msk.f32.mxu1 %vm4950_vm2, %v7283_v5  ;;  %vm33874_vm0 = vnez %v33873_v41  ;;  %v7664_v5 = vld [vmem:[#allocation2 + $0x89] sm:$0xff] }
 0x401   : > { %v7287_v19 = vsel %vm33874_vm0, %v28681_v22, 0.0  ;;  %v33880_v22 = vld [vmem:[#allocation55_spill] sm:$0xff]  ;;  %vm33883_vm0 = vnez %v33882_v57 }
 0x402   : > { %v7293_v56 = vsel %vm33883_vm0, %v33881_v21, 0.0  ;;  %v7671_v21 = vld [vmem:[#allocation2 + $0xc1] sm:$0xff] }
 0x403   : > { %24088 = vmatmul.mubr.msk.f32.gmra.mrb[50].mxu1 %vm4950_vm2, %v28673_v40  ;;  %v33875_v40 = vld [vmem:[#allocation63_spill] sm:$0xff] }
 0x404   : > { %24090 = vmatprep.mubr.msk.f32.mxu1 %vm4950_vm2, %v7285_v35  ;;  %vm33876_vm1 = vnez %v33875_v40  ;;  %v7665_v35 = vld [vmem:[#allocation2 + $0x91] sm:$0xff] }
 0x405   : > { %v7289_v27 = vsel %vm33876_vm1, %v28691_v15, 0.0  ;;  %v7263_v15 = vld [vmem:[#allocation2 + $0x110] sm:$0xff]  ;;  %vm33886_vm1 = vnez %v33885_v39 }
 0x406   : > { %v7295_v2 = vsel %vm33886_vm1, %v7263_v15, 0.0  ;;  %v7673_v15 = vld [vmem:[#allocation2 + $0xd1] sm:$0xff] }
 0x407   : > { %24091 = vmatmul.mubr.msk.f32.gmra.mrb[52].mxu1 %vm4950_vm2, %v28683_v42  ;;  %v33878_v42 = vld [vmem:[#allocation64_spill] sm:$0xff] }
 0x408   : > { %24093 = vmatprep.mubr.msk.f32.mxu1 %vm4950_vm2, %v7287_v19  ;;  %vm33879_vm7 = vnez %v33878_v42  ;;  %v7666_v19 = vld [vmem:[#allocation2 + $0x99] sm:$0xff] }
 0x409   : > { %v7291_v60 = vsel %vm33879_vm7, %v33877_v29, 0.0  ;;  %v7668_v29 = vld [vmem:[#allocation2 + $0xa9] sm:$0xff] }
 0x40b   : > { %24094 = vmatmul.mubr.msk.f32.gmra.mrb[54].mxu1 %vm4950_vm2, %v33789_v51  ;;  %v7651_v51 = vld [vmem:[#allocation2 + $0x21] sm:$0xff] }
 0x40c   : > { %24096 = vmatprep.mubr.msk.f32.mxu1 %vm4950_vm2, %v7289_v27  ;;  %v7667_v27 = vld [vmem:[#allocation2 + $0xa1] sm:$0xff] }
 0x40f   : > { %24097 = vmatmul.mubr.msk.f32.gmra.mrb[56].mxu1 %vm4950_vm2, %v33792_v33  ;;  %v7652_v33 = vld [vmem:[#allocation2 + $0x29] sm:$0xff] }
 0x410   : > { %24099 = vmatprep.mubr.msk.f32.mxu1 %vm4950_vm2, %v7291_v60  ;;  %v7669_v60 = vld [vmem:[#allocation2 + $0xb1] sm:$0xff] }
 0x413   : > { %24100 = vmatmul.mubr.msk.f32.gmra.mrb[58].mxu1 %vm4950_vm2, %v33880_v22  ;;  %v7670_v22 = vld [vmem:[#allocation2 + $0xb9] sm:$0xff] }
 0x414   : > { %24102 = vmatprep.mubr.msk.f32.mxu1 %vm4950_vm2, %v7293_v56  ;;  %v7672_v56 = vld [vmem:[#allocation2 + $0xc9] sm:$0xff] }
 0x417   : > { %24103 = vmatmul.mubr.msk.f32.gmra.mrb[60].mxu1 %vm4950_vm2, %v33884_v23  ;;  %v7674_v23 = vld [vmem:[#allocation2 + $0xd9] sm:$0xff] }
 0x418   : > { %24105 = vmatprep.mubr.msk.f32.mxu1 %vm4950_vm2, %v7295_v2  ;;  %v7675_v2 = vld [vmem:[#allocation2 + $0xe1] sm:$0xff] }
 0x41b   : > { %24106 = vmatmul.mubr.msk.f32.gmra.mrb[62].mxu1 %vm4950_vm2, %v7264_v6  ;;  %v7676_v6 = vld [vmem:[#allocation2 + $0xe9] sm:$0xff] }
 0x41c   : > { %24110 = vmatprep.mubr.msk.f32.mxu1 %vm4950_vm2, %v7651_v51  ;;  %v7677_v51 = vld [vmem:[#allocation2 + $0xf1] sm:$0xff] }
 0x41f   : > { %24111 = vmatmul.mubr.msk.f32.vlgmr.msra.gmra.mrb[32].mxu1 %vm4950_vm2, %v7652_v33  ;;  %v7678_v33 = vld [vmem:[#allocation2 + $0xf9] sm:$0xff] }
 0x420   : > { %24159 = vmatpush3.msra.mxu1 %v8101_v25  ;;  %24113 = vmatprep.mubr.msk.f32.mxu1 %vm4950_vm2, %v7653_v18  ;;  %v7660_v25 = vld [vmem:[#allocation2 + $0x69] sm:$0xff]  ;;  %v7681_v18 = vld [vmem:[#allocation2 + $0x111] sm:$0xff] }
 0x423   : > { %24114 = vmatmul.mubr.msk.f32.gmra.mrb[34].mxu1 %vm4950_vm2, %v7654_v48  ;;  %v33887_v48 = vld [vmem:[#allocation26_spill] sm:$0xff] }
 0x424   : > { %24116 = vmatprep.mubr.msk.f32.mxu1 %vm4950_vm2, %v7655_v62  ;;  %v7682_v62 = vld [vmem:[#allocation2 + $0x119] sm:$0xff] }
 0x427   : > { %24117 = vmatmul.mubr.msk.f32.gmra.mrb[36].mxu1 %vm4950_vm2, %v7656_v1  ;;  %v33888_v1 = vld [vmem:[#allocation19_spill] sm:$0xff] }
 0x428   : > { %24119 = vmatprep.mubr.msk.f32.mxu1 %vm4950_vm2, %v7657_v45  ;;  %v33889_v45 = vld [vmem:[#allocation3_spill] sm:$0xff] }
 0x429   : > { %vm33890_vm1 = vnez %v33889_v45 }
 0x42b   : > { %24120 = vmatmul.mubr.msk.f32.gmra.mrb[38].mxu1 %vm4950_vm2, %v7658_v43  ;;  %v8070_v43 = vsel %vm33890_vm1, %v28738_v16, 0.0  ;;  %v33897_v16 = vld [vmem:[#allocation59_spill] sm:$0xff] }
 0x42c   : > { %24122 = vmatprep.mubr.msk.f32.mxu1 %vm4950_vm2, %v7659_v3  ;;  %v33891_v3 = vld [vmem:[#allocation22_spill] sm:$0xff] }
 0x42f   : > { %24123 = vmatmul.mubr.msk.f32.gmra.mrb[40].mxu1 %vm4950_vm2, %v7660_v25 }
 0x430   : > { %24125 = vmatprep.mubr.msk.f32.mxu1 %vm4950_vm2, %v7661_v11  ;;  %v33894_v11 = vld [vmem:[#allocation58_spill] sm:$0xff] }
 0x433   : > { %24126 = vmatmul.mubr.msk.f32.gmra.mrb[42].mxu1 %vm4950_vm2, %v7662_v13  ;;  %v33895_v13 = vld [vmem:[#allocation8_spill] sm:$0xff] }
 0x434   : > { %24128 = vmatprep.mubr.msk.f32.mxu1 %vm4950_vm2, %v7663_v49  ;;  %vm33896_vm7 = vnez %v33895_v13 }
 0x435   : > { %v8074_v49 = vsel %vm33896_vm7, %v28758_v32, 0.0  ;;  %v33902_v32 = vld [vmem:[#allocation21_spill] sm:$0xff] }
 0x437   : > { %24129 = vmatmul.mubr.msk.f32.gmra.mrb[44].mxu1 %vm4950_vm2, %v7664_v5  ;;  %v33898_v5 = vld [vmem:[#allocation11_spill] sm:$0xff] }
 0x438   : > { %24131 = vmatprep.mubr.msk.f32.mxu1 %vm4950_vm2, %v7665_v35  ;;  %vm33899_vm1 = vnez %v33898_v5 }
 0x439   : > { %v8076_v35 = vsel %vm33899_vm1, %v28768_v0, 0.0  ;;  %v33905_v0 = vld [vmem:[#allocation24_spill] sm:$0xff] }
 0x43b   : > { %24132 = vmatmul.mubr.msk.f32.gmra.mrb[46].mxu1 %vm4950_vm2, %v7666_v19  ;;  %v33901_v19 = vld [vmem:[#allocation14_spill] sm:$0xff] }
 0x43c   : > { %24134 = vmatprep.mubr.msk.f32.mxu1 %vm4950_vm2, %v7667_v27  ;;  %v8078_v27 = vsel %vm33844_vm6, %v28778_v10, 0.0  ;;  %v33908_v10 = vld [vmem:[#allocation29_spill] sm:$0xff] }
 0x43f   : > { %24135 = vmatmul.mubr.msk.f32.gmra.mrb[48].mxu1 %vm4950_vm2, %v7668_v29  ;;  %v33903_v29 = vld [vmem:[#allocation17_spill] sm:$0xff] }
 0x440   : > { %24137 = vmatprep.mubr.msk.f32.mxu1 %vm4950_vm2, %v7669_v60  ;;  %vm33904_vm7 = vnez %v33903_v29 }
 0x441   : > { %v8080_v60 = vsel %vm33904_vm7, %v28788_v20, 0.0  ;;  %v33911_v20 = vld [vmem:[#allocation67_spill] sm:$0xff] }
 0x443   : > { %24138 = vmatmul.mubr.msk.f32.gmra.mrb[50].mxu1 %vm4950_vm2, %v7670_v22  ;;  %v33906_v22 = vld [vmem:[#allocation20_spill] sm:$0xff] }
 0x444   : > { %24140 = vmatprep.mubr.msk.f32.mxu1 %vm4950_vm2, %v7671_v21  ;;  %vm33907_vm1 = vnez %v33906_v22 }
 0x445   : > { %v8082_v21 = vsel %vm33907_vm1, %v28798_v28, 0.0  ;;  %v33913_v28 = vld [vmem:[#allocation68_spill] sm:$0xff] }
 0x447   : > { %24141 = vmatmul.mubr.msk.f32.gmra.mrb[52].mxu1 %vm4950_vm2, %v7672_v56  ;;  %v33909_v56 = vld [vmem:[#allocation23_spill] sm:$0xff] }
 0x448   : > { %24143 = vmatprep.mubr.msk.f32.mxu1 %vm4950_vm2, %v7673_v15  ;;  %vm33910_vm6 = vnez %v33909_v56 }
 0x449   : > { %v8084_v15 = vsel %vm33910_vm6, %v28808_v36, 0.0  ;;  %v8090_v36 = vsel %vm33861_vm15, %v28838_v12, 0.0  ;;  %v33917_v12 = vld [vmem:[#allocation52_spill] sm:$0xff] }
 0x44a   : > { %vm33918_vm15 = vnez %v33917_v12 }
 0x44b   : > { %24144 = vmatmul.mubr.msk.f32.gmra.mrb[54].mxu1 %vm4950_vm2, %v7674_v23 }
 0x44c   : > { %24146 = vmatprep.mubr.msk.f32.mxu1 %vm4950_vm2, %v7675_v2  ;;  %v8086_v2 = vsel %vm33855_vm5, %v28818_v44, 0.0  ;;  %v33915_v44 = vld [vmem:[#allocation43_spill] sm:$0xff] }
 0x44f   : > { %24147 = vmatmul.mubr.msk.f32.gmra.mrb[56].mxu1 %vm4950_vm2, %v7676_v6  ;;  %v33914_v6 = vld [vmem:[#allocation33_spill] sm:$0xff] }
 0x450   : > { %24149 = vmatprep.mubr.msk.f32.mxu1 %vm4950_vm2, %v7677_v51  ;;  %v8088_v51 = vsel %vm33858_vm4, %v28828_v55, 0.0  ;;  %v33916_v55 = vld [vmem:[#allocation48_spill] sm:$0xff] }
 0x453   : > { %24150 = vmatmul.mubr.msk.f32.gmra.mrb[58].mxu1 %vm4950_vm2, %v7678_v33  ;;  %v8092_v33 = vsel %vm33781_vm3, %v28848_v54, 0.0  ;;  %v8067_v54 = vld [vmem:[#allocation2 + $0x112] sm:$0xff] }
 0x454   : > { %24152 = vmatprep.mubr.msk.f32.mxu1 %vm4950_vm2, %v29043_v9  ;;  %v33892_v9 = vld [vmem:[#allocation5_spill] sm:$0xff] }
 0x455   : > { %vm33893_vm0 = vnez %v33892_v9 }
 0x456   : > { %v8072_v25 = vsel %vm33893_vm0, %v28748_v47, 0.0  ;;  %v33900_v47 = vld [vmem:[#allocation61_spill] sm:$0xff] }
 0x457   : > { %24153 = vmatmul.mubr.msk.f32.gmra.mrb[60].mxu1 %vm4950_vm2, %v33887_v48 }
 0x458   : > { %24155 = vmatprep.mubr.msk.f32.mxu1 %vm4950_vm2, %v7681_v18  ;;  %v33919_v18 = vld [vmem:[#allocation57_spill] sm:$0xff] }
 0x459   : > { %vm33920_vm3 = vnez %v33919_v18 }
 0x45b   : > { %24156 = vmatmul.mubr.msk.f32.gmra.mrb[62].mxu1 %vm4950_vm2, %v7682_v62 }
 0x45c   : > { %24160 = vmatprep.mubr.msk.f32.mxu1 %vm4950_vm2, %v33888_v1  ;;  %v8778_v1 = vld [vmem:[#allocation2 + $0x1] sm:$0xff] }
 0x45f   : > { %24161 = vmatmul.mubr.msk.f32.vlgmr.msra.gmra.mrb[32].mxu1 %vm4950_vm2, %v8070_v43  ;;  %v8776_v43 = vld [vmem:[%s32724_s3] sm:$0xff] }
 0x460   : > { %24163 = vmatprep.mubr.msk.f32.mxu1 %vm4950_vm2, %v33891_v3  ;;  %v8777_v3 = vld [vmem:[%s32724_s3 + $0x8] sm:$0xf] }
 0x463   : > { %24164 = vmatmul.mubr.msk.f32.gmra.mrb[34].mxu1 %vm4950_vm2, %v8072_v25  ;;  %v25636_v25 = vpack.c.bf16 %v8777_v3, %v8776_v43 }
 0x464   : > { %24166 = vmatprep.mubr.msk.f32.mxu1 %vm4950_vm2, %v33894_v11  ;;  %v8779_v11 = vld [vmem:[#allocation2 + $0x9] sm:$0xff] }
 0x467   : > { %24167 = vmatmul.mubr.msk.f32.gmra.mrb[36].mxu1 %vm4950_vm2, %v8074_v49 }
 0x468   : > { %24169 = vmatprep.mubr.msk.f32.mxu1 %vm4950_vm2, %v33897_v16 }
 0x46b   : > { %24170 = vmatmul.mubr.msk.f32.gmra.mrb[38].mxu1 %vm4950_vm2, %v8076_v35 }
 0x46c   : > { %24172 = vmatprep.mubr.msk.f32.mxu1 %vm4950_vm2, %v33900_v47 }
 0x46f   : > { %24173 = vmatmul.mubr.msk.f32.gmra.mrb[40].mxu1 %vm4950_vm2, %v8078_v27 }
 0x470   : > { %24175 = vmatprep.mubr.msk.f32.mxu1 %vm4950_vm2, %v33902_v32 }
 0x473   : > { %24176 = vmatmul.mubr.msk.f32.gmra.mrb[42].mxu1 %vm4950_vm2, %v8080_v60 }
 0x474   : > { %24178 = vmatprep.mubr.msk.f32.mxu1 %vm4950_vm2, %v33905_v0 }
 0x477   : > { %24179 = vmatmul.mubr.msk.f32.gmra.mrb[44].mxu1 %vm4950_vm2, %v8082_v21 }
 0x478   : > { %24181 = vmatprep.mubr.msk.f32.mxu1 %vm4950_vm2, %v33908_v10 }
 0x47b   : > { %24182 = vmatmul.mubr.msk.f32.gmra.mrb[46].mxu1 %vm4950_vm2, %v8084_v15 }
 0x47c   : > { %24184 = vmatprep.mubr.msk.f32.mxu1 %vm4950_vm2, %v33911_v20 }
 0x47f   : > { %24185 = vmatmul.mubr.msk.f32.gmra.mrb[48].mxu1 %vm4950_vm2, %v8086_v2 }
 0x480   : > { %24187 = vmatprep.mubr.msk.f32.mxu1 %vm4950_vm2, %v33913_v28 }
 0x483   : > { %24188 = vmatmul.mubr.msk.f32.gmra.mrb[50].mxu1 %vm4950_vm2, %v8088_v51 }
 0x484   : > { %24190 = vmatprep.mubr.msk.f32.mxu1 %vm4950_vm2, %v33862_v59  ;;  %v8094_v59 = vsel %vm33783_vm10, %v28858_v63, 0.0  ;;  %v8098_v63 = vsel %vm33920_vm3, %v29146_v26, 0.0  ;;  %vm33922_vm3 = vcmask 1043456  }
 0x487   : > { %24191 = vmatmul.mubr.msk.f32.gmra.mrb[52].mxu1 %vm4950_vm2, %v8090_v36 }
 0x488   : > { %24193 = vmatprep.mubr.msk.f32.mxu1 %vm4950_vm2, %v33864_v17  ;;  %v8096_v17 = vsel %vm33918_vm15, %v28868_v14, 0.0  ;;  %v8810_v14 = vld [vmem:[%s32724_s3 + $0xc] sm:$0xff]  ;;  %vm27063_vm15 = vmmov 1  }
 0x489   : > { %vm29386_vm10 = vmpackc.low %vm33922_vm3, %vm27063_vm15 }
 0x48b   : > { %24194 = vmatmul.mubr.msk.f32.gmra.mrb[54].mxu1 %vm4950_vm2, %v8092_v33 }
 0x48c   : > { %24196 = vmatprep.mubr.msk.f32.mxu1 %vm4950_vm2, %v28856_v37  ;;  %v8068_v37 = vld [vmem:[#allocation2 + $0x11a] sm:$0xff] }
 0x48d   : > { %v8100_v48 = vsel %vm33712_vm13, %v8068_v37, 0.0 }
 0x48f   : > { %24197 = vmatmul.mubr.msk.f32.gmra.mrb[56].mxu1 %vm4950_vm2, %v8094_v59 }
 0x490   : > { %24199 = vmatprep.mubr.msk.f32.mxu1 %vm4950_vm2, %v28866_v53  ;;  %v33921_v53 = vld [vmem:[#allocation60_spill] sm:$0xff] }
 0x493   : > { %24200 = vmatmul.mubr.msk.f32.gmra.mrb[58].mxu1 %vm4950_vm2, %v8096_v17 }
 0x494   : > { %24202 = vmatprep.mubr.msk.f32.mxu1 %vm4950_vm2, %v29144_v31  ;;  %v8811_v31 = vld [vmem:[%s32724_s3 + $0x14] sm:$0xf] }
 0x495   : > { %v25630_v62 = vpack.c.bf16 %v8811_v31, %v8810_v14 }
 0x497   : > { %24203 = vmatmul.mubr.msk.f32.gmra.mrb[60].mxu1 %vm4950_vm2, %v8098_v63  ;;  %25632 = vmatprep.subr.msk.bf16.mxu0 %vm29386_vm10, %v25630_v62 }
 0x498   : > { %24205 = vmatprep.mubr.msk.f32.mxu1 %vm4950_vm2, %v8067_v54  ;;  %25635 = vmatpush3.bf16.msk.msra.mxu0 %vm29386_vm10, %v25630_v62 }
 0x499   : > { %25638 = vmatprep.subr.msk.bf16.mxu0 %vm29386_vm10, %v25636_v25 }
 0x49b   : > { %24206 = vmatmul.mubr.msk.f32.gmra.mrb[62].mxu1 %vm4950_vm2, %v8100_v48  ;;  %vm32978_vm2 = vcmask 97280  }
 0x49c   : > { %24212 = vmatprep.mubr.msk.f32.mxu0 %vm32978_vm2, %v8778_v1 }
 0x49d   : > { %24213 = vmatmul.mubr.msk.f32.vlgmr.msra.gmra.mrb[32].mxu0 %vm32978_vm2, %v8779_v11 }
 0x49e   : > { %25641 = vmatpush3.bf16.msk.msra.mxu0 %vm29386_vm10, %v25636_v25 }
 0x532   : > { %v24162_v49 = vpop.f32.mrb[32].mxu1 }
 0x533   : > { %vm8456_vm15 = vcmp.ge.f32.partialorder %v24162_v49, 0.0  ;;  %v8488_v16 = vmul.f32 0.2, %v24162_v49  ;;  %v8264_v35 = vpop.f32.mrb[33].mxu1 }
 0x534   : > { %vm8455_vm3 = vcmp.ge.f32.partialorder %v8264_v35, 0.0  ;;  %v8487_v47 = vmul.f32 0.2, %v8264_v35 }
 0x535   : > { %v8520_v27 = vsel %vm8456_vm15, %v24162_v49, %v8488_v16 }
 0x536   : > { %8585 = vrot.lane.b32.xlu1 %v8520_v27, %s27064_s9  ;;  %v24165_v32 = vpop.f32.mrb[34].mxu1  ;;  %v8519_v60 = vsel %vm8455_vm3, %v8264_v35, %v8487_v47 }
 0x537   : > { %vm8458_vm13 = vcmp.ge.f32.partialorder %v24165_v32, 0.0  ;;  %v8490_v0 = vmul.f32 0.2, %v24165_v32  ;;  %8583 = vrot.lane.b32.xlu0 %v8519_v60, %s27064_s9  ;;  %v8274_v21 = vpop.f32.mrb[35].mxu1 }
 0x538   : > { %vm8457_vm2 = vcmp.ge.f32.partialorder %v8274_v21, 0.0  ;;  %v8489_v10 = vmul.f32 0.2, %v8274_v21 }
 0x539   : > { %v8522_v15 = vsel %vm8458_vm13, %v24165_v32, %v8490_v0 }
 0x53a   : > { %8589 = vrot.lane.b32.xlu1 %v8522_v15, %s27064_s9  ;;  %v24168_v20 = vpop.f32.mrb[36].mxu1  ;;  %v8521_v2 = vsel %vm8457_vm2, %v8274_v21, %v8489_v10 }
 0x53b   : > { %vm8460_vm4 = vcmp.ge.f32.partialorder %v24168_v20, 0.0  ;;  %v8492_v28 = vmul.f32 0.2, %v24168_v20  ;;  %8587 = vrot.lane.b32.xlu0 %v8521_v2, %s27064_s9  ;;  %v8284_v51 = vpop.f32.mrb[37].mxu1 }
 0x53c   : > { %vm8459_vm15 = vcmp.ge.f32.partialorder %v8284_v51, 0.0  ;;  %v8491_v36 = vmul.f32 0.2, %v8284_v51 }
 0x53d   : > { %v8524_v33 = vsel %vm8460_vm4, %v24168_v20, %v8492_v28 }
 0x53e   : > { %8593 = vrot.lane.b32.xlu1 %v8524_v33, %s27064_s9  ;;  %v24171_v59 = vpop.f32.mrb[38].mxu1  ;;  %v8523_v17 = vsel %vm8459_vm15, %v8284_v51, %v8491_v36 }
 0x53f   : > { %vm8462_vm3 = vcmp.ge.f32.partialorder %v24171_v59, 0.0  ;;  %v8494_v54 = vmul.f32 0.2, %v24171_v59  ;;  %8591 = vrot.lane.b32.xlu0 %v8523_v17, %s27064_s9  ;;  %v8294_v37 = vpop.f32.mrb[39].mxu1 }
 0x540   : > { %vm8461_vm13 = vcmp.ge.f32.partialorder %v8294_v37, 0.0  ;;  %v8493_v63 = vmul.f32 0.2, %v8294_v37 }
 0x541   : > { %v8526_v48 = vsel %vm8462_vm3, %v24171_v59, %v8494_v54 }
 0x542   : > { %8597 = vrot.lane.b32.xlu1 %v8526_v48, %s27064_s9  ;;  %v24174_v14 = vpop.f32.mrb[40].mxu1  ;;  %v8525_v31 = vsel %vm8461_vm13, %v8294_v37, %v8493_v63 }
 0x543   : > { %vm8464_vm2 = vcmp.ge.f32.partialorder %v24174_v14, 0.0  ;;  %v8496_v62 = vmul.f32 0.2, %v24174_v14  ;;  %8595 = vrot.lane.b32.xlu0 %v8525_v31, %s27064_s9  ;;  %v8304_v1 = vpop.f32.mrb[41].mxu1 }
 0x544   : > { %vm8463_vm4 = vcmp.ge.f32.partialorder %v8304_v1, 0.0  ;;  %v8495_v43 = vmul.f32 0.2, %v8304_v1 }
 0x545   : > { %v8528_v3 = vsel %vm8464_vm2, %v24174_v14, %v8496_v62 }
 0x546   : > { %8601 = vrot.lane.b32.xlu1 %v8528_v3, %s27064_s9  ;;  %v24177_v25 = vpop.f32.mrb[42].mxu1  ;;  %v8527_v11 = vsel %vm8463_vm4, %v8304_v1, %v8495_v43 }
 0x547   : > { %vm8466_vm15 = vcmp.ge.f32.partialorder %v24177_v25, 0.0  ;;  %v8498_v49 = vmul.f32 0.2, %v24177_v25  ;;  %8599 = vrot.lane.b32.xlu0 %v8527_v11, %s27064_s9  ;;  %v8314_v16 = vpop.f32.mrb[43].mxu1 }
 0x548   : > { %vm8465_vm3 = vcmp.ge.f32.partialorder %v8314_v16, 0.0  ;;  %v8497_v35 = vmul.f32 0.2, %v8314_v16 }
 0x549   : > { %v8530_v47 = vsel %vm8466_vm15, %v24177_v25, %v8498_v49 }
 0x54a   : > { %8605 = vrot.lane.b32.xlu1 %v8530_v47, %s27064_s9  ;;  %v24180_v27 = vpop.f32.mrb[44].mxu1  ;;  %v8529_v32 = vsel %vm8465_vm3, %v8314_v16, %v8497_v35 }
 0x54b   : > { %vm8468_vm13 = vcmp.ge.f32.partialorder %v24180_v27, 0.0  ;;  %v8500_v60 = vmul.f32 0.2, %v24180_v27  ;;  %8603 = vrot.lane.b32.xlu0 %v8529_v32, %s27064_s9  ;;  %v8324_v0 = vpop.f32.mrb[45].mxu1 }
 0x54c   : > { %vm8467_vm2 = vcmp.ge.f32.partialorder %v8324_v0, 0.0  ;;  %v8499_v21 = vmul.f32 0.2, %v8324_v0 }
 0x54d   : > { %v8532_v10 = vsel %vm8468_vm13, %v24180_v27, %v8500_v60 }
 0x54e   : > { %8609 = vrot.lane.b32.xlu1 %v8532_v10, %s27064_s9  ;;  %v24183_v15 = vpop.f32.mrb[46].mxu1  ;;  %v8531_v20 = vsel %vm8467_vm2, %v8324_v0, %v8499_v21 }
 0x54f   : > { %vm8470_vm4 = vcmp.ge.f32.partialorder %v24183_v15, 0.0  ;;  %v8502_v2 = vmul.f32 0.2, %v24183_v15  ;;  %8607 = vrot.lane.b32.xlu0 %v8531_v20, %s27064_s9  ;;  %v8334_v28 = vpop.f32.mrb[47].mxu1 }
 0x550   : > { %vm8469_vm15 = vcmp.ge.f32.partialorder %v8334_v28, 0.0  ;;  %v8501_v51 = vmul.f32 0.2, %v8334_v28 }
 0x551   : > { %v8534_v36 = vsel %vm8470_vm4, %v24183_v15, %v8502_v2 }
 0x552   : > { %8613 = vrot.lane.b32.xlu1 %v8534_v36, %s27064_s9  ;;  %v24186_v33 = vpop.f32.mrb[48].mxu1  ;;  %v8533_v59 = vsel %vm8469_vm15, %v8334_v28, %v8501_v51 }
 0x553   : > { %vm8472_vm3 = vcmp.ge.f32.partialorder %v24186_v33, 0.0  ;;  %v8504_v17 = vmul.f32 0.2, %v24186_v33  ;;  %8611 = vrot.lane.b32.xlu0 %v8533_v59, %s27064_s9  ;;  %v8344_v54 = vpop.f32.mrb[49].mxu1 }
 0x554   : > { %vm8471_vm13 = vcmp.ge.f32.partialorder %v8344_v54, 0.0  ;;  %v8503_v37 = vmul.f32 0.2, %v8344_v54 }
 0x555   : > { %v8536_v63 = vsel %vm8472_vm3, %v24186_v33, %v8504_v17 }
 0x556   : > { %8617 = vrot.lane.b32.xlu1 %v8536_v63, %s27064_s9  ;;  %v24189_v48 = vpop.f32.mrb[50].mxu1  ;;  %v8535_v14 = vsel %vm8471_vm13, %v8344_v54, %v8503_v37 }
 0x557   : > { %vm8474_vm2 = vcmp.ge.f32.partialorder %v24189_v48, 0.0  ;;  %v8506_v31 = vmul.f32 0.2, %v24189_v48  ;;  %8615 = vrot.lane.b32.xlu0 %v8535_v14, %s27064_s9  ;;  %v8354_v62 = vpop.f32.mrb[51].mxu1 }
 0x558   : > { %vm8473_vm4 = vcmp.ge.f32.partialorder %v8354_v62, 0.0  ;;  %v8505_v1 = vmul.f32 0.2, %v8354_v62 }
 0x559   : > { %v8538_v43 = vsel %vm8474_vm2, %v24189_v48, %v8506_v31 }
 0x55a   : > { %8621 = vrot.lane.b32.xlu1 %v8538_v43, %s27064_s9  ;;  %v24192_v3 = vpop.f32.mrb[52].mxu1  ;;  %v8537_v25 = vsel %vm8473_vm4, %v8354_v62, %v8505_v1  ;;  %v9525_v1 = vld [vmem:[%s32724_s3 + $0x18] sm:$0xff] }
 0x55b   : > { %vm8476_vm15 = vcmp.ge.f32.partialorder %v24192_v3, 0.0  ;;  %v8508_v11 = vmul.f32 0.2, %v24192_v3  ;;  %8619 = vrot.lane.b32.xlu0 %v8537_v25, %s27064_s9  ;;  %v8364_v49 = vpop.f32.mrb[53].mxu1 }
 0x55c   : > { %vm8475_vm3 = vcmp.ge.f32.partialorder %v8364_v49, 0.0  ;;  %v8507_v16 = vmul.f32 0.2, %v8364_v49 }
 0x55d   : > { %v8540_v35 = vsel %vm8476_vm15, %v24192_v3, %v8508_v11  ;;  %v9526_v3 = vld [vmem:[%s32724_s3 + $0x20] sm:$0xf] }
 0x55e   : > { %8625 = vrot.lane.b32.xlu1 %v8540_v35, %s27064_s9  ;;  %v24195_v47 = vpop.f32.mrb[54].mxu1  ;;  %v8539_v27 = vsel %vm8475_vm3, %v8364_v49, %v8507_v16  ;;  %v29441_v49 = vpack.c.bf16 %v9526_v3, %v9525_v1 }
 0x55f   : > { %vm8478_vm13 = vcmp.ge.f32.partialorder %v24195_v47, 0.0  ;;  %v8510_v32 = vmul.f32 0.2, %v24195_v47  ;;  %8623 = vrot.lane.b32.xlu0 %v8539_v27, %s27064_s9  ;;  %v8374_v60 = vpop.f32.mrb[55].mxu1 }
 0x560   : > { %vm8477_vm2 = vcmp.ge.f32.partialorder %v8374_v60, 0.0  ;;  %v8509_v0 = vmul.f32 0.2, %v8374_v60  ;;  %25644 = vmatprep.subr.msk.bf16.mxu0 %vm29386_vm10, %v29441_v49 }
 0x561   : > { %v8542_v21 = vsel %vm8478_vm13, %v24195_v47, %v8510_v32 }
 0x562   : > { %8629 = vrot.lane.b32.xlu1 %v8542_v21, %s27064_s9  ;;  %v24198_v10 = vpop.f32.mrb[56].mxu1  ;;  %v8541_v15 = vsel %vm8477_vm2, %v8374_v60, %v8509_v0 }
 0x563   : > { %vm8480_vm4 = vcmp.ge.f32.partialorder %v24198_v10, 0.0  ;;  %v8512_v20 = vmul.f32 0.2, %v24198_v10  ;;  %8627 = vrot.lane.b32.xlu0 %v8541_v15, %s27064_s9  ;;  %v8384_v2 = vpop.f32.mrb[57].mxu1 }
 0x564   : > { %vm8479_vm15 = vcmp.ge.f32.partialorder %v8384_v2, 0.0  ;;  %v8511_v28 = vmul.f32 0.2, %v8384_v2 }
 0x565   : > { %v8544_v51 = vsel %vm8480_vm4, %v24198_v10, %v8512_v20 }
 0x566   : > { %8633 = vrot.lane.b32.xlu1 %v8544_v51, %s27064_s9  ;;  %v24201_v36 = vpop.f32.mrb[58].mxu1  ;;  %v8543_v33 = vsel %vm8479_vm15, %v8384_v2, %v8511_v28 }
 0x567   : > { %vm8482_vm3 = vcmp.ge.f32.partialorder %v24201_v36, 0.0  ;;  %v8514_v59 = vmul.f32 0.2, %v24201_v36  ;;  %8631 = vrot.lane.b32.xlu0 %v8543_v33, %s27064_s9  ;;  %v8394_v17 = vpop.f32.mrb[59].mxu1 }
 0x568   : > { %vm8481_vm13 = vcmp.ge.f32.partialorder %v8394_v17, 0.0  ;;  %v8513_v54 = vmul.f32 0.2, %v8394_v17 }
 0x569   : > { %v8546_v37 = vsel %vm8482_vm3, %v24201_v36, %v8514_v59 }
 0x56a   : > { %8637 = vrot.lane.b32.xlu1 %v8546_v37, %s27064_s9  ;;  %v24204_v63 = vpop.f32.mrb[60].mxu1  ;;  %v8545_v48 = vsel %vm8481_vm13, %v8394_v17, %v8513_v54  ;;  %vm8679_vm13 = vcmask 97344  }
 0x56b   : > { %vm8484_vm2 = vcmp.ge.f32.partialorder %v24204_v63, 0.0  ;;  %v8516_v14 = vmul.f32 0.2, %v24204_v63  ;;  %8635 = vrot.lane.b32.xlu0 %v8545_v48, %s27064_s9  ;;  %v8404_v31 = vpop.f32.mrb[61].mxu1 }
 0x56c   : > { %vm8483_vm4 = vcmp.ge.f32.partialorder %v8404_v31, 0.0  ;;  %v8515_v62 = vmul.f32 0.2, %v8404_v31 }
 0x56d   : > { %v8548_v43 = vsel %vm8484_vm2, %v24204_v63, %v8516_v14  ;;  %vm33926_vm2 = vcmask 97280  }
 0x56e   : > { %8641 = vrot.lane.b32.xlu1 %v8548_v43, %s27064_s9  ;;  %v24207_v25 = vpop.f32.mrb[62].mxu1  ;;  %v8547_v11 = vsel %vm8483_vm4, %v8404_v31, %v8515_v62  ;;  %vm33928_vm4 = vmmov %vm33926_vm2 }
 0x56f   : > { %vm8486_vm15 = vcmp.ge.f32.partialorder %v24207_v25, 0.0  ;;  %v8518_v16 = vmul.f32 0.2, %v24207_v25  ;;  %8639 = vrot.lane.b32.xlu0 %v8547_v11, %s27064_s9  ;;  %v8414_v35 = vpop.f32.mrb[63].mxu1 }
 0x570   : > { %vm8485_vm3 = vcmp.ge.f32.partialorder %v8414_v35, 0.0  ;;  %v8517_v47 = vmul.f32 0.2, %v8414_v35 }
 0x571   : > { %v8550_v27 = vsel %vm8486_vm15, %v24207_v25, %v8518_v16  ;;  %vm33930_vm15 = vmmov %vm33926_vm2 }
 0x572   : > { %8645 = vrot.lane.b32.xlu1 %v8550_v27, %s27064_s9  ;;  %v8549_v32 = vsel %vm8485_vm3, %v8414_v35, %v8517_v47  ;;  %vm33932_vm3 = vmmov %vm33926_vm2 }
 0x573   : > { %8643 = vrot.lane.b32.xlu0 %v8549_v32, %s27064_s9 }
 0x5a8   : > { %v8586_v60 = vpop.permute.xlu1 %8585 }
 0x5a9   : > { %v8584_v0 = vpop.permute.xlu0 %8583  ;;  %8681 = vst.msk [vmem:[#allocation2 + $0x19] sm:$0xff] %vm8679_vm13, %v8586_v60 }
 0x5aa   : > { %8680 = vst.msk [vmem:[#allocation2 + $0x11] sm:$0xff] %vm8679_vm13, %v8584_v0 }
 0x5ac   : > { %v8590_v21 = vpop.permute.xlu1 %8589 }
 0x5ad   : > { %v8588_v10 = vpop.permute.xlu0 %8587  ;;  %8683 = vst.msk [vmem:[#allocation2 + $0x29] sm:$0xff] %vm8679_vm13, %v8590_v21 }
 0x5ae   : > { %8682 = vst.msk [vmem:[#allocation2 + $0x21] sm:$0xff] %vm8679_vm13, %v8588_v10 }
 0x5b0   : > { %v8594_v15 = vpop.permute.xlu1 %8593  ;;  %v29459_v28 = vld [vmem:[#allocation2 + $0x19] sm:$0xff] }
 0x5b1   : > { %v8592_v20 = vpop.permute.xlu0 %8591  ;;  %v29453_v2 = vld [vmem:[#allocation2 + $0x11] sm:$0xff]  ;;  %8685 = vst.msk [vmem:[#allocation2 + $0x39] sm:$0xff] %vm8679_vm13, %v8594_v15  ;;  %33927 = vst [vmem:[#allocation32_spill] sm:$0xff] %v29459_v28 }
 0x5b2   : > { %33925 = vst [vmem:[#allocation28_spill] sm:$0xff] %v29453_v2  ;;  %24215 = vmatprep.mubr.msk.f32.mxu0 %vm33926_vm2, %v29453_v2  ;;  %8684 = vst.msk [vmem:[#allocation2 + $0x31] sm:$0xff] %vm8679_vm13, %v8592_v20 }
 0x5b3   : > { %24216 = vmatmul.mubr.msk.f32.gmra.mrb[34].mxu0 %vm33928_vm4, %v29459_v28  ;;  %vm33935_vm4 = vmmov %vm33926_vm2 }
 0x5b4   : > { %v8598_v51 = vpop.permute.xlu1 %8597  ;;  %v29469_v59 = vld [vmem:[#allocation2 + $0x29] sm:$0xff] }
 0x5b5   : > { %8687 = vst.msk [vmem:[#allocation2 + $0x49] sm:$0xff] %vm8679_vm13, %v8598_v51  ;;  %v8596_v36 = vpop.permute.xlu0 %8595  ;;  %v29464_v33 = vld [vmem:[#allocation2 + $0x21] sm:$0xff]  ;;  %33931 = vst [vmem:[#allocation37_spill] sm:$0xff] %v29469_v59 }
 0x5b6   : > { %33929 = vst [vmem:[#allocation34_spill] sm:$0xff] %v29464_v33  ;;  %8686 = vst.msk [vmem:[#allocation2 + $0x41] sm:$0xff] %vm8679_vm13, %v8596_v36  ;;  %24218 = vmatprep.mubr.msk.f32.mxu0 %vm33930_vm15, %v29464_v33 }
 0x5b7   : > { %24219 = vmatmul.mubr.msk.f32.gmra.mrb[36].mxu0 %vm33932_vm3, %v29469_v59  ;;  %vm33937_vm15 = vmmov %vm33926_vm2 }
 0x5b8   : > { %v8602_v17 = vpop.permute.xlu1 %8601  ;;  %v29479_v63 = vld [vmem:[#allocation2 + $0x39] sm:$0xff]  ;;  %vm33939_vm3 = vmmov %vm33926_vm2 }
 0x5b9   : > { %8689 = vst.msk [vmem:[#allocation2 + $0x59] sm:$0xff] %vm8679_vm13, %v8602_v17  ;;  %v8600_v54 = vpop.permute.xlu0 %8599  ;;  %v29474_v37 = vld [vmem:[#allocation2 + $0x31] sm:$0xff]  ;;  %33934 = vst [vmem:[#allocation42_spill] sm:$0xff] %v29479_v63 }
 0x5ba   : > { %33933 = vst [vmem:[#allocation39_spill] sm:$0xff] %v29474_v37  ;;  %8688 = vst.msk [vmem:[#allocation2 + $0x51] sm:$0xff] %vm8679_vm13, %v8600_v54  ;;  %24221 = vmatprep.mubr.msk.f32.mxu0 %vm33926_vm2, %v29474_v37 }
 0x5bb   : > { %24222 = vmatmul.mubr.msk.f32.gmra.mrb[38].mxu0 %vm33935_vm4, %v29479_v63  ;;  %vm33942_vm4 = vmmov %vm33926_vm2 }
 0x5bc   : > { %v8606_v48 = vpop.permute.xlu1 %8605  ;;  %v29489_v62 = vld [vmem:[#allocation2 + $0x49] sm:$0xff] }
 0x5bd   : > { %8691 = vst.msk [vmem:[#allocation2 + $0x69] sm:$0xff] %vm8679_vm13, %v8606_v48  ;;  %v8604_v14 = vpop.permute.xlu0 %8603  ;;  %v29484_v31 = vld [vmem:[#allocation2 + $0x41] sm:$0xff]  ;;  %33938 = vst [vmem:[#allocation47_spill] sm:$0xff] %v29489_v62 }
 0x5be   : > { %33936 = vst [vmem:[#allocation44_spill] sm:$0xff] %v29484_v31  ;;  %8690 = vst.msk [vmem:[#allocation2 + $0x61] sm:$0xff] %vm8679_vm13, %v8604_v14  ;;  %24224 = vmatprep.mubr.msk.f32.mxu0 %vm33937_vm15, %v29484_v31  ;;  %v29817_v9 = vld [vmem:[#allocation2 + $0x42] sm:$0xff] }
 0x5bf   : > { %24225 = vmatmul.mubr.msk.f32.gmra.mrb[40].mxu0 %vm33939_vm3, %v29489_v62  ;;  %vm33944_vm15 = vmmov %vm33926_vm2  ;;  %34034 = vst [vmem:[#allocation22_spill] sm:$0xff] %v29817_v9 }
 0x5c0   : > { %v8610_v1 = vpop.permute.xlu1 %8609  ;;  %v29499_v25 = vld [vmem:[#allocation2 + $0x59] sm:$0xff]  ;;  %vm33946_vm3 = vmmov %vm33926_vm2 }
 0x5c1   : > { %8693 = vst.msk [vmem:[#allocation2 + $0x79] sm:$0xff] %vm8679_vm13, %v8610_v1  ;;  %v8608_v43 = vpop.permute.xlu0 %8607  ;;  %v29494_v3 = vld [vmem:[#allocation2 + $0x51] sm:$0xff]  ;;  %33941 = vst [vmem:[#allocation51_spill] sm:$0xff] %v29499_v25 }
 0x5c2   : > { %33940 = vst [vmem:[#allocation49_spill] sm:$0xff] %v29494_v3  ;;  %8692 = vst.msk [vmem:[#allocation2 + $0x71] sm:$0xff] %vm8679_vm13, %v8608_v43  ;;  %24227 = vmatprep.mubr.msk.f32.mxu0 %vm33926_vm2, %v29494_v3 }
 0x5c3   : > { %24228 = vmatmul.mubr.msk.f32.gmra.mrb[42].mxu0 %vm33942_vm4, %v29499_v25  ;;  %vm33949_vm4 = vmmov %vm33926_vm2 }
 0x5c4   : > { %v8614_v11 = vpop.permute.xlu1 %8613  ;;  %v29509_v47 = vld [vmem:[#allocation2 + $0x69] sm:$0xff] }
 0x5c5   : > { %8695 = vst.msk [vmem:[#allocation2 + $0x89] sm:$0xff] %vm8679_vm13, %v8614_v11  ;;  %v8612_v16 = vpop.permute.xlu0 %8611  ;;  %v29504_v35 = vld [vmem:[#allocation2 + $0x61] sm:$0xff]  ;;  %33945 = vst [vmem:[#allocation56_spill] sm:$0xff] %v29509_v47  ;;  %v11548_v26 = vld [vmem:[#allocation2 + $0x69] sm:$0xff] }
 0x5c6   : > { %33943 = vst [vmem:[#allocation53_spill] sm:$0xff] %v29504_v35  ;;  %8694 = vst.msk [vmem:[#allocation2 + $0x81] sm:$0xff] %vm8679_vm13, %v8612_v16  ;;  %24230 = vmatprep.mubr.msk.f32.mxu0 %vm33944_vm15, %v29504_v35 }
 0x5c7   : > { %24231 = vmatmul.mubr.msk.f32.gmra.mrb[44].mxu0 %vm33946_vm3, %v29509_v47  ;;  %vm33951_vm15 = vmmov %vm33926_vm2 }
 0x5c8   : > { %v8618_v27 = vpop.permute.xlu1 %8617  ;;  %v29519_v0 = vld [vmem:[#allocation2 + $0x79] sm:$0xff]  ;;  %vm33953_vm3 = vmmov %vm33926_vm2 }
 0x5c9   : > { %8697 = vst.msk [vmem:[#allocation2 + $0x99] sm:$0xff] %vm8679_vm13, %v8618_v27  ;;  %v8616_v32 = vpop.permute.xlu0 %8615  ;;  %v29514_v60 = vld [vmem:[#allocation2 + $0x71] sm:$0xff]  ;;  %33948 = vst [vmem:[#allocation30_spill] sm:$0xff] %v29519_v0 }
 0x5ca   : > { %33947 = vst [vmem:[#allocation25_spill] sm:$0xff] %v29514_v60  ;;  %8696 = vst.msk [vmem:[#allocation2 + $0x91] sm:$0xff] %vm8679_vm13, %v8616_v32  ;;  %24233 = vmatprep.mubr.msk.f32.mxu0 %vm33926_vm2, %v29514_v60 }
 0x5cb   : > { %24234 = vmatmul.mubr.msk.f32.gmra.mrb[46].mxu0 %vm33949_vm4, %v29519_v0  ;;  %vm33956_vm4 = vmmov %vm33926_vm2  ;;  %v29687_v0 = vld [vmem:[#allocation2 + $0x78] sm:$0xff] }
 0x5cc   : > { %v8622_v21 = vpop.permute.xlu1 %8621  ;;  %v29529_v20 = vld [vmem:[#allocation2 + $0x89] sm:$0xff] }
 0x5cd   : > { %8699 = vst.msk [vmem:[#allocation2 + $0xa9] sm:$0xff] %vm8679_vm13, %v8622_v21  ;;  %v8620_v10 = vpop.permute.xlu0 %8619  ;;  %v29524_v15 = vld [vmem:[#allocation2 + $0x81] sm:$0xff]  ;;  %33952 = vst [vmem:[#allocation4_spill] sm:$0xff] %v29529_v20 }
 0x5ce   : > { %33950 = vst [vmem:[#allocation31_spill] sm:$0xff] %v29524_v15  ;;  %8698 = vst.msk [vmem:[#allocation2 + $0xa1] sm:$0xff] %vm8679_vm13, %v8620_v10  ;;  %24236 = vmatprep.mubr.msk.f32.mxu0 %vm33951_vm15, %v29524_v15  ;;  %v29685_v15 = vld [vmem:[#allocation2 + $0x80] sm:$0xff]  ;;  %v29697_v47 = vld [vmem:[#allocation2 + $0x88] sm:$0xff] }
 0x5cf   : > { %24237 = vmatmul.mubr.msk.f32.gmra.mrb[48].mxu0 %vm33953_vm3, %v29529_v20  ;;  %vm33958_vm15 = vmmov %vm33926_vm2  ;;  %v29677_v20 = vld [vmem:[#allocation2 + $0x68] sm:$0xff] }
 0x5d0   : > { %v8626_v51 = vpop.permute.xlu1 %8625  ;;  %v29539_v54 = vld [vmem:[#allocation2 + $0x99] sm:$0xff]  ;;  %vm33960_vm3 = vmmov %vm33926_vm2  ;;  %v29857_v29 = vld [vmem:[#allocation2 + $0x82] sm:$0xff] }
 0x5d1   : > { %8701 = vst.msk [vmem:[#allocation2 + $0xb9] sm:$0xff] %vm8679_vm13, %v8626_v51  ;;  %v8624_v36 = vpop.permute.xlu0 %8623  ;;  %v29534_v17 = vld [vmem:[#allocation2 + $0x91] sm:$0xff]  ;;  %33955 = vst [vmem:[#allocation36_spill] sm:$0xff] %v29539_v54 }
 0x5d2   : > { %33954 = vst [vmem:[#allocation35_spill] sm:$0xff] %v29534_v17  ;;  %8700 = vst.msk [vmem:[#allocation2 + $0xb1] sm:$0xff] %vm8679_vm13, %v8624_v36  ;;  %24239 = vmatprep.mubr.msk.f32.mxu0 %vm33926_vm2, %v29534_v17  ;;  %v29675_v17 = vld [vmem:[#allocation2 + $0x70] sm:$0xff]  ;;  %v29707_v25 = vld [vmem:[#allocation2 + $0x98] sm:$0xff] }
 0x5d3   : > { %24240 = vmatmul.mubr.msk.f32.gmra.mrb[50].mxu0 %vm33956_vm4, %v29539_v54  ;;  %vm33963_vm4 = vmmov %vm33926_vm2  ;;  %v29667_v54 = vld [vmem:[#allocation2 + $0x58] sm:$0xff]  ;;  %v29695_v60 = vld [vmem:[#allocation2 + $0x90] sm:$0xff]  ;;  %34045 = vst [vmem:[#allocation21_spill] sm:$0xff] %v29857_v29 }
 0x5d4   : > { %v8630_v48 = vpop.permute.xlu1 %8629  ;;  %v29549_v43 = vld [vmem:[#allocation2 + $0xa9] sm:$0xff]  ;;  %v29867_v22 = vld [vmem:[#allocation2 + $0x92] sm:$0xff] }
 0x5d5   : > { %8703 = vst.msk [vmem:[#allocation2 + $0xc9] sm:$0xff] %vm8679_vm13, %v8630_v48  ;;  %v8628_v14 = vpop.permute.xlu0 %8627  ;;  %v29544_v1 = vld [vmem:[#allocation2 + $0xa1] sm:$0xff]  ;;  %33959 = vst [vmem:[#allocation7_spill] sm:$0xff] %v29549_v43 }
 0x5d6   : > { %33957 = vst [vmem:[#allocation6_spill] sm:$0xff] %v29544_v1  ;;  %8702 = vst.msk [vmem:[#allocation2 + $0xc1] sm:$0xff] %vm8679_vm13, %v8628_v14  ;;  %24242 = vmatprep.mubr.msk.f32.mxu0 %vm33958_vm15, %v29544_v1  ;;  %v29665_v1 = vld [vmem:[#allocation2 + $0x60] sm:$0xff]  ;;  %v29717_v62 = vld [vmem:[#allocation2 + $0xa8] sm:$0xff] }
 0x5d7   : > { %24243 = vmatmul.mubr.msk.f32.gmra.mrb[52].mxu0 %vm33960_vm3, %v29549_v43  ;;  %vm33965_vm15 = vmmov %vm33926_vm2  ;;  %v29657_v43 = vld [vmem:[#allocation2 + $0x48] sm:$0xff]  ;;  %v29705_v35 = vld [vmem:[#allocation2 + $0xa0] sm:$0xff]  ;;  %34048 = vst [vmem:[#allocation24_spill] sm:$0xff] %v29867_v22 }
 0x5d8   : > { %v8634_v11 = vpop.permute.xlu1 %8633  ;;  %v29559_v32 = vld [vmem:[#allocation2 + $0xb9] sm:$0xff]  ;;  %vm33967_vm3 = vmmov %vm33926_vm2  ;;  %v29877_v56 = vld [vmem:[#allocation2 + $0xa2] sm:$0xff] }
 0x5d9   : > { %8705 = vst.msk [vmem:[#allocation2 + $0xd9] sm:$0xff] %vm8679_vm13, %v8634_v11  ;;  %v8632_v16 = vpop.permute.xlu0 %8631  ;;  %v29554_v27 = vld [vmem:[#allocation2 + $0xb1] sm:$0xff]  ;;  %33962 = vst [vmem:[#allocation41_spill] sm:$0xff] %v29559_v32 }
 0x5da   : > { %33961 = vst [vmem:[#allocation40_spill] sm:$0xff] %v29554_v27  ;;  %8704 = vst.msk [vmem:[#allocation2 + $0xd1] sm:$0xff] %vm8679_vm13, %v8632_v16  ;;  %24245 = vmatprep.mubr.msk.f32.mxu0 %vm33926_vm2, %v29554_v27  ;;  %v29655_v27 = vld [vmem:[#allocation2 + $0x50] sm:$0xff]  ;;  %v29727_v63 = vld [vmem:[#allocation2 + $0xb8] sm:$0xff] }
 0x5db   : > { %24246 = vmatmul.mubr.msk.f32.gmra.mrb[54].mxu0 %vm33963_vm4, %v29559_v32  ;;  %vm33970_vm4 = vmmov %vm33926_vm2  ;;  %v29647_v32 = vld [vmem:[#allocation2 + $0x38] sm:$0xff]  ;;  %v29715_v3 = vld [vmem:[#allocation2 + $0xb0] sm:$0xff]  ;;  %34051 = vst [vmem:[#allocation29_spill] sm:$0xff] %v29877_v56 }
 0x5dc   : > { %v8638_v21 = vpop.permute.xlu1 %8637  ;;  %v29569_v36 = vld [vmem:[#allocation2 + $0xc9] sm:$0xff]  ;;  %v29887_v23 = vld [vmem:[#allocation2 + $0xb2] sm:$0xff] }
 0x5dd   : > { %8707 = vst.msk [vmem:[#allocation2 + $0xe9] sm:$0xff] %vm8679_vm13, %v8638_v21  ;;  %v8636_v10 = vpop.permute.xlu0 %8635  ;;  %v29564_v51 = vld [vmem:[#allocation2 + $0xc1] sm:$0xff]  ;;  %33966 = vst [vmem:[#allocation10_spill] sm:$0xff] %v29569_v36 }
 0x5de   : > { %33964 = vst [vmem:[#allocation9_spill] sm:$0xff] %v29564_v51  ;;  %8706 = vst.msk [vmem:[#allocation2 + $0xe1] sm:$0xff] %vm8679_vm13, %v8636_v10  ;;  %24248 = vmatprep.mubr.msk.f32.mxu0 %vm33965_vm15, %v29564_v51  ;;  %v29725_v31 = vld [vmem:[#allocation2 + $0xc0] sm:$0xff]  ;;  %v29737_v59 = vld [vmem:[#allocation2 + $0xc8] sm:$0xff] }
 0x5df   : > { %24249 = vmatmul.mubr.msk.f32.gmra.mrb[56].mxu0 %vm33967_vm3, %v29569_v36  ;;  %vm33972_vm15 = vmmov %vm33926_vm2  ;;  %34007 = vst [vmem:[#allocation69_spill] sm:$0xff] %v29737_v59 }
 0x5e0   : > { %v8642_v48 = vpop.permute.xlu1 %8641  ;;  %v29579_v16 = vld [vmem:[#allocation2 + $0xd9] sm:$0xff]  ;;  %vm33974_vm3 = vmmov %vm33926_vm2  ;;  %34055 = vst [vmem:[#allocation67_spill] sm:$0xff] %v29887_v23 }
 0x5e1   : > { %8709 = vst.msk [vmem:[#allocation2 + $0xf9] sm:$0xff] %vm8679_vm13, %v8642_v48  ;;  %v8640_v14 = vpop.permute.xlu0 %8639  ;;  %v29574_v11 = vld [vmem:[#allocation2 + $0xd1] sm:$0xff]  ;;  %33969 = vst [vmem:[#allocation46_spill] sm:$0xff] %v29579_v16 }
 0x5e2   : > { %33968 = vst [vmem:[#allocation45_spill] sm:$0xff] %v29574_v11  ;;  %8708 = vst.msk [vmem:[#allocation2 + $0xf1] sm:$0xff] %vm8679_vm13, %v8640_v14  ;;  %24251 = vmatprep.mubr.msk.f32.mxu0 %vm33926_vm2, %v29574_v11  ;;  %v8712_v14 = vld [vmem:[#allocation2] sm:$0xff]  ;;  %v29735_v37 = vld [vmem:[#allocation2 + $0xd0] sm:$0xff] }
 0x5e3   : > { %24252 = vmatmul.mubr.msk.f32.gmra.mrb[58].mxu0 %vm33970_vm4, %v29579_v16  ;;  %v8744_v16 = vsel %vm33868_vm9, %v8712_v14, 0.0  ;;  %vm33978_vm4 = vmmov %vm33926_vm2  ;;  %v29610_v14 = vld [vmem:[#allocation2 + $0x10] sm:$0xff]  ;;  %v29747_v28 = vld [vmem:[#allocation2 + $0xd8] sm:$0xff] }
 0x5e4   : > { %v8646_v21 = vpop.permute.xlu1 %8645  ;;  %v29589_v48 = vld [vmem:[#allocation2 + $0xe9] sm:$0xff]  ;;  %34012 = vst [vmem:[#allocation16_spill] sm:$0xff] %v29747_v28 }
 0x5e5   : > { %8711 = vst.msk [vmem:[#allocation2 + $0x109] sm:$0xff] %vm8679_vm13, %v8646_v21  ;;  %v8644_v10 = vpop.permute.xlu0 %8643  ;;  %v29584_v36 = vld [vmem:[#allocation2 + $0xe1] sm:$0xff]  ;;  %33973 = vst [vmem:[#allocation13_spill] sm:$0xff] %v29589_v48 }
 0x5e6   : > { %33971 = vst [vmem:[#allocation12_spill] sm:$0xff] %v29584_v36  ;;  %8710 = vst.msk [vmem:[#allocation2 + $0x101] sm:$0xff] %vm8679_vm13, %v8644_v10  ;;  %24254 = vmatprep.mubr.msk.f32.mxu0 %vm33972_vm15, %v29584_v36  ;;  %v9947_v10 = vld [vmem:[%s32724_s3 + $0x24] sm:$0xff]  ;;  %v9948_v36 = vld [vmem:[%s32724_s3 + $0x2c] sm:$0xf] }
 0x5e7   : > { %24255 = vmatmul.mubr.msk.f32.gmra.mrb[60].mxu0 %vm33974_vm3, %v29589_v48  ;;  %vm33977_vm13 = vmmov %vm33926_vm2  ;;  %v8713_v48 = vld [vmem:[#allocation2 + $0x8] sm:$0xff]  ;;  %v29612_v51 = vpack.c.bf16 %v9948_v36, %v9947_v10  ;;  %v29627_v36 = vld [vmem:[#allocation2 + $0x18] sm:$0xff] }
 0x5e8   : > { %v29599_v21 = vld [vmem:[#allocation2 + $0xf9] sm:$0xff]  ;;  %vm33979_vm15 = vmmov %vm33926_vm2 }
 0x5e9   : > { %v29593_v11 = vld [vmem:[#allocation2 + $0xf1] sm:$0xff]  ;;  %33976 = vst [vmem:[#allocation18_spill] sm:$0xff] %v29599_v21  ;;  %vm33980_vm3 = vmmov %vm33926_vm2  ;;  %v29645_v10 = vld [vmem:[#allocation2 + $0x40] sm:$0xff] }
 0x5ea   : > { %33975 = vst [vmem:[#allocation50_spill] sm:$0xff] %v29593_v11  ;;  %24257 = vmatprep.mubr.msk.f32.mxu0 %vm33926_vm2, %v29593_v11  ;;  %v8746_v11 = vsel %vm33869_vm12, %v29610_v14, 0.0  ;;  %v29745_v33 = vld [vmem:[#allocation2 + $0xe0] sm:$0xff]  ;;  %v29755_v2 = vld [vmem:[#allocation2 + $0xf0] sm:$0xff] }
 0x5eb   : > { %24258 = vmatmul.mubr.msk.f32.gmra.mrb[62].mxu0 %vm33977_vm13, %v29599_v21  ;;  %v29622_v21 = vld [vmem:[#allocation2 + $0x20] sm:$0xff]  ;;  %vm33981_vm13 = vmmov %vm33926_vm2  ;;  %34011 = vst [vmem:[#allocation70_spill] sm:$0xff] %v29745_v33 }
 0x5ec   : > { %24264 = vmatprep.mubr.msk.f32.mxu0 %vm33978_vm4, %v8744_v16  ;;  %v8748_v16 = vsel %vm33785_vm8, %v29622_v21, 0.0  ;;  %vm33982_vm4 = vmmov %vm33926_vm2  ;;  %34016 = vst [vmem:[#allocation55_spill] sm:$0xff] %v29755_v2 }
 0x5ef   : > { %24265 = vmatmul.mubr.msk.f32.vlgmr.msra.gmra.mrb[32].mxu0 %vm33979_vm15, %v8713_v48  ;;  %vm33983_vm15 = vmmov %vm33926_vm2 }
 0x5f0   : > { %25647 = vmatpush3.bf16.msk.msra.mxu0 %vm29386_vm10, %v29441_v49  ;;  %24267 = vmatprep.mubr.msk.f32.mxu0 %vm33980_vm3, %v8746_v11  ;;  %v29635_v49 = vld [vmem:[#allocation2 + $0x30] sm:$0xff]  ;;  %v29637_v11 = vld [vmem:[#allocation2 + $0x28] sm:$0xff]  ;;  %vm33984_vm3 = vmmov %vm33926_vm2 }
 0x5f1   : > { %25650 = vmatprep.subr.msk.bf16.mxu0 %vm29386_vm10, %v29612_v51  ;;  %v8750_v48 = vsel %vm33786_vm14, %v29635_v49, 0.0 }
 0x5f3   : > { %24268 = vmatmul.mubr.msk.f32.gmra.mrb[34].mxu0 %vm33926_vm2, %v29627_v36 }
 0x5f4   : > { %24270 = vmatprep.mubr.msk.f32.mxu0 %vm33981_vm13, %v8748_v16  ;;  %v8752_v16 = vsel %vm33751_vm11, %v29645_v10, 0.0  ;;  %vm33985_vm13 = vmmov %vm33926_vm2 }
 0x5f7   : > { %24271 = vmatmul.mubr.msk.f32.gmra.mrb[36].mxu0 %vm33982_vm4, %v29637_v11  ;;  %vm33986_vm4 = vnez %v33383_v24 }
 0x5f8   : > { %24273 = vmatprep.mubr.msk.f32.mxu0 %vm33983_vm15, %v8750_v48  ;;  %v8754_v48 = vsel %vm33986_vm4, %v29655_v27, 0.0  ;;  %vm33987_vm15 = vmmov %vm33926_vm2 }
 0x5fb   : > { %24274 = vmatmul.mubr.msk.f32.gmra.mrb[38].mxu0 %vm33984_vm3, %v29647_v32  ;;  %vm33988_vm3 = vmmov %vm33926_vm2 }
 0x5fc   : > { %24276 = vmatprep.mubr.msk.f32.mxu0 %vm33926_vm2, %v8752_v16  ;;  %vm33989_vm2 = vnez %v33395_v8  ;;  %vm33990_vm11 = vmmov %vm33988_vm3 }
 0x5fd   : > { %v8756_v16 = vsel %vm33989_vm2, %v29665_v1, 0.0  ;;  %vm33993_vm4 = vmmov %vm33988_vm3 }
 0x5fe   : > { %vm33995_vm2 = vmmov %vm33988_vm3 }
 0x5ff   : > { %24277 = vmatmul.mubr.msk.f32.gmra.mrb[40].mxu0 %vm33985_vm13, %v29657_v43  ;;  %vm33991_vm13 = vmmov %vm33988_vm3 }
 0x600   : > { %24279 = vmatprep.mubr.msk.f32.mxu0 %vm33987_vm15, %v8754_v48  ;;  %vm33992_vm15 = vnez %v33406_v4 }
 0x601   : > { %v8758_v48 = vsel %vm33992_vm15, %v29675_v17, 0.0  ;;  %vm33998_vm15 = vmmov %vm33995_vm2 }
 0x603   : > { %24280 = vmatmul.mubr.msk.f32.gmra.mrb[42].mxu0 %vm33988_vm3, %v29667_v54 }
 0x604   : > { %24282 = vmatprep.mubr.msk.f32.mxu0 %vm33990_vm11, %v8756_v16  ;;  %vm33994_vm11 = vnez %v33418_v58 }
 0x605   : > { %v8760_v16 = vsel %vm33994_vm11, %v29685_v15, 0.0 }
 0x607   : > { %24283 = vmatmul.mubr.msk.f32.gmra.mrb[44].mxu0 %vm33991_vm13, %v29677_v20  ;;  %vm33996_vm13 = vmmov %vm33995_vm2 }
 0x608   : > { %24285 = vmatprep.mubr.msk.f32.mxu0 %vm33993_vm4, %v8758_v48  ;;  %vm33997_vm4 = vnez %v33429_v34 }
 0x609   : > { %v8762_v48 = vsel %vm33997_vm4, %v29695_v60, 0.0 }
 0x60b   : > { %24286 = vmatmul.mubr.msk.f32.gmra.mrb[46].mxu0 %vm33988_vm3, %v29687_v0  ;;  %vm33999_vm3 = vmmov %vm33995_vm2 }
 0x60c   : > { %24288 = vmatprep.mubr.msk.f32.mxu0 %vm33995_vm2, %v8760_v16  ;;  %vm34000_vm2 = vnez %v33434_v30  ;;  %vm34001_vm11 = vmmov %vm33999_vm3 }
 0x60d   : > { %v8764_v16 = vsel %vm34000_vm2, %v29705_v35, 0.0  ;;  %vm34004_vm4 = vmmov %vm33999_vm3 }
 0x60e   : > { %vm34006_vm2 = vmmov %vm33999_vm3 }
 0x60f   : > { %24289 = vmatmul.mubr.msk.f32.gmra.mrb[48].mxu0 %vm33996_vm13, %v29697_v47  ;;  %vm34002_vm13 = vmmov %vm33999_vm3 }
 0x610   : > { %24291 = vmatprep.mubr.msk.f32.mxu0 %vm33998_vm15, %v8762_v48  ;;  %vm34003_vm15 = vnez %v33873_v41 }
 0x611   : > { %v8766_v48 = vsel %vm34003_vm15, %v29715_v3, 0.0  ;;  %vm34010_vm15 = vmmov %vm34006_vm2 }
 0x613   : > { %24292 = vmatmul.mubr.msk.f32.gmra.mrb[50].mxu0 %vm33999_vm3, %v29707_v25 }
 0x614   : > { %24294 = vmatprep.mubr.msk.f32.mxu0 %vm34001_vm11, %v8764_v16  ;;  %vm34005_vm11 = vnez %v33875_v40  ;;  %v29757_v40 = vld [vmem:[#allocation2 + $0xe8] sm:$0xff] }
 0x615   : > { %v8768_v16 = vsel %vm34005_vm11, %v29725_v31, 0.0  ;;  %34017 = vst [vmem:[#allocation15_spill] sm:$0xff] %v29757_v40 }
 0x617   : > { %24295 = vmatmul.mubr.msk.f32.gmra.mrb[52].mxu0 %vm34002_vm13, %v29717_v62  ;;  %vm34008_vm13 = vmmov %vm34006_vm2 }
 0x618   : > { %24297 = vmatprep.mubr.msk.f32.mxu0 %vm34004_vm4, %v8766_v48  ;;  %vm34009_vm4 = vnez %v33878_v42  ;;  %v9461_v42 = vld [vmem:[#allocation2 + $0x2] sm:$0xff] }
 0x619   : > { %v8770_v48 = vsel %vm34009_vm4, %v29735_v37, 0.0 }
 0x61b   : > { %24298 = vmatmul.mubr.msk.f32.gmra.mrb[54].mxu0 %vm33999_vm3, %v29727_v63  ;;  %vm34013_vm3 = vmmov %vm34006_vm2 }
 0x61c   : > { %24300 = vmatprep.mubr.msk.f32.mxu0 %vm34006_vm2, %v8768_v16  ;;  %vm34014_vm2 = vnez %v33882_v57  ;;  %vm34015_vm11 = vmmov %vm34013_vm3  ;;  %v10338_v57 = vld [vmem:[%s32724_s3 + $0x38] sm:$0xf] }
 0x61d   : > { %v8772_v16 = vsel %vm34014_vm2, %v29745_v33, 0.0  ;;  %vm34020_vm4 = vmmov %vm34013_vm3  ;;  %v29783_v33 = vld [vmem:[#allocation2 + $0x1a] sm:$0xff] }
 0x61f   : > { %24301 = vmatmul.mubr.msk.f32.gmra.mrb[56].mxu0 %vm34008_vm13, %v29737_v59  ;;  %vm34018_vm13 = vmmov %vm34013_vm3 }
 0x620   : > { %24303 = vmatprep.mubr.msk.f32.mxu0 %vm34010_vm15, %v8770_v48  ;;  %vm34019_vm15 = vnez %v33885_v39 }
 0x621   : > { %v8774_v48 = vsel %vm34019_vm15, %v29755_v2, 0.0  ;;  %v29781_v2 = vld [vmem:[#allocation2 + $0x12] sm:$0xff] }
 0x623   : > { %24304 = vmatmul.mubr.msk.f32.gmra.mrb[58].mxu0 %vm34013_vm3, %v29747_v28  ;;  %v29765_v28 = vld [vmem:[#allocation2 + $0xf8] sm:$0xff] }
 0x624   : > { %24306 = vmatprep.mubr.msk.f32.mxu0 %vm34015_vm11, %v8772_v16  ;;  %34021 = vst [vmem:[#allocation54_spill] sm:$0xff] %v29765_v28  ;;  %v10337_v16 = vld [vmem:[%s32724_s3 + $0x30] sm:$0xff]  ;;  %vm34022_vm11 = vmmov %vm34013_vm3 }
 0x625   : > { %v29776_v39 = vpack.c.bf16 %v10338_v57, %v10337_v16  ;;  %v29799_v57 = vld [vmem:[#allocation2 + $0x2a] sm:$0xff]  ;;  %v29807_v16 = vld [vmem:[#allocation2 + $0x32] sm:$0xff] }
 0x626   : > { %34030 = vst [vmem:[#allocation19_spill] sm:$0xff] %v29807_v16 }
 0x627   : > { %24307 = vmatmul.mubr.msk.f32.gmra.mrb[60].mxu0 %vm34018_vm13, %v29757_v40  ;;  %v9462_v40 = vld [vmem:[#allocation2 + $0xa] sm:$0xff]  ;;  %vm34024_vm13 = vmmov %vm34013_vm3 }
 0x628   : > { %24309 = vmatprep.mubr.msk.f32.mxu0 %vm34020_vm4, %v8774_v48  ;;  %vm34023_vm4 = vnez %v33889_v45 }
 0x629   : > { %v9494_v48 = vsel %vm34023_vm4, %v9462_v40, 0.0  ;;  %v9496_v40 = vsel %vm33893_vm0, %v29783_v33, 0.0  ;;  %vm34029_vm4 = vmmov %vm34013_vm3 }
 0x62a   : > { %vm34031_vm0 = vmmov %vm34013_vm3 }
 0x62b   : > { %24310 = vmatmul.mubr.msk.f32.gmra.mrb[62].mxu0 %vm34022_vm11, %v29765_v28  ;;  %vm34025_vm11 = vmmov %vm34013_vm3 }
 0x62c   : > { %24316 = vmatprep.mubr.msk.f32.mxu0 %vm34013_vm3, %v9461_v42  ;;  %v29797_v42 = vld [vmem:[#allocation2 + $0x22] sm:$0xff]  ;;  %vm34033_vm15 = vmmov %vm34031_vm0 }
 0x62d   : > { %34026 = vst [vmem:[#allocation26_spill] sm:$0xff] %v29797_v42 }
 0x62f   : > { %24317 = vmatmul.mubr.msk.f32.vlgmr.msra.gmra.mrb[32].mxu0 %vm34024_vm13, %v9494_v48  ;;  %vm34027_vm13 = vmmov %vm34013_vm3  ;;  %v29809_v48 = vld [vmem:[#allocation2 + $0x3a] sm:$0xff] }
 0x630   : > { %25653 = vmatpush3.bf16.msk.msra.mxu0 %vm29386_vm10, %v29612_v51  ;;  %24319 = vmatprep.mubr.msk.f32.mxu0 %vm34025_vm11, %v29781_v2  ;;  %vm34028_vm11 = vnez %v33895_v13  ;;  %v29827_v13 = vld [vmem:[#allocation2 + $0x52] sm:$0xff] }
 0x631   : > { %25656 = vmatprep.subr.msk.bf16.mxu0 %vm29386_vm10, %v29776_v39  ;;  %v9498_v51 = vsel %vm34028_vm11, %v29799_v57, 0.0  ;;  %vm34037_vm11 = vmmov %vm34031_vm0  ;;  %34038 = vst [vmem:[#allocation58_spill] sm:$0xff] %v29827_v13 }
 0x633   : > { %24320 = vmatmul.mubr.msk.f32.gmra.mrb[34].mxu0 %vm34013_vm3, %v9496_v40  ;;  %vm34032_vm3 = vnez %v33898_v5  ;;  %v29837_v5 = vld [vmem:[#allocation2 + $0x62] sm:$0xff] }
 0x634   : > { %24322 = vmatprep.mubr.msk.f32.mxu0 %vm34027_vm13, %v29797_v42  ;;  %v9500_v40 = vsel %vm34032_vm3, %v29809_v48, 0.0  ;;  %v29819_v42 = vld [vmem:[#allocation2 + $0x4a] sm:$0xff]  ;;  %vm34035_vm13 = vmmov %vm34031_vm0  ;;  %34040 = vst [vmem:[#allocation59_spill] sm:$0xff] %v29837_v5 }
 0x637   : > { %24323 = vmatmul.mubr.msk.f32.gmra.mrb[36].mxu0 %vm34029_vm4, %v9498_v51  ;;  %vm34036_vm4 = vnez %v33901_v19  ;;  %v29847_v19 = vld [vmem:[#allocation2 + $0x72] sm:$0xff] }
 0x638   : > { %24325 = vmatprep.mubr.msk.f32.mxu0 %vm34031_vm0, %v29807_v16  ;;  %v9502_v51 = vsel %vm34036_vm4, %v29819_v42, 0.0  ;;  %v29829_v16 = vld [vmem:[#allocation2 + $0x5a] sm:$0xff]  ;;  %34043 = vst [vmem:[#allocation61_spill] sm:$0xff] %v29847_v19 }
 0x63b   : > { %24326 = vmatmul.mubr.msk.f32.gmra.mrb[38].mxu0 %vm34033_vm15, %v9500_v40  ;;  %v9504_v40 = vsel %vm33904_vm7, %v29829_v16, 0.0  ;;  %vm34039_vm15 = vmmov %vm34031_vm0 }
 0x63c   : > { %24328 = vmatprep.mubr.msk.f32.mxu0 %vm34035_vm13, %v29817_v9  ;;  %v29839_v9 = vld [vmem:[#allocation2 + $0x6a] sm:$0xff]  ;;  %vm34041_vm13 = vmmov %vm34031_vm0 }
 0x63f   : > { %24329 = vmatmul.mubr.msk.f32.gmra.mrb[40].mxu0 %vm34037_vm11, %v9502_v51  ;;  %v9506_v51 = vsel %vm33907_vm1, %v29839_v9, 0.0  ;;  %vm34042_vm11 = vmmov %vm34031_vm0 }
 0x640   : > { %24331 = vmatprep.mubr.msk.f32.mxu0 %vm34031_vm0, %v29827_v13  ;;  %v29849_v13 = vld [vmem:[#allocation2 + $0x7a] sm:$0xff] }
 0x643   : > { %24332 = vmatmul.mubr.msk.f32.gmra.mrb[42].mxu0 %vm34039_vm15, %v9504_v40  ;;  %v9508_v40 = vsel %vm33910_vm6, %v29849_v13, 0.0  ;;  %vm34044_vm15 = vmmov %vm34031_vm0 }
 0x644   : > { %24334 = vmatprep.mubr.msk.f32.mxu0 %vm34041_vm13, %v29837_v5  ;;  %v29859_v5 = vld [vmem:[#allocation2 + $0x8a] sm:$0xff]  ;;  %vm34046_vm13 = vmmov %vm34031_vm0 }
 0x645   : > { %vm34050_vm6 = vmmov %vm34031_vm0 }
 0x647   : > { %24335 = vmatmul.mubr.msk.f32.gmra.mrb[44].mxu0 %vm34042_vm11, %v9506_v51  ;;  %v9510_v51 = vsel %vm33855_vm5, %v29859_v5, 0.0  ;;  %vm34047_vm11 = vmmov %vm34031_vm0 }
 0x648   : > { %24337 = vmatprep.mubr.msk.f32.mxu0 %vm34031_vm0, %v29847_v19  ;;  %v29869_v19 = vld [vmem:[#allocation2 + $0x9a] sm:$0xff]  ;;  %vm34054_vm5 = vmmov %vm34031_vm0 }
 0x64b   : > { %24338 = vmatmul.mubr.msk.f32.gmra.mrb[46].mxu0 %vm34044_vm15, %v9508_v40  ;;  %vm34049_vm15 = vnez %v33914_v6  ;;  %v29897_v6 = vld [vmem:[#allocation2 + $0xc2] sm:$0xff] }
 0x64c   : > { %24340 = vmatprep.mubr.msk.f32.mxu0 %vm34046_vm13, %v29857_v29  ;;  %v9512_v40 = vsel %vm34049_vm15, %v29869_v19, 0.0  ;;  %v29879_v29 = vld [vmem:[#allocation2 + $0xaa] sm:$0xff]  ;;  %vm34052_vm13 = vmmov %vm34031_vm0  ;;  %34058 = vst [vmem:[#allocation68_spill] sm:$0xff] %v29897_v6 }
 0x64d   : > { %vm34057_vm15 = vmmov %vm34031_vm0 }
 0x64f   : > { %24341 = vmatmul.mubr.msk.f32.gmra.mrb[48].mxu0 %vm34047_vm11, %v9510_v51  ;;  %vm34053_vm11 = vnez %v33860_v46  ;;  %v29907_v46 = vld [vmem:[#allocation2 + $0xd2] sm:$0xff] }
 0x650   : > { %24343 = vmatprep.mubr.msk.f32.mxu0 %vm34031_vm0, %v29867_v22  ;;  %v9514_v51 = vsel %vm34053_vm11, %v29879_v29, 0.0  ;;  %v29889_v22 = vld [vmem:[#allocation2 + $0xba] sm:$0xff]  ;;  %vm34061_vm11 = vmmov %vm34031_vm0  ;;  %34062 = vst [vmem:[#allocation71_spill] sm:$0xff] %v29907_v46 }
 0x653   : > { %24344 = vmatmul.mubr.msk.f32.gmra.mrb[50].mxu0 %vm34050_vm6, %v9512_v40  ;;  %vm34056_vm6 = vnez %v33915_v44  ;;  %v29917_v44 = vld [vmem:[#allocation2 + $0xe2] sm:$0xff] }
 0x654   : > { %24346 = vmatprep.mubr.msk.f32.mxu0 %vm34052_vm13, %v29877_v56  ;;  %v9516_v40 = vsel %vm34056_vm6, %v29889_v22, 0.0  ;;  %v29899_v56 = vld [vmem:[#allocation2 + $0xca] sm:$0xff]  ;;  %vm34059_vm13 = vmmov %vm34031_vm0 }
 0x655   : > { %vm34064_vm6 = vmmov %vm34031_vm0 }
 0x657   : > { %24347 = vmatmul.mubr.msk.f32.gmra.mrb[52].mxu0 %vm34054_vm5, %v9514_v51  ;;  %vm34060_vm5 = vnez %v33916_v55  ;;  %v29927_v55 = vld [vmem:[#allocation2 + $0xf2] sm:$0xff] }
 0x658   : > { %24349 = vmatprep.mubr.msk.f32.mxu0 %vm34031_vm0, %v29887_v23  ;;  %v9518_v51 = vsel %vm34060_vm5, %v29899_v56, 0.0  ;;  %v29909_v23 = vld [vmem:[#allocation2 + $0xda] sm:$0xff]  ;;  %vm34067_vm5 = vmmov %vm34031_vm0  ;;  %34068 = vst [vmem:[#allocation72_spill] sm:$0xff] %v29927_v55 }
 0x65b   : > { %24350 = vmatmul.mubr.msk.f32.gmra.mrb[54].mxu0 %vm34057_vm15, %v9516_v40  ;;  %vm34063_vm15 = vnez %v33917_v12  ;;  %v10759_v12 = vld [vmem:[%s32724_s3 + $0x3c] sm:$0xff] }
 0x65c   : > { %24352 = vmatprep.mubr.msk.f32.mxu0 %vm34059_vm13, %v29897_v6  ;;  %v9520_v40 = vsel %vm34063_vm15, %v29909_v23, 0.0  ;;  %v29919_v6 = vld [vmem:[#allocation2 + $0xea] sm:$0xff]  ;;  %vm34065_vm13 = vmmov %vm34031_vm0 }
 0x65f   : > { %24353 = vmatmul.mubr.msk.f32.gmra.mrb[56].mxu0 %vm34061_vm11, %v9518_v51  ;;  %vm34066_vm11 = vnez %v33919_v18  ;;  %v10760_v18 = vld [vmem:[%s32724_s3 + $0x44] sm:$0xf] }
 0x660   : > { %24355 = vmatprep.mubr.msk.f32.mxu0 %vm34031_vm0, %v29907_v46  ;;  %v9522_v51 = vsel %vm34066_vm11, %v29919_v6, 0.0  ;;  %v29929_v46 = vld [vmem:[#allocation2 + $0xfa] sm:$0xff] }
 0x663   : > { %24356 = vmatmul.mubr.msk.f32.gmra.mrb[58].mxu0 %vm34064_vm6, %v9520_v40  ;;  %vm34069_vm6 = vnez %v33921_v53  ;;  %v9917_v53 = vsel %vm33869_vm12, %v29622_v21, 0.0  ;;  %vm34076_vm12 = vmmov %vm34031_vm0 }
 0x664   : > { %24358 = vmatprep.mubr.msk.f32.mxu0 %vm34065_vm13, %v29917_v44  ;;  %v9524_v40 = vsel %vm34069_vm6, %v29929_v46, 0.0  ;;  %vm34071_vm13 = vmmov %vm34031_vm0 }
 0x665   : > { %vm34072_vm6 = vmmov %vm34031_vm0 }
 0x667   : > { %24359 = vmatmul.mubr.msk.f32.gmra.mrb[60].mxu0 %vm34067_vm5, %v9522_v51  ;;  %vm34070_vm5 = vmmov %vm34031_vm0  ;;  %v9915_v51 = vsel %vm33868_vm9, %v29610_v14, 0.0 }
 0x668   : > { %24361 = vmatprep.mubr.msk.f32.mxu0 %vm34031_vm0, %v29927_v55  ;;  %v25660_v55 = vpack.c.bf16 %v10760_v18, %v10759_v12  ;;  %v9919_v12 = vsel %vm33785_vm8, %v29635_v49, 0.0  ;;  %vm34078_vm9 = vmmov %vm34031_vm0 }
 0x66b   : > { %24362 = vmatmul.mubr.msk.f32.gmra.mrb[62].mxu0 %vm34070_vm5, %v9524_v40  ;;  %vm34073_vm5 = vmmov %vm34031_vm0 }
 0x66c   : > { %24368 = vmatprep.mubr.msk.f32.mxu0 %vm34071_vm13, %v9915_v51  ;;  %vm34074_vm13 = vmmov %vm34031_vm0 }
 0x66f   : > { %24369 = vmatmul.mubr.msk.f32.vlgmr.msra.gmra.mrb[32].mxu0 %vm34031_vm0, %v29627_v36 }
 0x670   : > { %25659 = vmatpush3.bf16.msk.msra.mxu0 %vm29386_vm10, %v29776_v39  ;;  %24371 = vmatprep.mubr.msk.f32.mxu0 %vm34072_vm6, %v9917_v53  ;;  %v9921_v39 = vsel %vm33786_vm14, %v29645_v10, 0.0  ;;  %vm34075_vm6 = vmmov %vm34031_vm0 }
 0x671   : > { %25662 = vmatprep.subr.msk.bf16.mxu0 %vm29386_vm10, %v25660_v55  ;;  %vm34081_vm8 = vmmov %vm34075_vm6 }
 0x672   : > { %vm34083_vm14 = vmmov %vm34075_vm6 }
 0x673   : > { %24372 = vmatmul.mubr.msk.f32.gmra.mrb[34].mxu0 %vm34073_vm5, %v29637_v11  ;;  %vm34077_vm5 = vnez %v33370_v50 }
 0x674   : > { %24374 = vmatprep.mubr.msk.f32.mxu0 %vm34074_vm13, %v9919_v12  ;;  %v9923_v18 = vsel %vm34077_vm5, %v29655_v27, 0.0  ;;  %vm34079_vm13 = vmmov %vm34031_vm0 }
 0x675   : > { %vm34086_vm5 = vmmov %vm34075_vm6 }
 0x677   : > { %24375 = vmatmul.mubr.msk.f32.gmra.mrb[36].mxu0 %vm34031_vm0, %v29647_v32  ;;  %vm34080_vm0 = vnez %v33383_v24 }
 0x678   : > { %24377 = vmatprep.mubr.msk.f32.mxu0 %vm34075_vm6, %v9921_v39  ;;  %v9925_v53 = vsel %vm34080_vm0, %v29665_v1, 0.0  ;;  %vm34089_vm0 = vmmov %vm34086_vm5 }
 0x67b   : > { %24378 = vmatmul.mubr.msk.f32.gmra.mrb[38].mxu0 %vm34076_vm12, %v29657_v43  ;;  %vm34082_vm12 = vnez %v33395_v8 }
 0x67c   : > { %24380 = vmatprep.mubr.msk.f32.mxu0 %vm34078_vm9, %v9923_v18  ;;  %v9927_v14 = vsel %vm34082_vm12, %v29675_v17, 0.0  ;;  %vm34084_vm9 = vmmov %vm34075_vm6  ;;  %v34099_v18 = vld [vmem:[#allocation63_spill] sm:$0xff] }
 0x67d   : > { %vm34092_vm12 = vmmov %vm34089_vm0 }
 0x67f   : > { %24381 = vmatmul.mubr.msk.f32.gmra.mrb[40].mxu0 %vm34079_vm13, %v29667_v54  ;;  %vm34085_vm13 = vnez %v33406_v4 }
 0x680   : > { %24383 = vmatprep.mubr.msk.f32.mxu0 %vm34081_vm8, %v9925_v53  ;;  %v9929_v36 = vsel %vm34085_vm13, %v29685_v15, 0.0  ;;  %vm34087_vm8 = vmmov %vm34086_vm5 }
 0x681   : > { %vm34095_vm13 = vmmov %vm34089_vm0 }
 0x683   : > { %24384 = vmatmul.mubr.msk.f32.gmra.mrb[42].mxu0 %vm34075_vm6, %v29677_v20  ;;  %vm34088_vm6 = vnez %v33418_v58 }
 0x684   : > { %24386 = vmatprep.mubr.msk.f32.mxu0 %vm34083_vm14, %v9927_v14  ;;  %v9931_v40 = vsel %vm34088_vm6, %v29695_v60, 0.0  ;;  %vm34090_vm14 = vmmov %vm34089_vm0  ;;  %v34102_v14 = vld [vmem:[#allocation16_spill] sm:$0xff] }
 0x685   : > { %vm34097_vm6 = vmmov %vm34089_vm0 }
 0x687   : > { %24387 = vmatmul.mubr.msk.f32.gmra.mrb[44].mxu0 %vm34084_vm9, %v29687_v0  ;;  %vm34091_vm9 = vnez %v33429_v34 }
 0x688   : > { %24389 = vmatprep.mubr.msk.f32.mxu0 %vm34086_vm5, %v9929_v36  ;;  %v9933_v51 = vsel %vm34091_vm9, %v29705_v35, 0.0  ;;  %vm34093_vm5 = vmmov %vm34089_vm0  ;;  %v34104_v36 = vld [vmem:[#allocation70_spill] sm:$0xff] }
 0x689   : > { %vm34101_vm9 = vmmov %vm34089_vm0 }
 0x68b   : > { %24390 = vmatmul.mubr.msk.f32.gmra.mrb[46].mxu0 %vm34087_vm8, %v29697_v47  ;;  %vm34094_vm8 = vnez %v33434_v30 }
 0x68c   : > { %24392 = vmatprep.mubr.msk.f32.mxu0 %vm34089_vm0, %v9931_v40  ;;  %v9935_v12 = vsel %vm34094_vm8, %v29715_v3, 0.0  ;;  %v34105_v40 = vld [vmem:[#allocation64_spill] sm:$0xff]  ;;  %vm34107_vm8 = vmmov %vm34097_vm6 }
 0x68f   : > { %24393 = vmatmul.mubr.msk.f32.gmra.mrb[48].mxu0 %vm34090_vm14, %v29707_v25  ;;  %vm34096_vm14 = vnez %v33873_v41  ;;  %v11181_v41 = vld [vmem:[%s32724_s3 + $0x48] sm:$0xff] }
 0x690   : > { %24395 = vmatprep.mubr.msk.f32.mxu0 %vm34092_vm12, %v9933_v51  ;;  %v9937_v39 = vsel %vm34096_vm14, %v29725_v31, 0.0  ;;  %vm34098_vm12 = vmmov %vm34089_vm0 }
 0x693   : > { %24396 = vmatmul.mubr.msk.f32.gmra.mrb[50].mxu0 %vm34093_vm5, %v29717_v62  ;;  %vm34100_vm5 = vnez %v34099_v18  ;;  %v30036_v18 = vld [vmem:[#allocation2 + $0x100] sm:$0xff] }
 0x694   : > { %24398 = vmatprep.mubr.msk.f32.mxu0 %vm34095_vm13, %v9935_v12  ;;  %v9939_v53 = vsel %vm34100_vm5, %v29735_v37, 0.0  ;;  %vm34103_vm13 = vmmov %vm34089_vm0  ;;  %v34108_v12 = vld [vmem:[#allocation15_spill] sm:$0xff]  ;;  %34112 = vst [vmem:[#allocation16_spill] sm:$0xff] %v30036_v18 }
 0x697   : > { %24399 = vmatmul.mubr.msk.f32.gmra.mrb[52].mxu0 %vm34089_vm0, %v29727_v63  ;;  %vm34106_vm0 = vnez %v34105_v40 }
 0x698   : > { %24401 = vmatprep.mubr.msk.f32.mxu0 %vm34097_vm6, %v9937_v39  ;;  %v9941_v51 = vsel %vm34106_vm0, %v34104_v36, 0.0  ;;  %v34109_v39 = vld [vmem:[#allocation55_spill] sm:$0xff]  ;;  %vm34116_vm0 = vmmov %vm34097_vm6 }
 0x69b   : > { %24402 = vmatmul.mubr.msk.f32.gmra.mrb[54].mxu0 %vm34098_vm12, %v29737_v59  ;;  %v9943_v59 = vsel %vm34014_vm2, %v34109_v39, 0.0  ;;  %vm34111_vm12 = vmmov %vm34097_vm6  ;;  %v34124_v39 = vld [vmem:[#allocation37_spill] sm:$0xff] }
 0x69c   : > { %24404 = vmatprep.mubr.msk.f32.mxu0 %vm34101_vm9, %v9939_v53  ;;  %vm34113_vm9 = vmmov %vm34097_vm6  ;;  %v34114_v53 = vld [vmem:[#allocation66_spill] sm:$0xff] }
 0x69d   : > { %vm34136_vm2 = vmmov %vm34116_vm0 }
 0x69f   : > { %24405 = vmatmul.mubr.msk.f32.gmra.mrb[56].mxu0 %vm34103_vm13, %v34102_v14  ;;  %vm34115_vm13 = vnez %v34114_v53 }
 0x6a0   : > { %24407 = vmatprep.mubr.msk.f32.mxu0 %vm34107_vm8, %v9941_v51  ;;  %v9945_v40 = vsel %vm34115_vm13, %v30036_v18, 0.0  ;;  %v30044_v51 = vld [vmem:[#allocation2 + $0x108] sm:$0xff]  ;;  %vm34118_vm8 = vmmov %vm34116_vm0  ;;  %v34121_v18 = vld [vmem:[#allocation32_spill] sm:$0xff] }
 0x6a1   : > { %34117 = vst [vmem:[#allocation70_spill] sm:$0xff] %v30044_v51  ;;  %vm34133_vm13 = vmmov %vm34116_vm0 }
 0x6a3   : > { %24408 = vmatmul.mubr.msk.f32.gmra.mrb[58].mxu0 %vm34097_vm6, %v34108_v12  ;;  %vm34120_vm6 = vmmov %vm34116_vm0 }
 0x6a4   : > { %24410 = vmatprep.mubr.msk.f32.mxu0 %vm34111_vm12, %v9943_v59  ;;  %v11182_v59 = vld [vmem:[%s32724_s3 + $0x50] sm:$0xf]  ;;  %vm34122_vm12 = vmmov %vm34116_vm0 }
 0x6a5   : > { %v25666_v53 = vpack.c.bf16 %v11182_v59, %v11181_v41  ;;  %v34130_v41 = vld [vmem:[#allocation44_spill] sm:$0xff]  ;;  %v34135_v59 = vld [vmem:[#allocation51_spill] sm:$0xff] }
 0x6a7   : > { %24411 = vmatmul.mubr.msk.f32.gmra.mrb[60].mxu0 %vm34113_vm9, %v29765_v28  ;;  %v34119_v28 = vld [vmem:[#allocation28_spill] sm:$0xff]  ;;  %vm34125_vm9 = vmmov %vm34116_vm0 }
 0x6a8   : > { %24413 = vmatprep.mubr.msk.f32.mxu0 %vm34116_vm0, %v9945_v40  ;;  %v34123_v40 = vld [vmem:[#allocation34_spill] sm:$0xff] }
 0x6ab   : > { %24414 = vmatmul.mubr.msk.f32.gmra.mrb[62].mxu0 %vm34118_vm8, %v30044_v51  ;;  %v34126_v51 = vld [vmem:[#allocation39_spill] sm:$0xff]  ;;  %vm34127_vm8 = vmmov %vm34116_vm0 }
 0x6ac   : > { %24420 = vmatprep.mubr.msk.f32.mxu0 %vm34120_vm6, %v34119_v28  ;;  %v34128_v28 = vld [vmem:[#allocation42_spill] sm:$0xff]  ;;  %vm34129_vm6 = vmmov %vm34116_vm0 }
 0x6af   : > { %24421 = vmatmul.mubr.msk.f32.vlgmr.msra.gmra.mrb[32].mxu0 %vm34122_vm12, %v34121_v18  ;;  %vm34131_vm12 = vmmov %vm34116_vm0  ;;  %v34132_v18 = vld [vmem:[#allocation47_spill] sm:$0xff] }
 0x6b0   : > { %25665 = vmatpush3.bf16.msk.msra.mxu0 %vm29386_vm10, %v25660_v55  ;;  %24423 = vmatprep.mubr.msk.f32.mxu0 %vm34116_vm0, %v34123_v40  ;;  %v34134_v55 = vld [vmem:[#allocation49_spill] sm:$0xff] }
 0x6b1   : > { %25668 = vmatprep.subr.msk.bf16.mxu0 %vm29386_vm10, %v25666_v53  ;;  %v34137_v40 = vld [vmem:[#allocation53_spill] sm:$0xff] }
 0x6b3   : > { %24424 = vmatmul.mubr.msk.f32.gmra.mrb[34].mxu0 %vm34125_vm9, %v34124_v39  ;;  %vm34138_vm9 = vmmov %vm34116_vm0  ;;  %v34139_v39 = vld [vmem:[#allocation56_spill] sm:$0xff] }
 0x6b4   : > { %24426 = vmatprep.mubr.msk.f32.mxu0 %vm34127_vm8, %v34126_v51  ;;  %vm34140_vm8 = vmmov %vm34116_vm0  ;;  %v34141_v51 = vld [vmem:[#allocation25_spill] sm:$0xff] }
 0x6b7   : > { %24427 = vmatmul.mubr.msk.f32.gmra.mrb[36].mxu0 %vm34129_vm6, %v34128_v28  ;;  %vm34142_vm6 = vmmov %vm34116_vm0  ;;  %v34143_v28 = vld [vmem:[#allocation30_spill] sm:$0xff] }
 0x6b8   : > { %24429 = vmatprep.mubr.msk.f32.mxu0 %vm34131_vm12, %v34130_v41  ;;  %vm34144_vm12 = vmmov %vm34116_vm0  ;;  %v34145_v41 = vld [vmem:[#allocation31_spill] sm:$0xff] }
 0x6bb   : > { %24430 = vmatmul.mubr.msk.f32.gmra.mrb[38].mxu0 %vm34133_vm13, %v34132_v18  ;;  %vm34146_vm13 = vmmov %vm34116_vm0  ;;  %v34147_v18 = vld [vmem:[#allocation4_spill] sm:$0xff] }
 0x6bc   : > { %24432 = vmatprep.mubr.msk.f32.mxu0 %vm34116_vm0, %v34134_v55  ;;  %v34148_v55 = vld [vmem:[#allocation35_spill] sm:$0xff] }
 0x6bf   : > { %24433 = vmatmul.mubr.msk.f32.gmra.mrb[40].mxu0 %vm34136_vm2, %v34135_v59  ;;  %vm34149_vm2 = vmmov %vm34116_vm0  ;;  %v34150_v59 = vld [vmem:[#allocation36_spill] sm:$0xff] }
 0x6c0   : > { %24435 = vmatprep.mubr.msk.f32.mxu0 %vm34138_vm9, %v34137_v40  ;;  %vm34151_vm9 = vmmov %vm34116_vm0  ;;  %v34152_v40 = vld [vmem:[#allocation6_spill] sm:$0xff] }
 0x6c3   : > { %24436 = vmatmul.mubr.msk.f32.gmra.mrb[42].mxu0 %vm34140_vm8, %v34139_v39  ;;  %vm34153_vm8 = vmmov %vm34116_vm0  ;;  %v34154_v39 = vld [vmem:[#allocation7_spill] sm:$0xff] }
 0x6c4   : > { %24438 = vmatprep.mubr.msk.f32.mxu0 %vm34142_vm6, %v34141_v51  ;;  %vm34155_vm6 = vmmov %vm34116_vm0  ;;  %v34156_v51 = vld [vmem:[#allocation40_spill] sm:$0xff] }
 0x6c7   : > { %24439 = vmatmul.mubr.msk.f32.gmra.mrb[44].mxu0 %vm34144_vm12, %v34143_v28  ;;  %vm34157_vm12 = vmmov %vm34116_vm0  ;;  %v34158_v28 = vld [vmem:[#allocation41_spill] sm:$0xff] }
 0x6c8   : > { %24441 = vmatprep.mubr.msk.f32.mxu0 %vm34146_vm13, %v34145_v41  ;;  %vm34159_vm13 = vmmov %vm34116_vm0  ;;  %v34160_v41 = vld [vmem:[#allocation9_spill] sm:$0xff] }
 0x6cb   : > { %24442 = vmatmul.mubr.msk.f32.gmra.mrb[46].mxu0 %vm34116_vm0, %v34147_v18  ;;  %v34161_v18 = vld [vmem:[#allocation10_spill] sm:$0xff] }
 0x6cc   : > { %24444 = vmatprep.mubr.msk.f32.mxu0 %vm34149_vm2, %v34148_v55  ;;  %vm34162_vm2 = vmmov %vm34116_vm0  ;;  %v34163_v55 = vld [vmem:[#allocation45_spill] sm:$0xff] }
 0x6cf   : > { %24445 = vmatmul.mubr.msk.f32.gmra.mrb[48].mxu0 %vm34151_vm9, %v34150_v59  ;;  %vm34164_vm9 = vmmov %vm34116_vm0  ;;  %v34165_v59 = vld [vmem:[#allocation46_spill] sm:$0xff] }
 0x6d0   : > { %24447 = vmatprep.mubr.msk.f32.mxu0 %vm34153_vm8, %v34152_v40  ;;  %vm34166_vm8 = vmmov %vm34116_vm0  ;;  %v34167_v40 = vld [vmem:[#allocation12_spill] sm:$0xff] }
 0x6d3   : > { %24448 = vmatmul.mubr.msk.f32.gmra.mrb[50].mxu0 %vm34155_vm6, %v34154_v39  ;;  %vm34168_vm6 = vmmov %vm34116_vm0  ;;  %v34169_v39 = vld [vmem:[#allocation13_spill] sm:$0xff] }
 0x6d4   : > { %24450 = vmatprep.mubr.msk.f32.mxu0 %vm34157_vm12, %v34156_v51  ;;  %vm34170_vm12 = vmmov %vm34116_vm0  ;;  %v34171_v51 = vld [vmem:[#allocation50_spill] sm:$0xff] }
 0x6d7   : > { %24451 = vmatmul.mubr.msk.f32.gmra.mrb[52].mxu0 %vm34159_vm13, %v34158_v28  ;;  %vm34172_vm13 = vmmov %vm34116_vm0  ;;  %v34173_v28 = vld [vmem:[#allocation18_spill] sm:$0xff] }
 0x6d8   : > { %24453 = vmatprep.mubr.msk.f32.mxu0 %vm34116_vm0, %v34160_v41  ;;  %v30118_v41 = vld [vmem:[#allocation2 + $0x101] sm:$0xff] }
 0x6db   : > { %24454 = vmatmul.mubr.msk.f32.gmra.mrb[54].mxu0 %vm34162_vm2, %v34161_v18  ;;  %vm34174_vm2 = vmmov %vm34116_vm0  ;;  %v30122_v18 = vld [vmem:[#allocation2 + $0x109] sm:$0xff] }
 0x6dc   : > { %24456 = vmatprep.mubr.msk.f32.mxu0 %vm34164_vm9, %v34163_v55  ;;  %v11571_v55 = vld [vmem:[%s32724_s3 + $0x54] sm:$0xff]  ;;  %vm34175_vm9 = vmmov %vm34116_vm0 }
 0x6df   : > { %24457 = vmatmul.mubr.msk.f32.gmra.mrb[56].mxu0 %vm34166_vm8, %v34165_v59  ;;  %v11572_v59 = vld [vmem:[%s32724_s3 + $0x5c] sm:$0xf]  ;;  %vm34176_vm8 = vmmov %vm34116_vm0 }
 0x6e0   : > { %24459 = vmatprep.mubr.msk.f32.mxu0 %vm34168_vm6, %v34167_v40  ;;  %v25672_v40 = vpack.c.bf16 %v11572_v59, %v11571_v55  ;;  %vm34177_vm6 = vnez %v33889_v45  ;;  %v34183_v55 = vld [vmem:[#allocation19_spill] sm:$0xff]  ;;  %v10734_v45 = vsel %vm34032_vm3, %v29819_v42, 0.0 }
 0x6e3   : > { %24460 = vmatmul.mubr.msk.f32.gmra.mrb[58].mxu0 %vm34170_vm12, %v34169_v39  ;;  %v10728_v39 = vsel %vm34177_vm6, %v29783_v33, 0.0  ;;  %vm34178_vm12 = vmmov %vm34116_vm0  ;;  %v34185_v33 = vld [vmem:[#allocation8_spill] sm:$0xff] }
 0x6e4   : > { %24462 = vmatprep.mubr.msk.f32.mxu0 %vm34172_vm13, %v34171_v51  ;;  %v34179_v51 = vld [vmem:[#allocation26_spill] sm:$0xff]  ;;  %vm34180_vm13 = vmmov %vm34116_vm0 }
 0x6e5   : > { %vm34191_vm6 = vmmov %vm34174_vm2 }
 0x6e7   : > { %24463 = vmatmul.mubr.msk.f32.gmra.mrb[60].mxu0 %vm34116_vm0, %v34173_v28  ;;  %v34181_v28 = vld [vmem:[#allocation5_spill] sm:$0xff] }
 0x6e8   : > { %24465 = vmatprep.mubr.msk.f32.mxu0 %vm34174_vm2, %v30118_v41  ;;  %vm34182_vm0 = vnez %v34181_v28  ;;  %v34192_v28 = vld [vmem:[#allocation58_spill] sm:$0xff] }
 0x6eb   : > { %24466 = vmatmul.mubr.msk.f32.gmra.mrb[62].mxu0 %vm34175_vm9, %v30122_v18  ;;  %vm34184_vm9 = vmmov %vm34174_vm2 }
 0x6ec   : > { %24472 = vmatprep.mubr.msk.f32.mxu0 %vm34176_vm8, %v29781_v2  ;;  %v10730_v2 = vsel %vm34182_vm0, %v29799_v57, 0.0  ;;  %vm34186_vm8 = vnez %v34185_v33  ;;  %v34195_v33 = vld [vmem:[#allocation59_spill] sm:$0xff] }
 0x6ed   : > { %v10732_v59 = vsel %vm34186_vm8, %v29809_v48, 0.0 }
 0x6ef   : > { %24473 = vmatmul.mubr.msk.f32.vlgmr.msra.gmra.mrb[32].mxu0 %vm34178_vm12, %v10728_v39  ;;  %vm34187_vm12 = vmmov %vm34174_vm2  ;;  %v34199_v39 = vld [vmem:[#allocation61_spill] sm:$0xff] }
 0x6f0   : > { %25671 = vmatpush3.bf16.msk.msra.mxu0 %vm29386_vm10, %v25666_v53  ;;  %24475 = vmatprep.mubr.msk.f32.mxu0 %vm34180_vm13, %v34179_v51  ;;  %v34188_v53 = vld [vmem:[#allocation22_spill] sm:$0xff]  ;;  %vm34189_vm13 = vmmov %vm34174_vm2 }
 0x6f1   : > { %25674 = vmatprep.subr.msk.bf16.mxu0 %vm29386_vm10, %v25672_v40 }
 0x6f3   : > { %24476 = vmatmul.mubr.msk.f32.gmra.mrb[34].mxu0 %vm34174_vm2, %v10730_v2  ;;  %v34202_v2 = vld [vmem:[#allocation21_spill] sm:$0xff] }
 0x6f4   : > { %24478 = vmatprep.mubr.msk.f32.mxu0 %vm34184_vm9, %v34183_v55  ;;  %v10736_v55 = vsel %vm34036_vm4, %v29829_v16, 0.0  ;;  %vm34194_vm9 = vmmov %vm34174_vm2 }
 0x6f5   : > { %vm34206_vm4 = vmmov %vm34174_vm2 }
 0x6f7   : > { %24479 = vmatmul.mubr.msk.f32.gmra.mrb[36].mxu0 %vm34187_vm12, %v10732_v59  ;;  %vm34196_vm12 = vmmov %vm34174_vm2  ;;  %v34207_v59 = vld [vmem:[#allocation24_spill] sm:$0xff] }
 0x6f8   : > { %24481 = vmatprep.mubr.msk.f32.mxu0 %vm34189_vm13, %v34188_v53  ;;  %v10738_v53 = vsel %vm33904_vm7, %v29839_v9, 0.0  ;;  %vm34198_vm13 = vmmov %vm34174_vm2 }
 0x6f9   : > { %vm34211_vm7 = vmmov %vm34174_vm2 }
 0x6fb   : > { %24482 = vmatmul.mubr.msk.f32.gmra.mrb[38].mxu0 %vm34191_vm6, %v10734_v45  ;;  %vm34200_vm6 = vmmov %vm34174_vm2  ;;  %v34212_v45 = vld [vmem:[#allocation29_spill] sm:$0xff] }
 0x6fc   : > { %24484 = vmatprep.mubr.msk.f32.mxu0 %vm34174_vm2, %v34192_v28  ;;  %v10740_v28 = vsel %vm33907_vm1, %v29849_v13, 0.0  ;;  %vm34215_vm1 = vmmov %vm34174_vm2 }
 0x6ff   : > { %24485 = vmatmul.mubr.msk.f32.gmra.mrb[40].mxu0 %vm34194_vm9, %v10736_v55  ;;  %vm34203_vm9 = vmmov %vm34174_vm2  ;;  %v34204_v55 = vld [vmem:[#allocation23_spill] sm:$0xff] }
 0x700   : > { %24487 = vmatprep.mubr.msk.f32.mxu0 %vm34196_vm12, %v34195_v33  ;;  %vm34205_vm12 = vnez %v34204_v55  ;;  %v34216_v55 = vld [vmem:[#allocation67_spill] sm:$0xff] }
 0x701   : > { %v10742_v33 = vsel %vm34205_vm12, %v29859_v5, 0.0  ;;  %vm34220_vm12 = vmmov %vm34215_vm1 }
 0x703   : > { %24488 = vmatmul.mubr.msk.f32.gmra.mrb[42].mxu0 %vm34198_vm13, %v10738_v53  ;;  %vm34208_vm13 = vmmov %vm34174_vm2  ;;  %v34209_v53 = vld [vmem:[#allocation27_spill] sm:$0xff] }
 0x704   : > { %24490 = vmatprep.mubr.msk.f32.mxu0 %vm34200_vm6, %v34199_v39  ;;  %vm34210_vm6 = vnez %v34209_v53  ;;  %v34221_v53 = vld [vmem:[#allocation68_spill] sm:$0xff] }
 0x705   : > { %v10744_v39 = vsel %vm34210_vm6, %v29869_v19, 0.0  ;;  %vm34225_vm6 = vmmov %vm34215_vm1 }
 0x707   : > { %24491 = vmatmul.mubr.msk.f32.gmra.mrb[44].mxu0 %vm34174_vm2, %v10740_v28  ;;  %v34213_v28 = vld [vmem:[#allocation33_spill] sm:$0xff] }
 0x708   : > { %24493 = vmatprep.mubr.msk.f32.mxu0 %vm34203_vm9, %v34202_v2  ;;  %vm34214_vm9 = vnez %v34213_v28  ;;  %v34226_v28 = vld [vmem:[#allocation71_spill] sm:$0xff] }
 0x709   : > { %v10746_v2 = vsel %vm34214_vm9, %v29879_v29, 0.0  ;;  %vm34229_vm9 = vmmov %vm34215_vm1 }
 0x70b   : > { %24494 = vmatmul.mubr.msk.f32.gmra.mrb[46].mxu0 %vm34206_vm4, %v10742_v33  ;;  %vm34217_vm4 = vmmov %vm34215_vm1  ;;  %v34218_v33 = vld [vmem:[#allocation38_spill] sm:$0xff] }
 0x70c   : > { %24496 = vmatprep.mubr.msk.f32.mxu0 %vm34208_vm13, %v34207_v59  ;;  %vm34219_vm13 = vnez %v34218_v33  ;;  %v10754_v33 = vsel %vm34063_vm15, %v29919_v6, 0.0 }
 0x70d   : > { %v10748_v59 = vsel %vm34219_vm13, %v29889_v22, 0.0 }
 0x70f   : > { %24497 = vmatmul.mubr.msk.f32.gmra.mrb[48].mxu0 %vm34211_vm7, %v10744_v39  ;;  %vm34222_vm7 = vmmov %vm34215_vm1  ;;  %v34223_v39 = vld [vmem:[#allocation43_spill] sm:$0xff] }
 0x710   : > { %24499 = vmatprep.mubr.msk.f32.mxu0 %vm34174_vm2, %v34212_v45  ;;  %vm34224_vm2 = vnez %v34223_v39  ;;  %v34233_v39 = vld [vmem:[#allocation72_spill] sm:$0xff] }
 0x711   : > { %v10750_v45 = vsel %vm34224_vm2, %v29899_v56, 0.0 }
 0x713   : > { %24500 = vmatmul.mubr.msk.f32.gmra.mrb[50].mxu0 %vm34215_vm1, %v10746_v2  ;;  %v34227_v2 = vld [vmem:[#allocation48_spill] sm:$0xff] }
 0x714   : > { %24502 = vmatprep.mubr.msk.f32.mxu0 %vm34217_vm4, %v34216_v55  ;;  %vm34228_vm4 = vnez %v34227_v2  ;;  %v30226_v2 = vld [vmem:[#allocation2 + $0x102] sm:$0xff] }
 0x715   : > { %v10752_v55 = vsel %vm34228_vm4, %v29909_v23, 0.0  ;;  %34236 = vst [vmem:[#allocation15_spill] sm:$0xff] %v30226_v2 }
 0x717   : > { %24503 = vmatmul.mubr.msk.f32.gmra.mrb[52].mxu0 %vm34220_vm12, %v10748_v59  ;;  %vm34230_vm12 = vmmov %vm34215_vm1  ;;  %v34238_v59 = vld [vmem:[#allocation60_spill] sm:$0xff] }
 0x718   : > { %24505 = vmatprep.mubr.msk.f32.mxu0 %vm34222_vm7, %v34221_v53  ;;  %vm34232_vm7 = vmmov %vm34215_vm1 }
 0x71b   : > { %24506 = vmatmul.mubr.msk.f32.gmra.mrb[54].mxu0 %vm34225_vm6, %v10750_v45  ;;  %vm34234_vm6 = vmmov %vm34215_vm1  ;;  %v11994_v45 = vld [vmem:[%s32724_s3 + $0x68] sm:$0xf] }
 0x71c   : > { %24508 = vmatprep.mubr.msk.f32.mxu0 %vm34215_vm1, %v34226_v28  ;;  %v10756_v28 = vsel %vm34066_vm11, %v29929_v46, 0.0  ;;  %vm34244_vm11 = vmmov %vm34215_vm1 }
 0x71f   : > { %24509 = vmatmul.mubr.msk.f32.gmra.mrb[56].mxu0 %vm34229_vm9, %v10752_v55  ;;  %v30228_v55 = vld [vmem:[#allocation2 + $0x10a] sm:$0xff]  ;;  %vm34237_vm9 = vmmov %vm34215_vm1 }
 0x720   : > { %24511 = vmatprep.mubr.msk.f32.mxu0 %vm34230_vm12, %v29917_v44  ;;  %vm34239_vm12 = vnez %v34238_v59 }
 0x723   : > { %24512 = vmatmul.mubr.msk.f32.gmra.mrb[58].mxu0 %vm34232_vm7, %v10754_v33  ;;  %v10758_v33 = vsel %vm34239_vm12, %v30228_v55, 0.0  ;;  %vm34240_vm7 = vmmov %vm34215_vm1  ;;  %vm34243_vm12 = vnez %v33746_v52 }
 0x724   : > { %24514 = vmatprep.mubr.msk.f32.mxu0 %vm34234_vm6, %v34233_v39  ;;  %v11993_v39 = vld [vmem:[%s32724_s3 + $0x60] sm:$0xff]  ;;  %vm34241_vm6 = vnez %v33743_v7  ;;  %v11151_v59 = vsel %vm34243_vm12, %v29635_v49, 0.0  ;;  %vm34249_vm12 = vnez %v33361_v38 }
 0x725   : > { %v11155_v49 = vsel %vm34249_vm12, %v29655_v27, 0.0  ;;  %v34285_v27 = vld [vmem:[#allocation65_spill] sm:$0xff] }
 0x727   : > { %24515 = vmatmul.mubr.msk.f32.gmra.mrb[60].mxu0 %vm34215_vm1, %v10756_v28  ;;  %v11149_v28 = vsel %vm34241_vm6, %v29622_v21, 0.0 }
 0x728   : > { %24517 = vmatprep.mubr.msk.f32.mxu0 %vm34237_vm9, %v30226_v2  ;;  %v25678_v2 = vpack.c.bf16 %v11994_v45, %v11993_v39  ;;  %vm34242_vm9 = vmmov %vm34215_vm1  ;;  %v11539_v39 = vld [vmem:[#allocation2 + $0x21] sm:$0xff]  ;;  %v11541_v45 = vld [vmem:[#allocation2 + $0x31] sm:$0xff] }
 0x72b   : > { %24518 = vmatmul.mubr.msk.f32.gmra.mrb[62].mxu0 %vm34240_vm7, %v10758_v33  ;;  %vm34245_vm7 = vmmov %vm34215_vm1  ;;  %v11542_v33 = vld [vmem:[#allocation2 + $0x39] sm:$0xff] }
 0x72c   : > { %24524 = vmatprep.mubr.msk.f32.mxu0 %vm34215_vm1, %v11149_v28  ;;  %vm34246_vm1 = vnez %v33748_v61  ;;  %vm34248_vm6 = vmmov %vm34245_vm7  ;;  %v11543_v28 = vld [vmem:[#allocation2 + $0x41] sm:$0xff] }
 0x72d   : > { %v11153_v21 = vsel %vm34246_vm1, %v29645_v10, 0.0  ;;  %vm34251_vm15 = vmmov %vm34248_vm6  ;;  %v11147_v10 = vld [vmem:[#allocation2 + $0x110] sm:$0xff] }
 0x72e   : > { %vm34253_vm4 = vmmov %vm34248_vm6 }
 0x72f   : > { %24525 = vmatmul.mubr.msk.f32.vlgmr.msra.gmra.mrb[32].mxu0 %vm34242_vm9, %v29637_v11  ;;  %vm34247_vm9 = vmmov %vm34245_vm7 }
 0x730   : > { %25677 = vmatpush3.bf16.msk.msra.mxu0 %vm29386_vm10, %v25672_v40  ;;  %24527 = vmatprep.mubr.msk.f32.mxu0 %vm34244_vm11, %v11151_v59  ;;  %vm34250_vm11 = vmmov %vm34248_vm6  ;;  %v11148_v40 = vld [vmem:[#allocation2 + $0x118] sm:$0xff]  ;;  %v11540_v59 = vld [vmem:[#allocation2 + $0x29] sm:$0xff] }
 0x731   : > { %25680 = vmatprep.subr.msk.bf16.mxu0 %vm29386_vm10, %v25678_v2  ;;  %vm34256_vm1 = vmmov %vm34253_vm4 }
 0x732   : > { %vm34259_vm12 = vmmov %vm34256_vm1 }
 0x733   : > { %24528 = vmatmul.mubr.msk.f32.gmra.mrb[34].mxu0 %vm34245_vm7, %v29647_v32  ;;  %vm34252_vm7 = vnez %v33370_v50 }
 0x734   : > { %24530 = vmatprep.mubr.msk.f32.mxu0 %vm34247_vm9, %v11153_v21  ;;  %v11157_v32 = vsel %vm34252_vm7, %v29665_v1, 0.0  ;;  %vm34254_vm9 = vmmov %vm34253_vm4  ;;  %v34284_v1 = vld [vmem:[#allocation16_spill] sm:$0xff] }
 0x735   : > { %vm34262_vm7 = vmmov %vm34256_vm1  ;;  %v11544_v21 = vld [vmem:[#allocation2 + $0x49] sm:$0xff] }
 0x737   : > { %24531 = vmatmul.mubr.msk.f32.gmra.mrb[36].mxu0 %vm34248_vm6, %v29657_v43  ;;  %vm34255_vm6 = vnez %v33383_v24 }
 0x738   : > { %24533 = vmatprep.mubr.msk.f32.mxu0 %vm34250_vm11, %v11155_v49  ;;  %v11159_v43 = vsel %vm34255_vm6, %v29675_v17, 0.0  ;;  %vm34257_vm11 = vmmov %vm34256_vm1  ;;  %v11545_v49 = vld [vmem:[#allocation2 + $0x51] sm:$0xff] }
 0x739   : > { %vm34264_vm6 = vmmov %vm34256_vm1 }
 0x73b   : > { %24534 = vmatmul.mubr.msk.f32.gmra.mrb[38].mxu0 %vm34251_vm15, %v29667_v54  ;;  %vm34258_vm15 = vnez %v33395_v8 }
 0x73c   : > { %24536 = vmatprep.mubr.msk.f32.mxu0 %vm34253_vm4, %v11157_v32  ;;  %v11161_v54 = vsel %vm34258_vm15, %v29685_v15, 0.0  ;;  %vm34260_vm4 = vmmov %vm34256_vm1  ;;  %v34279_v15 = vld [vmem:[#allocation64_spill] sm:$0xff]  ;;  %v11546_v32 = vld [vmem:[#allocation2 + $0x59] sm:$0xff] }
 0x73d   : > { %vm34267_vm15 = vmmov %vm34256_vm1 }
 0x73f   : > { %24537 = vmatmul.mubr.msk.f32.gmra.mrb[40].mxu0 %vm34254_vm9, %v29677_v20  ;;  %vm34261_vm9 = vnez %v33406_v4 }
 0x740   : > { %24539 = vmatprep.mubr.msk.f32.mxu0 %vm34256_vm1, %v11159_v43  ;;  %v11163_v20 = vsel %vm34261_vm9, %v29695_v60, 0.0  ;;  %vm34270_vm9 = vmmov %vm34264_vm6  ;;  %v11171_v60 = vsel %vm34096_vm14, %v29735_v37, 0.0  ;;  %v34282_v37 = vld [vmem:[#allocation54_spill] sm:$0xff] }
 0x741   : > { %v11547_v43 = vld [vmem:[#allocation2 + $0x61] sm:$0xff] }
 0x743   : > { %24540 = vmatmul.mubr.msk.f32.gmra.mrb[42].mxu0 %vm34257_vm11, %v29687_v0  ;;  %vm34263_vm11 = vnez %v33418_v58 }
 0x744   : > { %24542 = vmatprep.mubr.msk.f32.mxu0 %vm34259_vm12, %v11161_v54  ;;  %v11165_v0 = vsel %vm34263_vm11, %v29705_v35, 0.0  ;;  %vm34265_vm12 = vmmov %vm34256_vm1  ;;  %v34271_v35 = vld [vmem:[#allocation69_spill] sm:$0xff] }
 0x745   : > { %v11550_v54 = vld [vmem:[#allocation2 + $0x79] sm:$0xff] }
 0x747   : > { %24543 = vmatmul.mubr.msk.f32.gmra.mrb[44].mxu0 %vm34260_vm4, %v29697_v47  ;;  %vm34266_vm4 = vnez %v33429_v34 }
 0x748   : > { %24545 = vmatprep.mubr.msk.f32.mxu0 %vm34262_vm7, %v11163_v20  ;;  %v11167_v47 = vsel %vm34266_vm4, %v29715_v3, 0.0  ;;  %vm34268_vm7 = vmmov %vm34256_vm1  ;;  %v11173_v3 = vsel %vm34100_vm5, %v34104_v36, 0.0  ;;  %v34290_v36 = vld [vmem:[#allocation66_spill] sm:$0xff] }
 0x749   : > { %v11551_v20 = vld [vmem:[#allocation2 + $0x81] sm:$0xff] }
 0x74b   : > { %24546 = vmatmul.mubr.msk.f32.gmra.mrb[46].mxu0 %vm34256_vm1, %v29707_v25  ;;  %vm34269_vm1 = vnez %v33434_v30 }
 0x74c   : > { %24548 = vmatprep.mubr.msk.f32.mxu0 %vm34264_vm6, %v11165_v0  ;;  %v11169_v25 = vsel %vm34269_vm1, %v29725_v31, 0.0  ;;  %v34278_v31 = vld [vmem:[#allocation55_spill] sm:$0xff] }
 0x74d   : > { %v11552_v0 = vld [vmem:[#allocation2 + $0x89] sm:$0xff] }
 0x74f   : > { %24549 = vmatmul.mubr.msk.f32.gmra.mrb[48].mxu0 %vm34265_vm12, %v29717_v62  ;;  %v34272_v62 = vld [vmem:[#allocation62_spill] sm:$0xff]  ;;  %vm34273_vm12 = vmmov %vm34264_vm6 }
 0x750   : > { %24551 = vmatprep.mubr.msk.f32.mxu0 %vm34267_vm15, %v11167_v47  ;;  %vm34274_vm15 = vmmov %vm34264_vm6  ;;  %v11553_v47 = vld [vmem:[#allocation2 + $0x91] sm:$0xff] }
 0x753   : > { %24552 = vmatmul.mubr.msk.f32.gmra.mrb[50].mxu0 %vm34268_vm7, %v29727_v63  ;;  %v34275_v63 = vld [vmem:[#allocation63_spill] sm:$0xff]  ;;  %vm34276_vm7 = vmmov %vm34264_vm6 }
 0x754   : > { %24554 = vmatprep.mubr.msk.f32.mxu0 %vm34270_vm9, %v11169_v25  ;;  %vm34277_vm9 = vmmov %vm34264_vm6  ;;  %v11554_v25 = vld [vmem:[#allocation2 + $0x99] sm:$0xff] }
 0x755   : > { %vm34281_vm1 = vmmov %vm34276_vm7 }
 0x756   : > { %vm34287_vm14 = vmmov %vm34281_vm1 }
 0x757   : > { %24555 = vmatmul.mubr.msk.f32.gmra.mrb[52].mxu0 %vm34264_vm6, %v34271_v35  ;;  %vm34280_vm6 = vnez %v34279_v15  ;;  %vm34292_vm5 = vmmov %vm34281_vm1  ;;  %v11555_v35 = vld [vmem:[#allocation2 + $0xa1] sm:$0xff] }
 0x758   : > { %24557 = vmatprep.mubr.msk.f32.mxu0 %vm34273_vm12, %v11171_v60  ;;  %v11175_v17 = vsel %vm34280_vm6, %v34278_v31, 0.0  ;;  %vm34283_vm12 = vmmov %vm34281_vm1  ;;  %v11556_v60 = vld [vmem:[#allocation2 + $0xa9] sm:$0xff]  ;;  %v11558_v31 = vld [vmem:[#allocation2 + $0xb9] sm:$0xff] }
 0x759   : > { %vm34294_vm6 = vmmov %vm34281_vm1 }
 0x75b   : > { %24558 = vmatmul.mubr.msk.f32.gmra.mrb[54].mxu0 %vm34274_vm15, %v34102_v14  ;;  %vm34286_vm15 = vnez %v34285_v27  ;;  %v34288_v14 = vld [vmem:[#allocation70_spill] sm:$0xff]  ;;  %v14222_v27 = vld [vmem:[%s32725_s4 + $0x48] sm:$0xff] }
 0x75c   : > { %24560 = vmatprep.mubr.msk.f32.mxu0 %vm34276_vm7, %v11173_v3  ;;  %v11177_v11 = vsel %vm34286_vm15, %v34284_v1, 0.0  ;;  %vm34289_vm7 = vmmov %vm34281_vm1  ;;  %v11557_v3 = vld [vmem:[#allocation2 + $0xb1] sm:$0xff] }
 0x75d   : > { %v11561_v1 = vld [vmem:[#allocation2 + $0xd1] sm:$0xff] }
 0x75f   : > { %24561 = vmatmul.mubr.msk.f32.gmra.mrb[56].mxu0 %vm34277_vm9, %v34108_v12  ;;  %vm34291_vm9 = vnez %v34290_v36 }
 0x760   : > { %24563 = vmatprep.mubr.msk.f32.mxu0 %vm34281_vm1, %v11175_v17  ;;  %v11179_v12 = vsel %vm34291_vm9, %v11147_v10, 0.0  ;;  %vm34300_vm9 = vmmov %vm34281_vm1  ;;  %v11559_v17 = vld [vmem:[#allocation2 + $0xc1] sm:$0xff] }
 0x761   : > { %v11563_v10 = vld [vmem:[#allocation2 + $0xe1] sm:$0xff] }
 0x763   : > { %24564 = vmatmul.mubr.msk.f32.gmra.mrb[58].mxu0 %vm34283_vm12, %v34282_v37  ;;  %vm34293_vm12 = vmmov %vm34281_vm1  ;;  %v11560_v37 = vld [vmem:[#allocation2 + $0xc9] sm:$0xff] }
 0x764   : > { %24566 = vmatprep.mubr.msk.f32.mxu0 %vm34287_vm14, %v11177_v11  ;;  %vm34295_vm14 = vmmov %vm34281_vm1  ;;  %v11562_v11 = vld [vmem:[#allocation2 + $0xd9] sm:$0xff] }
 0x767   : > { %24567 = vmatmul.mubr.msk.f32.gmra.mrb[60].mxu0 %vm34289_vm7, %v34288_v14  ;;  %vm34296_vm7 = vmmov %vm34281_vm1  ;;  %v11564_v14 = vld [vmem:[#allocation2 + $0xe9] sm:$0xff] }
 0x768   : > { %24569 = vmatprep.mubr.msk.f32.mxu0 %vm34292_vm5, %v11179_v12  ;;  %vm34297_vm5 = vmmov %vm34281_vm1  ;;  %v11565_v12 = vld [vmem:[#allocation2 + $0xf1] sm:$0xff] }
 0x76b   : > { %24570 = vmatmul.mubr.msk.f32.gmra.mrb[62].mxu0 %vm34281_vm1, %v11148_v40  ;;  %v11566_v40 = vld [vmem:[#allocation2 + $0xf9] sm:$0xff] }
 0x76c   : > { %24576 = vmatprep.mubr.msk.f32.mxu0 %vm34293_vm12, %v11539_v39  ;;  %vm34298_vm12 = vmmov %vm34281_vm1  ;;  %v11569_v39 = vld [vmem:[#allocation2 + $0x111] sm:$0xff] }
 0x76f   : > { %24577 = vmatmul.mubr.msk.f32.vlgmr.msra.gmra.mrb[32].mxu0 %vm34294_vm6, %v11540_v59  ;;  %vm34299_vm6 = vmmov %vm34281_vm1  ;;  %v11570_v59 = vld [vmem:[#allocation2 + $0x119] sm:$0xff] }
 0x770   : > { %25683 = vmatpush3.bf16.msk.msra.mxu0 %vm29386_vm10, %v25678_v2  ;;  %24579 = vmatprep.mubr.msk.f32.mxu0 %vm34295_vm14, %v11541_v45  ;;  %vm34301_vm10 = vmmov %vm34281_vm1  ;;  %v11549_v2 = vld [vmem:[#allocation2 + $0x71] sm:$0xff]  ;;  %v34322_v45 = vld [vmem:[#allocation3_spill] sm:$0xff] }
 0x771   : > { %vm34302_vm14 = vmmov %vm34281_vm1 }
 0x773   : > { %24580 = vmatmul.mubr.msk.f32.gmra.mrb[34].mxu0 %vm34296_vm7, %v11542_v33  ;;  %vm34303_vm7 = vmmov %vm34281_vm1 }
 0x774   : > { %24582 = vmatprep.mubr.msk.f32.mxu0 %vm34297_vm5, %v11543_v28  ;;  %vm34304_vm5 = vmmov %vm34281_vm1  ;;  %v34325_v28 = vld [vmem:[#allocation19_spill] sm:$0xff] }
 0x777   : > { %24583 = vmatmul.mubr.msk.f32.gmra.mrb[36].mxu0 %vm34281_vm1, %v11544_v21  ;;  %v34329_v21 = vld [vmem:[#allocation22_spill] sm:$0xff] }
 0x778   : > { %24585 = vmatprep.mubr.msk.f32.mxu0 %vm34298_vm12, %v11545_v49  ;;  %vm34305_vm12 = vmmov %vm34281_vm1  ;;  %v11966_v49 = vsel %vm34186_vm8, %v29819_v42, 0.0  ;;  %v34341_v42 = vld [vmem:[#allocation61_spill] sm:$0xff] }
 0x77b   : > { %24586 = vmatmul.mubr.msk.f32.gmra.mrb[38].mxu0 %vm34299_vm6, %v11546_v32  ;;  %vm34307_vm6 = vmmov %vm34281_vm1  ;;  %v34334_v32 = vld [vmem:[#allocation11_spill] sm:$0xff] }
 0x77c   : > { %24588 = vmatprep.mubr.msk.f32.mxu0 %vm34300_vm9, %v11547_v43  ;;  %vm34306_vm9 = vmmov %vm34281_vm1  ;;  %v11968_v43 = vsel %vm34032_vm3, %v29829_v16, 0.0  ;;  %v34345_v16 = vld [vmem:[#allocation21_spill] sm:$0xff] }
 0x77d   : > { %vm34349_vm3 = vmmov %vm34281_vm1 }
 0x77f   : > { %24589 = vmatmul.mubr.msk.f32.gmra.mrb[40].mxu0 %vm34301_vm10, %v11548_v26  ;;  %vm34308_vm10 = vmmov %vm34281_vm1  ;;  %v34338_v26 = vld [vmem:[#allocation14_spill] sm:$0xff] }
 0x780   : > { %24591 = vmatprep.mubr.msk.f32.mxu0 %vm34302_vm14, %v11549_v2  ;;  %vm34309_vm14 = vmmov %vm34281_vm1 }
 0x783   : > { %24592 = vmatmul.mubr.msk.f32.gmra.mrb[42].mxu0 %vm34303_vm7, %v11550_v54  ;;  %vm34310_vm7 = vmmov %vm34281_vm1  ;;  %v34342_v54 = vld [vmem:[#allocation17_spill] sm:$0xff] }
 0x784   : > { %24594 = vmatprep.mubr.msk.f32.mxu0 %vm34304_vm5, %v11551_v20  ;;  %vm34311_vm5 = vmmov %vm34281_vm1 }
 0x787   : > { %24595 = vmatmul.mubr.msk.f32.gmra.mrb[44].mxu0 %vm34281_vm1, %v11552_v0  ;;  %v34347_v0 = vld [vmem:[#allocation20_spill] sm:$0xff] }
 0x788   : > { %24597 = vmatprep.mubr.msk.f32.mxu0 %vm34305_vm12, %v11553_v47  ;;  %vm34312_vm12 = vmmov %vm34281_vm1 }
 0x78b   : > { %24598 = vmatmul.mubr.msk.f32.gmra.mrb[46].mxu0 %vm34306_vm9, %v11554_v25  ;;  %vm34313_vm9 = vmmov %vm34281_vm1  ;;  %v34352_v25 = vld [vmem:[#allocation23_spill] sm:$0xff] }
 0x78c   : > { %24600 = vmatprep.mubr.msk.f32.mxu0 %vm34307_vm6, %v11555_v35  ;;  %vm34314_vm6 = vmmov %vm34281_vm1 }
 0x78f   : > { %24601 = vmatmul.mubr.msk.f32.gmra.mrb[48].mxu0 %vm34308_vm10, %v11556_v60  ;;  %vm34315_vm10 = vmmov %vm34281_vm1  ;;  %v34357_v60 = vld [vmem:[#allocation27_spill] sm:$0xff] }
 0x790   : > { %24603 = vmatprep.mubr.msk.f32.mxu0 %vm34309_vm14, %v11557_v3  ;;  %vm34316_vm14 = vmmov %vm34281_vm1 }
 0x793   : > { %24604 = vmatmul.mubr.msk.f32.gmra.mrb[50].mxu0 %vm34310_vm7, %v11558_v31  ;;  %vm34317_vm7 = vmmov %vm34281_vm1  ;;  %v34361_v31 = vld [vmem:[#allocation33_spill] sm:$0xff] }
 0x794   : > { %24606 = vmatprep.mubr.msk.f32.mxu0 %vm34311_vm5, %v11559_v17  ;;  %vm34318_vm5 = vmmov %vm34281_vm1 }
 0x797   : > { %24607 = vmatmul.mubr.msk.f32.gmra.mrb[52].mxu0 %vm34281_vm1, %v11560_v37  ;;  %v11982_v37 = vsel %vm34219_vm13, %v29899_v56, 0.0  ;;  %v34374_v56 = vld [vmem:[#allocation72_spill] sm:$0xff]  ;;  %vm34378_vm13 = vmmov %vm34349_vm3 }
 0x798   : > { %24609 = vmatprep.mubr.msk.f32.mxu0 %vm34312_vm12, %v11561_v1  ;;  %vm34319_vm12 = vmmov %vm34281_vm1  ;;  %v34369_v1 = vld [vmem:[#allocation43_spill] sm:$0xff] }
 0x79b   : > { %24610 = vmatmul.mubr.msk.f32.gmra.mrb[54].mxu0 %vm34313_vm9, %v11562_v11  ;;  %vm34320_vm9 = vmmov %vm34281_vm1  ;;  %v11984_v11 = vsel %vm34224_vm2, %v29909_v23, 0.0  ;;  %v34379_v23 = vld [vmem:[#allocation15_spill] sm:$0xff] }
 0x79c   : > { %24612 = vmatprep.mubr.msk.f32.mxu0 %vm34314_vm6, %v11563_v10  ;;  %vm34321_vm6 = vmmov %vm34281_vm1  ;;  %v34376_v10 = vld [vmem:[#allocation52_spill] sm:$0xff] }
 0x79d   : > { %vm34386_vm2 = vmmov %vm34349_vm3 }
 0x79f   : > { %24613 = vmatmul.mubr.msk.f32.gmra.mrb[56].mxu0 %vm34315_vm10, %v11564_v14  ;;  %vm34323_vm10 = vnez %v34322_v45 }
 0x7a0   : > { %24615 = vmatprep.mubr.msk.f32.mxu0 %vm34316_vm14, %v11565_v12  ;;  %v11962_v33 = vsel %vm34323_vm10, %v29799_v57, 0.0  ;;  %vm34324_vm14 = vmmov %vm34281_vm1  ;;  %v34332_v57 = vld [vmem:[#allocation58_spill] sm:$0xff]  ;;  %v11959_v12 = vld [vmem:[#allocation2 + $0x112] sm:$0xff] }
 0x7a3   : > { %24616 = vmatmul.mubr.msk.f32.gmra.mrb[58].mxu0 %vm34317_vm7, %v11566_v40  ;;  %vm34326_vm7 = vmmov %vm34281_vm1  ;;  %v34380_v40 = vld [vmem:[#allocation57_spill] sm:$0xff] }
 0x7a4   : > { %24618 = vmatprep.mubr.msk.f32.mxu0 %vm34318_vm5, %v30118_v41  ;;  %vm34328_vm5 = vmmov %vm34281_vm1 }
 0x7a7   : > { %24619 = vmatmul.mubr.msk.f32.gmra.mrb[60].mxu0 %vm34281_vm1, %v30122_v18  ;;  %v11964_v18 = vsel %vm34182_vm0, %v29809_v48, 0.0  ;;  %v34336_v48 = vld [vmem:[#allocation59_spill] sm:$0xff] }
 0x7a8   : > { %24621 = vmatprep.mubr.msk.f32.mxu0 %vm34319_vm12, %v11569_v39  ;;  %vm34331_vm12 = vmmov %vm34281_vm1  ;;  %v34384_v39 = vld [vmem:[#allocation60_spill] sm:$0xff] }
 0x7ab   : > { %24622 = vmatmul.mubr.msk.f32.gmra.mrb[62].mxu0 %vm34320_vm9, %v11570_v59  ;;  %vm34333_vm9 = vmmov %vm34281_vm1 }
 0x7ac   : > { %24628 = vmatprep.mubr.msk.f32.mxu0 %vm34321_vm6, %v34179_v51  ;;  %vm34335_vm6 = vmmov %vm34281_vm1 }
 0x7af   : > { %24629 = vmatmul.mubr.msk.f32.vlgmr.msra.gmra.mrb[32].mxu0 %vm34324_vm14, %v11962_v33  ;;  %vm34337_vm14 = vmmov %vm34281_vm1  ;;  %v12707_v33 = vld [vmem:[%s32725_s4 + $0x18] sm:$0xff] }
 0x7b0   : > { %24631 = vmatprep.mubr.msk.f32.mxu0 %vm34326_vm7, %v34325_v28  ;;  %vm34339_vm7 = vnez %v34338_v26 }
 0x7b1   : > { %v11970_v2 = vsel %vm34339_vm7, %v29839_v9, 0.0  ;;  %v34350_v9 = vld [vmem:[#allocation24_spill] sm:$0xff]  ;;  %vm34354_vm7 = vmmov %vm34349_vm3 }
 0x7b3   : > { %24632 = vmatmul.mubr.msk.f32.gmra.mrb[34].mxu0 %vm34328_vm5, %v11964_v18  ;;  %vm34340_vm5 = vmmov %vm34281_vm1  ;;  %v12672_v18 = vld [vmem:[%s32725_s4] sm:$0xff] }
 0x7b4   : > { %24634 = vmatprep.mubr.msk.f32.mxu0 %vm34281_vm1, %v34329_v21  ;;  %v12673_v21 = vld [vmem:[%s32725_s4 + $0x8] sm:$0xff] }
 0x7b7   : > { %24635 = vmatmul.mubr.msk.f32.gmra.mrb[36].mxu0 %vm34331_vm12, %v11966_v49  ;;  %vm34343_vm12 = vnez %v34342_v54  ;;  %v25688_v49 = vpack.c.bf16 %v12673_v21, %v12672_v18 }
 0x7b8   : > { %24637 = vmatprep.mubr.msk.f32.mxu0 %vm34333_vm9, %v34332_v57  ;;  %v11972_v20 = vsel %vm34343_vm12, %v29849_v13, 0.0  ;;  %vm34344_vm9 = vmmov %vm34281_vm1  ;;  %v34355_v13 = vld [vmem:[#allocation29_spill] sm:$0xff]  ;;  %v12675_v57 = vld [vmem:[#allocation2 + $0x9] sm:$0xff] }
 0x7b9   : > { %vm34359_vm12 = vmmov %vm34349_vm3 }
 0x7bb   : > { %24638 = vmatmul.mubr.msk.f32.gmra.mrb[38].mxu0 %vm34335_vm6, %v11968_v43  ;;  %vm34346_vm6 = vmmov %vm34281_vm1 }
 0x7bc   : > { %24640 = vmatprep.mubr.msk.f32.mxu0 %vm34337_vm14, %v34336_v48  ;;  %vm34348_vm14 = vnez %v34347_v0 }
 0x7bd   : > { %v11974_v47 = vsel %vm34348_vm14, %v29859_v5, 0.0  ;;  %v34360_v5 = vld [vmem:[#allocation67_spill] sm:$0xff]  ;;  %vm34363_vm14 = vmmov %vm34349_vm3 }
 0x7bf   : > { %24641 = vmatmul.mubr.msk.f32.gmra.mrb[40].mxu0 %vm34340_vm5, %v11970_v2  ;;  %vm34351_vm5 = vmmov %vm34281_vm1 }
 0x7c0   : > { %24643 = vmatprep.mubr.msk.f32.mxu0 %vm34281_vm1, %v34341_v42  ;;  %vm34353_vm1 = vnez %v34352_v25 }
 0x7c1   : > { %v11976_v35 = vsel %vm34353_vm1, %v29869_v19, 0.0  ;;  %v34365_v19 = vld [vmem:[#allocation38_spill] sm:$0xff] }
 0x7c3   : > { %24644 = vmatmul.mubr.msk.f32.gmra.mrb[42].mxu0 %vm34344_vm9, %v11972_v20  ;;  %vm34356_vm9 = vmmov %vm34349_vm3 }
 0x7c4   : > { %24646 = vmatprep.mubr.msk.f32.mxu0 %vm34346_vm6, %v34345_v16  ;;  %vm34358_vm6 = vnez %v34357_v60 }
 0x7c5   : > { %v11978_v3 = vsel %vm34358_vm6, %v29879_v29, 0.0  ;;  %v34367_v29 = vld [vmem:[#allocation71_spill] sm:$0xff] }
 0x7c7   : > { %24647 = vmatmul.mubr.msk.f32.gmra.mrb[44].mxu0 %vm34349_vm3, %v11974_v47 }
 0x7c8   : > { %24649 = vmatprep.mubr.msk.f32.mxu0 %vm34351_vm5, %v34350_v9  ;;  %vm34362_vm5 = vnez %v34361_v31 }
 0x7c9   : > { %v11980_v17 = vsel %vm34362_vm5, %v29889_v22, 0.0  ;;  %v34371_v22 = vld [vmem:[#allocation48_spill] sm:$0xff]  ;;  %vm34373_vm5 = vmmov %vm34349_vm3 }
 0x7cb   : > { %24650 = vmatmul.mubr.msk.f32.gmra.mrb[46].mxu0 %vm34354_vm7, %v11976_v35  ;;  %vm34364_vm7 = vmmov %vm34349_vm3 }
 0x7cc   : > { %24652 = vmatprep.mubr.msk.f32.mxu0 %vm34356_vm9, %v34355_v13  ;;  %vm34366_vm9 = vmmov %vm34349_vm3 }
 0x7cf   : > { %24653 = vmatmul.mubr.msk.f32.gmra.mrb[48].mxu0 %vm34359_vm12, %v11978_v3  ;;  %vm34368_vm12 = vmmov %vm34349_vm3 }
 0x7d0   : > { %24655 = vmatprep.mubr.msk.f32.mxu0 %vm34349_vm3, %v34360_v5 }
 0x7d3   : > { %24656 = vmatmul.mubr.msk.f32.gmra.mrb[50].mxu0 %vm34363_vm14, %v11980_v17  ;;  %vm34370_vm14 = vmmov %vm34349_vm3 }
 0x7d4   : > { %24658 = vmatprep.mubr.msk.f32.mxu0 %vm34364_vm7, %v34221_v53  ;;  %vm34372_vm7 = vnez %v34371_v22 }
 0x7d5   : > { %v11986_v53 = vsel %vm34372_vm7, %v29919_v6, 0.0  ;;  %vm34382_vm7 = vmmov %vm34349_vm3 }
 0x7d7   : > { %24659 = vmatmul.mubr.msk.f32.gmra.mrb[52].mxu0 %vm34366_vm9, %v11982_v37  ;;  %vm34375_vm9 = vmmov %vm34349_vm3 }
 0x7d8   : > { %24661 = vmatprep.mubr.msk.f32.mxu0 %vm34368_vm12, %v34367_v29  ;;  %vm34377_vm12 = vnez %v34376_v10  ;;  %v14640_v10 = vld [vmem:[%s32725_s4 + $0x50] sm:$0xff] }
 0x7d9   : > { %v11988_v14 = vsel %vm34377_vm12, %v29929_v46, 0.0  ;;  %v12706_v46 = vld [vmem:[%s32725_s4 + $0x10] sm:$0xff] }
 0x7da   : > { %v25684_v28 = vpack.c.bf16 %v12707_v33, %v12706_v46 }
 0x7db   : > { %24662 = vmatmul.mubr.msk.f32.gmra.mrb[54].mxu0 %vm34349_vm3, %v11984_v11 }
 0x7dc   : > { %24664 = vmatprep.mubr.msk.f32.mxu0 %vm34370_vm14, %v29917_v44  ;;  %v11960_v44 = vld [vmem:[#allocation2 + $0x11a] sm:$0xff]  ;;  %vm34381_vm14 = vnez %v34380_v40  ;;  %25685 = vmatprep.subr.bf16.mxu1 %v25684_v28 }
 0x7dd   : > { %v11990_v6 = vsel %vm34381_vm14, %v30228_v55, 0.0  ;;  %25687 = vmatpush3.bf16.msra.mxu1 %v25684_v28  ;;  %v12674_v55 = vld [vmem:[#allocation2 + $0x1] sm:$0xff]  ;;  %v14641_v40 = vld [vmem:[%s32725_s4 + $0x58] sm:$0xff] }
 0x7de   : > { %25689 = vmatprep.subr.bf16.mxu1 %v25688_v49 }
 0x7df   : > { %24665 = vmatmul.mubr.msk.f32.gmra.mrb[56].mxu0 %vm34373_vm5, %v11986_v53  ;;  %vm34383_vm5 = vmmov %vm34349_vm3 }
 0x7e0   : > { %24667 = vmatprep.mubr.msk.f32.mxu0 %vm34375_vm9, %v34374_v56  ;;  %vm34385_vm9 = vnez %v34384_v39 }
 0x7e1   : > { %v11992_v59 = vsel %vm34385_vm9, %v11960_v44, 0.0 }
 0x7e3   : > { %24668 = vmatmul.mubr.msk.f32.gmra.mrb[58].mxu0 %vm34378_vm13, %v11988_v14  ;;  %vm33089_vm13 = vcmask 130048  }
 0x7e4   : > { %24670 = vmatprep.mubr.msk.f32.mxu0 %vm34349_vm3, %v34379_v23  ;;  %24680 = vmatprep.mubr.msk.f32.mxu1 %vm33089_vm13, %v12674_v55 }
 0x7e5   : > { %24681 = vmatmul.mubr.msk.f32.vlgmr.msra.gmra.mrb[64].mxu1 %vm33089_vm13, %v12675_v57 }
 0x7e6   : > { %25691 = vmatpush3.bf16.msra.mxu1 %v25688_v49 }
 0x7e7   : > { %24671 = vmatmul.mubr.msk.f32.gmra.mrb[60].mxu0 %vm34382_vm7, %v11990_v6 }
 0x7e8   : > { %24673 = vmatprep.mubr.msk.f32.mxu0 %vm34383_vm5, %v11959_v12 }
 0x7eb   : > { %24674 = vmatmul.mubr.msk.f32.gmra.mrb[62].mxu0 %vm34386_vm2, %v11992_v59 }
 0x882   : > { %v24630_v43 = vpop.f32.mrb[32].mxu0 }
 0x883   : > { %vm12352_vm2 = vcmp.ge.f32.partialorder %v24630_v43, 0.0  ;;  %v12384_v48 = vmul.f32 0.2, %v24630_v43  ;;  %v12160_v2 = vpop.f32.mrb[33].mxu0 }
 0x884   : > { %vm12351_vm7 = vcmp.ge.f32.partialorder %v12160_v2, 0.0  ;;  %v12383_v42 = vmul.f32 0.2, %v12160_v2 }
 0x885   : > { %v12416_v20 = vsel %vm12352_vm2, %v24630_v43, %v12384_v48 }
 0x886   : > { %12481 = vrot.lane.b32.xlu1 %v12416_v20, %s27065_s29  ;;  %v24633_v16 = vpop.f32.mrb[34].mxu0  ;;  %v12415_v47 = vsel %vm12351_vm7, %v12160_v2, %v12383_v42 }
 0x887   : > { %vm12354_vm3 = vcmp.ge.f32.partialorder %v24633_v16, 0.0  ;;  %v12386_v9 = vmul.f32 0.2, %v24633_v16  ;;  %12479 = vrot.lane.b32.xlu0 %v12415_v47, %s27065_s29  ;;  %v12170_v35 = vpop.f32.mrb[35].mxu0 }
 0x888   : > { %vm12353_vm5 = vcmp.ge.f32.partialorder %v12170_v35, 0.0  ;;  %v12385_v13 = vmul.f32 0.2, %v12170_v35 }
 0x889   : > { %v12418_v3 = vsel %vm12354_vm3, %v24633_v16, %v12386_v9 }
 0x88a   : > { %12485 = vrot.lane.b32.xlu1 %v12418_v3, %s27065_s29  ;;  %v24636_v5 = vpop.f32.mrb[36].mxu0  ;;  %v12417_v17 = vsel %vm12353_vm5, %v12170_v35, %v12385_v13 }
 0x88b   : > { %vm12356_vm13 = vcmp.ge.f32.partialorder %v24636_v5, 0.0  ;;  %v12388_v37 = vmul.f32 0.2, %v24636_v5  ;;  %12483 = vrot.lane.b32.xlu0 %v12417_v17, %s27065_s29  ;;  %v12180_v29 = vpop.f32.mrb[37].mxu0 }
 0x88c   : > { %vm12355_vm2 = vcmp.ge.f32.partialorder %v12180_v29, 0.0  ;;  %v12387_v11 = vmul.f32 0.2, %v12180_v29 }
 0x88d   : > { %v12420_v53 = vsel %vm12356_vm13, %v24636_v5, %v12388_v37 }
 0x88e   : > { %12489 = vrot.lane.b32.xlu1 %v12420_v53, %s27065_s29  ;;  %v24639_v56 = vpop.f32.mrb[38].mxu0  ;;  %v12419_v14 = vsel %vm12355_vm2, %v12180_v29, %v12387_v11 }
 0x88f   : > { %vm12358_vm7 = vcmp.ge.f32.partialorder %v24639_v56, 0.0  ;;  %v12390_v23 = vmul.f32 0.2, %v24639_v56  ;;  %12487 = vrot.lane.b32.xlu0 %v12419_v14, %s27065_s29  ;;  %v12190_v12 = vpop.f32.mrb[39].mxu0 }
 0x890   : > { %vm12357_vm3 = vcmp.ge.f32.partialorder %v12190_v12, 0.0  ;;  %v12389_v44 = vmul.f32 0.2, %v12190_v12 }
 0x891   : > { %v12422_v6 = vsel %vm12358_vm7, %v24639_v56, %v12390_v23 }
 0x892   : > { %12493 = vrot.lane.b32.xlu1 %v12422_v6, %s27065_s29  ;;  %v24642_v59 = vpop.f32.mrb[40].mxu0  ;;  %v12421_v46 = vsel %vm12357_vm3, %v12190_v12, %v12389_v44 }
 0x893   : > { %vm12360_vm5 = vcmp.ge.f32.partialorder %v24642_v59, 0.0  ;;  %v12392_v33 = vmul.f32 0.2, %v24642_v59  ;;  %12491 = vrot.lane.b32.xlu0 %v12421_v46, %s27065_s29  ;;  %v12200_v28 = vpop.f32.mrb[41].mxu0 }
 0x894   : > { %vm12359_vm13 = vcmp.ge.f32.partialorder %v12200_v28, 0.0  ;;  %v12391_v55 = vmul.f32 0.2, %v12200_v28 }
 0x895   : > { %v12424_v18 = vsel %vm12360_vm5, %v24642_v59, %v12392_v33 }
 0x896   : > { %12497 = vrot.lane.b32.xlu1 %v12424_v18, %s27065_s29  ;;  %v24645_v21 = vpop.f32.mrb[42].mxu0  ;;  %v12423_v49 = vsel %vm12359_vm13, %v12200_v28, %v12391_v55 }
 0x897   : > { %vm12362_vm2 = vcmp.ge.f32.partialorder %v24645_v21, 0.0  ;;  %v12394_v57 = vmul.f32 0.2, %v24645_v21  ;;  %12495 = vrot.lane.b32.xlu0 %v12423_v49, %s27065_s29  ;;  %v12210_v43 = vpop.f32.mrb[43].mxu0 }
 0x898   : > { %vm12361_vm7 = vcmp.ge.f32.partialorder %v12210_v43, 0.0  ;;  %v12393_v48 = vmul.f32 0.2, %v12210_v43 }
 0x899   : > { %v12426_v2 = vsel %vm12362_vm2, %v24645_v21, %v12394_v57 }
 0x89a   : > { %12501 = vrot.lane.b32.xlu1 %v12426_v2, %s27065_s29  ;;  %v24648_v42 = vpop.f32.mrb[44].mxu0  ;;  %v12425_v20 = vsel %vm12361_vm7, %v12210_v43, %v12393_v48 }
 0x89b   : > { %vm12364_vm3 = vcmp.ge.f32.partialorder %v24648_v42, 0.0  ;;  %v12396_v16 = vmul.f32 0.2, %v24648_v42  ;;  %12499 = vrot.lane.b32.xlu0 %v12425_v20, %s27065_s29  ;;  %v12220_v47 = vpop.f32.mrb[45].mxu0 }
 0x89c   : > { %vm12363_vm5 = vcmp.ge.f32.partialorder %v12220_v47, 0.0  ;;  %v12395_v9 = vmul.f32 0.2, %v12220_v47 }
 0x89d   : > { %v12428_v35 = vsel %vm12364_vm3, %v24648_v42, %v12396_v16 }
 0x89e   : > { %12505 = vrot.lane.b32.xlu1 %v12428_v35, %s27065_s29  ;;  %v24651_v13 = vpop.f32.mrb[46].mxu0  ;;  %v12427_v3 = vsel %vm12363_vm5, %v12220_v47, %v12395_v9 }
 0x89f   : > { %vm12366_vm13 = vcmp.ge.f32.partialorder %v24651_v13, 0.0  ;;  %v12398_v5 = vmul.f32 0.2, %v24651_v13  ;;  %12503 = vrot.lane.b32.xlu0 %v12427_v3, %s27065_s29  ;;  %v12230_v17 = vpop.f32.mrb[47].mxu0 }
 0x8a0   : > { %vm12365_vm2 = vcmp.ge.f32.partialorder %v12230_v17, 0.0  ;;  %v12397_v37 = vmul.f32 0.2, %v12230_v17 }
 0x8a1   : > { %v12430_v29 = vsel %vm12366_vm13, %v24651_v13, %v12398_v5 }
 0x8a2   : > { %12509 = vrot.lane.b32.xlu1 %v12430_v29, %s27065_s29  ;;  %v24654_v11 = vpop.f32.mrb[48].mxu0  ;;  %v12429_v53 = vsel %vm12365_vm2, %v12230_v17, %v12397_v37 }
 0x8a3   : > { %vm12368_vm7 = vcmp.ge.f32.partialorder %v24654_v11, 0.0  ;;  %v12400_v56 = vmul.f32 0.2, %v24654_v11  ;;  %12507 = vrot.lane.b32.xlu0 %v12429_v53, %s27065_s29  ;;  %v12240_v14 = vpop.f32.mrb[49].mxu0 }
 0x8a4   : > { %vm12367_vm3 = vcmp.ge.f32.partialorder %v12240_v14, 0.0  ;;  %v12399_v23 = vmul.f32 0.2, %v12240_v14 }
 0x8a5   : > { %v12432_v12 = vsel %vm12368_vm7, %v24654_v11, %v12400_v56 }
 0x8a6   : > { %12513 = vrot.lane.b32.xlu1 %v12432_v12, %s27065_s29  ;;  %v24657_v44 = vpop.f32.mrb[50].mxu0  ;;  %v12431_v6 = vsel %vm12367_vm3, %v12240_v14, %v12399_v23 }
 0x8a7   : > { %vm12370_vm5 = vcmp.ge.f32.partialorder %v24657_v44, 0.0  ;;  %v12402_v59 = vmul.f32 0.2, %v24657_v44  ;;  %12511 = vrot.lane.b32.xlu0 %v12431_v6, %s27065_s29  ;;  %v12250_v46 = vpop.f32.mrb[51].mxu0 }
 0x8a8   : > { %vm12369_vm13 = vcmp.ge.f32.partialorder %v12250_v46, 0.0  ;;  %v12401_v33 = vmul.f32 0.2, %v12250_v46 }
 0x8a9   : > { %v12434_v28 = vsel %vm12370_vm5, %v24657_v44, %v12402_v59 }
 0x8aa   : > { %12517 = vrot.lane.b32.xlu1 %v12434_v28, %s27065_s29  ;;  %v24660_v55 = vpop.f32.mrb[52].mxu0  ;;  %v12433_v18 = vsel %vm12369_vm13, %v12250_v46, %v12401_v33  ;;  %v13415_v46 = vld [vmem:[%s32725_s4 + $0x20] sm:$0xff]  ;;  %v13416_v33 = vld [vmem:[%s32725_s4 + $0x28] sm:$0xff] }
 0x8ab   : > { %vm12372_vm2 = vcmp.ge.f32.partialorder %v24660_v55, 0.0  ;;  %v12404_v21 = vmul.f32 0.2, %v24660_v55  ;;  %12515 = vrot.lane.b32.xlu0 %v12433_v18, %s27065_s29  ;;  %v12260_v49 = vpop.f32.mrb[53].mxu0 }
 0x8ac   : > { %vm12371_vm7 = vcmp.ge.f32.partialorder %v12260_v49, 0.0  ;;  %v12403_v57 = vmul.f32 0.2, %v12260_v49 }
 0x8ad   : > { %v12436_v43 = vsel %vm12372_vm2, %v24660_v55, %v12404_v21  ;;  %v30518_v55 = vpack.c.bf16 %v13416_v33, %v13415_v46 }
 0x8ae   : > { %12521 = vrot.lane.b32.xlu1 %v12436_v43, %s27065_s29  ;;  %v24663_v48 = vpop.f32.mrb[54].mxu0  ;;  %v12435_v2 = vsel %vm12371_vm7, %v12260_v49, %v12403_v57 }
 0x8af   : > { %vm12374_vm3 = vcmp.ge.f32.partialorder %v24663_v48, 0.0  ;;  %v12406_v42 = vmul.f32 0.2, %v24663_v48  ;;  %12519 = vrot.lane.b32.xlu0 %v12435_v2, %s27065_s29  ;;  %v12270_v20 = vpop.f32.mrb[55].mxu0  ;;  %25693 = vmatprep.subr.bf16.mxu1 %v30518_v55 }
 0x8b0   : > { %vm12373_vm5 = vcmp.ge.f32.partialorder %v12270_v20, 0.0  ;;  %v12405_v16 = vmul.f32 0.2, %v12270_v20 }
 0x8b1   : > { %v12438_v47 = vsel %vm12374_vm3, %v24663_v48, %v12406_v42 }
 0x8b2   : > { %12525 = vrot.lane.b32.xlu1 %v12438_v47, %s27065_s29  ;;  %v24666_v9 = vpop.f32.mrb[56].mxu0  ;;  %v12437_v35 = vsel %vm12373_vm5, %v12270_v20, %v12405_v16 }
 0x8b3   : > { %vm12376_vm13 = vcmp.ge.f32.partialorder %v24666_v9, 0.0  ;;  %v12408_v13 = vmul.f32 0.2, %v24666_v9  ;;  %12523 = vrot.lane.b32.xlu0 %v12437_v35, %s27065_s29  ;;  %v12280_v3 = vpop.f32.mrb[57].mxu0 }
 0x8b4   : > { %vm12375_vm2 = vcmp.ge.f32.partialorder %v12280_v3, 0.0  ;;  %v12407_v5 = vmul.f32 0.2, %v12280_v3 }
 0x8b5   : > { %v12440_v17 = vsel %vm12376_vm13, %v24666_v9, %v12408_v13 }
 0x8b6   : > { %12529 = vrot.lane.b32.xlu1 %v12440_v17, %s27065_s29  ;;  %v24669_v37 = vpop.f32.mrb[58].mxu0  ;;  %v12439_v29 = vsel %vm12375_vm2, %v12280_v3, %v12407_v5 }
 0x8b7   : > { %vm12378_vm7 = vcmp.ge.f32.partialorder %v24669_v37, 0.0  ;;  %v12410_v11 = vmul.f32 0.2, %v24669_v37  ;;  %12527 = vrot.lane.b32.xlu0 %v12439_v29, %s27065_s29  ;;  %v12290_v53 = vpop.f32.mrb[59].mxu0 }
 0x8b8   : > { %vm12377_vm3 = vcmp.ge.f32.partialorder %v12290_v53, 0.0  ;;  %v12409_v56 = vmul.f32 0.2, %v12290_v53 }
 0x8b9   : > { %v12442_v14 = vsel %vm12378_vm7, %v24669_v37, %v12410_v11 }
 0x8ba   : > { %12533 = vrot.lane.b32.xlu1 %v12442_v14, %s27065_s29  ;;  %v24672_v23 = vpop.f32.mrb[60].mxu0  ;;  %v12441_v12 = vsel %vm12377_vm3, %v12290_v53, %v12409_v56  ;;  %vm12575_vm3 = vcmask 130144  }
 0x8bb   : > { %vm12380_vm5 = vcmp.ge.f32.partialorder %v24672_v23, 0.0  ;;  %v12412_v44 = vmul.f32 0.2, %v24672_v23  ;;  %12531 = vrot.lane.b32.xlu0 %v12441_v12, %s27065_s29  ;;  %v12300_v6 = vpop.f32.mrb[61].mxu0 }
 0x8bc   : > { %vm12379_vm13 = vcmp.ge.f32.partialorder %v12300_v6, 0.0  ;;  %v12411_v59 = vmul.f32 0.2, %v12300_v6 }
 0x8bd   : > { %v12444_v28 = vsel %vm12380_vm5, %v24672_v23, %v12412_v44  ;;  %vm34388_vm5 = vcmask 130048  }
 0x8be   : > { %12537 = vrot.lane.b32.xlu1 %v12444_v28, %s27065_s29  ;;  %v24675_v18 = vpop.f32.mrb[62].mxu0  ;;  %v12443_v21 = vsel %vm12379_vm13, %v12300_v6, %v12411_v59  ;;  %vm34390_vm13 = vmmov %vm34388_vm5 }
 0x8bf   : > { %vm12382_vm2 = vcmp.ge.f32.partialorder %v24675_v18, 0.0  ;;  %v12414_v49 = vmul.f32 0.2, %v24675_v18  ;;  %12535 = vrot.lane.b32.xlu0 %v12443_v21, %s27065_s29  ;;  %v12310_v57 = vpop.f32.mrb[63].mxu0 }
 0x8c0   : > { %vm12381_vm7 = vcmp.ge.f32.partialorder %v12310_v57, 0.0  ;;  %v12413_v43 = vmul.f32 0.2, %v12310_v57 }
 0x8c1   : > { %v12446_v48 = vsel %vm12382_vm2, %v24675_v18, %v12414_v49  ;;  %vm34392_vm2 = vmmov %vm34388_vm5 }
 0x8c2   : > { %12541 = vrot.lane.b32.xlu1 %v12446_v48, %s27065_s29  ;;  %v12445_v2 = vsel %vm12381_vm7, %v12310_v57, %v12413_v43  ;;  %vm34394_vm7 = vmmov %vm34392_vm2 }
 0x8c3   : > { %12539 = vrot.lane.b32.xlu0 %v12445_v2, %s27065_s29 }
 0x8f8   : > { %v12482_v42 = vpop.permute.xlu1 %12481 }
 0x8f9   : > { %v12480_v20 = vpop.permute.xlu0 %12479  ;;  %12577 = vst.msk [vmem:[#allocation2 + $0x19] sm:$0xff] %vm12575_vm3, %v12482_v42 }
 0x8fa   : > { %12576 = vst.msk [vmem:[#allocation2 + $0x11] sm:$0xff] %vm12575_vm3, %v12480_v20 }
 0x8fc   : > { %v12486_v16 = vpop.permute.xlu1 %12485 }
 0x8fd   : > { %v12484_v47 = vpop.permute.xlu0 %12483  ;;  %12579 = vst.msk [vmem:[#allocation2 + $0x29] sm:$0xff] %vm12575_vm3, %v12486_v16 }
 0x8fe   : > { %12578 = vst.msk [vmem:[#allocation2 + $0x21] sm:$0xff] %vm12575_vm3, %v12484_v47 }
 0x900   : > { %v12490_v9 = vpop.permute.xlu1 %12489  ;;  %v30535_v3 = vld [vmem:[#allocation2 + $0x19] sm:$0xff] }
 0x901   : > { %v12488_v35 = vpop.permute.xlu0 %12487  ;;  %v30529_v13 = vld [vmem:[#allocation2 + $0x11] sm:$0xff]  ;;  %12581 = vst.msk [vmem:[#allocation2 + $0x39] sm:$0xff] %vm12575_vm3, %v12490_v9  ;;  %34389 = vst [vmem:[#allocation32_spill] sm:$0xff] %v30535_v3 }
 0x902   : > { %34387 = vst [vmem:[#allocation28_spill] sm:$0xff] %v30529_v13  ;;  %24683 = vmatprep.mubr.msk.f32.mxu1 %vm34388_vm5, %v30529_v13  ;;  %12580 = vst.msk [vmem:[#allocation2 + $0x31] sm:$0xff] %vm12575_vm3, %v12488_v35 }
 0x903   : > { %24684 = vmatmul.mubr.msk.f32.gmra.mrb[66].mxu1 %vm34390_vm13, %v30535_v3  ;;  %vm34396_vm5 = vmmov %vm34392_vm2 }
 0x904   : > { %v12494_v5 = vpop.permute.xlu1 %12493  ;;  %v30545_v29 = vld [vmem:[#allocation2 + $0x29] sm:$0xff]  ;;  %vm34398_vm13 = vmmov %vm34392_vm2 }
 0x905   : > { %12583 = vst.msk [vmem:[#allocation2 + $0x49] sm:$0xff] %vm12575_vm3, %v12494_v5  ;;  %v12492_v17 = vpop.permute.xlu0 %12491  ;;  %v30540_v37 = vld [vmem:[#allocation2 + $0x21] sm:$0xff]  ;;  %34393 = vst [vmem:[#allocation37_spill] sm:$0xff] %v30545_v29 }
 0x906   : > { %34391 = vst [vmem:[#allocation34_spill] sm:$0xff] %v30540_v37  ;;  %12582 = vst.msk [vmem:[#allocation2 + $0x41] sm:$0xff] %vm12575_vm3, %v12492_v17  ;;  %24686 = vmatprep.mubr.msk.f32.mxu1 %vm34392_vm2, %v30540_v37 }
 0x907   : > { %24687 = vmatmul.mubr.msk.f32.gmra.mrb[68].mxu1 %vm34394_vm7, %v30545_v29  ;;  %vm34401_vm7 = vmmov %vm34392_vm2 }
 0x908   : > { %v12498_v11 = vpop.permute.xlu1 %12497  ;;  %v30555_v14 = vld [vmem:[#allocation2 + $0x39] sm:$0xff] }
 0x909   : > { %12585 = vst.msk [vmem:[#allocation2 + $0x59] sm:$0xff] %vm12575_vm3, %v12498_v11  ;;  %v12496_v53 = vpop.permute.xlu0 %12495  ;;  %v30550_v56 = vld [vmem:[#allocation2 + $0x31] sm:$0xff]  ;;  %34397 = vst [vmem:[#allocation42_spill] sm:$0xff] %v30555_v14 }
 0x90a   : > { %34395 = vst [vmem:[#allocation39_spill] sm:$0xff] %v30550_v56  ;;  %12584 = vst.msk [vmem:[#allocation2 + $0x51] sm:$0xff] %vm12575_vm3, %v12496_v53  ;;  %24689 = vmatprep.mubr.msk.f32.mxu1 %vm34396_vm5, %v30550_v56 }
 0x90b   : > { %24690 = vmatmul.mubr.msk.f32.gmra.mrb[70].mxu1 %vm34398_vm13, %v30555_v14  ;;  %vm34403_vm5 = vmmov %vm34392_vm2 }
 0x90c   : > { %v12502_v23 = vpop.permute.xlu1 %12501  ;;  %v30565_v6 = vld [vmem:[#allocation2 + $0x49] sm:$0xff]  ;;  %vm34405_vm13 = vmmov %vm34392_vm2 }
 0x90d   : > { %12587 = vst.msk [vmem:[#allocation2 + $0x69] sm:$0xff] %vm12575_vm3, %v12502_v23  ;;  %v12500_v12 = vpop.permute.xlu0 %12499  ;;  %v30560_v44 = vld [vmem:[#allocation2 + $0x41] sm:$0xff]  ;;  %34400 = vst [vmem:[#allocation47_spill] sm:$0xff] %v30565_v6 }
 0x90e   : > { %34399 = vst [vmem:[#allocation44_spill] sm:$0xff] %v30560_v44  ;;  %12586 = vst.msk [vmem:[#allocation2 + $0x61] sm:$0xff] %vm12575_vm3, %v12500_v12  ;;  %24692 = vmatprep.mubr.msk.f32.mxu1 %vm34392_vm2, %v30560_v44  ;;  %v30885_v41 = vld [vmem:[#allocation2 + $0x42] sm:$0xff] }
 0x90f   : > { %24693 = vmatmul.mubr.msk.f32.gmra.mrb[72].mxu1 %vm34401_vm7, %v30565_v6  ;;  %vm34408_vm7 = vmmov %vm34392_vm2  ;;  %34494 = vst [vmem:[#allocation19_spill] sm:$0xff] %v30885_v41 }
 0x910   : > { %v12506_v59 = vpop.permute.xlu1 %12505  ;;  %v30575_v28 = vld [vmem:[#allocation2 + $0x59] sm:$0xff] }
 0x911   : > { %12589 = vst.msk [vmem:[#allocation2 + $0x79] sm:$0xff] %vm12575_vm3, %v12506_v59  ;;  %v12504_v46 = vpop.permute.xlu0 %12503  ;;  %v30570_v33 = vld [vmem:[#allocation2 + $0x51] sm:$0xff]  ;;  %34404 = vst [vmem:[#allocation51_spill] sm:$0xff] %v30575_v28 }
 0x912   : > { %34402 = vst [vmem:[#allocation49_spill] sm:$0xff] %v30570_v33  ;;  %12588 = vst.msk [vmem:[#allocation2 + $0x71] sm:$0xff] %vm12575_vm3, %v12504_v46  ;;  %24695 = vmatprep.mubr.msk.f32.mxu1 %vm34403_vm5, %v30570_v33  ;;  %v30895_v51 = vld [vmem:[#allocation2 + $0x52] sm:$0xff] }
 0x913   : > { %24696 = vmatmul.mubr.msk.f32.gmra.mrb[74].mxu1 %vm34405_vm13, %v30575_v28  ;;  %vm34410_vm5 = vmmov %vm34392_vm2  ;;  %34498 = vst [vmem:[#allocation22_spill] sm:$0xff] %v30895_v51 }
 0x914   : > { %v12510_v18 = vpop.permute.xlu1 %12509  ;;  %v30585_v57 = vld [vmem:[#allocation2 + $0x69] sm:$0xff]  ;;  %vm34412_vm13 = vmmov %vm34392_vm2 }
 0x915   : > { %12591 = vst.msk [vmem:[#allocation2 + $0x89] sm:$0xff] %vm12575_vm3, %v12510_v18  ;;  %v12508_v21 = vpop.permute.xlu0 %12507  ;;  %v30580_v49 = vld [vmem:[#allocation2 + $0x61] sm:$0xff]  ;;  %34407 = vst [vmem:[#allocation56_spill] sm:$0xff] %v30585_v57 }
 0x916   : > { %34406 = vst [vmem:[#allocation53_spill] sm:$0xff] %v30580_v49  ;;  %12590 = vst.msk [vmem:[#allocation2 + $0x81] sm:$0xff] %vm12575_vm3, %v12508_v21  ;;  %24698 = vmatprep.mubr.msk.f32.mxu1 %vm34392_vm2, %v30580_v49 }
 0x917   : > { %24699 = vmatmul.mubr.msk.f32.gmra.mrb[76].mxu1 %vm34408_vm7, %v30585_v57  ;;  %vm34415_vm7 = vmmov %vm34392_vm2 }
 0x918   : > { %v12514_v43 = vpop.permute.xlu1 %12513  ;;  %v30595_v42 = vld [vmem:[#allocation2 + $0x79] sm:$0xff] }
 0x919   : > { %12593 = vst.msk [vmem:[#allocation2 + $0x99] sm:$0xff] %vm12575_vm3, %v12514_v43  ;;  %v12512_v48 = vpop.permute.xlu0 %12511  ;;  %v30590_v2 = vld [vmem:[#allocation2 + $0x71] sm:$0xff]  ;;  %34411 = vst [vmem:[#allocation30_spill] sm:$0xff] %v30595_v42 }
 0x91a   : > { %34409 = vst [vmem:[#allocation25_spill] sm:$0xff] %v30590_v2  ;;  %12592 = vst.msk [vmem:[#allocation2 + $0x91] sm:$0xff] %vm12575_vm3, %v12512_v48  ;;  %24701 = vmatprep.mubr.msk.f32.mxu1 %vm34410_vm5, %v30590_v2 }
 0x91b   : > { %24702 = vmatmul.mubr.msk.f32.gmra.mrb[78].mxu1 %vm34412_vm13, %v30595_v42  ;;  %vm34417_vm5 = vmmov %vm34392_vm2 }
 0x91c   : > { %v12518_v20 = vpop.permute.xlu1 %12517  ;;  %v30605_v9 = vld [vmem:[#allocation2 + $0x89] sm:$0xff]  ;;  %vm34419_vm13 = vmmov %vm34392_vm2 }
 0x91d   : > { %12595 = vst.msk [vmem:[#allocation2 + $0xa9] sm:$0xff] %vm12575_vm3, %v12518_v20  ;;  %v12516_v16 = vpop.permute.xlu0 %12515  ;;  %v30600_v47 = vld [vmem:[#allocation2 + $0x81] sm:$0xff]  ;;  %34414 = vst [vmem:[#allocation4_spill] sm:$0xff] %v30605_v9 }
 0x91e   : > { %34413 = vst [vmem:[#allocation31_spill] sm:$0xff] %v30600_v47  ;;  %12594 = vst.msk [vmem:[#allocation2 + $0xa1] sm:$0xff] %vm12575_vm3, %v12516_v16  ;;  %24704 = vmatprep.mubr.msk.f32.mxu1 %vm34392_vm2, %v30600_v47  ;;  %v30759_v47 = vld [vmem:[#allocation2 + $0x78] sm:$0xff]  ;;  %v30769_v2 = vld [vmem:[#allocation2 + $0x88] sm:$0xff] }
 0x91f   : > { %24705 = vmatmul.mubr.msk.f32.gmra.mrb[80].mxu1 %vm34415_vm7, %v30605_v9  ;;  %vm34422_vm7 = vmmov %vm34392_vm2  ;;  %v30757_v9 = vld [vmem:[#allocation2 + $0x80] sm:$0xff] }
 0x920   : > { %v12522_v35 = vpop.permute.xlu1 %12521  ;;  %v30615_v11 = vld [vmem:[#allocation2 + $0x99] sm:$0xff] }
 0x921   : > { %12597 = vst.msk [vmem:[#allocation2 + $0xb9] sm:$0xff] %vm12575_vm3, %v12522_v35  ;;  %v12520_v5 = vpop.permute.xlu0 %12519  ;;  %v30610_v17 = vld [vmem:[#allocation2 + $0x91] sm:$0xff]  ;;  %34418 = vst [vmem:[#allocation36_spill] sm:$0xff] %v30615_v11 }
 0x922   : > { %34416 = vst [vmem:[#allocation35_spill] sm:$0xff] %v30610_v17  ;;  %12596 = vst.msk [vmem:[#allocation2 + $0xb1] sm:$0xff] %vm12575_vm3, %v12520_v5  ;;  %24707 = vmatprep.mubr.msk.f32.mxu1 %vm34417_vm5, %v30610_v17  ;;  %v30749_v17 = vld [vmem:[#allocation2 + $0x68] sm:$0xff]  ;;  %v30767_v42 = vld [vmem:[#allocation2 + $0x90] sm:$0xff] }
 0x923   : > { %24708 = vmatmul.mubr.msk.f32.gmra.mrb[82].mxu1 %vm34419_vm13, %v30615_v11  ;;  %vm34424_vm5 = vmmov %vm34392_vm2  ;;  %v30747_v11 = vld [vmem:[#allocation2 + $0x70] sm:$0xff]  ;;  %v30779_v49 = vld [vmem:[#allocation2 + $0x98] sm:$0xff] }
 0x924   : > { %v12526_v53 = vpop.permute.xlu1 %12525  ;;  %v30625_v59 = vld [vmem:[#allocation2 + $0xa9] sm:$0xff]  ;;  %vm34426_vm13 = vmmov %vm34392_vm2 }
 0x925   : > { %12599 = vst.msk [vmem:[#allocation2 + $0xc9] sm:$0xff] %vm12575_vm3, %v12526_v53  ;;  %v12524_v23 = vpop.permute.xlu0 %12523  ;;  %v30620_v12 = vld [vmem:[#allocation2 + $0xa1] sm:$0xff]  ;;  %34421 = vst [vmem:[#allocation7_spill] sm:$0xff] %v30625_v59 }
 0x926   : > { %34420 = vst [vmem:[#allocation6_spill] sm:$0xff] %v30620_v12  ;;  %12598 = vst.msk [vmem:[#allocation2 + $0xc1] sm:$0xff] %vm12575_vm3, %v12524_v23  ;;  %24710 = vmatprep.mubr.msk.f32.mxu1 %vm34392_vm2, %v30620_v12  ;;  %v30739_v12 = vld [vmem:[#allocation2 + $0x58] sm:$0xff]  ;;  %v30777_v57 = vld [vmem:[#allocation2 + $0xa0] sm:$0xff] }
 0x927   : > { %24711 = vmatmul.mubr.msk.f32.gmra.mrb[84].mxu1 %vm34422_vm7, %v30625_v59  ;;  %vm34429_vm7 = vmmov %vm34392_vm2  ;;  %v30737_v59 = vld [vmem:[#allocation2 + $0x60] sm:$0xff]  ;;  %v30789_v33 = vld [vmem:[#allocation2 + $0xa8] sm:$0xff] }
 0x928   : > { %v12530_v46 = vpop.permute.xlu1 %12529  ;;  %v30635_v43 = vld [vmem:[#allocation2 + $0xb9] sm:$0xff]  ;;  %v30945_v25 = vld [vmem:[#allocation2 + $0xa2] sm:$0xff] }
 0x929   : > { %12601 = vst.msk [vmem:[#allocation2 + $0xd9] sm:$0xff] %vm12575_vm3, %v12530_v46  ;;  %v12528_v18 = vpop.permute.xlu0 %12527  ;;  %v30630_v21 = vld [vmem:[#allocation2 + $0xb1] sm:$0xff]  ;;  %34425 = vst [vmem:[#allocation41_spill] sm:$0xff] %v30635_v43 }
 0x92a   : > { %34423 = vst [vmem:[#allocation40_spill] sm:$0xff] %v30630_v21  ;;  %12600 = vst.msk [vmem:[#allocation2 + $0xd1] sm:$0xff] %vm12575_vm3, %v12528_v18  ;;  %24713 = vmatprep.mubr.msk.f32.mxu1 %vm34424_vm5, %v30630_v21  ;;  %v30729_v21 = vld [vmem:[#allocation2 + $0x48] sm:$0xff]  ;;  %v30787_v28 = vld [vmem:[#allocation2 + $0xb0] sm:$0xff] }
 0x92b   : > { %24714 = vmatmul.mubr.msk.f32.gmra.mrb[86].mxu1 %vm34426_vm13, %v30635_v43  ;;  %vm34431_vm5 = vmmov %vm34392_vm2  ;;  %v30727_v43 = vld [vmem:[#allocation2 + $0x50] sm:$0xff]  ;;  %v30799_v44 = vld [vmem:[#allocation2 + $0xb8] sm:$0xff]  ;;  %34515 = vst [vmem:[#allocation24_spill] sm:$0xff] %v30945_v25 }
 0x92c   : > { %v12534_v48 = vpop.permute.xlu1 %12533  ;;  %v30645_v35 = vld [vmem:[#allocation2 + $0xc9] sm:$0xff]  ;;  %vm34433_vm13 = vmmov %vm34392_vm2  ;;  %v30955_v60 = vld [vmem:[#allocation2 + $0xb2] sm:$0xff] }
 0x92d   : > { %12603 = vst.msk [vmem:[#allocation2 + $0xe9] sm:$0xff] %vm12575_vm3, %v12534_v48  ;;  %v12532_v20 = vpop.permute.xlu0 %12531  ;;  %v30640_v16 = vld [vmem:[#allocation2 + $0xc1] sm:$0xff]  ;;  %34428 = vst [vmem:[#allocation10_spill] sm:$0xff] %v30645_v35 }
 0x92e   : > { %34427 = vst [vmem:[#allocation9_spill] sm:$0xff] %v30640_v16  ;;  %12602 = vst.msk [vmem:[#allocation2 + $0xe1] sm:$0xff] %vm12575_vm3, %v12532_v20  ;;  %24716 = vmatprep.mubr.msk.f32.mxu1 %vm34392_vm2, %v30640_v16  ;;  %v30696_v16 = vld [vmem:[#allocation2 + $0x20] sm:$0xff]  ;;  %v30809_v56 = vld [vmem:[#allocation2 + $0xc8] sm:$0xff] }
 0x92f   : > { %24717 = vmatmul.mubr.msk.f32.gmra.mrb[88].mxu1 %vm34429_vm7, %v30645_v35  ;;  %vm34436_vm7 = vmmov %vm34392_vm2  ;;  %v30797_v6 = vld [vmem:[#allocation2 + $0xc0] sm:$0xff]  ;;  %34519 = vst [vmem:[#allocation29_spill] sm:$0xff] %v30955_v60 }
 0x930   : > { %v12538_v5 = vpop.permute.xlu1 %12537  ;;  %v30655_v46 = vld [vmem:[#allocation2 + $0xd9] sm:$0xff] }
 0x931   : > { %12605 = vst.msk [vmem:[#allocation2 + $0xf9] sm:$0xff] %vm12575_vm3, %v12538_v5  ;;  %v12536_v53 = vpop.permute.xlu0 %12535  ;;  %v30650_v23 = vld [vmem:[#allocation2 + $0xd1] sm:$0xff]  ;;  %34432 = vst [vmem:[#allocation46_spill] sm:$0xff] %v30655_v46 }
 0x932   : > { %34430 = vst [vmem:[#allocation45_spill] sm:$0xff] %v30650_v23  ;;  %12604 = vst.msk [vmem:[#allocation2 + $0xf1] sm:$0xff] %vm12575_vm3, %v12536_v53  ;;  %24719 = vmatprep.mubr.msk.f32.mxu1 %vm34431_vm5, %v30650_v23  ;;  %v12608_v53 = vld [vmem:[#allocation2] sm:$0xff]  ;;  %vm34438_vm5 = vnez %v33743_v7  ;;  %v30807_v14 = vld [vmem:[#allocation2 + $0xd0] sm:$0xff] }
 0x933   : > { %24720 = vmatmul.mubr.msk.f32.gmra.mrb[90].mxu1 %vm34433_vm13, %v30655_v46  ;;  %v12640_v46 = vsel %vm34438_vm5, %v12608_v53, 0.0  ;;  %vm34439_vm13 = vmmov %vm34392_vm2  ;;  %v30686_v53 = vld [vmem:[#allocation2 + $0x10] sm:$0xff]  ;;  %v30819_v37 = vld [vmem:[#allocation2 + $0xd8] sm:$0xff] }
 0x934   : > { %v12542_v18 = vpop.permute.xlu1 %12541  ;;  %v30665_v5 = vld [vmem:[#allocation2 + $0xe9] sm:$0xff]  ;;  %vm34444_vm5 = vmmov %vm34392_vm2  ;;  %34476 = vst [vmem:[#allocation68_spill] sm:$0xff] %v30819_v37 }
 0x935   : > { %12607 = vst.msk [vmem:[#allocation2 + $0x109] sm:$0xff] %vm12575_vm3, %v12542_v18  ;;  %v12540_v48 = vpop.permute.xlu0 %12539  ;;  %v30660_v20 = vld [vmem:[#allocation2 + $0xe1] sm:$0xff]  ;;  %34435 = vst [vmem:[#allocation13_spill] sm:$0xff] %v30665_v5 }
 0x936   : > { %34434 = vst [vmem:[#allocation12_spill] sm:$0xff] %v30660_v20  ;;  %12606 = vst.msk [vmem:[#allocation2 + $0x101] sm:$0xff] %vm12575_vm3, %v12540_v48  ;;  %24722 = vmatprep.mubr.msk.f32.mxu1 %vm34392_vm2, %v30660_v20  ;;  %v13834_v48 = vld [vmem:[%s32725_s4 + $0x30] sm:$0xff]  ;;  %v13835_v20 = vld [vmem:[%s32725_s4 + $0x38] sm:$0xff] }
 0x937   : > { %24723 = vmatmul.mubr.msk.f32.gmra.mrb[92].mxu1 %vm34436_vm7, %v30665_v5  ;;  %vm34441_vm3 = vmmov %vm34392_vm2  ;;  %v12609_v5 = vld [vmem:[#allocation2 + $0x8] sm:$0xff]  ;;  %v30688_v35 = vpack.c.bf16 %v13835_v20, %v13834_v48  ;;  %v30717_v48 = vld [vmem:[#allocation2 + $0x40] sm:$0xff] }
 0x938   : > { %v30675_v18 = vld [vmem:[#allocation2 + $0xf9] sm:$0xff]  ;;  %vm34442_vm7 = vmmov %vm34392_vm2  ;;  %v30829_v13 = vld [vmem:[#allocation2 + $0xe8] sm:$0xff] }
 0x939   : > { %v30669_v23 = vld [vmem:[#allocation2 + $0xf1] sm:$0xff]  ;;  %34440 = vst [vmem:[#allocation18_spill] sm:$0xff] %v30675_v18  ;;  %v30817_v29 = vld [vmem:[#allocation2 + $0xe0] sm:$0xff]  ;;  %34479 = vst [vmem:[#allocation55_spill] sm:$0xff] %v30829_v13 }
 0x93a   : > { %34437 = vst [vmem:[#allocation50_spill] sm:$0xff] %v30669_v23  ;;  %24725 = vmatprep.mubr.msk.f32.mxu1 %vm34439_vm13, %v30669_v23  ;;  %vm34443_vm13 = vnez %v33746_v52  ;;  %34475 = vst [vmem:[#allocation26_spill] sm:$0xff] %v30817_v29  ;;  %v30827_v3 = vld [vmem:[#allocation2 + $0xf0] sm:$0xff] }
 0x93b   : > { %24726 = vmatmul.mubr.msk.f32.gmra.mrb[94].mxu1 %vm34441_vm3, %v30675_v18  ;;  %v12642_v23 = vsel %vm34443_vm13, %v30686_v53, 0.0  ;;  %vm34445_vm3 = vmmov %vm34392_vm2  ;;  %vm34449_vm13 = vnez %v33361_v38  ;;  %v30719_v18 = vld [vmem:[#allocation2 + $0x38] sm:$0xff]  ;;  %34478 = vst [vmem:[#allocation69_spill] sm:$0xff] %v30827_v3 }
 0x93c   : > { %24732 = vmatprep.mubr.msk.f32.mxu1 %vm34392_vm2, %v12640_v46  ;;  %v30699_v46 = vld [vmem:[#allocation2 + $0x18] sm:$0xff]  ;;  %vm34446_vm2 = vnez %v33748_v61  ;;  %vm34450_vm9 = vmmov %vm34445_vm3 }
 0x93d   : > { %v12644_v20 = vsel %vm34446_vm2, %v30696_v16, 0.0  ;;  %vm34452_vm2 = vmmov %vm34445_vm3 }
 0x93f   : > { %24733 = vmatmul.mubr.msk.f32.vlgmr.msra.gmra.mrb[64].mxu1 %vm34442_vm7, %v12609_v5  ;;  %vm34447_vm7 = vmmov %vm34445_vm3  ;;  %v30707_v5 = vld [vmem:[#allocation2 + $0x30] sm:$0xff] }
 0x940   : > { %25695 = vmatpush3.bf16.msra.mxu1 %v30518_v55  ;;  %24735 = vmatprep.mubr.msk.f32.mxu1 %vm34444_vm5, %v12642_v23  ;;  %v30709_v55 = vld [vmem:[#allocation2 + $0x28] sm:$0xff]  ;;  %vm34448_vm5 = vmmov %vm34445_vm3  ;;  %v12646_v23 = vsel %vm34449_vm13, %v30707_v5, 0.0 }
 0x941   : > { %25697 = vmatprep.subr.bf16.mxu1 %v30688_v35  ;;  %vm34455_vm13 = vmmov %vm34452_vm2 }
 0x943   : > { %24736 = vmatmul.mubr.msk.f32.gmra.mrb[66].mxu1 %vm34445_vm3, %v30699_v46 }
 0x944   : > { %24738 = vmatprep.mubr.msk.f32.mxu1 %vm34447_vm7, %v12644_v20  ;;  %vm34451_vm7 = vnez %v33370_v50 }
 0x945   : > { %v12648_v20 = vsel %vm34451_vm7, %v30717_v48, 0.0 }
 0x947   : > { %24739 = vmatmul.mubr.msk.f32.gmra.mrb[68].mxu1 %vm34448_vm5, %v30709_v55  ;;  %vm34453_vm5 = vmmov %vm34452_vm2 }
 0x948   : > { %24741 = vmatprep.mubr.msk.f32.mxu1 %vm34450_vm9, %v12646_v23  ;;  %vm34454_vm9 = vnez %v33383_v24 }
 0x949   : > { %v12650_v23 = vsel %vm34454_vm9, %v30727_v43, 0.0 }
 0x94b   : > { %24742 = vmatmul.mubr.msk.f32.gmra.mrb[70].mxu1 %vm34445_vm3, %v30719_v18  ;;  %vm34456_vm3 = vmmov %vm34452_vm2 }
 0x94c   : > { %24744 = vmatprep.mubr.msk.f32.mxu1 %vm34452_vm2, %v12648_v20  ;;  %vm34457_vm2 = vnez %v33395_v8  ;;  %vm34458_vm7 = vmmov %vm34456_vm3 }
 0x94d   : > { %v12652_v20 = vsel %vm34457_vm2, %v30737_v59, 0.0  ;;  %vm34461_vm9 = vmmov %vm34456_vm3 }
 0x94f   : > { %24745 = vmatmul.mubr.msk.f32.gmra.mrb[72].mxu1 %vm34453_vm5, %v30729_v21  ;;  %vm34459_vm5 = vmmov %vm34456_vm3 }
 0x950   : > { %24747 = vmatprep.mubr.msk.f32.mxu1 %vm34455_vm13, %v12650_v23  ;;  %vm34460_vm13 = vnez %v33406_v4 }
 0x951   : > { %v12654_v23 = vsel %vm34460_vm13, %v30747_v11, 0.0 }
 0x953   : > { %24748 = vmatmul.mubr.msk.f32.gmra.mrb[74].mxu1 %vm34456_vm3, %v30739_v12 }
 0x954   : > { %24750 = vmatprep.mubr.msk.f32.mxu1 %vm34458_vm7, %v12652_v20  ;;  %v12656_v20 = vsel %vm34263_vm11, %v30757_v9, 0.0  ;;  %vm34462_vm7 = vmmov %vm34456_vm3 }
 0x955   : > { %vm34466_vm11 = vmmov %vm34456_vm3 }
 0x957   : > { %24751 = vmatmul.mubr.msk.f32.gmra.mrb[76].mxu1 %vm34459_vm5, %v30749_v17  ;;  %vm34463_vm5 = vmmov %vm34456_vm3 }
 0x958   : > { %24753 = vmatprep.mubr.msk.f32.mxu1 %vm34461_vm9, %v12654_v23  ;;  %v12658_v23 = vsel %vm34266_vm4, %v30767_v42, 0.0  ;;  %vm34464_vm9 = vmmov %vm34456_vm3 }
 0x959   : > { %vm34469_vm4 = vmmov %vm34456_vm3 }
 0x95b   : > { %24754 = vmatmul.mubr.msk.f32.gmra.mrb[78].mxu1 %vm34456_vm3, %v30759_v47 }
 0x95c   : > { %24756 = vmatprep.mubr.msk.f32.mxu1 %vm34462_vm7, %v12656_v20  ;;  %vm34465_vm7 = vnez %v33434_v30 }
 0x95d   : > { %v12660_v20 = vsel %vm34465_vm7, %v30777_v57, 0.0  ;;  %vm34471_vm7 = vmmov %vm34456_vm3 }
 0x95f   : > { %24757 = vmatmul.mubr.msk.f32.gmra.mrb[80].mxu1 %vm34463_vm5, %v30769_v2  ;;  %vm34467_vm5 = vmmov %vm34456_vm3 }
 0x960   : > { %24759 = vmatprep.mubr.msk.f32.mxu1 %vm34464_vm9, %v12658_v23  ;;  %vm34468_vm9 = vnez %v34272_v62 }
 0x961   : > { %v12662_v23 = vsel %vm34468_vm9, %v30787_v28, 0.0  ;;  %vm34474_vm9 = vmmov %vm34456_vm3 }
 0x963   : > { %24760 = vmatmul.mubr.msk.f32.gmra.mrb[82].mxu1 %vm34456_vm3, %v30779_v49 }
 0x964   : > { %24762 = vmatprep.mubr.msk.f32.mxu1 %vm34466_vm11, %v12660_v20  ;;  %vm34470_vm11 = vnez %v34275_v63  ;;  %v31100_v63 = vld [vmem:[#allocation2 + $0x100] sm:$0xff] }
 0x965   : > { %v12664_v20 = vsel %vm34470_vm11, %v30797_v6, 0.0  ;;  %34576 = vst [vmem:[#allocation15_spill] sm:$0xff] %v31100_v63 }
 0x967   : > { %24763 = vmatmul.mubr.msk.f32.gmra.mrb[84].mxu1 %vm34467_vm5, %v30789_v33  ;;  %vm34472_vm5 = vmmov %vm34456_vm3 }
 0x968   : > { %24765 = vmatprep.mubr.msk.f32.mxu1 %vm34469_vm4, %v12662_v23  ;;  %vm34473_vm4 = vnez %v34279_v15  ;;  %v13351_v15 = vld [vmem:[#allocation2 + $0x2] sm:$0xff] }
 0x969   : > { %v12666_v23 = vsel %vm34473_vm4, %v30807_v14, 0.0  ;;  %vm34482_vm4 = vmmov %vm34456_vm3 }
 0x96b   : > { %24766 = vmatmul.mubr.msk.f32.gmra.mrb[86].mxu1 %vm34456_vm3, %v30799_v44 }
 0x96c   : > { %24768 = vmatprep.mubr.msk.f32.mxu1 %vm34471_vm7, %v12664_v20  ;;  %v12668_v20 = vsel %vm34286_vm15, %v30817_v29, 0.0  ;;  %vm34477_vm7 = vmmov %vm34456_vm3  ;;  %v30855_v29 = vld [vmem:[#allocation2 + $0x1a] sm:$0xff] }
 0x96f   : > { %24769 = vmatmul.mubr.msk.f32.gmra.mrb[88].mxu1 %vm34472_vm5, %v30809_v56  ;;  %vm34480_vm5 = vmmov %vm34456_vm3 }
 0x970   : > { %24771 = vmatprep.mubr.msk.f32.mxu1 %vm34474_vm9, %v12666_v23  ;;  %vm34481_vm9 = vnez %v34290_v36 }
 0x971   : > { %v12670_v23 = vsel %vm34481_vm9, %v30827_v3, 0.0  ;;  %v30853_v3 = vld [vmem:[#allocation2 + $0x12] sm:$0xff] }
 0x973   : > { %24772 = vmatmul.mubr.msk.f32.gmra.mrb[90].mxu1 %vm34456_vm3, %v30819_v37  ;;  %v30837_v37 = vld [vmem:[#allocation2 + $0xf8] sm:$0xff] }
 0x974   : > { %24774 = vmatprep.mubr.msk.f32.mxu1 %vm34477_vm7, %v12668_v20  ;;  %34483 = vst [vmem:[#allocation54_spill] sm:$0xff] %v30837_v37  ;;  %v14221_v20 = vld [vmem:[%s32725_s4 + $0x40] sm:$0xff]  ;;  %vm34484_vm7 = vmmov %vm34456_vm3 }
 0x975   : > { %v30848_v36 = vpack.c.bf16 %v14222_v27, %v14221_v20  ;;  %v30865_v27 = vld [vmem:[#allocation2 + $0x22] sm:$0xff]  ;;  %v30875_v20 = vld [vmem:[#allocation2 + $0x32] sm:$0xff] }
 0x976   : > { %34487 = vst [vmem:[#allocation16_spill] sm:$0xff] %v30865_v27  ;;  %34490 = vst [vmem:[#allocation70_spill] sm:$0xff] %v30875_v20 }
 0x977   : > { %24775 = vmatmul.mubr.msk.f32.gmra.mrb[92].mxu1 %vm34480_vm5, %v30829_v13  ;;  %v13352_v13 = vld [vmem:[#allocation2 + $0xa] sm:$0xff]  ;;  %vm34486_vm5 = vmmov %vm34456_vm3 }
 0x978   : > { %24777 = vmatprep.mubr.msk.f32.mxu1 %vm34482_vm4, %v12670_v23  ;;  %v13384_v23 = vsel %vm34323_vm10, %v13352_v13, 0.0  ;;  %vm34485_vm4 = vmmov %vm34456_vm3  ;;  %v30867_v13 = vld [vmem:[#allocation2 + $0x2a] sm:$0xff] }
 0x97b   : > { %24778 = vmatmul.mubr.msk.f32.gmra.mrb[94].mxu1 %vm34456_vm3, %v30837_v37 }
 0x97c   : > { %24784 = vmatprep.mubr.msk.f32.mxu1 %vm34484_vm7, %v13351_v15  ;;  %v13386_v15 = vsel %vm34182_vm0, %v30855_v29, 0.0  ;;  %vm34488_vm7 = vmmov %vm34456_vm3 }
 0x97f   : > { %24785 = vmatmul.mubr.msk.f32.vlgmr.msra.gmra.mrb[64].mxu1 %vm34485_vm4, %v13384_v23  ;;  %vm34489_vm4 = vmmov %vm34456_vm3  ;;  %v30877_v23 = vld [vmem:[#allocation2 + $0x3a] sm:$0xff] }
 0x980   : > { %25699 = vmatpush3.bf16.msra.mxu1 %v30688_v35  ;;  %24787 = vmatprep.mubr.msk.f32.mxu1 %vm34486_vm5, %v30853_v3  ;;  %v13388_v35 = vsel %vm34186_vm8, %v30867_v13, 0.0  ;;  %vm34491_vm5 = vmmov %vm34456_vm3 }
 0x981   : > { %25701 = vmatprep.subr.bf16.mxu1 %v30848_v36  ;;  %vm34493_vm0 = vmmov %vm34489_vm4 }
 0x982   : > { %vm34497_vm8 = vmmov %vm34493_vm0 }
 0x983   : > { %24788 = vmatmul.mubr.msk.f32.gmra.mrb[66].mxu1 %vm34456_vm3, %v13386_v15  ;;  %vm34492_vm3 = vnez %v34334_v32  ;;  %v30905_v32 = vld [vmem:[#allocation2 + $0x62] sm:$0xff] }
 0x984   : > { %24790 = vmatprep.mubr.msk.f32.mxu1 %vm34488_vm7, %v30865_v27  ;;  %v13390_v15 = vsel %vm34492_vm3, %v30877_v23, 0.0  ;;  %v30887_v27 = vld [vmem:[#allocation2 + $0x4a] sm:$0xff]  ;;  %vm34495_vm7 = vmmov %vm34493_vm0  ;;  %34502 = vst [vmem:[#allocation58_spill] sm:$0xff] %v30905_v32 }
 0x987   : > { %24791 = vmatmul.mubr.msk.f32.gmra.mrb[68].mxu1 %vm34489_vm4, %v13388_v35  ;;  %vm34496_vm4 = vnez %v34338_v26  ;;  %v30915_v26 = vld [vmem:[#allocation2 + $0x72] sm:$0xff] }
 0x988   : > { %24793 = vmatprep.mubr.msk.f32.mxu1 %vm34491_vm5, %v30875_v20  ;;  %v13392_v35 = vsel %vm34496_vm4, %v30887_v27, 0.0  ;;  %v30897_v20 = vld [vmem:[#allocation2 + $0x5a] sm:$0xff]  ;;  %vm34499_vm5 = vmmov %vm34493_vm0  ;;  %34506 = vst [vmem:[#allocation59_spill] sm:$0xff] %v30915_v26 }
 0x989   : > { %vm34501_vm3 = vmmov %vm34499_vm5 }
 0x98a   : > { %vm34505_vm4 = vmmov %vm34501_vm3 }
 0x98b   : > { %24794 = vmatmul.mubr.msk.f32.gmra.mrb[70].mxu1 %vm34493_vm0, %v13390_v15  ;;  %vm34500_vm0 = vnez %v34342_v54  ;;  %v30925_v54 = vld [vmem:[#allocation2 + $0x82] sm:$0xff] }
 0x98c   : > { %24796 = vmatprep.mubr.msk.f32.mxu1 %vm34495_vm7, %v30885_v41  ;;  %v13394_v15 = vsel %vm34500_vm0, %v30897_v20, 0.0  ;;  %v30907_v41 = vld [vmem:[#allocation2 + $0x6a] sm:$0xff]  ;;  %vm34503_vm7 = vmmov %vm34501_vm3  ;;  %34508 = vst [vmem:[#allocation61_spill] sm:$0xff] %v30925_v54 }
 0x98f   : > { %24797 = vmatmul.mubr.msk.f32.gmra.mrb[72].mxu1 %vm34497_vm8, %v13392_v35  ;;  %vm34504_vm8 = vnez %v34347_v0  ;;  %v30935_v0 = vld [vmem:[#allocation2 + $0x92] sm:$0xff] }
 0x990   : > { %24799 = vmatprep.mubr.msk.f32.mxu1 %vm34499_vm5, %v30895_v51  ;;  %v13396_v35 = vsel %vm34504_vm8, %v30907_v41, 0.0  ;;  %v30917_v51 = vld [vmem:[#allocation2 + $0x7a] sm:$0xff]  ;;  %vm34507_vm5 = vmmov %vm34501_vm3  ;;  %34511 = vst [vmem:[#allocation21_spill] sm:$0xff] %v30935_v0 }
 0x993   : > { %24800 = vmatmul.mubr.msk.f32.gmra.mrb[74].mxu1 %vm34501_vm3, %v13394_v15  ;;  %v13398_v15 = vsel %vm34353_vm1, %v30917_v51, 0.0 }
 0x994   : > { %24802 = vmatprep.mubr.msk.f32.mxu1 %vm34503_vm7, %v30905_v32  ;;  %v30927_v32 = vld [vmem:[#allocation2 + $0x8a] sm:$0xff]  ;;  %vm34509_vm7 = vmmov %vm34501_vm3 }
 0x997   : > { %24803 = vmatmul.mubr.msk.f32.gmra.mrb[76].mxu1 %vm34505_vm4, %v13396_v35  ;;  %v13400_v35 = vsel %vm34358_vm6, %v30927_v32, 0.0  ;;  %vm34510_vm4 = vmmov %vm34501_vm3 }
 0x998   : > { %24805 = vmatprep.mubr.msk.f32.mxu1 %vm34507_vm5, %v30915_v26  ;;  %v30937_v26 = vld [vmem:[#allocation2 + $0x9a] sm:$0xff]  ;;  %vm34512_vm5 = vmmov %vm34501_vm3 }
 0x999   : > { %vm34514_vm1 = vmmov %vm34510_vm4 }
 0x99a   : > { %vm34518_vm6 = vmmov %vm34514_vm1 }
 0x99b   : > { %24806 = vmatmul.mubr.msk.f32.gmra.mrb[78].mxu1 %vm34501_vm3, %v13398_v15  ;;  %vm34513_vm3 = vnez %v34361_v31  ;;  %v30965_v31 = vld [vmem:[#allocation2 + $0xc2] sm:$0xff] }
 0x99c   : > { %24808 = vmatprep.mubr.msk.f32.mxu1 %vm34509_vm7, %v30925_v54  ;;  %v13402_v15 = vsel %vm34513_vm3, %v30937_v26, 0.0  ;;  %v30947_v54 = vld [vmem:[#allocation2 + $0xaa] sm:$0xff]  ;;  %vm34516_vm7 = vmmov %vm34514_vm1  ;;  %34523 = vst [vmem:[#allocation67_spill] sm:$0xff] %v30965_v31 }
 0x99f   : > { %24809 = vmatmul.mubr.msk.f32.gmra.mrb[80].mxu1 %vm34510_vm4, %v13400_v35  ;;  %vm34517_vm4 = vnez %v34365_v19  ;;  %v30975_v19 = vld [vmem:[#allocation2 + $0xd2] sm:$0xff] }
 0x9a0   : > { %24811 = vmatprep.mubr.msk.f32.mxu1 %vm34512_vm5, %v30935_v0  ;;  %v13404_v35 = vsel %vm34517_vm4, %v30947_v54, 0.0  ;;  %v30957_v0 = vld [vmem:[#allocation2 + $0xba] sm:$0xff]  ;;  %vm34520_vm5 = vmmov %vm34514_vm1  ;;  %34527 = vst [vmem:[#allocation71_spill] sm:$0xff] %v30975_v19 }
 0x9a1   : > { %vm34522_vm3 = vmmov %vm34520_vm5 }
 0x9a2   : > { %vm34526_vm4 = vmmov %vm34522_vm3 }
 0x9a3   : > { %24812 = vmatmul.mubr.msk.f32.gmra.mrb[82].mxu1 %vm34514_vm1, %v13402_v15  ;;  %vm34521_vm1 = vnez %v34369_v1  ;;  %v30985_v1 = vld [vmem:[#allocation2 + $0xe2] sm:$0xff] }
 0x9a4   : > { %24814 = vmatprep.mubr.msk.f32.mxu1 %vm34516_vm7, %v30945_v25  ;;  %v13406_v15 = vsel %vm34521_vm1, %v30957_v0, 0.0  ;;  %v30967_v25 = vld [vmem:[#allocation2 + $0xca] sm:$0xff]  ;;  %vm34524_vm7 = vmmov %vm34522_vm3 }
 0x9a7   : > { %24815 = vmatmul.mubr.msk.f32.gmra.mrb[84].mxu1 %vm34518_vm6, %v13404_v35  ;;  %vm34525_vm6 = vnez %v34371_v22  ;;  %v30995_v22 = vld [vmem:[#allocation2 + $0xf2] sm:$0xff] }
 0x9a8   : > { %24817 = vmatprep.mubr.msk.f32.mxu1 %vm34520_vm5, %v30955_v60  ;;  %v13408_v35 = vsel %vm34525_vm6, %v30967_v25, 0.0  ;;  %v30977_v60 = vld [vmem:[#allocation2 + $0xda] sm:$0xff]  ;;  %vm34528_vm5 = vmmov %vm34522_vm3  ;;  %34531 = vst [vmem:[#allocation72_spill] sm:$0xff] %v30995_v22 }
 0x9ab   : > { %24818 = vmatmul.mubr.msk.f32.gmra.mrb[86].mxu1 %vm34522_vm3, %v13406_v15  ;;  %v13410_v15 = vsel %vm34377_vm12, %v30977_v60, 0.0 }
 0x9ac   : > { %24820 = vmatprep.mubr.msk.f32.mxu1 %vm34524_vm7, %v30965_v31  ;;  %v30987_v31 = vld [vmem:[#allocation2 + $0xea] sm:$0xff]  ;;  %vm34529_vm7 = vmmov %vm34522_vm3 }
 0x9af   : > { %24821 = vmatmul.mubr.msk.f32.gmra.mrb[88].mxu1 %vm34526_vm4, %v13408_v35  ;;  %v13412_v35 = vsel %vm34381_vm14, %v30987_v31, 0.0  ;;  %vm34530_vm4 = vmmov %vm34522_vm3 }
 0x9b0   : > { %24823 = vmatprep.mubr.msk.f32.mxu1 %vm34528_vm5, %v30975_v19  ;;  %v30997_v19 = vld [vmem:[#allocation2 + $0xfa] sm:$0xff]  ;;  %vm34532_vm5 = vmmov %vm34522_vm3 }
 0x9b1   : > { %vm34536_vm14 = vmmov %vm34532_vm5 }
 0x9b2   : > { %vm34538_vm12 = vmmov %vm34532_vm5 }
 0x9b3   : > { %24824 = vmatmul.mubr.msk.f32.gmra.mrb[90].mxu1 %vm34522_vm3, %v13410_v15  ;;  %vm34533_vm3 = vnez %v34384_v39  ;;  %vm34543_vm6 = vmmov %vm34532_vm5 }
 0x9b4   : > { %24826 = vmatprep.mubr.msk.f32.mxu1 %vm34529_vm7, %v30985_v1  ;;  %v13414_v15 = vsel %vm34533_vm3, %v30997_v19, 0.0  ;;  %vm34534_vm7 = vmmov %vm34530_vm4  ;;  %vm34537_vm3 = vnez %v33746_v52 }
 0x9b5   : > { %v13804_v39 = vsel %vm34537_vm3, %v30696_v16, 0.0  ;;  %vm34542_vm3 = vnez %v33361_v38  ;;  %vm34546_vm1 = vmmov %vm34532_vm5 }
 0x9b7   : > { %24827 = vmatmul.mubr.msk.f32.gmra.mrb[92].mxu1 %vm34530_vm4, %v13412_v35  ;;  %vm34535_vm4 = vnez %v33743_v7 }
 0x9b8   : > { %24829 = vmatprep.mubr.msk.f32.mxu1 %vm34532_vm5, %v30995_v22  ;;  %v13802_v35 = vsel %vm34535_vm4, %v30686_v53, 0.0  ;;  %v25704_v22 = vpack.c.bf16 %v14641_v40, %v14640_v10  ;;  %vm34540_vm4 = vnez %v33748_v61  ;;  %v13808_v10 = vsel %vm34542_vm3, %v30717_v48, 0.0 }
 0x9b9   : > { %v13806_v53 = vsel %vm34540_vm4, %v30707_v5, 0.0  ;;  %vm34549_vm4 = vmmov %vm34546_vm1 }
 0x9bb   : > { %24830 = vmatmul.mubr.msk.f32.gmra.mrb[94].mxu1 %vm34534_vm7, %v13414_v15  ;;  %vm34539_vm7 = vmmov %vm34532_vm5 }
 0x9bc   : > { %24836 = vmatprep.mubr.msk.f32.mxu1 %vm34536_vm14, %v13802_v35  ;;  %vm34541_vm14 = vmmov %vm34532_vm5 }
 0x9bf   : > { %24837 = vmatmul.mubr.msk.f32.vlgmr.msra.gmra.mrb[64].mxu1 %vm34532_vm5, %v30699_v46  ;;  %v13816_v46 = vsel %vm34460_vm13, %v30757_v9, 0.0 }
 0x9c0   : > { %25703 = vmatpush3.bf16.msra.mxu1 %v30848_v36  ;;  %24839 = vmatprep.mubr.msk.f32.mxu1 %vm34538_vm12, %v13804_v39  ;;  %vm34544_vm12 = vmmov %vm34532_vm5  ;;  %v13814_v39 = vsel %vm34457_vm2, %v30747_v11, 0.0 }
 0x9c1   : > { %25705 = vmatprep.subr.bf16.mxu1 %v25704_v22 }
 0x9c3   : > { %24840 = vmatmul.mubr.msk.f32.gmra.mrb[66].mxu1 %vm34539_vm7, %v30709_v55  ;;  %vm34545_vm7 = vnez %v33370_v50 }
 0x9c4   : > { %24842 = vmatprep.mubr.msk.f32.mxu1 %vm34541_vm14, %v13806_v53  ;;  %v13810_v36 = vsel %vm34545_vm7, %v30727_v43, 0.0  ;;  %vm34547_vm14 = vmmov %vm34546_vm1 }
 0x9c7   : > { %24843 = vmatmul.mubr.msk.f32.gmra.mrb[68].mxu1 %vm34532_vm5, %v30719_v18  ;;  %vm34548_vm5 = vnez %v33383_v24 }
 0x9c8   : > { %24845 = vmatprep.mubr.msk.f32.mxu1 %vm34543_vm6, %v13808_v10  ;;  %v13812_v40 = vsel %vm34548_vm5, %v30737_v59, 0.0  ;;  %vm34550_vm6 = vmmov %vm34546_vm1 }
 0x9c9   : > { %vm34555_vm5 = vmmov %vm34546_vm1 }
 0x9cb   : > { %24846 = vmatmul.mubr.msk.f32.gmra.mrb[70].mxu1 %vm34544_vm12, %v30729_v21  ;;  %vm34551_vm12 = vmmov %vm34546_vm1 }
 0x9cc   : > { %24848 = vmatprep.mubr.msk.f32.mxu1 %vm34546_vm1, %v13810_v36  ;;  %v13826_v36 = vsel %vm34470_vm11, %v30807_v14, 0.0 }
 0x9cf   : > { %24849 = vmatmul.mubr.msk.f32.gmra.mrb[72].mxu1 %vm34547_vm14, %v30739_v12  ;;  %vm34552_vm14 = vmmov %vm34546_vm1 }
 0x9d0   : > { %24851 = vmatprep.mubr.msk.f32.mxu1 %vm34549_vm4, %v13812_v40  ;;  %vm34553_vm4 = vmmov %vm34546_vm1  ;;  %v34566_v40 = vld [vmem:[#allocation68_spill] sm:$0xff] }
 0x9d1   : > { %vm34558_vm2 = vmmov %vm34553_vm4 }
 0x9d2   : > { %vm34561_vm13 = vmmov %vm34558_vm2 }
 0x9d3   : > { %24852 = vmatmul.mubr.msk.f32.gmra.mrb[74].mxu1 %vm34550_vm6, %v30749_v17  ;;  %vm34554_vm6 = vnez %v33418_v58 }
 0x9d4   : > { %24854 = vmatprep.mubr.msk.f32.mxu1 %vm34551_vm12, %v13814_v39  ;;  %v13818_v15 = vsel %vm34554_vm6, %v30767_v42, 0.0  ;;  %vm34556_vm12 = vmmov %vm34546_vm1  ;;  %v34568_v39 = vld [vmem:[#allocation26_spill] sm:$0xff] }
 0x9d5   : > { %vm34564_vm6 = vmmov %vm34558_vm2 }
 0x9d7   : > { %24855 = vmatmul.mubr.msk.f32.gmra.mrb[76].mxu1 %vm34546_vm1, %v30759_v47  ;;  %vm34557_vm1 = vnez %v33429_v34 }
 0x9d8   : > { %24857 = vmatprep.mubr.msk.f32.mxu1 %vm34552_vm14, %v13816_v46  ;;  %v13820_v35 = vsel %vm34557_vm1, %v30777_v57, 0.0  ;;  %vm34559_vm14 = vmmov %vm34558_vm2  ;;  %v34569_v46 = vld [vmem:[#allocation64_spill] sm:$0xff] }
 0x9db   : > { %24858 = vmatmul.mubr.msk.f32.gmra.mrb[78].mxu1 %vm34553_vm4, %v30769_v2  ;;  %vm34560_vm4 = vnez %v33434_v30 }
 0x9dc   : > { %24860 = vmatprep.mubr.msk.f32.mxu1 %vm34555_vm5, %v13818_v15  ;;  %v13822_v53 = vsel %vm34560_vm4, %v30787_v28, 0.0  ;;  %vm34562_vm5 = vmmov %vm34558_vm2 }
 0x9dd   : > { %vm34571_vm4 = vmmov %vm34558_vm2 }
 0x9df   : > { %24861 = vmatmul.mubr.msk.f32.gmra.mrb[80].mxu1 %vm34556_vm12, %v30779_v49  ;;  %vm34563_vm12 = vnez %v34272_v62 }
 0x9e0   : > { %24863 = vmatprep.mubr.msk.f32.mxu1 %vm34558_vm2, %v13820_v35  ;;  %v13824_v10 = vsel %vm34563_vm12, %v30797_v6, 0.0  ;;  %v34572_v35 = vld [vmem:[#allocation55_spill] sm:$0xff] }
 0x9e3   : > { %24864 = vmatmul.mubr.msk.f32.gmra.mrb[82].mxu1 %vm34559_vm14, %v30789_v33  ;;  %vm34565_vm14 = vmmov %vm34558_vm2 }
 0x9e4   : > { %24866 = vmatprep.mubr.msk.f32.mxu1 %vm34561_vm13, %v13822_v53  ;;  %vm34567_vm13 = vmmov %vm34558_vm2  ;;  %v34574_v53 = vld [vmem:[#allocation69_spill] sm:$0xff] }
 0x9e5   : > { %v13830_v62 = vsel %vm34286_vm15, %v34574_v53, 0.0  ;;  %v34587_v53 = vld [vmem:[#allocation37_spill] sm:$0xff]  ;;  %vm34596_vm15 = vmmov %vm34558_vm2 }
 0x9e7   : > { %24867 = vmatmul.mubr.msk.f32.gmra.mrb[84].mxu1 %vm34562_vm5, %v30799_v44  ;;  %vm34570_vm5 = vnez %v34569_v46  ;;  %v13832_v46 = vsel %vm34481_vm9, %v31100_v63, 0.0  ;;  %v34584_v63 = vld [vmem:[#allocation32_spill] sm:$0xff]  ;;  %vm34590_vm9 = vmmov %vm34558_vm2 }
 0x9e8   : > { %24869 = vmatprep.mubr.msk.f32.mxu1 %vm34564_vm6, %v13824_v10  ;;  %v13828_v15 = vsel %vm34570_vm5, %v34568_v39, 0.0  ;;  %vm34573_vm6 = vmmov %vm34558_vm2  ;;  %v15059_v10 = vld [vmem:[%s32725_s4 + $0x60] sm:$0xff] }
 0x9e9   : > { %v34591_v39 = vld [vmem:[#allocation42_spill] sm:$0xff] }
 0x9eb   : > { %24870 = vmatmul.mubr.msk.f32.gmra.mrb[86].mxu1 %vm34558_vm2, %v30809_v56 }
 0x9ec   : > { %24872 = vmatprep.mubr.msk.f32.mxu1 %vm34565_vm14, %v13826_v36  ;;  %vm34577_vm14 = vmmov %vm34558_vm2 }
 0x9ef   : > { %24873 = vmatmul.mubr.msk.f32.gmra.mrb[88].mxu1 %vm34567_vm13, %v34566_v40  ;;  %vm34579_vm13 = vmmov %vm34558_vm2 }
 0x9f0   : > { %24875 = vmatprep.mubr.msk.f32.mxu1 %vm34571_vm4, %v13828_v15  ;;  %v31108_v15 = vld [vmem:[#allocation2 + $0x108] sm:$0xff]  ;;  %vm34581_vm4 = vmmov %vm34558_vm2 }
 0x9f1   : > { %34580 = vst [vmem:[#allocation68_spill] sm:$0xff] %v31108_v15 }
 0x9f3   : > { %24876 = vmatmul.mubr.msk.f32.gmra.mrb[90].mxu1 %vm34573_vm6, %v34572_v35  ;;  %vm34583_vm6 = vmmov %vm34558_vm2  ;;  %v34589_v35 = vld [vmem:[#allocation39_spill] sm:$0xff] }
 0x9f4   : > { %24878 = vmatprep.mubr.msk.f32.mxu1 %vm34558_vm2, %v13830_v62  ;;  %v15060_v62 = vld [vmem:[%s32725_s4 + $0x68] sm:$0xff] }
 0x9f5   : > { %v25708_v36 = vpack.c.bf16 %v15060_v62, %v15059_v10  ;;  %v34600_v10 = vld [vmem:[#allocation53_spill] sm:$0xff]  ;;  %v34610_v62 = vld [vmem:[#allocation4_spill] sm:$0xff] }
 0x9f7   : > { %24879 = vmatmul.mubr.msk.f32.gmra.mrb[92].mxu1 %vm34577_vm14, %v30837_v37  ;;  %v34582_v37 = vld [vmem:[#allocation28_spill] sm:$0xff]  ;;  %vm34586_vm14 = vmmov %vm34558_vm2 }
 0x9f8   : > { %24881 = vmatprep.mubr.msk.f32.mxu1 %vm34579_vm13, %v13832_v46  ;;  %v34585_v46 = vld [vmem:[#allocation34_spill] sm:$0xff]  ;;  %vm34588_vm13 = vmmov %vm34558_vm2 }
 0x9fb   : > { %24882 = vmatmul.mubr.msk.f32.gmra.mrb[94].mxu1 %vm34581_vm4, %v31108_v15  ;;  %vm34592_vm4 = vmmov %vm34558_vm2  ;;  %v34593_v15 = vld [vmem:[#allocation44_spill] sm:$0xff] }
 0x9fc   : > { %24888 = vmatprep.mubr.msk.f32.mxu1 %vm34583_vm6, %v34582_v37  ;;  %vm34594_vm6 = vmmov %vm34558_vm2  ;;  %v34595_v37 = vld [vmem:[#allocation47_spill] sm:$0xff] }
 0x9ff   : > { %24889 = vmatmul.mubr.msk.f32.vlgmr.msra.gmra.mrb[64].mxu1 %vm34558_vm2, %v34584_v63  ;;  %v34597_v63 = vld [vmem:[#allocation49_spill] sm:$0xff] }
 0xa00   : > { %25707 = vmatpush3.bf16.msra.mxu1 %v25704_v22  ;;  %24891 = vmatprep.mubr.msk.f32.mxu1 %vm34586_vm14, %v34585_v46  ;;  %v34598_v22 = vld [vmem:[#allocation51_spill] sm:$0xff]  ;;  %vm34599_vm14 = vmmov %vm34558_vm2 }
 0xa01   : > { %25709 = vmatprep.subr.bf16.mxu1 %v25708_v36  ;;  %v34611_v46 = vld [vmem:[#allocation35_spill] sm:$0xff] }
 0xa03   : > { %24892 = vmatmul.mubr.msk.f32.gmra.mrb[66].mxu1 %vm34588_vm13, %v34587_v53  ;;  %vm34601_vm13 = vmmov %vm34558_vm2  ;;  %v34602_v53 = vld [vmem:[#allocation56_spill] sm:$0xff] }
 0xa04   : > { %24894 = vmatprep.mubr.msk.f32.mxu1 %vm34590_vm9, %v34589_v35  ;;  %vm34603_vm9 = vmmov %vm34558_vm2  ;;  %v34604_v35 = vld [vmem:[#allocation25_spill] sm:$0xff] }
 0xa07   : > { %24895 = vmatmul.mubr.msk.f32.gmra.mrb[68].mxu1 %vm34592_vm4, %v34591_v39  ;;  %vm34605_vm4 = vmmov %vm34558_vm2  ;;  %v34606_v39 = vld [vmem:[#allocation30_spill] sm:$0xff] }
 0xa08   : > { %24897 = vmatprep.mubr.msk.f32.mxu1 %vm34594_vm6, %v34593_v15  ;;  %vm34607_vm6 = vmmov %vm34558_vm2  ;;  %v34608_v15 = vld [vmem:[#allocation31_spill] sm:$0xff] }
 0xa0b   : > { %24898 = vmatmul.mubr.msk.f32.gmra.mrb[70].mxu1 %vm34596_vm15, %v34595_v37  ;;  %vm34609_vm15 = vmmov %vm34558_vm2  ;;  %v34613_v37 = vld [vmem:[#allocation36_spill] sm:$0xff] }
 0xa0c   : > { %24900 = vmatprep.mubr.msk.f32.mxu1 %vm34558_vm2, %v34597_v63  ;;  %v34615_v63 = vld [vmem:[#allocation6_spill] sm:$0xff] }
 0xa0f   : > { %24901 = vmatmul.mubr.msk.f32.gmra.mrb[72].mxu1 %vm34599_vm14, %v34598_v22  ;;  %vm34612_vm14 = vmmov %vm34558_vm2  ;;  %v34617_v22 = vld [vmem:[#allocation7_spill] sm:$0xff] }
 0xa10   : > { %24903 = vmatprep.mubr.msk.f32.mxu1 %vm34601_vm13, %v34600_v10  ;;  %vm34614_vm13 = vmmov %vm34558_vm2  ;;  %v34619_v10 = vld [vmem:[#allocation40_spill] sm:$0xff] }
 0xa13   : > { %24904 = vmatmul.mubr.msk.f32.gmra.mrb[74].mxu1 %vm34603_vm9, %v34602_v53  ;;  %vm34616_vm9 = vmmov %vm34558_vm2  ;;  %v34621_v53 = vld [vmem:[#allocation41_spill] sm:$0xff] }
 0xa14   : > { %24906 = vmatprep.mubr.msk.f32.mxu1 %vm34605_vm4, %v34604_v35  ;;  %vm34618_vm4 = vmmov %vm34558_vm2  ;;  %v34623_v35 = vld [vmem:[#allocation9_spill] sm:$0xff] }
 0xa17   : > { %24907 = vmatmul.mubr.msk.f32.gmra.mrb[76].mxu1 %vm34607_vm6, %v34606_v39  ;;  %vm34620_vm6 = vmmov %vm34558_vm2  ;;  %v34624_v39 = vld [vmem:[#allocation10_spill] sm:$0xff] }
 0xa18   : > { %24909 = vmatprep.mubr.msk.f32.mxu1 %vm34609_vm15, %v34608_v15  ;;  %vm34622_vm15 = vmmov %vm34558_vm2  ;;  %v34626_v15 = vld [vmem:[#allocation45_spill] sm:$0xff] }
 0xa1b   : > { %24910 = vmatmul.mubr.msk.f32.gmra.mrb[78].mxu1 %vm34558_vm2, %v34610_v62  ;;  %v34628_v62 = vld [vmem:[#allocation46_spill] sm:$0xff] }
 0xa1c   : > { %24912 = vmatprep.mubr.msk.f32.mxu1 %vm34612_vm14, %v34611_v46  ;;  %vm34625_vm14 = vmmov %vm34558_vm2  ;;  %v34630_v46 = vld [vmem:[#allocation12_spill] sm:$0xff] }
 0xa1f   : > { %24913 = vmatmul.mubr.msk.f32.gmra.mrb[80].mxu1 %vm34614_vm13, %v34613_v37  ;;  %vm34627_vm13 = vmmov %vm34558_vm2  ;;  %v34632_v37 = vld [vmem:[#allocation13_spill] sm:$0xff] }
 0xa20   : > { %24915 = vmatprep.mubr.msk.f32.mxu1 %vm34616_vm9, %v34615_v63  ;;  %vm34629_vm9 = vmmov %vm34558_vm2  ;;  %v34634_v63 = vld [vmem:[#allocation50_spill] sm:$0xff] }
 0xa23   : > { %24916 = vmatmul.mubr.msk.f32.gmra.mrb[82].mxu1 %vm34618_vm4, %v34617_v22  ;;  %vm34631_vm4 = vmmov %vm34558_vm2  ;;  %v34636_v22 = vld [vmem:[#allocation18_spill] sm:$0xff] }
 0xa24   : > { %24918 = vmatprep.mubr.msk.f32.mxu1 %vm34620_vm6, %v34619_v10  ;;  %vm34633_vm6 = vmmov %vm34558_vm2  ;;  %v31178_v10 = vld [vmem:[#allocation2 + $0x101] sm:$0xff] }
 0xa27   : > { %24919 = vmatmul.mubr.msk.f32.gmra.mrb[84].mxu1 %vm34622_vm15, %v34621_v53  ;;  %vm34635_vm15 = vmmov %vm34558_vm2  ;;  %v31182_v53 = vld [vmem:[#allocation2 + $0x109] sm:$0xff] }
 0xa28   : > { %24921 = vmatprep.mubr.msk.f32.mxu1 %vm34558_vm2, %v34623_v35  ;;  %v15446_v35 = vld [vmem:[%s32725_s4 + $0x70] sm:$0xff] }
 0xa2b   : > { %24922 = vmatmul.mubr.msk.f32.gmra.mrb[86].mxu1 %vm34625_vm14, %v34624_v39  ;;  %vm34637_vm14 = vmmov %vm34558_vm2  ;;  %v15447_v39 = vld [vmem:[%s32725_s4 + $0x78] sm:$0xff] }
 0xa2c   : > { %24924 = vmatprep.mubr.msk.f32.mxu1 %vm34627_vm13, %v34626_v15  ;;  %vm34638_vm13 = vmmov %vm34558_vm2  ;;  %v25712_v15 = vpack.c.bf16 %v15447_v39, %v15446_v35  ;;  %v34652_v35 = vld [vmem:[#allocation11_spill] sm:$0xff] }
 0xa2f   : > { %24925 = vmatmul.mubr.msk.f32.gmra.mrb[88].mxu1 %vm34629_vm9, %v34628_v62  ;;  %vm34639_vm9 = vmmov %vm34558_vm2  ;;  %v14609_v62 = vsel %vm34323_vm10, %v30855_v29, 0.0 }
 0xa30   : > { %24927 = vmatprep.mubr.msk.f32.mxu1 %vm34631_vm4, %v34630_v46  ;;  %vm34640_vm4 = vmmov %vm34558_vm2  ;;  %v34641_v46 = vld [vmem:[#allocation16_spill] sm:$0xff] }
 0xa31   : > { %vm34654_vm10 = vmmov %vm34558_vm2 }
 0xa33   : > { %24928 = vmatmul.mubr.msk.f32.gmra.mrb[90].mxu1 %vm34633_vm6, %v34632_v37  ;;  %vm34642_vm6 = vmmov %vm34558_vm2  ;;  %v34643_v37 = vld [vmem:[#allocation5_spill] sm:$0xff] }
 0xa34   : > { %24930 = vmatprep.mubr.msk.f32.mxu1 %vm34635_vm15, %v34634_v63  ;;  %vm34644_vm15 = vnez %v34643_v37 }
 0xa35   : > { %v14611_v63 = vsel %vm34644_vm15, %v30867_v13, 0.0  ;;  %vm34658_vm15 = vmmov %vm34558_vm2 }
 0xa37   : > { %24931 = vmatmul.mubr.msk.f32.gmra.mrb[92].mxu1 %vm34558_vm2, %v34636_v22  ;;  %v34645_v22 = vld [vmem:[#allocation70_spill] sm:$0xff] }
 0xa38   : > { %24933 = vmatprep.mubr.msk.f32.mxu1 %vm34637_vm14, %v31178_v10  ;;  %vm34646_vm14 = vmmov %vm34558_vm2 }
 0xa3b   : > { %24934 = vmatmul.mubr.msk.f32.gmra.mrb[94].mxu1 %vm34638_vm13, %v31182_v53 }
 0xa3c   : > { %24940 = vmatprep.mubr.msk.f32.mxu1 %vm34639_vm9, %v30853_v3  ;;  %v34647_v3 = vld [vmem:[#allocation8_spill] sm:$0xff]  ;;  %vm34649_vm9 = vmmov %vm34558_vm2 }
 0xa3d   : > { %vm34648_vm13 = vnez %v34647_v3  ;;  %v34659_v3 = vld [vmem:[#allocation58_spill] sm:$0xff] }
 0xa3e   : > { %v14613_v29 = vsel %vm34648_vm13, %v30877_v23, 0.0 }
 0xa3f   : > { %24941 = vmatmul.mubr.msk.f32.vlgmr.msra.gmra.mrb[64].mxu1 %vm34640_vm4, %v14609_v62  ;;  %vm34651_vm4 = vmmov %vm34558_vm2  ;;  %v34655_v62 = vld [vmem:[#allocation22_spill] sm:$0xff] }
 0xa40   : > { %25711 = vmatpush3.bf16.msra.mxu1 %v25708_v36  ;;  %24943 = vmatprep.mubr.msk.f32.mxu1 %vm34642_vm6, %v34641_v46  ;;  %v34650_v36 = vld [vmem:[#allocation19_spill] sm:$0xff]  ;;  %vm34653_vm6 = vnez %v34652_v35 }
 0xa41   : > { %25713 = vmatprep.subr.bf16.mxu1 %v25712_v15  ;;  %v14615_v39 = vsel %vm34653_vm6, %v30887_v27, 0.0  ;;  %v34663_v35 = vld [vmem:[#allocation59_spill] sm:$0xff] }
 0xa43   : > { %24944 = vmatmul.mubr.msk.f32.gmra.mrb[66].mxu1 %vm34558_vm2, %v14611_v63  ;;  %v34656_v63 = vld [vmem:[#allocation14_spill] sm:$0xff] }
 0xa44   : > { %24946 = vmatprep.mubr.msk.f32.mxu1 %vm34646_vm14, %v34645_v22  ;;  %vm34657_vm14 = vnez %v34656_v63  ;;  %v34666_v63 = vld [vmem:[#allocation61_spill] sm:$0xff] }
 0xa45   : > { %v14617_v37 = vsel %vm34657_vm14, %v30897_v20, 0.0  ;;  %vm34670_vm14 = vmmov %vm34558_vm2 }
 0xa47   : > { %24947 = vmatmul.mubr.msk.f32.gmra.mrb[68].mxu1 %vm34649_vm9, %v14613_v29  ;;  %vm34660_vm9 = vmmov %vm34558_vm2  ;;  %v34671_v29 = vld [vmem:[#allocation21_spill] sm:$0xff] }
 0xa48   : > { %24949 = vmatprep.mubr.msk.f32.mxu1 %vm34651_vm4, %v34650_v36  ;;  %v14619_v36 = vsel %vm34500_vm0, %v30907_v41, 0.0  ;;  %vm34662_vm4 = vmmov %vm34558_vm2 }
 0xa49   : > { %vm34675_vm0 = vmmov %vm34558_vm2 }
 0xa4b   : > { %24950 = vmatmul.mubr.msk.f32.gmra.mrb[70].mxu1 %vm34654_vm10, %v14615_v39  ;;  %vm34664_vm10 = vmmov %vm34558_vm2  ;;  %v34676_v39 = vld [vmem:[#allocation24_spill] sm:$0xff] }
 0xa4c   : > { %24952 = vmatprep.mubr.msk.f32.mxu1 %vm34558_vm2, %v34655_v62  ;;  %v14621_v62 = vsel %vm34504_vm8, %v30917_v51, 0.0  ;;  %vm34680_vm8 = vmmov %vm34675_vm0 }
 0xa4f   : > { %24953 = vmatmul.mubr.msk.f32.gmra.mrb[72].mxu1 %vm34658_vm15, %v14617_v37  ;;  %vm34667_vm15 = vmmov %vm34558_vm2  ;;  %v34668_v37 = vld [vmem:[#allocation23_spill] sm:$0xff] }
 0xa50   : > { %24955 = vmatprep.mubr.msk.f32.mxu1 %vm34660_vm9, %v34659_v3  ;;  %vm34669_vm9 = vnez %v34668_v37  ;;  %v34681_v37 = vld [vmem:[#allocation29_spill] sm:$0xff] }
 0xa51   : > { %v14623_v3 = vsel %vm34669_vm9, %v30927_v32, 0.0  ;;  %vm34685_vm9 = vmmov %vm34675_vm0 }
 0xa53   : > { %24956 = vmatmul.mubr.msk.f32.gmra.mrb[74].mxu1 %vm34662_vm4, %v14619_v36  ;;  %vm34672_vm4 = vmmov %vm34558_vm2  ;;  %v34673_v36 = vld [vmem:[#allocation27_spill] sm:$0xff] }
 0xa54   : > { %24958 = vmatprep.mubr.msk.f32.mxu1 %vm34664_vm10, %v34663_v35  ;;  %vm34674_vm10 = vnez %v34673_v36  ;;  %v34686_v36 = vld [vmem:[#allocation67_spill] sm:$0xff] }
 0xa55   : > { %v14625_v35 = vsel %vm34674_vm10, %v30937_v26, 0.0  ;;  %vm34689_vm10 = vmmov %vm34675_vm0 }
 0xa57   : > { %24959 = vmatmul.mubr.msk.f32.gmra.mrb[76].mxu1 %vm34558_vm2, %v14621_v62  ;;  %vm34677_vm2 = vmmov %vm34675_vm0  ;;  %v34678_v62 = vld [vmem:[#allocation33_spill] sm:$0xff] }
 0xa58   : > { %24961 = vmatprep.mubr.msk.f32.mxu1 %vm34667_vm15, %v34666_v63  ;;  %vm34679_vm15 = vnez %v34678_v62  ;;  %v34690_v62 = vld [vmem:[#allocation71_spill] sm:$0xff] }
 0xa59   : > { %v14627_v63 = vsel %vm34679_vm15, %v30947_v54, 0.0  ;;  %vm34694_vm15 = vmmov %vm34675_vm0 }
 0xa5b   : > { %24962 = vmatmul.mubr.msk.f32.gmra.mrb[78].mxu1 %vm34670_vm14, %v14623_v3  ;;  %vm34682_vm14 = vmmov %vm34675_vm0  ;;  %v34683_v3 = vld [vmem:[#allocation38_spill] sm:$0xff] }
 0xa5c   : > { %24964 = vmatprep.mubr.msk.f32.mxu1 %vm34672_vm4, %v34671_v29  ;;  %vm34684_vm4 = vnez %v34683_v3 }
 0xa5d   : > { %v14629_v29 = vsel %vm34684_vm4, %v30957_v0, 0.0 }
 0xa5f   : > { %24965 = vmatmul.mubr.msk.f32.gmra.mrb[80].mxu1 %vm34675_vm0, %v14625_v35  ;;  %v34687_v35 = vld [vmem:[#allocation43_spill] sm:$0xff] }
 0xa60   : > { %24967 = vmatprep.mubr.msk.f32.mxu1 %vm34677_vm2, %v34676_v39  ;;  %vm34688_vm2 = vnez %v34687_v35  ;;  %v34699_v35 = vld [vmem:[#allocation72_spill] sm:$0xff] }
 0xa61   : > { %v14631_v39 = vsel %vm34688_vm2, %v30967_v25, 0.0 }
 0xa63   : > { %24968 = vmatmul.mubr.msk.f32.gmra.mrb[82].mxu1 %vm34680_vm8, %v14627_v63  ;;  %vm34691_vm8 = vmmov %vm34675_vm0  ;;  %v34692_v63 = vld [vmem:[#allocation48_spill] sm:$0xff] }
 0xa64   : > { %24970 = vmatprep.mubr.msk.f32.mxu1 %vm34682_vm14, %v34681_v37  ;;  %vm34693_vm14 = vnez %v34692_v63  ;;  %vm34698_vm4 = vmmov %vm34691_vm8  ;;  %v31282_v63 = vld [vmem:[#allocation2 + $0x102] sm:$0xff] }
 0xa65   : > { %v14633_v37 = vsel %vm34693_vm14, %v30977_v60, 0.0  ;;  %vm34703_vm2 = vmmov %vm34698_vm4  ;;  %34704 = vst [vmem:[#allocation28_spill] sm:$0xff] %v31282_v63 }
 0xa67   : > { %24971 = vmatmul.mubr.msk.f32.gmra.mrb[84].mxu1 %vm34685_vm9, %v14629_v29  ;;  %vm34695_vm9 = vmmov %vm34675_vm0  ;;  %v34696_v29 = vld [vmem:[#allocation52_spill] sm:$0xff] }
 0xa68   : > { %24973 = vmatprep.mubr.msk.f32.mxu1 %vm34675_vm0, %v34686_v36  ;;  %vm34697_vm0 = vnez %v34696_v29  ;;  %v34706_v29 = vld [vmem:[#allocation60_spill] sm:$0xff] }
 0xa69   : > { %v14635_v3 = vsel %vm34697_vm0, %v30987_v31, 0.0 }
 0xa6b   : > { %24974 = vmatmul.mubr.msk.f32.gmra.mrb[86].mxu1 %vm34689_vm10, %v14631_v39  ;;  %vm34700_vm10 = vmmov %vm34698_vm4  ;;  %v34701_v39 = vld [vmem:[#allocation57_spill] sm:$0xff] }
 0xa6c   : > { %24976 = vmatprep.mubr.msk.f32.mxu1 %vm34691_vm8, %v34690_v62  ;;  %vm34702_vm8 = vnez %v34701_v39  ;;  %v15866_v39 = vld [vmem:[%s32725_s4 + $0x88] sm:$0xff] }
 0xa6d   : > { %v14637_v62 = vsel %vm34702_vm8, %v30997_v19, 0.0 }
 0xa6f   : > { %24977 = vmatmul.mubr.msk.f32.gmra.mrb[88].mxu1 %vm34694_vm15, %v14633_v37  ;;  %v31284_v37 = vld [vmem:[#allocation2 + $0x10a] sm:$0xff]  ;;  %vm34705_vm15 = vmmov %vm34703_vm2 }
 0xa70   : > { %24979 = vmatprep.mubr.msk.f32.mxu1 %vm34695_vm9, %v30985_v1  ;;  %vm34707_vm9 = vnez %v34706_v29 }
 0xa73   : > { %24980 = vmatmul.mubr.msk.f32.gmra.mrb[90].mxu1 %vm34698_vm4, %v14635_v3  ;;  %v14639_v3 = vsel %vm34707_vm9, %v31284_v37, 0.0  ;;  %vm34708_vm4 = vmmov %vm34703_vm2  ;;  %vm34712_vm9 = vnez %v33746_v52 }
 0xa74   : > { %24982 = vmatprep.mubr.msk.f32.mxu1 %vm34700_vm10, %v34699_v35  ;;  %v15865_v35 = vld [vmem:[%s32725_s4 + $0x80] sm:$0xff]  ;;  %vm34710_vm10 = vmmov %vm34708_vm4  ;;  %v15029_v29 = vsel %vm34712_vm9, %v30707_v5, 0.0  ;;  %v15033_v5 = vsel %vm34542_vm3, %v30727_v43, 0.0  ;;  %v34749_v43 = vld [vmem:[#allocation65_spill] sm:$0xff] }
 0xa75   : > { %vm34713_vm8 = vmmov %vm34708_vm4 }
 0xa76   : > { %vm34716_vm0 = vmmov %vm34708_vm4 }
 0xa77   : > { %24983 = vmatmul.mubr.msk.f32.gmra.mrb[92].mxu1 %vm34703_vm2, %v14637_v62  ;;  %vm34709_vm2 = vnez %v33743_v7 }
 0xa78   : > { %24985 = vmatprep.mubr.msk.f32.mxu1 %vm34705_vm15, %v31282_v63  ;;  %v15027_v62 = vsel %vm34709_vm2, %v30696_v16, 0.0  ;;  %v25716_v63 = vpack.c.bf16 %v15866_v39, %v15865_v35  ;;  %vm34711_vm15 = vmmov %vm34708_vm4  ;;  %vm34714_vm2 = vnez %v33748_v61  ;;  %v15414_v39 = vld [vmem:[#allocation2 + $0x21] sm:$0xff] }
 0xa79   : > { %v15031_v16 = vsel %vm34714_vm2, %v30717_v48, 0.0  ;;  %v15025_v48 = vld [vmem:[#allocation2 + $0x110] sm:$0xff] }
 0xa7b   : > { %24986 = vmatmul.mubr.msk.f32.gmra.mrb[94].mxu1 %vm34708_vm4, %v14639_v3  ;;  %v15415_v3 = vld [vmem:[#allocation2 + $0x29] sm:$0xff] }
 0xa7c   : > { %24992 = vmatprep.mubr.msk.f32.mxu1 %vm34710_vm10, %v15027_v62  ;;  %vm34715_vm10 = vmmov %vm34708_vm4  ;;  %v15416_v62 = vld [vmem:[#allocation2 + $0x31] sm:$0xff] }
 0xa7f   : > { %24993 = vmatmul.mubr.msk.f32.vlgmr.msra.gmra.mrb[64].mxu1 %vm34711_vm15, %v30709_v55  ;;  %vm34717_vm15 = vmmov %vm34716_vm0 }
 0xa80   : > { %25715 = vmatpush3.bf16.msra.mxu1 %v25712_v15  ;;  %24995 = vmatprep.mubr.msk.f32.mxu1 %vm34713_vm8, %v15029_v29  ;;  %vm34718_vm8 = vmmov %vm34716_vm0  ;;  %v34754_v15 = vld [vmem:[#allocation66_spill] sm:$0xff]  ;;  %v15026_v29 = vld [vmem:[#allocation2 + $0x118] sm:$0xff] }
 0xa81   : > { %25717 = vmatprep.subr.bf16.mxu1 %v25716_v63 }
 0xa83   : > { %24996 = vmatmul.mubr.msk.f32.gmra.mrb[66].mxu1 %vm34708_vm4, %v30719_v18  ;;  %v15035_v18 = vsel %vm34545_vm7, %v30737_v59, 0.0  ;;  %vm34719_vm4 = vmmov %vm34716_vm0  ;;  %v34748_v59 = vld [vmem:[#allocation15_spill] sm:$0xff] }
 0xa84   : > { %24998 = vmatprep.mubr.msk.f32.mxu1 %vm34715_vm10, %v15031_v16  ;;  %vm34720_vm10 = vmmov %vm34716_vm0  ;;  %v15417_v16 = vld [vmem:[#allocation2 + $0x39] sm:$0xff] }
 0xa85   : > { %vm34722_vm2 = vmmov %vm34719_vm4 }
 0xa86   : > { %vm34725_vm3 = vmmov %vm34722_vm2 }
 0xa87   : > { %24999 = vmatmul.mubr.msk.f32.gmra.mrb[68].mxu1 %vm34716_vm0, %v30729_v21  ;;  %vm34721_vm0 = vnez %v33383_v24  ;;  %vm34728_vm7 = vmmov %vm34722_vm2 }
 0xa88   : > { %25001 = vmatprep.mubr.msk.f32.mxu1 %vm34717_vm15, %v15033_v5  ;;  %v15037_v21 = vsel %vm34721_vm0, %v30747_v11, 0.0  ;;  %vm34723_vm15 = vmmov %vm34722_vm2  ;;  %v15418_v5 = vld [vmem:[#allocation2 + $0x41] sm:$0xff] }
 0xa89   : > { %vm34730_vm0 = vmmov %vm34722_vm2 }
 0xa8b   : > { %25002 = vmatmul.mubr.msk.f32.gmra.mrb[70].mxu1 %vm34718_vm8, %v30739_v12  ;;  %vm34724_vm8 = vnez %v33395_v8 }
 0xa8c   : > { %25004 = vmatprep.mubr.msk.f32.mxu1 %vm34719_vm4, %v15035_v18  ;;  %v15039_v12 = vsel %vm34724_vm8, %v30757_v9, 0.0  ;;  %vm34726_vm4 = vmmov %vm34722_vm2  ;;  %v34744_v9 = vld [vmem:[#allocation69_spill] sm:$0xff]  ;;  %v15419_v18 = vld [vmem:[#allocation2 + $0x49] sm:$0xff] }
 0xa8d   : > { %v15053_v11 = vsel %vm34570_vm5, %v34744_v9, 0.0  ;;  %vm34758_vm5 = vmmov %vm34730_vm0  ;;  %v15431_v9 = vld [vmem:[#allocation2 + $0xa9] sm:$0xff] }
 0xa8f   : > { %25005 = vmatmul.mubr.msk.f32.gmra.mrb[72].mxu1 %vm34720_vm10, %v30749_v17  ;;  %vm34727_vm10 = vnez %v33406_v4 }
 0xa90   : > { %25007 = vmatprep.mubr.msk.f32.mxu1 %vm34722_vm2, %v15037_v21  ;;  %v15041_v17 = vsel %vm34727_vm10, %v30767_v42, 0.0  ;;  %vm34735_vm10 = vmmov %vm34730_vm0  ;;  %v15420_v21 = vld [vmem:[#allocation2 + $0x51] sm:$0xff] }
 0xa93   : > { %25008 = vmatmul.mubr.msk.f32.gmra.mrb[74].mxu1 %vm34723_vm15, %v30759_v47  ;;  %vm34729_vm15 = vnez %v33418_v58 }
 0xa94   : > { %25010 = vmatprep.mubr.msk.f32.mxu1 %vm34725_vm3, %v15039_v12  ;;  %v15043_v47 = vsel %vm34729_vm15, %v30777_v57, 0.0  ;;  %vm34731_vm3 = vmmov %vm34730_vm0  ;;  %v15049_v57 = vsel %vm34563_vm12, %v30807_v14, 0.0  ;;  %v34746_v14 = vld [vmem:[#allocation54_spill] sm:$0xff] }
 0xa95   : > { %vm34751_vm12 = vmmov %vm34730_vm0  ;;  %v15421_v12 = vld [vmem:[#allocation2 + $0x59] sm:$0xff] }
 0xa97   : > { %25011 = vmatmul.mubr.msk.f32.gmra.mrb[76].mxu1 %vm34726_vm4, %v30769_v2  ;;  %v15045_v2 = vsel %vm34557_vm1, %v30787_v28, 0.0  ;;  %vm34732_vm4 = vmmov %vm34730_vm0  ;;  %v34739_v28 = vld [vmem:[#allocation26_spill] sm:$0xff] }
 0xa98   : > { %25013 = vmatprep.mubr.msk.f32.mxu1 %vm34728_vm7, %v15041_v17  ;;  %vm34733_vm7 = vmmov %vm34730_vm0  ;;  %v15051_v42 = vsel %vm34470_vm11, %v34739_v28, 0.0  ;;  %v15422_v17 = vld [vmem:[#allocation2 + $0x61] sm:$0xff]  ;;  %v15428_v28 = vld [vmem:[#allocation2 + $0x91] sm:$0xff] }
 0xa99   : > { %vm34756_vm11 = vmmov %vm34730_vm0 }
 0xa9b   : > { %25014 = vmatmul.mubr.msk.f32.gmra.mrb[78].mxu1 %vm34722_vm2, %v30779_v49  ;;  %vm34734_vm2 = vnez %v33434_v30 }
 0xa9c   : > { %25016 = vmatprep.mubr.msk.f32.mxu1 %vm34730_vm0, %v15043_v47  ;;  %v15047_v49 = vsel %vm34734_vm2, %v30797_v6, 0.0  ;;  %v34742_v6 = vld [vmem:[#allocation55_spill] sm:$0xff]  ;;  %v15424_v47 = vld [vmem:[#allocation2 + $0x71] sm:$0xff] }
 0xa9f   : > { %25017 = vmatmul.mubr.msk.f32.gmra.mrb[80].mxu1 %vm34731_vm3, %v30789_v33  ;;  %v34736_v33 = vld [vmem:[#allocation62_spill] sm:$0xff]  ;;  %vm34737_vm3 = vmmov %vm34730_vm0 }
 0xaa0   : > { %25019 = vmatprep.mubr.msk.f32.mxu1 %vm34732_vm4, %v15045_v2  ;;  %vm34738_vm4 = vmmov %vm34730_vm0  ;;  %v15425_v2 = vld [vmem:[#allocation2 + $0x79] sm:$0xff] }
 0xaa3   : > { %25020 = vmatmul.mubr.msk.f32.gmra.mrb[82].mxu1 %vm34733_vm7, %v30799_v44  ;;  %v34740_v44 = vld [vmem:[#allocation63_spill] sm:$0xff]  ;;  %vm34741_vm7 = vmmov %vm34730_vm0 }
 0xaa4   : > { %25022 = vmatprep.mubr.msk.f32.mxu1 %vm34735_vm10, %v15047_v49  ;;  %vm34743_vm10 = vmmov %vm34730_vm0  ;;  %v15426_v49 = vld [vmem:[#allocation2 + $0x81] sm:$0xff] }
 0xaa7   : > { %25023 = vmatmul.mubr.msk.f32.gmra.mrb[84].mxu1 %vm34730_vm0, %v30809_v56  ;;  %v34745_v56 = vld [vmem:[#allocation64_spill] sm:$0xff] }
 0xaa8   : > { %25025 = vmatprep.mubr.msk.f32.mxu1 %vm34737_vm3, %v15049_v57  ;;  %vm34747_vm3 = vmmov %vm34730_vm0  ;;  %v15427_v57 = vld [vmem:[#allocation2 + $0x89] sm:$0xff] }
 0xaab   : > { %25026 = vmatmul.mubr.msk.f32.gmra.mrb[86].mxu1 %vm34738_vm4, %v34566_v40  ;;  %vm34750_vm4 = vnez %v34749_v43  ;;  %v34752_v40 = vld [vmem:[#allocation68_spill] sm:$0xff] }
 0xaac   : > { %25028 = vmatprep.mubr.msk.f32.mxu1 %vm34741_vm7, %v15051_v42  ;;  %v15055_v55 = vsel %vm34750_vm4, %v34748_v59, 0.0  ;;  %vm34753_vm7 = vmmov %vm34730_vm0  ;;  %v15429_v42 = vld [vmem:[#allocation2 + $0x99] sm:$0xff]  ;;  %v15434_v59 = vld [vmem:[#allocation2 + $0xc1] sm:$0xff] }
 0xaaf   : > { %25029 = vmatmul.mubr.msk.f32.gmra.mrb[88].mxu1 %vm34743_vm10, %v34742_v6  ;;  %vm34755_vm10 = vnez %v34754_v15  ;;  %v15430_v6 = vld [vmem:[#allocation2 + $0xa1] sm:$0xff] }
 0xab0   : > { %25031 = vmatprep.mubr.msk.f32.mxu1 %vm34730_vm0, %v15053_v11  ;;  %v15057_v35 = vsel %vm34755_vm10, %v15025_v48, 0.0  ;;  %vm34761_vm10 = vmmov %vm34730_vm0  ;;  %v15432_v11 = vld [vmem:[#allocation2 + $0xb1] sm:$0xff] }
 0xab1   : > { %v15436_v48 = vld [vmem:[#allocation2 + $0xd1] sm:$0xff] }
 0xab3   : > { %25032 = vmatmul.mubr.msk.f32.gmra.mrb[90].mxu1 %vm34747_vm3, %v34746_v14  ;;  %vm34757_vm3 = vmmov %vm34730_vm0  ;;  %v15433_v14 = vld [vmem:[#allocation2 + $0xb9] sm:$0xff] }
 0xab4   : > { %25034 = vmatprep.mubr.msk.f32.mxu1 %vm34751_vm12, %v15055_v55  ;;  %vm34759_vm12 = vmmov %vm34730_vm0  ;;  %v15435_v55 = vld [vmem:[#allocation2 + $0xc9] sm:$0xff] }
 0xab7   : > { %25035 = vmatmul.mubr.msk.f32.gmra.mrb[92].mxu1 %vm34753_vm7, %v34752_v40  ;;  %vm34760_vm7 = vmmov %vm34730_vm0  ;;  %v15437_v40 = vld [vmem:[#allocation2 + $0xd9] sm:$0xff] }
 0xab8   : > { %25037 = vmatprep.mubr.msk.f32.mxu1 %vm34756_vm11, %v15057_v35  ;;  %vm34762_vm11 = vmmov %vm34730_vm0  ;;  %v15438_v35 = vld [vmem:[#allocation2 + $0xe1] sm:$0xff] }
 0xabb   : > { %25038 = vmatmul.mubr.msk.f32.gmra.mrb[94].mxu1 %vm34730_vm0, %v15026_v29  ;;  %v15439_v29 = vld [vmem:[#allocation2 + $0xe9] sm:$0xff] }
 0xabc   : > { %25044 = vmatprep.mubr.msk.f32.mxu1 %vm34757_vm3, %v15414_v39  ;;  %vm34763_vm3 = vmmov %vm34730_vm0  ;;  %v15440_v39 = vld [vmem:[#allocation2 + $0xf1] sm:$0xff] }
 0xabf   : > { %25045 = vmatmul.mubr.msk.f32.vlgmr.msra.gmra.mrb[64].mxu1 %vm34758_vm5, %v15415_v3  ;;  %vm34764_vm5 = vmmov %vm34730_vm0  ;;  %v15441_v3 = vld [vmem:[#allocation2 + $0xf9] sm:$0xff] }
 0xac0   : > { %25719 = vmatpush3.bf16.msra.mxu1 %v25716_v63  ;;  %25047 = vmatprep.mubr.msk.f32.mxu1 %vm34759_vm12, %v15416_v62  ;;  %v15423_v63 = vld [vmem:[#allocation2 + $0x69] sm:$0xff]  ;;  %vm34765_vm12 = vmmov %vm34730_vm0  ;;  %v15444_v62 = vld [vmem:[#allocation2 + $0x111] sm:$0xff] }
 0xac3   : > { %25048 = vmatmul.mubr.msk.f32.gmra.mrb[66].mxu1 %vm34760_vm7, %v15417_v16  ;;  %vm34766_vm7 = vmmov %vm34730_vm0  ;;  %v15445_v16 = vld [vmem:[#allocation2 + $0x119] sm:$0xff] }
 0xac4   : > { %25050 = vmatprep.mubr.msk.f32.mxu1 %vm34761_vm10, %v15418_v5  ;;  %vm34767_vm10 = vmmov %vm34730_vm0 }
 0xac7   : > { %25051 = vmatmul.mubr.msk.f32.gmra.mrb[68].mxu1 %vm34762_vm11, %v15419_v18  ;;  %vm34768_vm11 = vmmov %vm34730_vm0  ;;  %v34791_v18 = vld [vmem:[#allocation19_spill] sm:$0xff] }
 0xac8   : > { %25053 = vmatprep.mubr.msk.f32.mxu1 %vm34730_vm0, %v15420_v21  ;;  %v15838_v21 = vsel %vm34648_vm13, %v30887_v27, 0.0  ;;  %v34803_v27 = vld [vmem:[#allocation59_spill] sm:$0xff] }
 0xacb   : > { %25054 = vmatmul.mubr.msk.f32.gmra.mrb[70].mxu1 %vm34763_vm3, %v15421_v12  ;;  %vm34769_vm3 = vmmov %vm34730_vm0  ;;  %v15840_v12 = vsel %vm34653_vm6, %v30897_v20, 0.0  ;;  %v34808_v20 = vld [vmem:[#allocation61_spill] sm:$0xff] }
 0xacc   : > { %25056 = vmatprep.mubr.msk.f32.mxu1 %vm34764_vm5, %v15422_v17  ;;  %vm34770_vm5 = vmmov %vm34730_vm0  ;;  %v34800_v17 = vld [vmem:[#allocation14_spill] sm:$0xff] }
 0xacf   : > { %25057 = vmatmul.mubr.msk.f32.gmra.mrb[72].mxu1 %vm34765_vm12, %v15423_v63  ;;  %vm34771_vm12 = vmmov %vm34730_vm0 }
 0xad0   : > { %25059 = vmatprep.mubr.msk.f32.mxu1 %vm34766_vm7, %v15424_v47  ;;  %vm34772_vm7 = vmmov %vm34730_vm0  ;;  %v34805_v47 = vld [vmem:[#allocation17_spill] sm:$0xff] }
 0xad3   : > { %25060 = vmatmul.mubr.msk.f32.gmra.mrb[74].mxu1 %vm34767_vm10, %v15425_v2  ;;  %vm34773_vm10 = vmmov %vm34730_vm0 }
 0xad4   : > { %25062 = vmatprep.mubr.msk.f32.mxu1 %vm34768_vm11, %v15426_v49  ;;  %vm34774_vm11 = vmmov %vm34730_vm0  ;;  %v34809_v49 = vld [vmem:[#allocation20_spill] sm:$0xff] }
 0xad7   : > { %25063 = vmatmul.mubr.msk.f32.gmra.mrb[76].mxu1 %vm34730_vm0, %v15427_v57 }
 0xad8   : > { %25065 = vmatprep.mubr.msk.f32.mxu1 %vm34769_vm3, %v15428_v28  ;;  %vm34775_vm3 = vmmov %vm34730_vm0  ;;  %v34814_v28 = vld [vmem:[#allocation23_spill] sm:$0xff] }
 0xadb   : > { %25066 = vmatmul.mubr.msk.f32.gmra.mrb[78].mxu1 %vm34770_vm5, %v15429_v42  ;;  %vm34776_vm5 = vmmov %vm34730_vm0 }
 0xadc   : > { %25068 = vmatprep.mubr.msk.f32.mxu1 %vm34771_vm12, %v15430_v6  ;;  %vm34777_vm12 = vmmov %vm34730_vm0  ;;  %v34819_v6 = vld [vmem:[#allocation27_spill] sm:$0xff] }
 0xadf   : > { %25069 = vmatmul.mubr.msk.f32.gmra.mrb[80].mxu1 %vm34772_vm7, %v15431_v9  ;;  %vm34778_vm7 = vmmov %vm34730_vm0 }
 0xae0   : > { %25071 = vmatprep.mubr.msk.f32.mxu1 %vm34773_vm10, %v15432_v11  ;;  %vm34779_vm10 = vmmov %vm34730_vm0  ;;  %v34824_v11 = vld [vmem:[#allocation33_spill] sm:$0xff] }
 0xae3   : > { %25072 = vmatmul.mubr.msk.f32.gmra.mrb[82].mxu1 %vm34774_vm11, %v15433_v14  ;;  %vm34780_vm11 = vmmov %vm34730_vm0 }
 0xae4   : > { %25074 = vmatprep.mubr.msk.f32.mxu1 %vm34730_vm0, %v15434_v59 }
 0xae7   : > { %25075 = vmatmul.mubr.msk.f32.gmra.mrb[84].mxu1 %vm34775_vm3, %v15435_v55  ;;  %vm34781_vm3 = vmmov %vm34730_vm0  ;;  %v34832_v55 = vld [vmem:[#allocation43_spill] sm:$0xff] }
 0xae8   : > { %25077 = vmatprep.mubr.msk.f32.mxu1 %vm34776_vm5, %v15436_v48  ;;  %vm34782_vm5 = vmmov %vm34730_vm0 }
 0xaeb   : > { %25078 = vmatmul.mubr.msk.f32.gmra.mrb[86].mxu1 %vm34777_vm12, %v15437_v40  ;;  %vm34783_vm12 = vmmov %vm34730_vm0  ;;  %v34840_v40 = vld [vmem:[#allocation52_spill] sm:$0xff] }
 0xaec   : > { %25080 = vmatprep.mubr.msk.f32.mxu1 %vm34778_vm7, %v15438_v35  ;;  %vm34784_vm7 = vmmov %vm34730_vm0 }
 0xaef   : > { %25081 = vmatmul.mubr.msk.f32.gmra.mrb[88].mxu1 %vm34779_vm10, %v15439_v29  ;;  %vm34785_vm10 = vmmov %vm34730_vm0  ;;  %v15831_v29 = vld [vmem:[#allocation2 + $0x112] sm:$0xff] }
 0xaf0   : > { %25083 = vmatprep.mubr.msk.f32.mxu1 %vm34780_vm11, %v15440_v39  ;;  %vm34786_vm11 = vnez %v34322_v45  ;;  %v34844_v39 = vld [vmem:[#allocation57_spill] sm:$0xff] }
 0xaf1   : > { %v15834_v5 = vsel %vm34786_vm11, %v30867_v13, 0.0  ;;  %v34795_v13 = vld [vmem:[#allocation22_spill] sm:$0xff] }
 0xaf3   : > { %25084 = vmatmul.mubr.msk.f32.gmra.mrb[90].mxu1 %vm34730_vm0, %v15441_v3  ;;  %v34848_v3 = vld [vmem:[#allocation60_spill] sm:$0xff] }
 0xaf4   : > { %25086 = vmatprep.mubr.msk.f32.mxu1 %vm34781_vm3, %v31178_v10  ;;  %vm34787_vm3 = vmmov %vm34730_vm0  ;;  %v34788_v10 = vld [vmem:[#allocation5_spill] sm:$0xff] }
 0xaf7   : > { %25087 = vmatmul.mubr.msk.f32.gmra.mrb[92].mxu1 %vm34782_vm5, %v31182_v53  ;;  %vm34789_vm5 = vnez %v34788_v10 }
 0xaf8   : > { %25089 = vmatprep.mubr.msk.f32.mxu1 %vm34783_vm12, %v15444_v62  ;;  %v15836_v53 = vsel %vm34789_vm5, %v30877_v23, 0.0  ;;  %vm34790_vm12 = vmmov %vm34730_vm0  ;;  %v34798_v23 = vld [vmem:[#allocation58_spill] sm:$0xff] }
 0xaf9   : > { %vm34802_vm5 = vmmov %vm34730_vm0 }
 0xafb   : > { %25090 = vmatmul.mubr.msk.f32.gmra.mrb[94].mxu1 %vm34784_vm7, %v15445_v16  ;;  %vm34792_vm7 = vmmov %vm34730_vm0  ;;  %v16577_v16 = vld [vmem:[%s32726_s5 + $0x1c] sm:$0xff] }
 0xafc   : > { %25096 = vmatprep.mubr.msk.f32.mxu1 %vm34785_vm10, %v34641_v46  ;;  %v34793_v46 = vld [vmem:[#allocation8_spill] sm:$0xff]  ;;  %vm34794_vm10 = vmmov %vm34730_vm0 }
 0xaff   : > { %25097 = vmatmul.mubr.msk.f32.vlgmr.msra.gmra.mrb[64].mxu1 %vm34730_vm0, %v15834_v5 }
 0xb00   : > { %25099 = vmatprep.mubr.msk.f32.mxu1 %vm34787_vm3, %v34645_v22  ;;  %v34796_v22 = vld [vmem:[#allocation11_spill] sm:$0xff]  ;;  %vm34797_vm3 = vmmov %vm34730_vm0 }
 0xb01   : > { %vm34807_vm13 = vmmov %vm34797_vm3 }
 0xb02   : > { %vm34811_vm6 = vmmov %vm34797_vm3 }
 0xb03   : > { %25100 = vmatmul.mubr.msk.f32.gmra.mrb[66].mxu1 %vm34790_vm12, %v15836_v53  ;;  %vm34799_vm12 = vmmov %vm34730_vm0  ;;  %v16544_v53 = vld [vmem:[#allocation2 + $0x1] sm:$0xff] }
 0xb04   : > { %25102 = vmatprep.mubr.msk.f32.mxu1 %vm34792_vm7, %v34791_v18  ;;  %vm34801_vm7 = vnez %v34800_v17  ;;  %v16541_v18 = vld [vmem:[%s32726_s5] sm:$0xff] }
 0xb05   : > { %v15842_v63 = vsel %vm34801_vm7, %v30907_v41, 0.0  ;;  %v34812_v41 = vld [vmem:[#allocation21_spill] sm:$0xff]  ;;  %vm34816_vm7 = vmmov %vm34797_vm3 }
 0xb07   : > { %25103 = vmatmul.mubr.msk.f32.gmra.mrb[68].mxu1 %vm34794_vm10, %v15838_v21  ;;  %vm34804_vm10 = vmmov %vm34730_vm0  ;;  %v16542_v21 = vld [vmem:[%s32726_s5 + $0x8] sm:$0xff] }
 0xb08   : > { %25105 = vmatprep.mubr.msk.f32.mxu1 %vm34730_vm0, %v34795_v13  ;;  %vm34806_vm0 = vnez %v34805_v47  ;;  %v25724_v13 = vpack.c.bf16 %v16542_v21, %v16541_v18 }
 0xb09   : > { %v15844_v2 = vsel %vm34806_vm0, %v30917_v51, 0.0  ;;  %v34817_v51 = vld [vmem:[#allocation24_spill] sm:$0xff] }
 0xb0b   : > { %25106 = vmatmul.mubr.msk.f32.gmra.mrb[70].mxu1 %vm34797_vm3, %v15840_v12  ;;  %v16545_v12 = vld [vmem:[#allocation2 + $0x9] sm:$0xff] }
 0xb0c   : > { %25108 = vmatprep.mubr.msk.f32.mxu1 %vm34799_vm12, %v34798_v23  ;;  %vm34810_vm12 = vnez %v34809_v49 }
 0xb0d   : > { %v15846_v57 = vsel %vm34810_vm12, %v30927_v32, 0.0  ;;  %v34822_v32 = vld [vmem:[#allocation29_spill] sm:$0xff] }
 0xb0f   : > { %25109 = vmatmul.mubr.msk.f32.gmra.mrb[72].mxu1 %vm34802_vm5, %v15842_v63  ;;  %vm34813_vm5 = vmmov %vm34797_vm3 }
 0xb10   : > { %25111 = vmatprep.mubr.msk.f32.mxu1 %vm34804_vm10, %v34803_v27  ;;  %vm34815_vm10 = vnez %v34814_v28  ;;  %vm34821_vm0 = vmmov %vm34813_vm5 }
 0xb11   : > { %v15848_v42 = vsel %vm34815_vm10, %v30937_v26, 0.0  ;;  %vm34826_vm12 = vmmov %vm34821_vm0  ;;  %v34828_v26 = vld [vmem:[#allocation38_spill] sm:$0xff] }
 0xb12   : > { %vm34830_vm10 = vmmov %vm34821_vm0 }
 0xb13   : > { %25112 = vmatmul.mubr.msk.f32.gmra.mrb[74].mxu1 %vm34807_vm13, %v15844_v2  ;;  %vm34818_vm13 = vmmov %vm34797_vm3 }
 0xb14   : > { %25114 = vmatprep.mubr.msk.f32.mxu1 %vm34797_vm3, %v34808_v20  ;;  %vm34820_vm3 = vnez %v34819_v6 }
 0xb15   : > { %v15850_v9 = vsel %vm34820_vm3, %v30947_v54, 0.0  ;;  %v34831_v54 = vld [vmem:[#allocation71_spill] sm:$0xff]  ;;  %vm34834_vm3 = vmmov %vm34821_vm0 }
 0xb17   : > { %25115 = vmatmul.mubr.msk.f32.gmra.mrb[76].mxu1 %vm34811_vm6, %v15846_v57  ;;  %vm34823_vm6 = vmmov %vm34821_vm0 }
 0xb18   : > { %25117 = vmatprep.mubr.msk.f32.mxu1 %vm34813_vm5, %v34812_v41  ;;  %vm34825_vm5 = vnez %v34824_v11 }
 0xb19   : > { %v15852_v14 = vsel %vm34825_vm5, %v30957_v0, 0.0  ;;  %v34836_v0 = vld [vmem:[#allocation48_spill] sm:$0xff] }
 0xb1b   : > { %25118 = vmatmul.mubr.msk.f32.gmra.mrb[78].mxu1 %vm34816_vm7, %v15848_v42  ;;  %vm34827_vm7 = vmmov %vm34821_vm0 }
 0xb1c   : > { %25120 = vmatprep.mubr.msk.f32.mxu1 %vm34818_vm13, %v34817_v51  ;;  %vm34829_vm13 = vnez %v34828_v26 }
 0xb1d   : > { %v15854_v59 = vsel %vm34829_vm13, %v30967_v25, 0.0  ;;  %v34838_v25 = vld [vmem:[#allocation72_spill] sm:$0xff]  ;;  %vm34842_vm13 = vmmov %vm34834_vm3 }
 0xb1f   : > { %25121 = vmatmul.mubr.msk.f32.gmra.mrb[80].mxu1 %vm34821_vm0, %v15850_v9 }
 0xb20   : > { %25123 = vmatprep.mubr.msk.f32.mxu1 %vm34823_vm6, %v34822_v32  ;;  %vm34833_vm6 = vnez %v34832_v55 }
 0xb21   : > { %v15856_v48 = vsel %vm34833_vm6, %v30977_v60, 0.0  ;;  %v34843_v60 = vld [vmem:[#allocation28_spill] sm:$0xff]  ;;  %vm34850_vm6 = vmmov %vm34834_vm3 }
 0xb23   : > { %25124 = vmatmul.mubr.msk.f32.gmra.mrb[82].mxu1 %vm34826_vm12, %v15852_v14  ;;  %vm34835_vm12 = vmmov %vm34821_vm0 }
 0xb24   : > { %25126 = vmatprep.mubr.msk.f32.mxu1 %vm34827_vm7, %v34686_v36  ;;  %v15858_v36 = vsel %vm34693_vm14, %v30987_v31, 0.0  ;;  %vm34837_vm7 = vmmov %vm34821_vm0 }
 0xb25   : > { %vm34846_vm14 = vmmov %vm34834_vm3 }
 0xb27   : > { %25127 = vmatmul.mubr.msk.f32.gmra.mrb[84].mxu1 %vm34830_vm10, %v15854_v59  ;;  %vm34839_vm10 = vmmov %vm34821_vm0 }
 0xb28   : > { %25129 = vmatprep.mubr.msk.f32.mxu1 %vm34821_vm0, %v34831_v54  ;;  %vm34841_vm0 = vnez %v34840_v40 }
 0xb29   : > { %v15860_v35 = vsel %vm34841_vm0, %v30997_v19, 0.0  ;;  %v16576_v19 = vld [vmem:[%s32726_s5 + $0x14] sm:$0xff] }
 0xb2a   : > { %v25720_v5 = vpack.c.bf16 %v16577_v16, %v16576_v19 }
 0xb2b   : > { %25130 = vmatmul.mubr.msk.f32.gmra.mrb[86].mxu1 %vm34834_vm3, %v15856_v48 }
 0xb2c   : > { %25132 = vmatprep.mubr.msk.f32.mxu1 %vm34835_vm12, %v30985_v1  ;;  %v15832_v1 = vld [vmem:[#allocation2 + $0x11a] sm:$0xff]  ;;  %vm34845_vm12 = vnez %v34844_v39  ;;  %25721 = vmatprep.subr.bf16.mxu0 %v25720_v5 }
 0xb2d   : > { %v15862_v31 = vsel %vm34845_vm12, %v31284_v37, 0.0  ;;  %25723 = vmatpush3.bf16.msra.mxu0 %v25720_v5  ;;  %v16578_v37 = vld [vmem:[%s32726_s5 + $0x24] sm:$0xf] }
 0xb2f   : > { %25133 = vmatmul.mubr.msk.f32.gmra.mrb[88].mxu1 %vm34837_vm7, %v15858_v36  ;;  %vm34847_vm7 = vmmov %vm34834_vm3 }
 0xb30   : > { %25135 = vmatprep.mubr.msk.f32.mxu1 %vm34839_vm10, %v34838_v25  ;;  %vm34849_vm10 = vnez %v34848_v3 }
 0xb31   : > { %v15864_v62 = vsel %vm34849_vm10, %v15832_v1, 0.0 }
 0xb33   : > { %25136 = vmatmul.mubr.msk.f32.gmra.mrb[90].mxu1 %vm34842_vm13, %v15860_v35 }
 0xb34   : > { %25138 = vmatprep.mubr.msk.f32.mxu1 %vm34834_vm3, %v34843_v60 }
 0xb37   : > { %25139 = vmatmul.mubr.msk.f32.gmra.mrb[92].mxu1 %vm34846_vm14, %v15862_v31  ;;  %vm34851_vm14 = vcmask 1043456  }
 0xb38   : > { %25141 = vmatprep.mubr.msk.f32.mxu1 %vm34847_vm7, %v15831_v29  ;;  %25148 = vmatprep.subr.msk.mxu0 %vm34851_vm14, %v16578_v37  ;;  %vm34852_vm13 = vmmov %vm34851_vm14 }
 0xb39   : > { %25149 = vmatpush3.msk.msra.mxu0 %vm34852_vm13, %v16578_v37 }
 0xb3a   : > { %25725 = vmatprep.subr.bf16.mxu0 %v25724_v13 }
 0xb3b   : > { %25142 = vmatmul.mubr.msk.f32.gmra.mrb[94].mxu1 %vm34850_vm6, %v15864_v62  ;;  %vm34853_vm6 = vcmask 162816  }
 0xb3c   : > { %25150 = vmatprep.mubr.msk.f32.mxu0 %vm34853_vm6, %v16544_v53  ;;  %vm34854_vm3 = vmmov %vm34853_vm6 }
 0xb3d   : > { %25151 = vmatmul.mubr.msk.f32.vlgmr.msra.gmra.mrb[64].mxu0 %vm34854_vm3, %v16545_v12 }
 0xb3e   : > { %25727 = vmatpush3.bf16.msra.mxu0 %v25724_v13 }
 0xbd2   : > { %v25098_v23 = vpop.f32.mrb[64].mxu1 }
 0xbd3   : > { %vm16221_vm7 = vcmp.ge.f32.partialorder %v25098_v23, 0.0  ;;  %v16253_v63 = vmul.f32 0.2, %v25098_v23  ;;  %v16029_v27 = vpop.f32.mrb[65].mxu1 }
 0xbd4   : > { %vm16220_vm14 = vcmp.ge.f32.partialorder %v16029_v27, 0.0  ;;  %v16252_v2 = vmul.f32 0.2, %v16029_v27 }
 0xbd5   : > { %v16285_v20 = vsel %vm16221_vm7, %v25098_v23, %v16253_v63 }
 0xbd6   : > { %16350 = vrot.lane.b32.xlu1 %v16285_v20, %s27066_s28  ;;  %v25101_v57 = vpop.f32.mrb[66].mxu1  ;;  %v16284_v41 = vsel %vm16220_vm14, %v16029_v27, %v16252_v2 }
 0xbd7   : > { %vm16223_vm13 = vcmp.ge.f32.partialorder %v25101_v57, 0.0  ;;  %v16255_v42 = vmul.f32 0.2, %v25101_v57  ;;  %16348 = vrot.lane.b32.xlu0 %v16284_v41, %s27066_s28  ;;  %v16039_v51 = vpop.f32.mrb[67].mxu1 }
 0xbd8   : > { %vm16222_vm6 = vcmp.ge.f32.partialorder %v16039_v51, 0.0  ;;  %v16254_v9 = vmul.f32 0.2, %v16039_v51 }
 0xbd9   : > { %v16287_v32 = vsel %vm16223_vm13, %v25101_v57, %v16255_v42 }
 0xbda   : > { %16354 = vrot.lane.b32.xlu1 %v16287_v32, %s27066_s28  ;;  %v25104_v14 = vpop.f32.mrb[68].mxu1  ;;  %v16286_v59 = vsel %vm16222_vm6, %v16039_v51, %v16254_v9 }
 0xbdb   : > { %vm16225_vm3 = vcmp.ge.f32.partialorder %v25104_v14, 0.0  ;;  %v16257_v54 = vmul.f32 0.2, %v25104_v14  ;;  %16352 = vrot.lane.b32.xlu0 %v16286_v59, %s27066_s28  ;;  %v16049_v48 = vpop.f32.mrb[69].mxu1 }
 0xbdc   : > { %vm16224_vm7 = vcmp.ge.f32.partialorder %v16049_v48, 0.0  ;;  %v16256_v36 = vmul.f32 0.2, %v16049_v48 }
 0xbdd   : > { %v16289_v25 = vsel %vm16225_vm3, %v25104_v14, %v16257_v54  ;;  %v16543_v14 = vld [vmem:[%s32726_s5 + $0x10] sm:$0xf] }
 0xbde   : > { %16358 = vrot.lane.b32.xlu1 %v16289_v25, %s27066_s28  ;;  %v25107_v35 = vpop.f32.mrb[70].mxu1  ;;  %v16288_v60 = vsel %vm16224_vm7, %v16049_v48, %v16256_v36 }
 0xbdf   : > { %vm16227_vm14 = vcmp.ge.f32.partialorder %v25107_v35, 0.0  ;;  %v16259_v29 = vmul.f32 0.2, %v25107_v35  ;;  %16356 = vrot.lane.b32.xlu0 %v16288_v60, %s27066_s28  ;;  %v16059_v1 = vpop.f32.mrb[71].mxu1 }
 0xbe0   : > { %vm16226_vm13 = vcmp.ge.f32.partialorder %v16059_v1, 0.0  ;;  %v16258_v31 = vmul.f32 0.2, %v16059_v1 }
 0xbe1   : > { %v16291_v62 = vsel %vm16227_vm14, %v25107_v35, %v16259_v29 }
 0xbe2   : > { %16362 = vrot.lane.b32.xlu1 %v16291_v62, %s27066_s28  ;;  %v25110_v19 = vpop.f32.mrb[72].mxu1  ;;  %v16290_v16 = vsel %vm16226_vm13, %v16059_v1, %v16258_v31 }
 0xbe3   : > { %vm16229_vm6 = vcmp.ge.f32.partialorder %v25110_v19, 0.0  ;;  %v16261_v5 = vmul.f32 0.2, %v25110_v19  ;;  %16360 = vrot.lane.b32.xlu0 %v16290_v16, %s27066_s28  ;;  %v16069_v37 = vpop.f32.mrb[73].mxu1 }
 0xbe4   : > { %vm16228_vm3 = vcmp.ge.f32.partialorder %v16069_v37, 0.0  ;;  %v16260_v53 = vmul.f32 0.2, %v16069_v37 }
 0xbe5   : > { %v16293_v18 = vsel %vm16229_vm6, %v25110_v19, %v16261_v5 }
 0xbe6   : > { %16366 = vrot.lane.b32.xlu1 %v16293_v18, %s27066_s28  ;;  %v25113_v21 = vpop.f32.mrb[74].mxu1  ;;  %v16292_v13 = vsel %vm16228_vm3, %v16069_v37, %v16260_v53 }
 0xbe7   : > { %vm16231_vm7 = vcmp.ge.f32.partialorder %v25113_v21, 0.0  ;;  %v16263_v12 = vmul.f32 0.2, %v25113_v21  ;;  %16364 = vrot.lane.b32.xlu0 %v16292_v13, %s27066_s28  ;;  %v16079_v23 = vpop.f32.mrb[75].mxu1 }
 0xbe8   : > { %vm16230_vm14 = vcmp.ge.f32.partialorder %v16079_v23, 0.0  ;;  %v16262_v63 = vmul.f32 0.2, %v16079_v23 }
 0xbe9   : > { %v16295_v27 = vsel %vm16231_vm7, %v25113_v21, %v16263_v12  ;;  %vm34855_vm7 = vcmask 1043456  }
 0xbea   : > { %16370 = vrot.lane.b32.xlu1 %v16295_v27, %s27066_s28  ;;  %v25116_v2 = vpop.f32.mrb[76].mxu1  ;;  %v16294_v20 = vsel %vm16230_vm14, %v16079_v23, %v16262_v63  ;;  %25202 = vmatprep.subr.msk.mxu0 %vm34855_vm7, %v16543_v14  ;;  %vm34856_vm10 = vmmov %vm34855_vm7 }
 0xbeb   : > { %vm16233_vm13 = vcmp.ge.f32.partialorder %v25116_v2, 0.0  ;;  %v16265_v57 = vmul.f32 0.2, %v25116_v2  ;;  %16368 = vrot.lane.b32.xlu0 %v16294_v20, %s27066_s28  ;;  %v16089_v41 = vpop.f32.mrb[77].mxu1  ;;  %25203 = vmatpush3.msk.msra.mxu0 %vm34856_vm10, %v16543_v14 }
 0xbec   : > { %vm16232_vm6 = vcmp.ge.f32.partialorder %v16089_v41, 0.0  ;;  %v16264_v42 = vmul.f32 0.2, %v16089_v41 }
 0xbed   : > { %v16297_v51 = vsel %vm16233_vm13, %v25116_v2, %v16265_v57 }
 0xbee   : > { %16374 = vrot.lane.b32.xlu1 %v16297_v51, %s27066_s28  ;;  %v25119_v9 = vpop.f32.mrb[78].mxu1  ;;  %v16296_v32 = vsel %vm16232_vm6, %v16089_v41, %v16264_v42 }
 0xbef   : > { %vm16235_vm3 = vcmp.ge.f32.partialorder %v25119_v9, 0.0  ;;  %v16267_v59 = vmul.f32 0.2, %v25119_v9  ;;  %16372 = vrot.lane.b32.xlu0 %v16296_v32, %s27066_s28  ;;  %v16099_v54 = vpop.f32.mrb[79].mxu1 }
 0xbf0   : > { %vm16234_vm14 = vcmp.ge.f32.partialorder %v16099_v54, 0.0  ;;  %v16266_v48 = vmul.f32 0.2, %v16099_v54 }
 0xbf1   : > { %v16299_v36 = vsel %vm16235_vm3, %v25119_v9, %v16267_v59 }
 0xbf2   : > { %16378 = vrot.lane.b32.xlu1 %v16299_v36, %s27066_s28  ;;  %v25122_v25 = vpop.f32.mrb[80].mxu1  ;;  %v16298_v35 = vsel %vm16234_vm14, %v16099_v54, %v16266_v48 }
 0xbf3   : > { %vm16237_vm13 = vcmp.ge.f32.partialorder %v25122_v25, 0.0  ;;  %v16269_v60 = vmul.f32 0.2, %v25122_v25  ;;  %16376 = vrot.lane.b32.xlu0 %v16298_v35, %s27066_s28  ;;  %v16109_v29 = vpop.f32.mrb[81].mxu1 }
 0xbf4   : > { %vm16236_vm6 = vcmp.ge.f32.partialorder %v16109_v29, 0.0  ;;  %v16268_v1 = vmul.f32 0.2, %v16109_v29 }
 0xbf5   : > { %v16301_v31 = vsel %vm16237_vm13, %v25122_v25, %v16269_v60 }
 0xbf6   : > { %16382 = vrot.lane.b32.xlu1 %v16301_v31, %s27066_s28  ;;  %v25125_v62 = vpop.f32.mrb[82].mxu1  ;;  %v16300_v19 = vsel %vm16236_vm6, %v16109_v29, %v16268_v1 }
 0xbf7   : > { %vm16239_vm7 = vcmp.ge.f32.partialorder %v25125_v62, 0.0  ;;  %v16271_v16 = vmul.f32 0.2, %v25125_v62  ;;  %16380 = vrot.lane.b32.xlu0 %v16300_v19, %s27066_s28  ;;  %v16119_v5 = vpop.f32.mrb[83].mxu1 }
 0xbf8   : > { %vm16238_vm10 = vcmp.ge.f32.partialorder %v16119_v5, 0.0  ;;  %v16270_v37 = vmul.f32 0.2, %v16119_v5 }
 0xbf9   : > { %v16303_v53 = vsel %vm16239_vm7, %v25125_v62, %v16271_v16 }
 0xbfa   : > { %16386 = vrot.lane.b32.xlu1 %v16303_v53, %s27066_s28  ;;  %v25128_v18 = vpop.f32.mrb[84].mxu1  ;;  %v16302_v21 = vsel %vm16238_vm10, %v16119_v5, %v16270_v37  ;;  %v17291_v5 = vld [vmem:[%s32726_s5 + $0x28] sm:$0xff]  ;;  %v17292_v37 = vld [vmem:[%s32726_s5 + $0x30] sm:$0xff] }
 0xbfb   : > { %vm16241_vm3 = vcmp.ge.f32.partialorder %v25128_v18, 0.0  ;;  %v16273_v13 = vmul.f32 0.2, %v25128_v18  ;;  %16384 = vrot.lane.b32.xlu0 %v16302_v21, %s27066_s28  ;;  %v16129_v12 = vpop.f32.mrb[85].mxu1 }
 0xbfc   : > { %vm16240_vm14 = vcmp.ge.f32.partialorder %v16129_v12, 0.0  ;;  %v16272_v23 = vmul.f32 0.2, %v16129_v12 }
 0xbfd   : > { %v16305_v63 = vsel %vm16241_vm3, %v25128_v18, %v16273_v13  ;;  %v31578_v18 = vpack.c.bf16 %v17292_v37, %v17291_v5 }
 0xbfe   : > { %16390 = vrot.lane.b32.xlu1 %v16305_v63, %s27066_s28  ;;  %v25131_v27 = vpop.f32.mrb[86].mxu1  ;;  %v16304_v2 = vsel %vm16240_vm14, %v16129_v12, %v16272_v23 }
 0xbff   : > { %vm16243_vm13 = vcmp.ge.f32.partialorder %v25131_v27, 0.0  ;;  %v16275_v20 = vmul.f32 0.2, %v25131_v27  ;;  %16388 = vrot.lane.b32.xlu0 %v16304_v2, %s27066_s28  ;;  %v16139_v57 = vpop.f32.mrb[87].mxu1  ;;  %25729 = vmatprep.subr.bf16.mxu0 %v31578_v18 }
 0xc00   : > { %vm16242_vm6 = vcmp.ge.f32.partialorder %v16139_v57, 0.0  ;;  %v16274_v41 = vmul.f32 0.2, %v16139_v57 }
 0xc01   : > { %v16307_v42 = vsel %vm16243_vm13, %v25131_v27, %v16275_v20 }
 0xc02   : > { %16394 = vrot.lane.b32.xlu1 %v16307_v42, %s27066_s28  ;;  %v25134_v51 = vpop.f32.mrb[88].mxu1  ;;  %v16306_v9 = vsel %vm16242_vm6, %v16139_v57, %v16274_v41 }
 0xc03   : > { %vm16245_vm7 = vcmp.ge.f32.partialorder %v25134_v51, 0.0  ;;  %v16277_v32 = vmul.f32 0.2, %v25134_v51  ;;  %16392 = vrot.lane.b32.xlu0 %v16306_v9, %s27066_s28  ;;  %v16149_v14 = vpop.f32.mrb[89].mxu1 }
 0xc04   : > { %vm16244_vm10 = vcmp.ge.f32.partialorder %v16149_v14, 0.0  ;;  %v16276_v59 = vmul.f32 0.2, %v16149_v14 }
 0xc05   : > { %v16309_v54 = vsel %vm16245_vm7, %v25134_v51, %v16277_v32 }
 0xc06   : > { %16398 = vrot.lane.b32.xlu1 %v16309_v54, %s27066_s28  ;;  %v25137_v48 = vpop.f32.mrb[90].mxu1  ;;  %v16308_v36 = vsel %vm16244_vm10, %v16149_v14, %v16276_v59 }
 0xc07   : > { %vm16247_vm3 = vcmp.ge.f32.partialorder %v25137_v48, 0.0  ;;  %v16279_v25 = vmul.f32 0.2, %v25137_v48  ;;  %16396 = vrot.lane.b32.xlu0 %v16308_v36, %s27066_s28  ;;  %v16159_v35 = vpop.f32.mrb[91].mxu1 }
 0xc08   : > { %vm16246_vm14 = vcmp.ge.f32.partialorder %v16159_v35, 0.0  ;;  %v16278_v60 = vmul.f32 0.2, %v16159_v35 }
 0xc09   : > { %v16311_v29 = vsel %vm16247_vm3, %v25137_v48, %v16279_v25  ;;  %vm16444_vm3 = vcmask 162944  }
 0xc0a   : > { %16402 = vrot.lane.b32.xlu1 %v16311_v29, %s27066_s28  ;;  %v25140_v1 = vpop.f32.mrb[92].mxu1  ;;  %v16310_v31 = vsel %vm16246_vm14, %v16159_v35, %v16278_v60  ;;  %vm34858_vm14 = vcmask 162816  }
 0xc0b   : > { %vm16249_vm13 = vcmp.ge.f32.partialorder %v25140_v1, 0.0  ;;  %v16281_v62 = vmul.f32 0.2, %v25140_v1  ;;  %16400 = vrot.lane.b32.xlu0 %v16310_v31, %s27066_s28  ;;  %v16169_v19 = vpop.f32.mrb[93].mxu1 }
 0xc0c   : > { %vm16248_vm6 = vcmp.ge.f32.partialorder %v16169_v19, 0.0  ;;  %v16280_v16 = vmul.f32 0.2, %v16169_v19 }
 0xc0d   : > { %v16313_v53 = vsel %vm16249_vm13, %v25140_v1, %v16281_v62  ;;  %vm34860_vm13 = vmmov %vm34858_vm14 }
 0xc0e   : > { %16406 = vrot.lane.b32.xlu1 %v16313_v53, %s27066_s28  ;;  %v25143_v21 = vpop.f32.mrb[94].mxu1  ;;  %v16312_v13 = vsel %vm16248_vm6, %v16169_v19, %v16280_v16  ;;  %vm34862_vm6 = vmmov %vm34860_vm13 }
 0xc0f   : > { %vm16251_vm7 = vcmp.ge.f32.partialorder %v25143_v21, 0.0  ;;  %v16283_v12 = vmul.f32 0.2, %v25143_v21  ;;  %16404 = vrot.lane.b32.xlu0 %v16312_v13, %s27066_s28  ;;  %v16179_v23 = vpop.f32.mrb[95].mxu1 }
 0xc10   : > { %vm16250_vm10 = vcmp.ge.f32.partialorder %v16179_v23, 0.0  ;;  %v16282_v63 = vmul.f32 0.2, %v16179_v23 }
 0xc11   : > { %v16315_v27 = vsel %vm16251_vm7, %v25143_v21, %v16283_v12  ;;  %vm34864_vm7 = vmmov %vm34862_vm6 }
 0xc12   : > { %v16314_v2 = vsel %vm16250_vm10, %v16179_v23, %v16282_v63  ;;  %16410 = vrot.lane.b32.xlu1 %v16315_v27, %s27066_s28  ;;  %vm34866_vm10 = vmmov %vm34862_vm6 }
 0xc13   : > { %16408 = vrot.lane.b32.xlu0 %v16314_v2, %s27066_s28 }
 0xc48   : > { %v16351_v20 = vpop.permute.xlu1 %16350 }
 0xc49   : > { %v16349_v57 = vpop.permute.xlu0 %16348  ;;  %16446 = vst.msk [vmem:[#allocation2 + $0x19] sm:$0xff] %vm16444_vm3, %v16351_v20 }
 0xc4a   : > { %16445 = vst.msk [vmem:[#allocation2 + $0x11] sm:$0xff] %vm16444_vm3, %v16349_v57 }
 0xc4c   : > { %v16355_v41 = vpop.permute.xlu1 %16354 }
 0xc4d   : > { %v16353_v42 = vpop.permute.xlu0 %16352  ;;  %16448 = vst.msk [vmem:[#allocation2 + $0x29] sm:$0xff] %vm16444_vm3, %v16355_v41 }
 0xc4e   : > { %16447 = vst.msk [vmem:[#allocation2 + $0x21] sm:$0xff] %vm16444_vm3, %v16353_v42 }
 0xc50   : > { %v16359_v51 = vpop.permute.xlu1 %16358  ;;  %v31595_v14 = vld [vmem:[#allocation2 + $0x19] sm:$0xff] }
 0xc51   : > { %v16357_v9 = vpop.permute.xlu0 %16356  ;;  %v31589_v32 = vld [vmem:[#allocation2 + $0x11] sm:$0xff]  ;;  %16450 = vst.msk [vmem:[#allocation2 + $0x39] sm:$0xff] %vm16444_vm3, %v16359_v51  ;;  %34859 = vst [vmem:[#allocation34_spill] sm:$0xff] %v31595_v14 }
 0xc52   : > { %34857 = vst [vmem:[#allocation32_spill] sm:$0xff] %v31589_v32  ;;  %25153 = vmatprep.mubr.msk.f32.mxu0 %vm34858_vm14, %v31589_v32  ;;  %16449 = vst.msk [vmem:[#allocation2 + $0x31] sm:$0xff] %vm16444_vm3, %v16357_v9 }
 0xc53   : > { %25154 = vmatmul.mubr.msk.f32.gmra.mrb[66].mxu0 %vm34860_vm13, %v31595_v14  ;;  %vm34868_vm14 = vmmov %vm34862_vm6 }
 0xc54   : > { %v16363_v59 = vpop.permute.xlu1 %16362  ;;  %v31605_v36 = vld [vmem:[#allocation2 + $0x29] sm:$0xff]  ;;  %vm34870_vm13 = vmmov %vm34862_vm6 }
 0xc55   : > { %16452 = vst.msk [vmem:[#allocation2 + $0x49] sm:$0xff] %vm16444_vm3, %v16363_v59  ;;  %v16361_v54 = vpop.permute.xlu0 %16360  ;;  %v31600_v48 = vld [vmem:[#allocation2 + $0x21] sm:$0xff]  ;;  %34863 = vst [vmem:[#allocation39_spill] sm:$0xff] %v31605_v36 }
 0xc56   : > { %34861 = vst [vmem:[#allocation37_spill] sm:$0xff] %v31600_v48  ;;  %16451 = vst.msk [vmem:[#allocation2 + $0x41] sm:$0xff] %vm16444_vm3, %v16361_v54  ;;  %25156 = vmatprep.mubr.msk.f32.mxu0 %vm34862_vm6, %v31600_v48 }
 0xc57   : > { %25157 = vmatmul.mubr.msk.f32.gmra.mrb[68].mxu0 %vm34864_vm7, %v31605_v36  ;;  %vm34873_vm7 = vmmov %vm34862_vm6 }
 0xc58   : > { %v16367_v25 = vpop.permute.xlu1 %16366  ;;  %v31615_v29 = vld [vmem:[#allocation2 + $0x39] sm:$0xff] }
 0xc59   : > { %16454 = vst.msk [vmem:[#allocation2 + $0x59] sm:$0xff] %vm16444_vm3, %v16367_v25  ;;  %v16365_v35 = vpop.permute.xlu0 %16364  ;;  %v31610_v60 = vld [vmem:[#allocation2 + $0x31] sm:$0xff]  ;;  %34867 = vst [vmem:[#allocation44_spill] sm:$0xff] %v31615_v29 }
 0xc5a   : > { %34865 = vst [vmem:[#allocation42_spill] sm:$0xff] %v31610_v60  ;;  %16453 = vst.msk [vmem:[#allocation2 + $0x51] sm:$0xff] %vm16444_vm3, %v16365_v35  ;;  %25159 = vmatprep.mubr.msk.f32.mxu0 %vm34866_vm10, %v31610_v60 }
 0xc5b   : > { %25160 = vmatmul.mubr.msk.f32.gmra.mrb[70].mxu0 %vm34868_vm14, %v31615_v29  ;;  %vm34875_vm10 = vmmov %vm34862_vm6 }
 0xc5c   : > { %v16371_v1 = vpop.permute.xlu1 %16370  ;;  %v31625_v19 = vld [vmem:[#allocation2 + $0x49] sm:$0xff]  ;;  %vm34877_vm14 = vmmov %vm34862_vm6 }
 0xc5d   : > { %16456 = vst.msk [vmem:[#allocation2 + $0x69] sm:$0xff] %vm16444_vm3, %v16371_v1  ;;  %v16369_v31 = vpop.permute.xlu0 %16368  ;;  %v31620_v62 = vld [vmem:[#allocation2 + $0x41] sm:$0xff]  ;;  %34871 = vst [vmem:[#allocation49_spill] sm:$0xff] %v31625_v19 }
 0xc5e   : > { %34869 = vst [vmem:[#allocation47_spill] sm:$0xff] %v31620_v62  ;;  %16455 = vst.msk [vmem:[#allocation2 + $0x61] sm:$0xff] %vm16444_vm3, %v16369_v31  ;;  %25162 = vmatprep.mubr.msk.f32.mxu0 %vm34870_vm13, %v31620_v62 }
 0xc5f   : > { %25163 = vmatmul.mubr.msk.f32.gmra.mrb[72].mxu0 %vm34862_vm6, %v31625_v19  ;;  %vm34879_vm13 = vmmov %vm34862_vm6 }
 0xc60   : > { %v16375_v16 = vpop.permute.xlu1 %16374  ;;  %v31635_v53 = vld [vmem:[#allocation2 + $0x59] sm:$0xff] }
 0xc61   : > { %16458 = vst.msk [vmem:[#allocation2 + $0x79] sm:$0xff] %vm16444_vm3, %v16375_v16  ;;  %v16373_v5 = vpop.permute.xlu0 %16372  ;;  %v31630_v37 = vld [vmem:[#allocation2 + $0x51] sm:$0xff]  ;;  %34874 = vst [vmem:[#allocation53_spill] sm:$0xff] %v31635_v53 }
 0xc62   : > { %34872 = vst [vmem:[#allocation51_spill] sm:$0xff] %v31630_v37  ;;  %16457 = vst.msk [vmem:[#allocation2 + $0x71] sm:$0xff] %vm16444_vm3, %v16373_v5  ;;  %25165 = vmatprep.mubr.msk.f32.mxu0 %vm34873_vm7, %v31630_v37 }
 0xc63   : > { %25166 = vmatmul.mubr.msk.f32.gmra.mrb[74].mxu0 %vm34875_vm10, %v31635_v53  ;;  %vm34882_vm7 = vmmov %vm34862_vm6 }
 0xc64   : > { %v16379_v21 = vpop.permute.xlu1 %16378  ;;  %v31645_v23 = vld [vmem:[#allocation2 + $0x69] sm:$0xff]  ;;  %vm34884_vm10 = vmmov %vm34862_vm6 }
 0xc65   : > { %16460 = vst.msk [vmem:[#allocation2 + $0x89] sm:$0xff] %vm16444_vm3, %v16379_v21  ;;  %v16377_v13 = vpop.permute.xlu0 %16376  ;;  %v31640_v12 = vld [vmem:[#allocation2 + $0x61] sm:$0xff]  ;;  %34878 = vst [vmem:[#allocation25_spill] sm:$0xff] %v31645_v23 }
 0xc66   : > { %34876 = vst [vmem:[#allocation56_spill] sm:$0xff] %v31640_v12  ;;  %16459 = vst.msk [vmem:[#allocation2 + $0x81] sm:$0xff] %vm16444_vm3, %v16377_v13  ;;  %25168 = vmatprep.mubr.msk.f32.mxu0 %vm34877_vm14, %v31640_v12 }
 0xc67   : > { %25169 = vmatmul.mubr.msk.f32.gmra.mrb[76].mxu0 %vm34879_vm13, %v31645_v23  ;;  %vm34886_vm14 = vmmov %vm34862_vm6 }
 0xc68   : > { %v16383_v63 = vpop.permute.xlu1 %16382  ;;  %v31655_v20 = vld [vmem:[#allocation2 + $0x79] sm:$0xff]  ;;  %vm34888_vm13 = vmmov %vm34862_vm6 }
 0xc69   : > { %16462 = vst.msk [vmem:[#allocation2 + $0x99] sm:$0xff] %vm16444_vm3, %v16383_v63  ;;  %v16381_v27 = vpop.permute.xlu0 %16380  ;;  %v31650_v2 = vld [vmem:[#allocation2 + $0x71] sm:$0xff]  ;;  %34881 = vst [vmem:[#allocation31_spill] sm:$0xff] %v31655_v20 }
 0xc6a   : > { %34880 = vst [vmem:[#allocation30_spill] sm:$0xff] %v31650_v2  ;;  %16461 = vst.msk [vmem:[#allocation2 + $0x91] sm:$0xff] %vm16444_vm3, %v16381_v27  ;;  %25171 = vmatprep.mubr.msk.f32.mxu0 %vm34862_vm6, %v31650_v2 }
 0xc6b   : > { %25172 = vmatmul.mubr.msk.f32.gmra.mrb[78].mxu0 %vm34882_vm7, %v31655_v20  ;;  %vm34891_vm7 = vmmov %vm34862_vm6 }
 0xc6c   : > { %v16387_v57 = vpop.permute.xlu1 %16386  ;;  %v31665_v51 = vld [vmem:[#allocation2 + $0x89] sm:$0xff] }
 0xc6d   : > { %16464 = vst.msk [vmem:[#allocation2 + $0xa9] sm:$0xff] %vm16444_vm3, %v16387_v57  ;;  %v16385_v41 = vpop.permute.xlu0 %16384  ;;  %v31660_v42 = vld [vmem:[#allocation2 + $0x81] sm:$0xff]  ;;  %34885 = vst [vmem:[#allocation35_spill] sm:$0xff] %v31665_v51 }
 0xc6e   : > { %34883 = vst [vmem:[#allocation4_spill] sm:$0xff] %v31660_v42  ;;  %16463 = vst.msk [vmem:[#allocation2 + $0xa1] sm:$0xff] %vm16444_vm3, %v16385_v41  ;;  %25174 = vmatprep.mubr.msk.f32.mxu0 %vm34884_vm10, %v31660_v42  ;;  %v31824_v42 = vld [vmem:[#allocation2 + $0x78] sm:$0xff]  ;;  %v31834_v2 = vld [vmem:[#allocation2 + $0x88] sm:$0xff] }
 0xc6f   : > { %25175 = vmatmul.mubr.msk.f32.gmra.mrb[80].mxu0 %vm34886_vm14, %v31665_v51  ;;  %vm34893_vm10 = vmmov %vm34862_vm6  ;;  %v31822_v51 = vld [vmem:[#allocation2 + $0x80] sm:$0xff] }
 0xc70   : > { %v16391_v9 = vpop.permute.xlu1 %16390  ;;  %v31675_v25 = vld [vmem:[#allocation2 + $0x99] sm:$0xff]  ;;  %vm34895_vm14 = vmmov %vm34862_vm6 }
 0xc71   : > { %16466 = vst.msk [vmem:[#allocation2 + $0xb9] sm:$0xff] %vm16444_vm3, %v16391_v9  ;;  %v16389_v59 = vpop.permute.xlu0 %16388  ;;  %v31670_v54 = vld [vmem:[#allocation2 + $0x91] sm:$0xff]  ;;  %34889 = vst [vmem:[#allocation6_spill] sm:$0xff] %v31675_v25 }
 0xc72   : > { %34887 = vst [vmem:[#allocation36_spill] sm:$0xff] %v31670_v54  ;;  %16465 = vst.msk [vmem:[#allocation2 + $0xb1] sm:$0xff] %vm16444_vm3, %v16389_v59  ;;  %25177 = vmatprep.mubr.msk.f32.mxu0 %vm34888_vm13, %v31670_v54  ;;  %v31814_v54 = vld [vmem:[#allocation2 + $0x68] sm:$0xff]  ;;  %v31832_v20 = vld [vmem:[#allocation2 + $0x90] sm:$0xff] }
 0xc73   : > { %25178 = vmatmul.mubr.msk.f32.gmra.mrb[82].mxu0 %vm34862_vm6, %v31675_v25  ;;  %vm34897_vm13 = vmmov %vm34862_vm6  ;;  %v31812_v25 = vld [vmem:[#allocation2 + $0x70] sm:$0xff]  ;;  %v31844_v12 = vld [vmem:[#allocation2 + $0x98] sm:$0xff] }
 0xc74   : > { %v16395_v35 = vpop.permute.xlu1 %16394  ;;  %v31685_v16 = vld [vmem:[#allocation2 + $0xa9] sm:$0xff] }
 0xc75   : > { %16468 = vst.msk [vmem:[#allocation2 + $0xc9] sm:$0xff] %vm16444_vm3, %v16395_v35  ;;  %v16393_v1 = vpop.permute.xlu0 %16392  ;;  %v31680_v31 = vld [vmem:[#allocation2 + $0xa1] sm:$0xff]  ;;  %34892 = vst [vmem:[#allocation40_spill] sm:$0xff] %v31685_v16 }
 0xc76   : > { %34890 = vst [vmem:[#allocation7_spill] sm:$0xff] %v31680_v31  ;;  %16467 = vst.msk [vmem:[#allocation2 + $0xc1] sm:$0xff] %vm16444_vm3, %v16393_v1  ;;  %25180 = vmatprep.mubr.msk.f32.mxu0 %vm34891_vm7, %v31680_v31  ;;  %v31804_v31 = vld [vmem:[#allocation2 + $0x58] sm:$0xff]  ;;  %v31842_v23 = vld [vmem:[#allocation2 + $0xa0] sm:$0xff] }
 0xc77   : > { %25181 = vmatmul.mubr.msk.f32.gmra.mrb[84].mxu0 %vm34893_vm10, %v31685_v16  ;;  %vm34900_vm7 = vmmov %vm34862_vm6  ;;  %v31802_v16 = vld [vmem:[#allocation2 + $0x60] sm:$0xff]  ;;  %v31854_v37 = vld [vmem:[#allocation2 + $0xa8] sm:$0xff] }
 0xc78   : > { %v16399_v5 = vpop.permute.xlu1 %16398  ;;  %v31695_v63 = vld [vmem:[#allocation2 + $0xb9] sm:$0xff]  ;;  %vm34902_vm10 = vmmov %vm34862_vm6 }
 0xc79   : > { %16470 = vst.msk [vmem:[#allocation2 + $0xd9] sm:$0xff] %vm16444_vm3, %v16399_v5  ;;  %v16397_v21 = vpop.permute.xlu0 %16396  ;;  %v31690_v13 = vld [vmem:[#allocation2 + $0xb1] sm:$0xff]  ;;  %34896 = vst [vmem:[#allocation9_spill] sm:$0xff] %v31695_v63 }
 0xc7a   : > { %34894 = vst [vmem:[#allocation41_spill] sm:$0xff] %v31690_v13  ;;  %16469 = vst.msk [vmem:[#allocation2 + $0xd1] sm:$0xff] %vm16444_vm3, %v16397_v21  ;;  %25183 = vmatprep.mubr.msk.f32.mxu0 %vm34895_vm14, %v31690_v13  ;;  %v31794_v13 = vld [vmem:[#allocation2 + $0x48] sm:$0xff]  ;;  %v31852_v53 = vld [vmem:[#allocation2 + $0xb0] sm:$0xff] }
 0xc7b   : > { %25184 = vmatmul.mubr.msk.f32.gmra.mrb[86].mxu0 %vm34897_vm13, %v31695_v63  ;;  %vm34904_vm14 = vmmov %vm34862_vm6  ;;  %v31792_v63 = vld [vmem:[#allocation2 + $0x50] sm:$0xff]  ;;  %v31864_v62 = vld [vmem:[#allocation2 + $0xb8] sm:$0xff] }
 0xc7c   : > { %v16403_v27 = vpop.permute.xlu1 %16402  ;;  %v31705_v9 = vld [vmem:[#allocation2 + $0xc9] sm:$0xff]  ;;  %vm34906_vm13 = vmmov %vm34862_vm6 }
 0xc7d   : > { %16472 = vst.msk [vmem:[#allocation2 + $0xe9] sm:$0xff] %vm16444_vm3, %v16403_v27  ;;  %v16401_v57 = vpop.permute.xlu0 %16400  ;;  %v31700_v41 = vld [vmem:[#allocation2 + $0xc1] sm:$0xff]  ;;  %34899 = vst [vmem:[#allocation45_spill] sm:$0xff] %v31705_v9 }
 0xc7e   : > { %34898 = vst [vmem:[#allocation10_spill] sm:$0xff] %v31700_v41  ;;  %16471 = vst.msk [vmem:[#allocation2 + $0xe1] sm:$0xff] %vm16444_vm3, %v16401_v57  ;;  %25186 = vmatprep.mubr.msk.f32.mxu0 %vm34862_vm6, %v31700_v41  ;;  %v31762_v41 = vld [vmem:[#allocation2 + $0x18] sm:$0xff]  ;;  %v31862_v19 = vld [vmem:[#allocation2 + $0xc0] sm:$0xff] }
 0xc7f   : > { %25187 = vmatmul.mubr.msk.f32.gmra.mrb[88].mxu0 %vm34900_vm7, %v31705_v9  ;;  %vm34909_vm7 = vnez %v33743_v7  ;;  %v31874_v60 = vld [vmem:[#allocation2 + $0xc8] sm:$0xff] }
 0xc80   : > { %v16407_v59 = vpop.permute.xlu1 %16406  ;;  %v31715_v5 = vld [vmem:[#allocation2 + $0xd9] sm:$0xff]  ;;  %v32035_v11 = vld [vmem:[#allocation2 + $0xc2] sm:$0xff] }
 0xc81   : > { %16474 = vst.msk [vmem:[#allocation2 + $0xf9] sm:$0xff] %vm16444_vm3, %v16407_v59  ;;  %v16405_v35 = vpop.permute.xlu0 %16404  ;;  %v31710_v1 = vld [vmem:[#allocation2 + $0xd1] sm:$0xff]  ;;  %34903 = vst [vmem:[#allocation12_spill] sm:$0xff] %v31715_v5 }
 0xc82   : > { %34901 = vst [vmem:[#allocation46_spill] sm:$0xff] %v31710_v1  ;;  %16473 = vst.msk [vmem:[#allocation2 + $0xf1] sm:$0xff] %vm16444_vm3, %v16405_v35  ;;  %25189 = vmatprep.mubr.msk.f32.mxu0 %vm34902_vm10, %v31710_v1  ;;  %v16477_v35 = vld [vmem:[#allocation2] sm:$0xff]  ;;  %v31872_v29 = vld [vmem:[#allocation2 + $0xd0] sm:$0xff] }
 0xc83   : > { %25190 = vmatmul.mubr.msk.f32.gmra.mrb[90].mxu0 %vm34904_vm14, %v31715_v5  ;;  %v16509_v5 = vsel %vm34909_vm7, %v16477_v35, 0.0  ;;  %vm34910_vm10 = vmmov %vm34862_vm6  ;;  %v17714_v35 = vld [vmem:[%s32726_s5 + $0x3c] sm:$0xff]  ;;  %35000 = vst [vmem:[#allocation21_spill] sm:$0xff] %v32035_v11 }
 0xc84   : > { %v16411_v21 = vpop.permute.xlu1 %16410  ;;  %v31725_v59 = vld [vmem:[#allocation2 + $0xe9] sm:$0xff]  ;;  %v31884_v48 = vld [vmem:[#allocation2 + $0xd8] sm:$0xff] }
 0xc85   : > { %16476 = vst.msk [vmem:[#allocation2 + $0x109] sm:$0xff] %vm16444_vm3, %v16411_v21  ;;  %v16409_v27 = vpop.permute.xlu0 %16408  ;;  %v31720_v57 = vld [vmem:[#allocation2 + $0xe1] sm:$0xff]  ;;  %34907 = vst [vmem:[#allocation50_spill] sm:$0xff] %v31725_v59 }
 0xc86   : > { %34905 = vst [vmem:[#allocation13_spill] sm:$0xff] %v31720_v57  ;;  %16475 = vst.msk [vmem:[#allocation2 + $0x101] sm:$0xff] %vm16444_vm3, %v16409_v27  ;;  %25192 = vmatprep.mubr.msk.f32.mxu0 %vm34906_vm13, %v31720_v57  ;;  %v16478_v27 = vld [vmem:[#allocation2 + $0x8] sm:$0xff]  ;;  %v31740_v57 = vld [vmem:[#allocation2 + $0x10] sm:$0xff] }
 0xc87   : > { %25193 = vmatmul.mubr.msk.f32.gmra.mrb[92].mxu0 %vm34862_vm6, %v31725_v59  ;;  %vm34912_vm3 = vmmov %vm34862_vm6  ;;  %v17293_v59 = vld [vmem:[%s32726_s5 + $0x38] sm:$0xf]  ;;  %v31882_v36 = vld [vmem:[#allocation2 + $0xe0] sm:$0xff]  ;;  %34948 = vst [vmem:[#allocation70_spill] sm:$0xff] %v31884_v48  ;;  %v17682_v39 = vsel %vm34909_vm7, %v31740_v57, 0.0 }
 0xc88   : > { %v31735_v21 = vld [vmem:[#allocation2 + $0xf9] sm:$0xff]  ;;  %vm34913_vm14 = vmmov %vm34912_vm3  ;;  %v31894_v32 = vld [vmem:[#allocation2 + $0xe8] sm:$0xff] }
 0xc89   : > { %v31729_v1 = vld [vmem:[#allocation2 + $0xf1] sm:$0xff]  ;;  %34911 = vst [vmem:[#allocation16_spill] sm:$0xff] %v31735_v21  ;;  %vm34914_vm13 = vmmov %vm34912_vm3 }
 0xc8a   : > { %34908 = vst [vmem:[#allocation18_spill] sm:$0xff] %v31729_v1  ;;  %25195 = vmatprep.mubr.msk.f32.mxu0 %vm34910_vm10, %v31729_v1  ;;  %v17715_v1 = vld [vmem:[%s32726_s5 + $0x44] sm:$0xff]  ;;  %vm34915_vm6 = vmmov %vm34912_vm3  ;;  %vm34916_vm10 = vcmask 1043456   ;;  %v31892_v14 = vld [vmem:[#allocation2 + $0xf0] sm:$0xff] }
 0xc8b   : > { %25196 = vmatmul.mubr.msk.f32.gmra.mrb[94].mxu0 %vm34912_vm3, %v31735_v21  ;;  %v31757_v21 = vld [vmem:[#allocation2 + $0x20] sm:$0xff]  ;;  %v31760_v9 = vpack.c.bf16 %v17715_v1, %v17714_v35  ;;  %34950 = vst [vmem:[#allocation67_spill] sm:$0xff] %v31892_v14  ;;  %34951 = vst [vmem:[#allocation26_spill] sm:$0xff] %v31894_v32 }
 0xc8c   : > { %25204 = vmatprep.mubr.msk.f32.mxu0 %vm34913_vm14, %v16509_v5  ;;  %v16511_v5 = vsel %vm34712_vm9, %v31740_v57, 0.0  ;;  %vm34917_vm14 = vnez %v33748_v61  ;;  %v31782_v35 = vld [vmem:[#allocation2 + $0x40] sm:$0xff] }
 0xc8f   : > { %25205 = vmatmul.mubr.msk.f32.vlgmr.msra.gmra.mrb[64].mxu0 %vm34914_vm13, %v16478_v27  ;;  %v16513_v27 = vsel %vm34917_vm14, %v31757_v21, 0.0  ;;  %vm34918_vm13 = vmmov %vm34912_vm3 }
 0xc90   : > { %25731 = vmatpush3.bf16.msra.mxu0 %v31578_v18  ;;  %25207 = vmatprep.mubr.msk.f32.mxu0 %vm34915_vm6, %v16511_v5  ;;  %v31770_v18 = vld [vmem:[#allocation2 + $0x30] sm:$0xff]  ;;  %vm34919_vm6 = vmmov %vm34916_vm10  ;;  %v31774_v5 = vld [vmem:[#allocation2 + $0x28] sm:$0xff] }
 0xc91   : > { %25256 = vmatprep.subr.msk.mxu0 %vm34916_vm10, %v17293_v59  ;;  %vm34920_vm10 = vmmov %vm34912_vm3 }
 0xc92   : > { %vm34922_vm9 = vmmov %vm34920_vm10 }
 0xc93   : > { %25208 = vmatmul.mubr.msk.f32.gmra.mrb[66].mxu0 %vm34912_vm3, %v31762_v41  ;;  %vm34921_vm3 = vnez %v33361_v38  ;;  %vm34925_vm14 = vmmov %vm34922_vm9 }
 0xc94   : > { %25210 = vmatprep.mubr.msk.f32.mxu0 %vm34918_vm13, %v16513_v27  ;;  %25257 = vmatpush3.msk.msra.mxu0 %vm34919_vm6, %v17293_v59  ;;  %v16515_v1 = vsel %vm34921_vm3, %v31770_v18, 0.0  ;;  %v31784_v27 = vld [vmem:[#allocation2 + $0x38] sm:$0xff]  ;;  %vm34923_vm13 = vmmov %vm34922_vm9  ;;  %vm34924_vm6 = vnez %v33370_v50 }
 0xc95   : > { %25733 = vmatprep.subr.bf16.mxu0 %v31760_v9  ;;  %v16517_v59 = vsel %vm34924_vm6, %v31782_v35, 0.0 }
 0xc97   : > { %25211 = vmatmul.mubr.msk.f32.gmra.mrb[68].mxu0 %vm34920_vm10, %v31774_v5  ;;  %vm34926_vm10 = vmmov %vm34922_vm9 }
 0xc98   : > { %25213 = vmatprep.mubr.msk.f32.mxu0 %vm34922_vm9, %v16515_v1  ;;  %vm34927_vm9 = vnez %v33383_v24  ;;  %vm34928_vm3 = vmmov %vm34926_vm10 }
 0xc99   : > { %v16519_v1 = vsel %vm34927_vm9, %v31792_v63, 0.0 }
 0xc9b   : > { %25214 = vmatmul.mubr.msk.f32.gmra.mrb[70].mxu0 %vm34923_vm13, %v31784_v27  ;;  %vm34929_vm13 = vmmov %vm34928_vm3 }
 0xc9c   : > { %25216 = vmatprep.mubr.msk.f32.mxu0 %vm34925_vm14, %v16517_v59  ;;  %v16521_v59 = vsel %vm34724_vm8, %v31802_v16, 0.0  ;;  %vm34930_vm14 = vmmov %vm34928_vm3 }
 0xc9f   : > { %25217 = vmatmul.mubr.msk.f32.gmra.mrb[72].mxu0 %vm34926_vm10, %v31794_v13  ;;  %vm34931_vm10 = vmmov %vm34928_vm3 }
 0xca0   : > { %25219 = vmatprep.mubr.msk.f32.mxu0 %vm34928_vm3, %v16519_v1  ;;  %vm34932_vm3 = vnez %v33406_v4  ;;  %vm34933_vm9 = vmmov %vm34931_vm10 }
 0xca1   : > { %v16523_v1 = vsel %vm34932_vm3, %v31812_v25, 0.0 }
 0xca3   : > { %25220 = vmatmul.mubr.msk.f32.gmra.mrb[74].mxu0 %vm34929_vm13, %v31804_v31  ;;  %vm34934_vm13 = vmmov %vm34933_vm9 }
 0xca4   : > { %25222 = vmatprep.mubr.msk.f32.mxu0 %vm34930_vm14, %v16521_v59  ;;  %v16525_v59 = vsel %vm34729_vm15, %v31822_v51, 0.0  ;;  %vm34935_vm14 = vmmov %vm34933_vm9 }
 0xca7   : > { %25223 = vmatmul.mubr.msk.f32.gmra.mrb[76].mxu0 %vm34931_vm10, %v31814_v54  ;;  %vm34936_vm10 = vmmov %vm34933_vm9 }
 0xca8   : > { %25225 = vmatprep.mubr.msk.f32.mxu0 %vm34933_vm9, %v16523_v1  ;;  %v16527_v1 = vsel %vm34557_vm1, %v31832_v20, 0.0 }
 0xcab   : > { %25226 = vmatmul.mubr.msk.f32.gmra.mrb[78].mxu0 %vm34934_vm13, %v31824_v42  ;;  %vm34937_vm13 = vmmov %vm34933_vm9 }
 0xcac   : > { %25228 = vmatprep.mubr.msk.f32.mxu0 %vm34935_vm14, %v16525_v59  ;;  %v16529_v59 = vsel %vm34734_vm2, %v31842_v23, 0.0  ;;  %vm34938_vm14 = vmmov %vm34933_vm9 }
 0xcaf   : > { %25229 = vmatmul.mubr.msk.f32.gmra.mrb[80].mxu0 %vm34936_vm10, %v31834_v2  ;;  %vm34939_vm10 = vmmov %vm34933_vm9 }
 0xcb0   : > { %25231 = vmatprep.mubr.msk.f32.mxu0 %vm34933_vm9, %v16527_v1  ;;  %vm34940_vm9 = vnez %v34736_v33  ;;  %vm34941_vm1 = vmmov %vm34939_vm10 }
 0xcb1   : > { %v16531_v1 = vsel %vm34940_vm9, %v31852_v53, 0.0  ;;  %vm34944_vm2 = vmmov %vm34941_vm1 }
 0xcb2   : > { %vm34947_vm9 = vmmov %vm34944_vm2 }
 0xcb3   : > { %25232 = vmatmul.mubr.msk.f32.gmra.mrb[82].mxu0 %vm34937_vm13, %v31844_v12  ;;  %vm34942_vm13 = vmmov %vm34941_vm1 }
 0xcb4   : > { %25234 = vmatprep.mubr.msk.f32.mxu0 %vm34938_vm14, %v16529_v59  ;;  %vm34943_vm14 = vnez %v34740_v44  ;;  %v32175_v44 = vld [vmem:[#allocation2 + $0x100] sm:$0xff] }
 0xcb5   : > { %v16533_v59 = vsel %vm34943_vm14, %v31862_v19, 0.0  ;;  %35052 = vst [vmem:[#allocation71_spill] sm:$0xff] %v32175_v44 }
 0xcb7   : > { %25235 = vmatmul.mubr.msk.f32.gmra.mrb[84].mxu0 %vm34939_vm10, %v31854_v37  ;;  %vm34945_vm10 = vmmov %vm34941_vm1 }
 0xcb8   : > { %25237 = vmatprep.mubr.msk.f32.mxu0 %vm34941_vm1, %v16531_v1  ;;  %vm34946_vm1 = vnez %v34745_v56  ;;  %v17227_v56 = vld [vmem:[#allocation2 + $0x2] sm:$0xff] }
 0xcb9   : > { %v16535_v1 = vsel %vm34946_vm1, %v31872_v29, 0.0  ;;  %vm34954_vm1 = vmmov %vm34944_vm2 }
 0xcbb   : > { %25238 = vmatmul.mubr.msk.f32.gmra.mrb[86].mxu0 %vm34942_vm13, %v31864_v62  ;;  %vm34949_vm13 = vmmov %vm34944_vm2 }
 0xcbc   : > { %25240 = vmatprep.mubr.msk.f32.mxu0 %vm34944_vm2, %v16533_v59  ;;  %v16537_v59 = vsel %vm34750_vm4, %v31882_v36, 0.0 }
 0xcbf   : > { %25241 = vmatmul.mubr.msk.f32.gmra.mrb[88].mxu0 %vm34945_vm10, %v31874_v60  ;;  %vm34952_vm10 = vmmov %vm34944_vm2 }
 0xcc0   : > { %25243 = vmatprep.mubr.msk.f32.mxu0 %vm34947_vm9, %v16535_v1  ;;  %vm34953_vm9 = vnez %v34754_v15  ;;  %v18106_v15 = vld [vmem:[%s32726_s5 + $0x58] sm:$0xff] }
 0xcc1   : > { %v16539_v1 = vsel %vm34953_vm9, %v31892_v14, 0.0  ;;  %v31935_v14 = vld [vmem:[#allocation2 + $0x2a] sm:$0xff] }
 0xcc3   : > { %25244 = vmatmul.mubr.msk.f32.gmra.mrb[90].mxu0 %vm34949_vm13, %v31884_v48  ;;  %v31902_v48 = vld [vmem:[#allocation2 + $0xf8] sm:$0xff]  ;;  %vm34956_vm13 = vmmov %vm34954_vm1 }
 0xcc4   : > { %25246 = vmatprep.mubr.msk.f32.mxu0 %vm34944_vm2, %v16537_v59  ;;  %34955 = vst [vmem:[#allocation55_spill] sm:$0xff] %v31902_v48  ;;  %v17228_v59 = vld [vmem:[#allocation2 + $0xa] sm:$0xff]  ;;  %vm34957_vm2 = vmmov %vm34954_vm1 }
 0xcc5   : > { %v17260_v43 = vsel %vm34786_vm11, %v17228_v59, 0.0  ;;  %vm34961_vm11 = vmmov %vm34954_vm1 }
 0xcc7   : > { %25247 = vmatmul.mubr.msk.f32.gmra.mrb[92].mxu0 %vm34952_vm10, %v31894_v32  ;;  %v17716_v32 = vld [vmem:[%s32726_s5 + $0x4c] sm:$0xf]  ;;  %vm34958_vm10 = vmmov %vm34954_vm1 }
 0xcc8   : > { %25249 = vmatprep.mubr.msk.f32.mxu0 %vm34954_vm1, %v16539_v1  ;;  %v18105_v1 = vld [vmem:[%s32726_s5 + $0x50] sm:$0xff] }
 0xcc9   : > { %v31927_v59 = vpack.c.bf16 %v18106_v15, %v18105_v1 }
 0xccb   : > { %25250 = vmatmul.mubr.msk.f32.gmra.mrb[94].mxu0 %vm34956_vm13, %v31902_v48  ;;  %v31919_v48 = vld [vmem:[#allocation2 + $0x12] sm:$0xff]  ;;  %vm34959_vm13 = vcmask 1043456  }
 0xccc   : > { %25258 = vmatprep.mubr.msk.f32.mxu0 %vm34957_vm2, %v17227_v56  ;;  %v31921_v56 = vld [vmem:[#allocation2 + $0x1a] sm:$0xff]  ;;  %vm34960_vm2 = vnez %v34788_v10  ;;  %vm34962_vm9 = vmmov %vm34959_vm13  ;;  %v31957_v10 = vld [vmem:[#allocation2 + $0x4a] sm:$0xff] }
 0xccd   : > { %v17262_v45 = vsel %vm34960_vm2, %v31921_v56, 0.0 }
 0xccf   : > { %25259 = vmatmul.mubr.msk.f32.vlgmr.msra.gmra.mrb[64].mxu0 %vm34954_vm1, %v17260_v43  ;;  %v31933_v43 = vld [vmem:[#allocation2 + $0x22] sm:$0xff] }
 0xcd0   : > { %25735 = vmatpush3.bf16.msra.mxu0 %v31760_v9  ;;  %25261 = vmatprep.mubr.msk.f32.mxu0 %vm34958_vm10, %v31919_v48  ;;  %vm34963_vm10 = vnez %v34793_v46  ;;  %v31945_v9 = vld [vmem:[#allocation2 + $0x32] sm:$0xff] }
 0xcd1   : > { %25310 = vmatprep.subr.msk.mxu0 %vm34959_vm13, %v17716_v32  ;;  %v17264_v15 = vsel %vm34963_vm10, %v31935_v14, 0.0  ;;  %vm34964_vm13 = vmmov %vm34954_vm1  ;;  %34965 = vst [vmem:[#allocation69_spill] sm:$0xff] %v31945_v9  ;;  %v31965_v46 = vld [vmem:[#allocation2 + $0x52] sm:$0xff] }
 0xcd2   : > { %34973 = vst [vmem:[#allocation15_spill] sm:$0xff] %v31965_v46 }
 0xcd3   : > { %25262 = vmatmul.mubr.msk.f32.gmra.mrb[66].mxu0 %vm34961_vm11, %v17262_v45  ;;  %v31947_v45 = vld [vmem:[#allocation2 + $0x3a] sm:$0xff]  ;;  %vm34966_vm11 = vmmov %vm34954_vm1 }
 0xcd4   : > { %25264 = vmatprep.mubr.msk.f32.mxu0 %vm34954_vm1, %v31933_v43  ;;  %25311 = vmatpush3.msk.msra.mxu0 %vm34962_vm9, %v17716_v32  ;;  %vm34967_vm1 = vnez %v34796_v22  ;;  %vm34968_vm9 = vmmov %vm34966_vm11  ;;  %v31955_v32 = vld [vmem:[#allocation2 + $0x42] sm:$0xff] }
 0xcd5   : > { %25737 = vmatprep.subr.bf16.mxu0 %v31927_v59  ;;  %v17266_v1 = vsel %vm34967_vm1, %v31947_v45, 0.0  ;;  %34969 = vst [vmem:[#allocation54_spill] sm:$0xff] %v31955_v32  ;;  %vm34970_vm10 = vmmov %vm34968_vm9  ;;  %v31975_v22 = vld [vmem:[#allocation2 + $0x62] sm:$0xff] }
 0xcd6   : > { %vm34972_vm2 = vmmov %vm34968_vm9  ;;  %34977 = vst [vmem:[#allocation68_spill] sm:$0xff] %v31975_v22 }
 0xcd7   : > { %25265 = vmatmul.mubr.msk.f32.gmra.mrb[68].mxu0 %vm34964_vm13, %v17264_v15  ;;  %vm34971_vm13 = vnez %v34800_v17  ;;  %vm34976_vm1 = vmmov %vm34972_vm2  ;;  %v31985_v17 = vld [vmem:[#allocation2 + $0x72] sm:$0xff] }
 0xcd8   : > { %25267 = vmatprep.mubr.msk.f32.mxu0 %vm34966_vm11, %v31945_v9  ;;  %v17268_v15 = vsel %vm34971_vm13, %v31957_v10, 0.0  ;;  %v31967_v9 = vld [vmem:[#allocation2 + $0x5a] sm:$0xff]  ;;  %vm34974_vm11 = vmmov %vm34972_vm2  ;;  %34981 = vst [vmem:[#allocation19_spill] sm:$0xff] %v31985_v17 }
 0xcd9   : > { %vm34980_vm13 = vmmov %vm34976_vm1 }
 0xcdb   : > { %25268 = vmatmul.mubr.msk.f32.gmra.mrb[70].mxu0 %vm34968_vm9, %v17266_v1  ;;  %vm34975_vm9 = vnez %v34805_v47  ;;  %v31995_v47 = vld [vmem:[#allocation2 + $0x82] sm:$0xff] }
 0xcdc   : > { %25270 = vmatprep.mubr.msk.f32.mxu0 %vm34970_vm10, %v31955_v32  ;;  %v17270_v1 = vsel %vm34975_vm9, %v31967_v9, 0.0  ;;  %v31977_v32 = vld [vmem:[#allocation2 + $0x6a] sm:$0xff]  ;;  %vm34978_vm10 = vmmov %vm34976_vm1  ;;  %34985 = vst [vmem:[#allocation22_spill] sm:$0xff] %v31995_v47 }
 0xcdd   : > { %vm34984_vm9 = vmmov %vm34978_vm10 }
 0xcdf   : > { %25271 = vmatmul.mubr.msk.f32.gmra.mrb[72].mxu0 %vm34972_vm2, %v17268_v15  ;;  %vm34979_vm2 = vnez %v34809_v49  ;;  %v32005_v49 = vld [vmem:[#allocation2 + $0x92] sm:$0xff] }
 0xce0   : > { %25273 = vmatprep.mubr.msk.f32.mxu0 %vm34974_vm11, %v31965_v46  ;;  %v17272_v15 = vsel %vm34979_vm2, %v31977_v32, 0.0  ;;  %v31987_v46 = vld [vmem:[#allocation2 + $0x7a] sm:$0xff]  ;;  %vm34982_vm11 = vmmov %vm34976_vm1  ;;  %34989 = vst [vmem:[#allocation58_spill] sm:$0xff] %v32005_v49 }
 0xce1   : > { %vm34988_vm2 = vmmov %vm34984_vm9 }
 0xce3   : > { %25274 = vmatmul.mubr.msk.f32.gmra.mrb[74].mxu0 %vm34976_vm1, %v17270_v1  ;;  %vm34983_vm1 = vnez %v34814_v28  ;;  %v32015_v28 = vld [vmem:[#allocation2 + $0xa2] sm:$0xff] }
 0xce4   : > { %25276 = vmatprep.mubr.msk.f32.mxu0 %vm34978_vm10, %v31975_v22  ;;  %v17274_v1 = vsel %vm34983_vm1, %v31987_v46, 0.0  ;;  %v31997_v22 = vld [vmem:[#allocation2 + $0x8a] sm:$0xff]  ;;  %vm34986_vm10 = vmmov %vm34984_vm9  ;;  %34992 = vst [vmem:[#allocation59_spill] sm:$0xff] %v32015_v28 }
 0xce7   : > { %25277 = vmatmul.mubr.msk.f32.gmra.mrb[76].mxu0 %vm34980_vm13, %v17272_v15  ;;  %vm34987_vm13 = vnez %v34819_v6  ;;  %v32025_v6 = vld [vmem:[#allocation2 + $0xb2] sm:$0xff] }
 0xce8   : > { %25279 = vmatprep.mubr.msk.f32.mxu0 %vm34982_vm11, %v31985_v17  ;;  %v17276_v15 = vsel %vm34987_vm13, %v31997_v22, 0.0  ;;  %v32007_v17 = vld [vmem:[#allocation2 + $0x9a] sm:$0xff]  ;;  %vm34990_vm11 = vmmov %vm34988_vm2  ;;  %34996 = vst [vmem:[#allocation61_spill] sm:$0xff] %v32025_v6 }
 0xceb   : > { %25280 = vmatmul.mubr.msk.f32.gmra.mrb[78].mxu0 %vm34984_vm9, %v17274_v1  ;;  %v17278_v1 = vsel %vm34825_vm5, %v32007_v17, 0.0  ;;  %vm34991_vm9 = vmmov %vm34988_vm2 }
 0xcec   : > { %25282 = vmatprep.mubr.msk.f32.mxu0 %vm34986_vm10, %v31995_v47  ;;  %v32017_v47 = vld [vmem:[#allocation2 + $0xaa] sm:$0xff]  ;;  %vm34993_vm10 = vmmov %vm34988_vm2 }
 0xced   : > { %vm34995_vm13 = vmmov %vm34991_vm9 }
 0xcee   : > { %vm34999_vm5 = vmmov %vm34993_vm10 }
 0xcef   : > { %25283 = vmatmul.mubr.msk.f32.gmra.mrb[80].mxu0 %vm34988_vm2, %v17276_v15  ;;  %vm34994_vm2 = vnez %v34828_v26  ;;  %v32045_v26 = vld [vmem:[#allocation2 + $0xd2] sm:$0xff] }
 0xcf0   : > { %25285 = vmatprep.mubr.msk.f32.mxu0 %vm34990_vm11, %v32005_v49  ;;  %v17280_v15 = vsel %vm34994_vm2, %v32017_v47, 0.0  ;;  %v32027_v49 = vld [vmem:[#allocation2 + $0xba] sm:$0xff]  ;;  %vm34997_vm11 = vmmov %vm34991_vm9  ;;  %35004 = vst [vmem:[#allocation24_spill] sm:$0xff] %v32045_v26 }
 0xcf1   : > { %vm35003_vm2 = vmmov %vm34999_vm5 }
 0xcf3   : > { %25286 = vmatmul.mubr.msk.f32.gmra.mrb[82].mxu0 %vm34991_vm9, %v17278_v1  ;;  %vm34998_vm9 = vnez %v34832_v55  ;;  %v32055_v55 = vld [vmem:[#allocation2 + $0xe2] sm:$0xff] }
 0xcf4   : > { %25288 = vmatprep.mubr.msk.f32.mxu0 %vm34993_vm10, %v32015_v28  ;;  %v17282_v1 = vsel %vm34998_vm9, %v32027_v49, 0.0  ;;  %v32037_v28 = vld [vmem:[#allocation2 + $0xca] sm:$0xff]  ;;  %vm35001_vm10 = vmmov %vm34999_vm5 }
 0xcf7   : > { %25289 = vmatmul.mubr.msk.f32.gmra.mrb[84].mxu0 %vm34995_vm13, %v17280_v15  ;;  %vm35002_vm13 = vnez %v34836_v0  ;;  %v32065_v0 = vld [vmem:[#allocation2 + $0xf2] sm:$0xff] }
 0xcf8   : > { %25291 = vmatprep.mubr.msk.f32.mxu0 %vm34997_vm11, %v32025_v6  ;;  %v17284_v15 = vsel %vm35002_vm13, %v32037_v28, 0.0  ;;  %v32047_v6 = vld [vmem:[#allocation2 + $0xda] sm:$0xff]  ;;  %vm35005_vm11 = vmmov %vm35003_vm2  ;;  %35008 = vst [vmem:[#allocation29_spill] sm:$0xff] %v32065_v0 }
 0xcfb   : > { %25292 = vmatmul.mubr.msk.f32.gmra.mrb[86].mxu0 %vm34999_vm5, %v17282_v1  ;;  %v17286_v1 = vsel %vm34841_vm0, %v32047_v6, 0.0  ;;  %vm35006_vm5 = vmmov %vm35003_vm2 }
 0xcfc   : > { %25294 = vmatprep.mubr.msk.f32.mxu0 %vm35001_vm10, %v32035_v11  ;;  %v32057_v11 = vld [vmem:[#allocation2 + $0xea] sm:$0xff]  ;;  %vm35007_vm10 = vmmov %vm35003_vm2 }
 0xcfd   : > { %vm35011_vm0 = vmmov %vm35003_vm2 }
 0xcfe   : > { %vm35016_vm7 = vmmov %vm35011_vm0 }
 0xcff   : > { %25295 = vmatmul.mubr.msk.f32.gmra.mrb[88].mxu0 %vm35003_vm2, %v17284_v15  ;;  %v17288_v15 = vsel %vm34845_vm12, %v32057_v11, 0.0  ;;  %vm35018_vm12 = vmmov %vm35011_vm0 }
 0xd00   : > { %25297 = vmatprep.mubr.msk.f32.mxu0 %vm35005_vm11, %v32045_v26  ;;  %v32067_v26 = vld [vmem:[#allocation2 + $0xfa] sm:$0xff]  ;;  %vm35009_vm11 = vmmov %vm35003_vm2 }
 0xd03   : > { %25298 = vmatmul.mubr.msk.f32.gmra.mrb[90].mxu0 %vm35006_vm5, %v17286_v1  ;;  %vm35010_vm5 = vnez %v34848_v3  ;;  %v18529_v3 = vld [vmem:[%s32726_s5 + $0x6c] sm:$0xff] }
 0xd04   : > { %25300 = vmatprep.mubr.msk.f32.mxu0 %vm35007_vm10, %v32055_v55  ;;  %v17290_v1 = vsel %vm35010_vm5, %v32067_v26, 0.0  ;;  %vm35012_vm10 = vmmov %vm35011_vm0  ;;  %vm35017_vm5 = vnez %v33748_v61 }
 0xd07   : > { %25301 = vmatmul.mubr.msk.f32.gmra.mrb[92].mxu0 %vm35003_vm2, %v17288_v15  ;;  %v18107_v15 = vld [vmem:[%s32726_s5 + $0x60] sm:$0xf]  ;;  %vm35013_vm2 = vnez %v33746_v52 }
 0xd08   : > { %25303 = vmatprep.mubr.msk.f32.mxu0 %vm35009_vm11, %v32065_v0  ;;  %v18528_v0 = vld [vmem:[%s32726_s5 + $0x64] sm:$0xff]  ;;  %v17684_v57 = vsel %vm35013_vm2, %v31757_v21, 0.0  ;;  %vm35014_vm11 = vmmov %vm35011_vm0 }
 0xd09   : > { %vm35020_vm2 = vmmov %vm35016_vm7 }
 0xd0b   : > { %25304 = vmatmul.mubr.msk.f32.gmra.mrb[94].mxu0 %vm35011_vm0, %v17290_v1  ;;  %v17686_v1 = vsel %vm35017_vm5, %v31770_v18, 0.0 }
 0xd0c   : > { %25312 = vmatprep.mubr.msk.f32.mxu0 %vm35012_vm10, %v17682_v39  ;;  %vm35015_vm10 = vcmask 1043456   ;;  %v25740_v39 = vpack.c.bf16 %v18529_v3, %v18528_v0  ;;  %v17690_v0 = vsel %vm34924_vm6, %v31792_v63, 0.0 }
 0xd0f   : > { %25313 = vmatmul.mubr.msk.f32.vlgmr.msra.gmra.mrb[64].mxu0 %vm35011_vm0, %v31762_v41  ;;  %vm35019_vm0 = vmmov %vm35015_vm10 }
 0xd10   : > { %25739 = vmatpush3.bf16.msra.mxu0 %v31927_v59  ;;  %25315 = vmatprep.mubr.msk.f32.mxu0 %vm35014_vm11, %v17684_v57  ;;  %vm35021_vm11 = vnez %v33361_v38  ;;  %v17694_v59 = vsel %vm34724_vm8, %v31812_v25, 0.0  ;;  %v17698_v57 = vsel %vm34729_vm15, %v31832_v20, 0.0 }
 0xd11   : > { %25364 = vmatprep.subr.msk.mxu0 %vm35015_vm10, %v18107_v15  ;;  %v17688_v41 = vsel %vm35021_vm11, %v31782_v35, 0.0  ;;  %vm35022_vm10 = vmmov %vm35020_vm2 }
 0xd13   : > { %25316 = vmatmul.mubr.msk.f32.gmra.mrb[66].mxu0 %vm35016_vm7, %v31774_v5  ;;  %vm35023_vm7 = vmmov %vm35020_vm2 }
 0xd14   : > { %25318 = vmatprep.mubr.msk.f32.mxu0 %vm35018_vm12, %v17686_v1  ;;  %25365 = vmatpush3.msk.msra.mxu0 %vm35019_vm0, %v18107_v15  ;;  %vm35024_vm12 = vmmov %vm35020_vm2  ;;  %v17696_v15 = vsel %vm34932_vm3, %v31822_v51, 0.0 }
 0xd15   : > { %25741 = vmatprep.subr.bf16.mxu0 %v25740_v39  ;;  %vm35025_vm0 = vmmov %vm35020_vm2 }
 0xd16   : > { %vm35027_vm5 = vmmov %vm35025_vm0 }
 0xd17   : > { %25319 = vmatmul.mubr.msk.f32.gmra.mrb[68].mxu0 %vm35020_vm2, %v31784_v27  ;;  %vm35026_vm2 = vnez %v33383_v24  ;;  %vm35035_vm8 = vmmov %vm35025_vm0 }
 0xd18   : > { %25321 = vmatprep.mubr.msk.f32.mxu0 %vm35022_vm10, %v17688_v41  ;;  %v17692_v3 = vsel %vm35026_vm2, %v31802_v16, 0.0  ;;  %vm35028_vm10 = vmmov %vm35025_vm0 }
 0xd19   : > { %vm35037_vm3 = vmmov %vm35025_vm0 }
 0xd1a   : > { %vm35040_vm15 = vmmov %vm35025_vm0 }
 0xd1b   : > { %25322 = vmatmul.mubr.msk.f32.gmra.mrb[70].mxu0 %vm35023_vm7, %v31794_v13  ;;  %vm35029_vm7 = vmmov %vm35025_vm0 }
 0xd1c   : > { %25324 = vmatprep.mubr.msk.f32.mxu0 %vm35024_vm12, %v17690_v0  ;;  %vm35030_vm12 = vmmov %vm35025_vm0 }
 0xd1f   : > { %25325 = vmatmul.mubr.msk.f32.gmra.mrb[72].mxu0 %vm35025_vm0, %v31804_v31 }
 0xd20   : > { %25327 = vmatprep.mubr.msk.f32.mxu0 %vm35027_vm5, %v17692_v3  ;;  %vm35031_vm5 = vmmov %vm35025_vm0  ;;  %v17706_v3 = vsel %vm34943_vm14, %v31872_v29, 0.0 }
 0xd23   : > { %25328 = vmatmul.mubr.msk.f32.gmra.mrb[74].mxu0 %vm35028_vm10, %v31814_v54  ;;  %vm35032_vm10 = vmmov %vm35025_vm0 }
 0xd24   : > { %25330 = vmatprep.mubr.msk.f32.mxu0 %vm35029_vm7, %v17694_v59  ;;  %vm35033_vm7 = vmmov %vm35025_vm0  ;;  %v35042_v59 = vld [vmem:[#allocation70_spill] sm:$0xff] }
 0xd27   : > { %25331 = vmatmul.mubr.msk.f32.gmra.mrb[76].mxu0 %vm35030_vm12, %v31824_v42  ;;  %vm35034_vm12 = vnez %v33429_v34  ;;  %v35222_v34 = vld [vmem:[#allocation70_spill] sm:$0xff] }
 0xd28   : > { %25333 = vmatprep.mubr.msk.f32.mxu0 %vm35025_vm0, %v17696_v15  ;;  %v17700_v1 = vsel %vm35034_vm12, %v31842_v23, 0.0  ;;  %v35044_v15 = vld [vmem:[#allocation64_spill] sm:$0xff] }
 0xd2b   : > { %25334 = vmatmul.mubr.msk.f32.gmra.mrb[78].mxu0 %vm35031_vm5, %v31834_v2  ;;  %vm35036_vm5 = vnez %v33434_v30 }
 0xd2c   : > { %25336 = vmatprep.mubr.msk.f32.mxu0 %vm35032_vm10, %v17698_v57  ;;  %v17702_v41 = vsel %vm35036_vm5, %v31852_v53, 0.0  ;;  %vm35038_vm10 = vmmov %vm35025_vm0 }
 0xd2d   : > { %vm35046_vm5 = vmmov %vm35025_vm0 }
 0xd2f   : > { %25337 = vmatmul.mubr.msk.f32.gmra.mrb[80].mxu0 %vm35033_vm7, %v31844_v12  ;;  %vm35039_vm7 = vnez %v34736_v33 }
 0xd30   : > { %25339 = vmatprep.mubr.msk.f32.mxu0 %vm35035_vm8, %v17700_v1  ;;  %v17704_v0 = vsel %vm35039_vm7, %v31862_v19, 0.0  ;;  %vm35041_vm8 = vmmov %vm35025_vm0  ;;  %v35047_v1 = vld [vmem:[#allocation26_spill] sm:$0xff] }
 0xd33   : > { %25340 = vmatmul.mubr.msk.f32.gmra.mrb[82].mxu0 %vm35025_vm0, %v31854_v37 }
 0xd34   : > { %25342 = vmatprep.mubr.msk.f32.mxu0 %vm35037_vm3, %v17702_v41  ;;  %vm35043_vm3 = vmmov %vm35025_vm0  ;;  %v35049_v41 = vld [vmem:[#allocation67_spill] sm:$0xff] }
 0xd35   : > { %v17710_v33 = vsel %vm34750_vm4, %v35049_v41, 0.0  ;;  %v35067_v41 = vld [vmem:[#allocation42_spill] sm:$0xff] }
 0xd37   : > { %25343 = vmatmul.mubr.msk.f32.gmra.mrb[84].mxu0 %vm35038_vm10, %v31864_v62  ;;  %vm35045_vm10 = vnez %v35044_v15 }
 0xd38   : > { %25345 = vmatprep.mubr.msk.f32.mxu0 %vm35040_vm15, %v17704_v0  ;;  %v17708_v57 = vsel %vm35045_vm10, %v31882_v36, 0.0  ;;  %vm35048_vm15 = vmmov %vm35025_vm0  ;;  %v35059_v0 = vld [vmem:[#allocation32_spill] sm:$0xff] }
 0xd39   : > { %vm35056_vm10 = vmmov %vm35025_vm0 }
 0xd3b   : > { %25346 = vmatmul.mubr.msk.f32.gmra.mrb[86].mxu0 %vm35041_vm8, %v31874_v60  ;;  %vm35051_vm8 = vmmov %vm35025_vm0 }
 0xd3c   : > { %25348 = vmatprep.mubr.msk.f32.mxu0 %vm35025_vm0, %v17706_v3  ;;  %v35053_v3 = vld [vmem:[#allocation55_spill] sm:$0xff] }
 0xd3f   : > { %25349 = vmatmul.mubr.msk.f32.gmra.mrb[88].mxu0 %vm35043_vm3, %v35042_v59  ;;  %v35054_v59 = vld [vmem:[#allocation66_spill] sm:$0xff] }
 0xd40   : > { %25351 = vmatprep.mubr.msk.f32.mxu0 %vm35046_vm5, %v17708_v57  ;;  %vm35055_vm3 = vnez %v35054_v59  ;;  %v32183_v57 = vld [vmem:[#allocation2 + $0x108] sm:$0xff]  ;;  %vm35058_vm5 = vmmov %vm35025_vm0  ;;  %v35061_v59 = vld [vmem:[#allocation34_spill] sm:$0xff] }
 0xd41   : > { %v17712_v15 = vsel %vm35055_vm3, %v32175_v44, 0.0  ;;  %35057 = vst [vmem:[#allocation72_spill] sm:$0xff] %v32183_v57  ;;  %v35066_v44 = vld [vmem:[#allocation39_spill] sm:$0xff]  ;;  %vm35071_vm4 = vmmov %vm35058_vm5 }
 0xd43   : > { %25352 = vmatmul.mubr.msk.f32.gmra.mrb[90].mxu0 %vm35048_vm15, %v35047_v1  ;;  %vm35060_vm15 = vmmov %vm35025_vm0  ;;  %v35070_v1 = vld [vmem:[#allocation44_spill] sm:$0xff] }
 0xd44   : > { %25354 = vmatprep.mubr.msk.f32.mxu0 %vm35051_vm8, %v17710_v33  ;;  %v18530_v33 = vld [vmem:[%s32726_s5 + $0x74] sm:$0xf]  ;;  %vm35064_vm8 = vmmov %vm35025_vm0 }
 0xd47   : > { %25355 = vmatmul.mubr.msk.f32.gmra.mrb[92].mxu0 %vm35025_vm0, %v35053_v3  ;;  %v18951_v3 = vld [vmem:[%s32726_s5 + $0x78] sm:$0xff] }
 0xd48   : > { %25357 = vmatprep.mubr.msk.f32.mxu0 %vm35056_vm10, %v17712_v15  ;;  %v18952_v15 = vld [vmem:[%s32726_s5 + $0x80] sm:$0xff]  ;;  %vm35062_vm10 = vmmov %vm35025_vm0  ;;  %vm35065_vm0 = vcmask 1043456  }
 0xd49   : > { %vm35069_vm3 = vmmov %vm35065_vm0 }
 0xd4b   : > { %25358 = vmatmul.mubr.msk.f32.gmra.mrb[94].mxu0 %vm35058_vm5, %v32183_v57  ;;  %v35063_v57 = vld [vmem:[#allocation37_spill] sm:$0xff] }
 0xd4c   : > { %25366 = vmatprep.mubr.msk.f32.mxu0 %vm35060_vm15, %v35059_v0  ;;  %v25744_v0 = vpack.c.bf16 %v18952_v15, %v18951_v3  ;;  %vm35068_vm15 = vmmov %vm35058_vm5  ;;  %v35078_v3 = vld [vmem:[#allocation53_spill] sm:$0xff]  ;;  %v35088_v15 = vld [vmem:[#allocation4_spill] sm:$0xff] }
 0xd4f   : > { %25367 = vmatmul.mubr.msk.f32.vlgmr.msra.gmra.mrb[64].mxu0 %vm35062_vm10, %v35061_v59  ;;  %v35072_v59 = vld [vmem:[#allocation47_spill] sm:$0xff]  ;;  %vm35073_vm10 = vmmov %vm35071_vm4 }
 0xd50   : > { %25743 = vmatpush3.bf16.msra.mxu0 %v25740_v39  ;;  %25369 = vmatprep.mubr.msk.f32.mxu0 %vm35064_vm8, %v35063_v57  ;;  %v35074_v39 = vld [vmem:[#allocation49_spill] sm:$0xff]  ;;  %vm35075_vm8 = vmmov %vm35071_vm4  ;;  %v35076_v57 = vld [vmem:[#allocation51_spill] sm:$0xff] }
 0xd51   : > { %25418 = vmatprep.subr.msk.mxu0 %vm35065_vm0, %v18530_v33  ;;  %vm35077_vm0 = vmmov %vm35071_vm4 }
 0xd53   : > { %25370 = vmatmul.mubr.msk.f32.gmra.mrb[66].mxu0 %vm35058_vm5, %v35066_v44  ;;  %vm35079_vm5 = vmmov %vm35077_vm0  ;;  %v35080_v44 = vld [vmem:[#allocation56_spill] sm:$0xff] }
 0xd54   : > { %25372 = vmatprep.mubr.msk.f32.mxu0 %vm35068_vm15, %v35067_v41  ;;  %25419 = vmatpush3.msk.msra.mxu0 %vm35069_vm3, %v18530_v33  ;;  %vm35081_vm15 = vmmov %vm35077_vm0  ;;  %v35082_v41 = vld [vmem:[#allocation25_spill] sm:$0xff]  ;;  %v35084_v33 = vld [vmem:[#allocation30_spill] sm:$0xff] }
 0xd55   : > { %25745 = vmatprep.subr.bf16.mxu0 %v25744_v0  ;;  %vm35083_vm3 = vmmov %vm35077_vm0 }
 0xd57   : > { %25373 = vmatmul.mubr.msk.f32.gmra.mrb[68].mxu0 %vm35071_vm4, %v35070_v1  ;;  %vm35085_vm4 = vmmov %vm35077_vm0  ;;  %v35086_v1 = vld [vmem:[#allocation31_spill] sm:$0xff] }
 0xd58   : > { %25375 = vmatprep.mubr.msk.f32.mxu0 %vm35073_vm10, %v35072_v59  ;;  %vm35087_vm10 = vmmov %vm35077_vm0  ;;  %v35090_v59 = vld [vmem:[#allocation35_spill] sm:$0xff] }
 0xd5b   : > { %25376 = vmatmul.mubr.msk.f32.gmra.mrb[70].mxu0 %vm35075_vm8, %v35074_v39  ;;  %vm35089_vm8 = vmmov %vm35077_vm0  ;;  %v35091_v39 = vld [vmem:[#allocation36_spill] sm:$0xff] }
 0xd5c   : > { %25378 = vmatprep.mubr.msk.f32.mxu0 %vm35077_vm0, %v35076_v57  ;;  %v35093_v57 = vld [vmem:[#allocation6_spill] sm:$0xff] }
 0xd5f   : > { %25379 = vmatmul.mubr.msk.f32.gmra.mrb[72].mxu0 %vm35079_vm5, %v35078_v3  ;;  %vm35092_vm5 = vmmov %vm35077_vm0  ;;  %v35095_v3 = vld [vmem:[#allocation7_spill] sm:$0xff] }
 0xd60   : > { %25381 = vmatprep.mubr.msk.f32.mxu0 %vm35081_vm15, %v35080_v44  ;;  %vm35094_vm15 = vmmov %vm35077_vm0  ;;  %v35097_v44 = vld [vmem:[#allocation40_spill] sm:$0xff] }
 0xd63   : > { %25382 = vmatmul.mubr.msk.f32.gmra.mrb[74].mxu0 %vm35083_vm3, %v35082_v41  ;;  %vm35096_vm3 = vmmov %vm35077_vm0  ;;  %v35099_v41 = vld [vmem:[#allocation41_spill] sm:$0xff] }
 0xd64   : > { %25384 = vmatprep.mubr.msk.f32.mxu0 %vm35085_vm4, %v35084_v33  ;;  %vm35098_vm4 = vmmov %vm35077_vm0  ;;  %v35101_v33 = vld [vmem:[#allocation9_spill] sm:$0xff] }
 0xd67   : > { %25385 = vmatmul.mubr.msk.f32.gmra.mrb[76].mxu0 %vm35087_vm10, %v35086_v1  ;;  %vm35100_vm10 = vmmov %vm35077_vm0  ;;  %v35103_v1 = vld [vmem:[#allocation10_spill] sm:$0xff] }
 0xd68   : > { %25387 = vmatprep.mubr.msk.f32.mxu0 %vm35089_vm8, %v35088_v15  ;;  %vm35102_vm8 = vmmov %vm35077_vm0  ;;  %v35104_v15 = vld [vmem:[#allocation45_spill] sm:$0xff] }
 0xd6b   : > { %25388 = vmatmul.mubr.msk.f32.gmra.mrb[78].mxu0 %vm35077_vm0, %v35090_v59  ;;  %v35106_v59 = vld [vmem:[#allocation46_spill] sm:$0xff] }
 0xd6c   : > { %25390 = vmatprep.mubr.msk.f32.mxu0 %vm35092_vm5, %v35091_v39  ;;  %vm35105_vm5 = vmmov %vm35077_vm0  ;;  %v35108_v39 = vld [vmem:[#allocation12_spill] sm:$0xff] }
 0xd6f   : > { %25391 = vmatmul.mubr.msk.f32.gmra.mrb[80].mxu0 %vm35094_vm15, %v35093_v57  ;;  %vm35107_vm15 = vmmov %vm35077_vm0  ;;  %v35110_v57 = vld [vmem:[#allocation13_spill] sm:$0xff] }
 0xd70   : > { %25393 = vmatprep.mubr.msk.f32.mxu0 %vm35096_vm3, %v35095_v3  ;;  %vm35109_vm3 = vmmov %vm35077_vm0  ;;  %v35112_v3 = vld [vmem:[#allocation50_spill] sm:$0xff] }
 0xd73   : > { %25394 = vmatmul.mubr.msk.f32.gmra.mrb[82].mxu0 %vm35098_vm4, %v35097_v44  ;;  %vm35111_vm4 = vmmov %vm35077_vm0  ;;  %v35114_v44 = vld [vmem:[#allocation18_spill] sm:$0xff] }
 0xd74   : > { %25396 = vmatprep.mubr.msk.f32.mxu0 %vm35100_vm10, %v35099_v41  ;;  %vm35113_vm10 = vmmov %vm35077_vm0  ;;  %v35116_v41 = vld [vmem:[#allocation16_spill] sm:$0xff] }
 0xd77   : > { %25397 = vmatmul.mubr.msk.f32.gmra.mrb[84].mxu0 %vm35102_vm8, %v35101_v33  ;;  %vm35115_vm8 = vmmov %vm35077_vm0  ;;  %v32258_v33 = vld [vmem:[#allocation2 + $0x101] sm:$0xff] }
 0xd78   : > { %25399 = vmatprep.mubr.msk.f32.mxu0 %vm35077_vm0, %v35103_v1  ;;  %v32262_v1 = vld [vmem:[#allocation2 + $0x109] sm:$0xff] }
 0xd7b   : > { %25400 = vmatmul.mubr.msk.f32.gmra.mrb[86].mxu0 %vm35105_vm5, %v35104_v15  ;;  %vm35117_vm5 = vmmov %vm35077_vm0  ;;  %v35120_v15 = vld [vmem:[#allocation3_spill] sm:$0xff] }
 0xd7c   : > { %25402 = vmatprep.mubr.msk.f32.mxu0 %vm35107_vm15, %v35106_v59  ;;  %vm35118_vm15 = vmmov %vm35077_vm0 }
 0xd7f   : > { %25403 = vmatmul.mubr.msk.f32.gmra.mrb[88].mxu0 %vm35109_vm3, %v35108_v39  ;;  %vm35119_vm3 = vmmov %vm35077_vm0  ;;  %v18953_v39 = vld [vmem:[%s32726_s5 + $0x88] sm:$0xf] }
 0xd80   : > { %25405 = vmatprep.mubr.msk.f32.mxu0 %vm35111_vm4, %v35110_v57  ;;  %vm35121_vm4 = vnez %v35120_v15  ;;  %v19342_v57 = vld [vmem:[%s32726_s5 + $0x8c] sm:$0xff]  ;;  %v35133_v15 = vld [vmem:[#allocation54_spill] sm:$0xff] }
 0xd81   : > { %v18497_v59 = vsel %vm35121_vm4, %v31921_v56, 0.0  ;;  %v35125_v56 = vld [vmem:[#allocation5_spill] sm:$0xff] }
 0xd83   : > { %25406 = vmatmul.mubr.msk.f32.gmra.mrb[90].mxu0 %vm35113_vm10, %v35112_v3  ;;  %v19343_v3 = vld [vmem:[%s32726_s5 + $0x94] sm:$0xff]  ;;  %vm35122_vm10 = vmmov %vm35077_vm0 }
 0xd84   : > { %25408 = vmatprep.mubr.msk.f32.mxu0 %vm35115_vm8, %v35114_v44  ;;  %vm35123_vm8 = vmmov %vm35077_vm0 }
 0xd87   : > { %25409 = vmatmul.mubr.msk.f32.gmra.mrb[92].mxu0 %vm35077_vm0, %v35116_v41  ;;  %vm35124_vm0 = vcmask 1043456   ;;  %v35128_v41 = vld [vmem:[#allocation69_spill] sm:$0xff] }
 0xd88   : > { %25411 = vmatprep.mubr.msk.f32.mxu0 %vm35117_vm5, %v32258_v33  ;;  %vm35126_vm5 = vnez %v35125_v56  ;;  %vm35129_vm4 = vmmov %vm35124_vm0 }
 0xd89   : > { %v18499_v44 = vsel %vm35126_vm5, %v31935_v14, 0.0 }
 0xd8b   : > { %25412 = vmatmul.mubr.msk.f32.gmra.mrb[94].mxu0 %vm35118_vm15, %v32262_v1  ;;  %vm35127_vm15 = vmmov %vm35119_vm3 }
 0xd8c   : > { %25420 = vmatprep.mubr.msk.f32.mxu0 %vm35119_vm3, %v31919_v48  ;;  %v25748_v48 = vpack.c.bf16 %v19343_v3, %v19342_v57  ;;  %v35135_v57 = vld [vmem:[#allocation11_spill] sm:$0xff] }
 0xd8d   : > { %vm35136_vm5 = vnez %v35135_v57  ;;  %v35148_v57 = vld [vmem:[#allocation19_spill] sm:$0xff] }
 0xd8e   : > { %v18503_v3 = vsel %vm35136_vm5, %v31957_v10, 0.0 }
 0xd8f   : > { %25421 = vmatmul.mubr.msk.f32.vlgmr.msra.gmra.mrb[64].mxu0 %vm35122_vm10, %v18497_v59 }
 0xd90   : > { %25747 = vmatpush3.bf16.msra.mxu0 %v25744_v0  ;;  %25423 = vmatprep.mubr.msk.f32.mxu0 %vm35123_vm8, %v31933_v43  ;;  %v35130_v0 = vld [vmem:[#allocation8_spill] sm:$0xff]  ;;  %vm35132_vm8 = vmmov %vm35119_vm3 }
 0xd91   : > { %25472 = vmatprep.subr.msk.mxu0 %vm35124_vm0, %v18953_v39  ;;  %vm35131_vm10 = vnez %v35130_v0  ;;  %vm35134_vm0 = vmmov %vm35119_vm3  ;;  %v35143_v0 = vld [vmem:[#allocation68_spill] sm:$0xff] }
 0xd92   : > { %v18501_v59 = vsel %vm35131_vm10, %v31947_v45, 0.0  ;;  %vm35142_vm14 = vmmov %vm35134_vm0 }
 0xd93   : > { %25424 = vmatmul.mubr.msk.f32.gmra.mrb[66].mxu0 %vm35127_vm15, %v18499_v44  ;;  %vm35137_vm15 = vmmov %vm35134_vm0  ;;  %v35138_v44 = vld [vmem:[#allocation15_spill] sm:$0xff] }
 0xd94   : > { %25426 = vmatprep.mubr.msk.f32.mxu0 %vm35119_vm3, %v35128_v41  ;;  %25473 = vmatpush3.msk.msra.mxu0 %vm35129_vm4, %v18953_v39  ;;  %vm35139_vm3 = vmmov %vm35134_vm0  ;;  %v35140_v39 = vld [vmem:[#allocation14_spill] sm:$0xff] }
 0xd95   : > { %25749 = vmatprep.subr.bf16.mxu0 %v25748_v48  ;;  %vm35141_vm4 = vnez %v35140_v39  ;;  %vm35147_vm10 = vmmov %vm35139_vm3  ;;  %v35153_v39 = vld [vmem:[#allocation22_spill] sm:$0xff] }
 0xd96   : > { %v18505_v56 = vsel %vm35141_vm4, %v31967_v9, 0.0 }
 0xd97   : > { %25427 = vmatmul.mubr.msk.f32.gmra.mrb[68].mxu0 %vm35132_vm8, %v18501_v59  ;;  %vm35144_vm8 = vmmov %vm35134_vm0  ;;  %v35145_v59 = vld [vmem:[#allocation17_spill] sm:$0xff] }
 0xd98   : > { %25429 = vmatprep.mubr.msk.f32.mxu0 %vm35134_vm0, %v35133_v15  ;;  %vm35146_vm0 = vnez %v35145_v59  ;;  %vm35152_vm5 = vmmov %vm35144_vm8  ;;  %v35157_v59 = vld [vmem:[#allocation58_spill] sm:$0xff] }
 0xd99   : > { %v18507_v15 = vsel %vm35146_vm0, %v31977_v32, 0.0  ;;  %vm35161_vm0 = vmmov %vm35152_vm5 }
 0xd9b   : > { %25430 = vmatmul.mubr.msk.f32.gmra.mrb[70].mxu0 %vm35137_vm15, %v18503_v3  ;;  %vm35149_vm15 = vmmov %vm35139_vm3  ;;  %v35150_v3 = vld [vmem:[#allocation20_spill] sm:$0xff] }
 0xd9c   : > { %25432 = vmatprep.mubr.msk.f32.mxu0 %vm35139_vm3, %v35138_v44  ;;  %vm35151_vm3 = vnez %v35150_v3  ;;  %v35162_v3 = vld [vmem:[#allocation59_spill] sm:$0xff] }
 0xd9d   : > { %v18509_v44 = vsel %vm35151_vm3, %v31987_v46, 0.0  ;;  %vm35166_vm3 = vmmov %vm35161_vm0 }
 0xd9f   : > { %25433 = vmatmul.mubr.msk.f32.gmra.mrb[72].mxu0 %vm35142_vm14, %v18505_v56  ;;  %vm35154_vm14 = vmmov %vm35152_vm5  ;;  %v35167_v56 = vld [vmem:[#allocation61_spill] sm:$0xff] }
 0xda0   : > { %25435 = vmatprep.mubr.msk.f32.mxu0 %vm35144_vm8, %v35143_v0  ;;  %v18511_v0 = vsel %vm34983_vm1, %v31997_v22, 0.0  ;;  %vm35156_vm8 = vmmov %vm35152_vm5 }
 0xda1   : > { %vm35171_vm1 = vmmov %vm35161_vm0 }
 0xda3   : > { %25436 = vmatmul.mubr.msk.f32.gmra.mrb[74].mxu0 %vm35147_vm10, %v18507_v15  ;;  %vm35158_vm10 = vmmov %vm35152_vm5  ;;  %v35159_v15 = vld [vmem:[#allocation27_spill] sm:$0xff] }
 0xda4   : > { %25438 = vmatprep.mubr.msk.f32.mxu0 %vm35149_vm15, %v35148_v57  ;;  %vm35160_vm15 = vnez %v35159_v15  ;;  %v35172_v15 = vld [vmem:[#allocation21_spill] sm:$0xff] }
 0xda5   : > { %v18513_v57 = vsel %vm35160_vm15, %v32007_v17, 0.0 }
 0xda7   : > { %25439 = vmatmul.mubr.msk.f32.gmra.mrb[76].mxu0 %vm35152_vm5, %v18509_v44  ;;  %vm35163_vm5 = vmmov %vm35161_vm0  ;;  %v35164_v44 = vld [vmem:[#allocation33_spill] sm:$0xff] }
 0xda8   : > { %25441 = vmatprep.mubr.msk.f32.mxu0 %vm35154_vm14, %v35153_v39  ;;  %vm35165_vm14 = vnez %v35164_v44  ;;  %v35175_v44 = vld [vmem:[#allocation24_spill] sm:$0xff] }
 0xda9   : > { %v18515_v39 = vsel %vm35165_vm14, %v32017_v47, 0.0 }
 0xdab   : > { %25442 = vmatmul.mubr.msk.f32.gmra.mrb[78].mxu0 %vm35156_vm8, %v18511_v0  ;;  %vm35168_vm8 = vmmov %vm35161_vm0  ;;  %v35169_v0 = vld [vmem:[#allocation38_spill] sm:$0xff] }
 0xdac   : > { %25444 = vmatprep.mubr.msk.f32.mxu0 %vm35158_vm10, %v35157_v59  ;;  %vm35170_vm10 = vnez %v35169_v0 }
 0xdad   : > { %v18517_v59 = vsel %vm35170_vm10, %v32027_v49, 0.0 }
 0xdaf   : > { %25445 = vmatmul.mubr.msk.f32.gmra.mrb[80].mxu0 %vm35161_vm0, %v18513_v57  ;;  %v35182_v57 = vld [vmem:[#allocation29_spill] sm:$0xff] }
 0xdb0   : > { %25447 = vmatprep.mubr.msk.f32.mxu0 %vm35163_vm5, %v35162_v3  ;;  %v18519_v3 = vsel %vm34998_vm9, %v32037_v28, 0.0  ;;  %vm35174_vm5 = vmmov %vm35161_vm0 }
 0xdb3   : > { %25448 = vmatmul.mubr.msk.f32.gmra.mrb[82].mxu0 %vm35166_vm3, %v18515_v39  ;;  %vm35176_vm3 = vmmov %vm35161_vm0  ;;  %v32367_v39 = vld [vmem:[#allocation2 + $0x102] sm:$0xff] }
 0xdb4   : > { %25450 = vmatprep.mubr.msk.f32.mxu0 %vm35168_vm8, %v35167_v56  ;;  %v18521_v56 = vsel %vm35002_vm13, %v32047_v6, 0.0  ;;  %vm35178_vm8 = vmmov %vm35161_vm0  ;;  %35187 = vst [vmem:[#allocation28_spill] sm:$0xff] %v32367_v39 }
 0xdb7   : > { %25451 = vmatmul.mubr.msk.f32.gmra.mrb[84].mxu0 %vm35171_vm1, %v18517_v59  ;;  %vm35179_vm1 = vmmov %vm35161_vm0 }
 0xdb8   : > { %25453 = vmatprep.mubr.msk.f32.mxu0 %vm35161_vm0, %v35172_v15  ;;  %vm35180_vm0 = vnez %v34840_v40  ;;  %vm35181_vm10 = vmmov %vm35179_vm1  ;;  %v35189_v40 = vld [vmem:[#allocation60_spill] sm:$0xff] }
 0xdb9   : > { %v18523_v59 = vsel %vm35180_vm0, %v32057_v11, 0.0  ;;  %vm35186_vm9 = vmmov %vm35179_vm1 }
 0xdbb   : > { %25454 = vmatmul.mubr.msk.f32.gmra.mrb[86].mxu0 %vm35174_vm5, %v18519_v3  ;;  %vm35183_vm5 = vmmov %vm35179_vm1  ;;  %v35184_v3 = vld [vmem:[#allocation57_spill] sm:$0xff] }
 0xdbc   : > { %25456 = vmatprep.mubr.msk.f32.mxu0 %vm35176_vm3, %v35175_v44  ;;  %vm35185_vm3 = vnez %v35184_v3 }
 0xdbd   : > { %v18525_v44 = vsel %vm35185_vm3, %v32067_v26, 0.0 }
 0xdbf   : > { %25457 = vmatmul.mubr.msk.f32.gmra.mrb[88].mxu0 %vm35178_vm8, %v18521_v56  ;;  %v32369_v56 = vld [vmem:[#allocation2 + $0x10a] sm:$0xff]  ;;  %vm35188_vm8 = vmmov %vm35179_vm1 }
 0xdc0   : > { %25459 = vmatprep.mubr.msk.f32.mxu0 %vm35179_vm1, %v32055_v55  ;;  %vm35190_vm1 = vnez %v35189_v40  ;;  %vm35193_vm3 = vmmov %vm35188_vm8  ;;  %v19766_v40 = vld [vmem:[%s32726_s5 + $0xa8] sm:$0xff] }
 0xdc1   : > { %vm35199_vm0 = vmmov %vm35193_vm3 }
 0xdc3   : > { %25460 = vmatmul.mubr.msk.f32.gmra.mrb[90].mxu0 %vm35181_vm10, %v18523_v59  ;;  %v18527_v59 = vsel %vm35190_vm1, %v32369_v56, 0.0  ;;  %vm35191_vm10 = vmmov %vm35183_vm5  ;;  %vm35198_vm1 = vnez %v33748_v61  ;;  %v18927_v61 = vsel %vm34924_vm6, %v31802_v16, 0.0  ;;  %v19311_v16 = vld [vmem:[#allocation2 + $0x29] sm:$0xff] }
 0xdc4   : > { %25462 = vmatprep.mubr.msk.f32.mxu0 %vm35183_vm5, %v35182_v57  ;;  %vm35192_vm5 = vnez %v33743_v7  ;;  %vm35209_vm6 = vmmov %vm35199_vm0 }
 0xdc5   : > { %v18919_v3 = vsel %vm35192_vm5, %v31757_v21, 0.0  ;;  %vm35197_vm5 = vmmov %vm35193_vm3 }
 0xdc7   : > { %25463 = vmatmul.mubr.msk.f32.gmra.mrb[92].mxu0 %vm35186_vm9, %v18525_v44  ;;  %v19344_v44 = vld [vmem:[%s32726_s5 + $0x9c] sm:$0xf]  ;;  %vm35194_vm9 = vmmov %vm35193_vm3 }
 0xdc8   : > { %25465 = vmatprep.mubr.msk.f32.mxu0 %vm35188_vm8, %v32367_v39  ;;  %v19765_v39 = vld [vmem:[%s32726_s5 + $0xa0] sm:$0xff]  ;;  %vm35195_vm8 = vnez %v33746_v52  ;;  %v18925_v52 = vsel %vm35021_vm11, %v31792_v63, 0.0  ;;  %vm35206_vm11 = vmmov %vm35199_vm0  ;;  %v19312_v63 = vld [vmem:[#allocation2 + $0x31] sm:$0xff] }
 0xdc9   : > { %v18921_v7 = vsel %vm35195_vm8, %v31770_v18, 0.0  ;;  %v25752_v21 = vpack.c.bf16 %v19766_v40, %v19765_v39  ;;  %vm35201_vm8 = vmmov %vm35199_vm0  ;;  %v18929_v40 = vsel %vm35026_vm2, %v31812_v25, 0.0  ;;  %v18918_v25 = vld [vmem:[#allocation2 + $0x118] sm:$0xff]  ;;  %v19318_v39 = vld [vmem:[#allocation2 + $0x61] sm:$0xff] }
 0xdca   : > { %vm35212_vm2 = vmmov %vm35199_vm0  ;;  %v19313_v18 = vld [vmem:[#allocation2 + $0x39] sm:$0xff] }
 0xdcb   : > { %25466 = vmatmul.mubr.msk.f32.gmra.mrb[94].mxu0 %vm35191_vm10, %v18527_v59  ;;  %vm35196_vm10 = vcmask 1043456   ;;  %v19319_v59 = vld [vmem:[#allocation2 + $0x69] sm:$0xff] }
 0xdcc   : > { %25474 = vmatprep.mubr.msk.f32.mxu0 %vm35193_vm3, %v18919_v3  ;;  %v18923_v3 = vsel %vm35198_vm1, %v31782_v35, 0.0  ;;  %vm35204_vm1 = vmmov %vm35199_vm0  ;;  %v19315_v35 = vld [vmem:[#allocation2 + $0x49] sm:$0xff] }
 0xdcf   : > { %25475 = vmatmul.mubr.msk.f32.vlgmr.msra.gmra.mrb[64].mxu0 %vm35194_vm9, %v31774_v5  ;;  %vm35200_vm9 = vmmov %vm35196_vm10  ;;  %v19314_v5 = vld [vmem:[#allocation2 + $0x41] sm:$0xff] }
 0xdd0   : > { %25751 = vmatpush3.bf16.msra.mxu0 %v25748_v48  ;;  %25477 = vmatprep.mubr.msk.f32.mxu0 %vm35193_vm3, %v18921_v7  ;;  %vm35202_vm3 = vmmov %vm35199_vm0  ;;  %v19317_v48 = vld [vmem:[#allocation2 + $0x59] sm:$0xff] }
 0xdd1   : > { %25526 = vmatprep.subr.msk.mxu0 %vm35196_vm10, %v19344_v44  ;;  %vm35203_vm10 = vmmov %vm35199_vm0  ;;  %v19321_v7 = vld [vmem:[#allocation2 + $0x79] sm:$0xff] }
 0xdd3   : > { %25478 = vmatmul.mubr.msk.f32.gmra.mrb[66].mxu0 %vm35197_vm5, %v31784_v27  ;;  %vm35205_vm5 = vmmov %vm35199_vm0  ;;  %v19316_v27 = vld [vmem:[#allocation2 + $0x51] sm:$0xff] }
 0xdd4   : > { %25480 = vmatprep.mubr.msk.f32.mxu0 %vm35199_vm0, %v18923_v3  ;;  %25527 = vmatpush3.msk.msra.mxu0 %vm35200_vm9, %v19344_v44  ;;  %vm35207_vm9 = vnez %v33395_v8  ;;  %v18937_v8 = vsel %vm35034_vm12, %v31852_v53, 0.0  ;;  %vm35223_vm12 = vmmov %vm35204_vm1  ;;  %v19320_v44 = vld [vmem:[#allocation2 + $0x71] sm:$0xff]  ;;  %v19323_v3 = vld [vmem:[#allocation2 + $0x89] sm:$0xff] }
 0xdd5   : > { %25753 = vmatprep.subr.bf16.mxu0 %v25752_v21  ;;  %v18931_v38 = vsel %vm35207_vm9, %v31822_v51, 0.0  ;;  %vm35216_vm9 = vmmov %vm35204_vm1  ;;  %v35241_v51 = vld [vmem:[#allocation66_spill] sm:$0xff] }
 0xdd7   : > { %25481 = vmatmul.mubr.msk.f32.gmra.mrb[68].mxu0 %vm35201_vm8, %v31794_v13  ;;  %vm35208_vm8 = vmmov %vm35199_vm0  ;;  %v19767_v13 = vld [vmem:[%s32726_s5 + $0xb0] sm:$0xf] }
 0xdd8   : > { %25483 = vmatprep.mubr.msk.f32.mxu0 %vm35202_vm3, %v18925_v52  ;;  %vm35210_vm3 = vnez %v33406_v4  ;;  %v19324_v52 = vld [vmem:[#allocation2 + $0x91] sm:$0xff] }
 0xdd9   : > { %v18933_v50 = vsel %vm35210_vm3, %v31832_v20, 0.0  ;;  %vm35219_vm3 = vmmov %vm35204_vm1 }
 0xddb   : > { %25484 = vmatmul.mubr.msk.f32.gmra.mrb[70].mxu0 %vm35203_vm10, %v31804_v31  ;;  %vm35211_vm10 = vmmov %vm35199_vm0  ;;  %v19310_v31 = vld [vmem:[#allocation2 + $0x21] sm:$0xff] }
 0xddc   : > { %25486 = vmatprep.mubr.msk.f32.mxu0 %vm35199_vm0, %v18927_v61  ;;  %vm35213_vm0 = vnez %v33418_v58  ;;  %v19325_v61 = vld [vmem:[#allocation2 + $0x99] sm:$0xff]  ;;  %v19332_v58 = vld [vmem:[#allocation2 + $0xd1] sm:$0xff] }
 0xddd   : > { %v18935_v24 = vsel %vm35213_vm0, %v31842_v23, 0.0  ;;  %vm35226_vm0 = vmmov %vm35204_vm1  ;;  %v35235_v23 = vld [vmem:[#allocation71_spill] sm:$0xff] }
 0xddf   : > { %25487 = vmatmul.mubr.msk.f32.gmra.mrb[72].mxu0 %vm35204_vm1, %v31814_v54 }
 0xde0   : > { %25489 = vmatprep.mubr.msk.f32.mxu0 %vm35205_vm5, %v18929_v40  ;;  %vm35214_vm5 = vmmov %vm35204_vm1  ;;  %v19326_v40 = vld [vmem:[#allocation2 + $0xa1] sm:$0xff] }
 0xde3   : > { %25490 = vmatmul.mubr.msk.f32.gmra.mrb[74].mxu0 %vm35206_vm11, %v31824_v42  ;;  %vm35215_vm11 = vmmov %vm35204_vm1  ;;  %v35239_v42 = vld [vmem:[#allocation72_spill] sm:$0xff] }
 0xde4   : > { %25492 = vmatprep.mubr.msk.f32.mxu0 %vm35208_vm8, %v18931_v38  ;;  %vm35217_vm8 = vnez %v33434_v30  ;;  %v35227_v30 = vld [vmem:[#allocation26_spill] sm:$0xff]  ;;  %v19327_v38 = vld [vmem:[#allocation2 + $0xa9] sm:$0xff] }
 0xde5   : > { %v18939_v4 = vsel %vm35217_vm8, %v31862_v19, 0.0  ;;  %v35229_v19 = vld [vmem:[#allocation67_spill] sm:$0xff]  ;;  %vm35238_vm8 = vmmov %vm35226_vm0 }
 0xde7   : > { %25493 = vmatmul.mubr.msk.f32.gmra.mrb[76].mxu0 %vm35209_vm6, %v31834_v2  ;;  %vm35218_vm6 = vmmov %vm35204_vm1  ;;  %v35236_v2 = vld [vmem:[#allocation65_spill] sm:$0xff] }
 0xde8   : > { %25495 = vmatprep.mubr.msk.f32.mxu0 %vm35211_vm10, %v18933_v50  ;;  %vm35221_vm10 = vmmov %vm35204_vm1  ;;  %v19328_v50 = vld [vmem:[#allocation2 + $0xb1] sm:$0xff] }
 0xdeb   : > { %25496 = vmatmul.mubr.msk.f32.gmra.mrb[78].mxu0 %vm35212_vm2, %v31844_v12 }
 0xdec   : > { %25498 = vmatprep.mubr.msk.f32.mxu0 %vm35204_vm1, %v18935_v24  ;;  %vm35228_vm1 = vmmov %vm35226_vm0  ;;  %v19329_v24 = vld [vmem:[#allocation2 + $0xb9] sm:$0xff] }
 0xdef   : > { %25499 = vmatmul.mubr.msk.f32.gmra.mrb[80].mxu0 %vm35214_vm5, %v31854_v37  ;;  %v18941_v37 = vsel %vm35039_vm7, %v31872_v29, 0.0  ;;  %v35233_v29 = vld [vmem:[#allocation55_spill] sm:$0xff]  ;;  %vm35234_vm7 = vmmov %vm35226_vm0 }
 0xdf0   : > { %25501 = vmatprep.mubr.msk.f32.mxu0 %vm35215_vm11, %v18937_v8  ;;  %vm35232_vm11 = vmmov %vm35226_vm0  ;;  %v19330_v8 = vld [vmem:[#allocation2 + $0xc1] sm:$0xff] }
 0xdf3   : > { %25502 = vmatmul.mubr.msk.f32.gmra.mrb[82].mxu0 %vm35216_vm9, %v31864_v62  ;;  %v35224_v62 = vld [vmem:[#allocation63_spill] sm:$0xff]  ;;  %vm35237_vm9 = vnez %v35236_v2 }
 0xdf4   : > { %25504 = vmatprep.mubr.msk.f32.mxu0 %vm35218_vm6, %v18939_v4  ;;  %vm35225_vm2 = vnez %v35224_v62  ;;  %v18947_v20 = vsel %vm35237_vm9, %v35235_v23, 0.0  ;;  %vm35240_vm6 = vmmov %vm35226_vm0  ;;  %v19331_v4 = vld [vmem:[#allocation2 + $0xc9] sm:$0xff]  ;;  %v35283_v23 = vld [vmem:[#allocation54_spill] sm:$0xff] }
 0xdf5   : > { %v18943_v53 = vsel %vm35225_vm2, %v31882_v36, 0.0  ;;  %v18917_v36 = vld [vmem:[#allocation2 + $0x110] sm:$0xff]  ;;  %vm35245_vm2 = vmmov %vm35226_vm0 }
 0xdf6   : > { %v19335_v62 = vld [vmem:[#allocation2 + $0xe9] sm:$0xff] }
 0xdf7   : > { %25505 = vmatmul.mubr.msk.f32.gmra.mrb[84].mxu0 %vm35219_vm3, %v31874_v60  ;;  %v35230_v60 = vld [vmem:[#allocation64_spill] sm:$0xff]  ;;  %vm35242_vm3 = vnez %v35241_v51  ;;  %v35299_v51 = vld [vmem:[#allocation17_spill] sm:$0xff] }
 0xdf8   : > { %25507 = vmatprep.mubr.msk.f32.mxu0 %vm35221_vm10, %v18941_v37  ;;  %vm35231_vm5 = vnez %v35230_v60  ;;  %v18949_v54 = vsel %vm35242_vm3, %v18917_v36, 0.0  ;;  %vm35243_vm10 = vmmov %vm35226_vm0  ;;  %v19333_v37 = vld [vmem:[#allocation2 + $0xd9] sm:$0xff] }
 0xdf9   : > { %v18945_v12 = vsel %vm35231_vm5, %v35229_v19, 0.0  ;;  %vm35247_vm5 = vcmask 1043456   ;;  %vm35253_vm3 = vmmov %vm35226_vm0  ;;  %v19340_v19 = vld [vmem:[#allocation2 + $0x111] sm:$0xff]  ;;  %v19341_v60 = vld [vmem:[#allocation2 + $0x119] sm:$0xff] }
 0xdfa   : > { %vm35250_vm9 = vmmov %vm35247_vm5 }
 0xdfb   : > { %25508 = vmatmul.mubr.msk.f32.gmra.mrb[86].mxu0 %vm35223_vm12, %v35222_v34  ;;  %vm35244_vm12 = vmmov %vm35226_vm0  ;;  %v19334_v34 = vld [vmem:[#allocation2 + $0xe1] sm:$0xff] }
 0xdfc   : > { %25510 = vmatprep.mubr.msk.f32.mxu0 %vm35226_vm0, %v18943_v53  ;;  %v19336_v53 = vld [vmem:[#allocation2 + $0xf1] sm:$0xff] }
 0xdff   : > { %25511 = vmatmul.mubr.msk.f32.gmra.mrb[88].mxu0 %vm35228_vm1, %v35227_v30  ;;  %vm35246_vm1 = vmmov %vm35226_vm0  ;;  %v19337_v30 = vld [vmem:[#allocation2 + $0xf9] sm:$0xff] }
 0xe00   : > { %25513 = vmatprep.mubr.msk.f32.mxu0 %vm35232_vm11, %v18945_v12  ;;  %vm35248_vm11 = vmmov %vm35226_vm0  ;;  %v35277_v12 = vld [vmem:[#allocation3_spill] sm:$0xff] }
 0xe03   : > { %25514 = vmatmul.mubr.msk.f32.gmra.mrb[90].mxu0 %vm35234_vm7, %v35233_v29  ;;  %vm35249_vm7 = vmmov %vm35226_vm0 }
 0xe04   : > { %25516 = vmatprep.mubr.msk.f32.mxu0 %vm35238_vm8, %v18947_v20  ;;  %vm35251_vm8 = vmmov %vm35226_vm0 }
 0xe07   : > { %25517 = vmatmul.mubr.msk.f32.gmra.mrb[92].mxu0 %vm35240_vm6, %v35239_v42  ;;  %vm35252_vm6 = vmmov %vm35226_vm0  ;;  %v19742_v42 = vsel %vm35141_vm4, %v31977_v32, 0.0  ;;  %v35307_v32 = vld [vmem:[#allocation58_spill] sm:$0xff] }
 0xe08   : > { %25519 = vmatprep.mubr.msk.f32.mxu0 %vm35243_vm10, %v18949_v54  ;;  %vm35254_vm10 = vmmov %vm35226_vm0 }
 0xe0b   : > { %25520 = vmatmul.mubr.msk.f32.gmra.mrb[94].mxu0 %vm35244_vm12, %v18918_v25  ;;  %vm35255_vm12 = vmmov %vm35226_vm0  ;;  %v35304_v25 = vld [vmem:[#allocation20_spill] sm:$0xff] }
 0xe0c   : > { %25528 = vmatprep.mubr.msk.f32.mxu0 %vm35245_vm2, %v19310_v31  ;;  %vm35256_vm2 = vmmov %vm35226_vm0 }
 0xe0f   : > { %25529 = vmatmul.mubr.msk.f32.vlgmr.msra.gmra.mrb[64].mxu0 %vm35226_vm0, %v19311_v16  ;;  %v35309_v16 = vld [vmem:[#allocation23_spill] sm:$0xff] }
 0xe10   : > { %25755 = vmatpush3.bf16.msra.mxu0 %v25752_v21  ;;  %25531 = vmatprep.mubr.msk.f32.mxu0 %vm35246_vm1, %v19312_v63  ;;  %v19322_v21 = vld [vmem:[#allocation2 + $0x81] sm:$0xff]  ;;  %vm35257_vm1 = vmmov %vm35226_vm0  ;;  %v20166_v63 = vld [vmem:[%s27219_s10 + $0x50] sm:$0xff] }
 0xe11   : > { %25580 = vmatprep.subr.msk.mxu0 %vm35247_vm5, %v19767_v13  ;;  %vm35258_vm5 = vmmov %vm35226_vm0 }
 0xe13   : > { %25532 = vmatmul.mubr.msk.f32.gmra.mrb[66].mxu0 %vm35248_vm11, %v19313_v18  ;;  %vm35259_vm11 = vmmov %vm35226_vm0  ;;  %v19750_v18 = vsel %vm35160_vm15, %v32017_v47, 0.0  ;;  %v35322_v47 = vld [vmem:[#allocation24_spill] sm:$0xff] }
 0xe14   : > { %25534 = vmatprep.mubr.msk.f32.mxu0 %vm35249_vm7, %v19314_v5  ;;  %25581 = vmatpush3.msk.msra.mxu0 %vm35250_vm9, %v19767_v13  ;;  %vm35260_vm7 = vmmov %vm35226_vm0 }
 0xe15   : > { %vm35261_vm9 = vmmov %vm35226_vm0 }
 0xe17   : > { %25535 = vmatmul.mubr.msk.f32.gmra.mrb[68].mxu0 %vm35251_vm8, %v19315_v35  ;;  %vm35262_vm8 = vmmov %vm35226_vm0  ;;  %v19752_v35 = vsel %vm35165_vm14, %v32027_v49, 0.0 }
 0xe18   : > { %25537 = vmatprep.mubr.msk.f32.mxu0 %vm35252_vm6, %v19316_v27  ;;  %vm35263_vm6 = vmmov %vm35226_vm0  ;;  %v35324_v27 = vld [vmem:[#allocation43_spill] sm:$0xff] }
 0xe1b   : > { %25538 = vmatmul.mubr.msk.f32.gmra.mrb[70].mxu0 %vm35253_vm3, %v19317_v48  ;;  %vm35264_vm3 = vmmov %vm35226_vm0 }
 0xe1c   : > { %25540 = vmatprep.mubr.msk.f32.mxu0 %vm35254_vm10, %v19318_v39  ;;  %vm35265_vm10 = vmmov %vm35226_vm0  ;;  %v19732_v39 = vld [vmem:[#allocation2 + $0x11a] sm:$0xff] }
 0xe1f   : > { %25541 = vmatmul.mubr.msk.f32.gmra.mrb[72].mxu0 %vm35255_vm12, %v19319_v59  ;;  %vm35266_vm12 = vmmov %vm35226_vm0 }
 0xe20   : > { %25543 = vmatprep.mubr.msk.f32.mxu0 %vm35256_vm2, %v19320_v44  ;;  %vm35267_vm2 = vmmov %vm35226_vm0 }
 0xe23   : > { %25544 = vmatmul.mubr.msk.f32.gmra.mrb[74].mxu0 %vm35226_vm0, %v19321_v7  ;;  %v20157_v7 = vld [vmem:[%s27219_s10 + $0x8] sm:$0xff] }
 0xe24   : > { %25546 = vmatprep.mubr.msk.f32.mxu0 %vm35257_vm1, %v19322_v21  ;;  %vm35268_vm1 = vmmov %vm35226_vm0 }
 0xe27   : > { %25547 = vmatmul.mubr.msk.f32.gmra.mrb[76].mxu0 %vm35258_vm5, %v19323_v3  ;;  %vm35269_vm5 = vmmov %vm35226_vm0 }
 0xe28   : > { %25549 = vmatprep.mubr.msk.f32.mxu0 %vm35259_vm11, %v19324_v52  ;;  %vm35270_vm11 = vmmov %vm35226_vm0  ;;  %v20156_v52 = vld [vmem:[%s27219_s10] sm:$0xff] }
 0xe2b   : > { %25550 = vmatmul.mubr.msk.f32.gmra.mrb[78].mxu0 %vm35260_vm7, %v19325_v61  ;;  %vm35271_vm7 = vmmov %vm35226_vm0 }
 0xe2c   : > { %25552 = vmatprep.mubr.msk.f32.mxu0 %vm35261_vm9, %v19326_v40  ;;  %vm35272_vm9 = vmmov %vm35226_vm0 }
 0xe2f   : > { %25553 = vmatmul.mubr.msk.f32.gmra.mrb[80].mxu0 %vm35262_vm8, %v19327_v38  ;;  %vm35273_vm8 = vmmov %vm35226_vm0 }
 0xe30   : > { %25555 = vmatprep.mubr.msk.f32.mxu0 %vm35263_vm6, %v19328_v50  ;;  %vm35274_vm6 = vmmov %vm35226_vm0  ;;  %v20159_v50 = vld [vmem:[%s27219_s10 + $0x18] sm:$0xff] }
 0xe33   : > { %25556 = vmatmul.mubr.msk.f32.gmra.mrb[82].mxu0 %vm35264_vm3, %v19329_v24  ;;  %vm35275_vm3 = vmmov %vm35226_vm0 }
 0xe34   : > { %25558 = vmatprep.mubr.msk.f32.mxu0 %vm35265_vm10, %v19330_v8  ;;  %vm35276_vm10 = vmmov %vm35226_vm0 }
 0xe37   : > { %25559 = vmatmul.mubr.msk.f32.gmra.mrb[84].mxu0 %vm35266_vm12, %v19331_v4  ;;  %vm35278_vm12 = vnez %v35277_v12  ;;  %v20158_v4 = vld [vmem:[%s27219_s10 + $0x10] sm:$0xff] }
 0xe38   : > { %25561 = vmatprep.mubr.msk.f32.mxu0 %vm35267_vm2, %v19332_v58  ;;  %v19734_v29 = vsel %vm35278_vm12, %v31935_v14, 0.0  ;;  %vm35279_vm2 = vmmov %vm35226_vm0  ;;  %v35288_v14 = vld [vmem:[#allocation15_spill] sm:$0xff] }
 0xe39   : > { %vm35296_vm12 = vmmov %vm35226_vm0 }
 0xe3b   : > { %25562 = vmatmul.mubr.msk.f32.gmra.mrb[86].mxu0 %vm35226_vm0, %v19333_v37 }
 0xe3c   : > { %25564 = vmatprep.mubr.msk.f32.mxu0 %vm35268_vm1, %v19334_v34 }
 0xe3f   : > { %25565 = vmatmul.mubr.msk.f32.gmra.mrb[88].mxu0 %vm35269_vm5, %v19335_v62  ;;  %vm35282_vm5 = vmmov %vm35226_vm0 }
 0xe40   : > { %25567 = vmatprep.mubr.msk.f32.mxu0 %vm35270_vm11, %v19336_v53  ;;  %vm35284_vm11 = vmmov %vm35226_vm0  ;;  %v20161_v53 = vld [vmem:[%s27219_s10 + $0x28] sm:$0xff] }
 0xe43   : > { %25568 = vmatmul.mubr.msk.f32.gmra.mrb[90].mxu0 %vm35271_vm7, %v19337_v30 }
 0xe44   : > { %25570 = vmatprep.mubr.msk.f32.mxu0 %vm35272_vm9, %v32258_v33  ;;  %v35280_v33 = vld [vmem:[#allocation5_spill] sm:$0xff]  ;;  %vm35287_vm9 = vmmov %vm35226_vm0 }
 0xe45   : > { %vm35281_vm1 = vnez %v35280_v33 }
 0xe47   : > { %25571 = vmatmul.mubr.msk.f32.gmra.mrb[92].mxu0 %vm35273_vm8, %v32262_v1  ;;  %v19736_v1 = vsel %vm35281_vm1, %v31947_v45, 0.0  ;;  %vm35289_vm8 = vmmov %vm35226_vm0  ;;  %v35293_v45 = vld [vmem:[#allocation68_spill] sm:$0xff] }
 0xe48   : > { %25573 = vmatprep.mubr.msk.f32.mxu0 %vm35274_vm6, %v19340_v19 }
 0xe4b   : > { %25574 = vmatmul.mubr.msk.f32.gmra.mrb[94].mxu0 %vm35275_vm3, %v19341_v60  ;;  %vm35292_vm3 = vmmov %vm35226_vm0  ;;  %v20160_v60 = vld [vmem:[%s27219_s10 + $0x20] sm:$0xff] }
 0xe4c   : > { %25582 = vmatprep.mubr.msk.f32.mxu0 %vm35276_vm10, %v31933_v43  ;;  %v35285_v43 = vld [vmem:[#allocation8_spill] sm:$0xff]  ;;  %vm35294_vm10 = vmmov %vm35226_vm0 }
 0xe4d   : > { %vm35286_vm7 = vnez %v35285_v43 }
 0xe4e   : > { %v19738_v2 = vsel %vm35286_vm7, %v31957_v10, 0.0  ;;  %v35297_v10 = vld [vmem:[#allocation19_spill] sm:$0xff] }
 0xe4f   : > { %25583 = vmatmul.mubr.msk.f32.vlgmr.msra.gmra.mrb[64].mxu0 %vm35279_vm2, %v19734_v29  ;;  %vm35298_vm2 = vmmov %vm35226_vm0 }
 0xe50   : > { %25585 = vmatprep.mubr.msk.f32.mxu0 %vm35226_vm0, %v35128_v41  ;;  %v35290_v41 = vld [vmem:[#allocation11_spill] sm:$0xff]  ;;  %vm35300_vm0 = vnez %v35299_v51  ;;  %vm35301_vm1 = vmmov %vm35298_vm2 }
 0xe51   : > { %vm35291_vm6 = vnez %v35290_v41  ;;  %v19744_v54 = vsel %vm35300_vm0, %v31987_v46, 0.0  ;;  %vm35306_vm7 = vmmov %vm35301_vm1  ;;  %v35312_v46 = vld [vmem:[#allocation59_spill] sm:$0xff]  ;;  %vm35321_vm0 = vnez %v35169_v0  ;;  %v35334_v0 = vld [vmem:[#allocation28_spill] sm:$0xff] }
 0xe52   : > { %v19740_v20 = vsel %vm35291_vm6, %v31967_v9, 0.0  ;;  %v35302_v9 = vld [vmem:[#allocation22_spill] sm:$0xff]  ;;  %vm35308_vm4 = vmmov %vm35301_vm1 }
 0xe53   : > { %25586 = vmatmul.mubr.msk.f32.gmra.mrb[66].mxu0 %vm35282_vm5, %v19736_v1  ;;  %vm35303_vm5 = vmmov %vm35301_vm1 }
 0xe54   : > { %25588 = vmatprep.mubr.msk.f32.mxu0 %vm35284_vm11, %v35283_v23  ;;  %vm35305_vm11 = vnez %v35304_v25  ;;  %vm35313_vm6 = vmmov %vm35301_vm1  ;;  %v20163_v23 = vld [vmem:[%s27219_s10 + $0x38] sm:$0xff] }
 0xe55   : > { %v19746_v31 = vsel %vm35305_vm11, %v31997_v22, 0.0  ;;  %v35316_v22 = vld [vmem:[#allocation61_spill] sm:$0xff]  ;;  %vm35323_vm15 = vmmov %vm35301_vm1 }
 0xe56   : > { %vm35326_vm11 = vmmov %vm35301_vm1 }
 0xe57   : > { %25589 = vmatmul.mubr.msk.f32.gmra.mrb[68].mxu0 %vm35287_vm9, %v19738_v2  ;;  %vm35310_vm9 = vnez %v35309_v16  ;;  %vm35327_vm14 = vmmov %vm35301_vm1  ;;  %v20167_v16 = vld [vmem:[%s27219_s10 + $0x58] sm:$0xff] }
 0xe58   : > { %25591 = vmatprep.mubr.msk.f32.mxu0 %vm35289_vm8, %v35288_v14  ;;  %v19748_v13 = vsel %vm35310_vm9, %v32007_v17, 0.0  ;;  %vm35311_vm8 = vmmov %vm35301_vm1  ;;  %v19754_v17 = vsel %vm35321_vm0, %v32037_v28, 0.0  ;;  %v35331_v28 = vld [vmem:[#allocation52_spill] sm:$0xff]  ;;  %vm35343_vm0 = vcmask 31744  }
 0xe59   : > { %vm35332_vm9 = vnez %v35331_v28  ;;  %v20162_v14 = vld [vmem:[%s27219_s10 + $0x30] sm:$0xff] }
 0xe5b   : > { %25592 = vmatmul.mubr.msk.f32.gmra.mrb[70].mxu0 %vm35292_vm3, %v19740_v20  ;;  %vm35315_vm3 = vmmov %vm35301_vm1 }
 0xe5c   : > { %25594 = vmatprep.mubr.msk.f32.mxu0 %vm35294_vm10, %v35293_v45  ;;  %vm35317_vm10 = vmmov %vm35301_vm1 }
 0xe5f   : > { %25595 = vmatmul.mubr.msk.f32.gmra.mrb[72].mxu0 %vm35296_vm12, %v19742_v42  ;;  %vm35319_vm12 = vmmov %vm35301_vm1  ;;  %v20165_v42 = vld [vmem:[%s27219_s10 + $0x48] sm:$0xff] }
 0xe60   : > { %25597 = vmatprep.mubr.msk.f32.mxu0 %vm35298_vm2, %v35297_v10  ;;  %vm35320_vm2 = vmmov %vm35301_vm1 }
 0xe63   : > { %25598 = vmatmul.mubr.msk.f32.gmra.mrb[74].mxu0 %vm35301_vm1, %v19744_v54  ;;  %v20164_v54 = vld [vmem:[%s27219_s10 + $0x40] sm:$0xff] }
 0xe64   : > { %25600 = vmatprep.mubr.msk.f32.mxu0 %vm35303_vm5, %v35302_v9  ;;  %vm35325_vm5 = vnez %v35324_v27 }
 0xe65   : > { %v19756_v48 = vsel %vm35325_vm5, %v32047_v6, 0.0  ;;  %v19760_v6 = vsel %vm35332_vm9, %v32067_v26, 0.0  ;;  %vm35346_vm5 = vmmov %vm35343_vm0 }
 0xe66   : > { %vm35351_vm9 = vmmov %vm35343_vm0 }
 0xe67   : > { %25601 = vmatmul.mubr.msk.f32.gmra.mrb[76].mxu0 %vm35306_vm7, %v19746_v31  ;;  %vm35329_vm7 = vmmov %vm35301_vm1 }
 0xe68   : > { %25603 = vmatprep.mubr.msk.f32.mxu0 %vm35308_vm4, %v35307_v32  ;;  %vm35330_vm4 = vmmov %vm35301_vm1 }
 0xe6b   : > { %25604 = vmatmul.mubr.msk.f32.gmra.mrb[78].mxu0 %vm35311_vm8, %v19748_v13  ;;  %vm35333_vm8 = vmmov %vm35301_vm1 }
 0xe6c   : > { %25606 = vmatprep.mubr.msk.f32.mxu0 %vm35313_vm6, %v35312_v46  ;;  %vm35335_vm6 = vmmov %vm35301_vm1 }
 0xe6f   : > { %25607 = vmatmul.mubr.msk.f32.gmra.mrb[80].mxu0 %vm35315_vm3, %v19750_v18  ;;  %vm35338_vm3 = vmmov %vm35301_vm1 }
 0xe70   : > { %25609 = vmatprep.mubr.msk.f32.mxu0 %vm35317_vm10, %v35316_v22  ;;  %vm35339_vm10 = vmmov %vm35301_vm1 }
 0xe73   : > { %25610 = vmatmul.mubr.msk.f32.gmra.mrb[82].mxu0 %vm35319_vm12, %v19752_v35 }
 0xe74   : > { %25612 = vmatprep.mubr.msk.f32.mxu0 %vm35320_vm2, %v35172_v15  ;;  %v19758_v15 = vsel %vm35002_vm13, %v32057_v11, 0.0  ;;  %v35336_v11 = vld [vmem:[#allocation57_spill] sm:$0xff]  ;;  %vm35342_vm2 = vmmov %vm35301_vm1 }
 0xe75   : > { %vm35337_vm13 = vnez %v35336_v11  ;;  %v20170_v11 = vld [vmem:[%s27219_s10 + $0x70] sm:$0xff] }
 0xe76   : > { %v19762_v59 = vsel %vm35337_vm13, %v32369_v56, 0.0  ;;  %vm35354_vm13 = vmmov %vm35343_vm0 }
 0xe77   : > { %25613 = vmatmul.mubr.msk.f32.gmra.mrb[84].mxu0 %vm35301_vm1, %v19754_v17  ;;  %vm35344_vm1 = vmmov %vm35343_vm0  ;;  %v20169_v17 = vld [vmem:[%s27219_s10 + $0x68] sm:$0xff] }
 0xe78   : > { %25615 = vmatprep.mubr.msk.f32.mxu0 %vm35323_vm15, %v35322_v47  ;;  %vm35345_vm15 = vmmov %vm35343_vm0 }
 0xe7b   : > { %25616 = vmatmul.mubr.msk.f32.gmra.mrb[86].mxu0 %vm35326_vm11, %v19756_v48  ;;  %vm35347_vm11 = vmmov %vm35343_vm0  ;;  %v20168_v48 = vld [vmem:[%s27219_s10 + $0x60] sm:$0xff] }
 0xe7c   : > { %25618 = vmatprep.mubr.msk.f32.mxu0 %vm35327_vm14, %v32055_v55  ;;  %v19731_v55 = vld [vmem:[#allocation2 + $0x112] sm:$0xff]  ;;  %vm35348_vm14 = vmmov %vm35343_vm0 }
 0xe7f   : > { %25619 = vmatmul.mubr.msk.f32.gmra.mrb[88].mxu0 %vm35329_vm7, %v19758_v15  ;;  %vm35349_vm7 = vmmov %vm35343_vm0 }
 0xe80   : > { %25621 = vmatprep.mubr.msk.f32.mxu0 %vm35330_vm4, %v35182_v57  ;;  %v35340_v57 = vld [vmem:[#allocation60_spill] sm:$0xff]  ;;  %vm35350_vm4 = vmmov %vm35343_vm0 }
 0xe81   : > { %vm35341_vm12 = vnez %v35340_v57 }
 0xe82   : > { %v19764_v44 = vsel %vm35341_vm12, %v19732_v39, 0.0  ;;  %vm35357_vm12 = vmmov %vm35343_vm0 }
 0xe83   : > { %25622 = vmatmul.mubr.msk.f32.gmra.mrb[90].mxu0 %vm35333_vm8, %v19760_v6  ;;  %vm35352_vm8 = vmmov %vm35343_vm0 }
 0xe84   : > { %25624 = vmatprep.mubr.msk.f32.mxu0 %vm35335_vm6, %v35334_v0  ;;  %vm35353_vm6 = vmmov %vm35343_vm0  ;;  %v20171_v0 = vld [vmem:[%s27219_s10 + $0x78] sm:$0xff] }
 0xe87   : > { %25625 = vmatmul.mubr.msk.f32.gmra.mrb[92].mxu0 %vm35338_vm3, %v19762_v59  ;;  %vm35355_vm3 = vmmov %vm35343_vm0 }
 0xe88   : > { %25627 = vmatprep.mubr.msk.f32.mxu0 %vm35339_vm10, %v19731_v55  ;;  %vm35356_vm10 = vmmov %vm35343_vm0 }
 0xe8b   : > { %25628 = vmatmul.mubr.msk.f32.gmra.mrb[94].mxu0 %vm35342_vm2, %v19764_v44  ;;  %vm35358_vm2 = vmmov %vm35343_vm0 }
 0xf22   : > { %v25584_v26 = vpop.f32.mrb[64].mxu0 }
 0xf23   : > { %v20125_v21 = vmul.f32 0.2, %v25584_v26  ;;  %v19933_v3 = vpop.f32.mrb[65].mxu0 }
 0xf24   : > { %v20124_v56 = vmul.f32 0.2, %v19933_v3 }
 0xf25   : > { %v20189_v61 = vadd.f32 %v20157_v7, %v20125_v21  ;;  %v20173_v7 = vld [vmem:[%s27219_s10 + $0x88] sm:$0xff] }
 0xf26   : > { %v20188_v40 = vadd.f32 %v20156_v52, %v20124_v56  ;;  %v25587_v38 = vpop.f32.mrb[66].mxu0  ;;  %v20172_v52 = vld [vmem:[%s27219_s10 + $0x80] sm:$0xff] }
 0xf27   : > { %20221 = vst.msk [vmem:[%s32622_s13 + $0x8] sm:$0xff] %vm35343_vm0, %v20189_v61  ;;  %v20127_v24 = vmul.f32 0.2, %v25587_v38  ;;  %v19943_v8 = vpop.f32.mrb[67].mxu0 }
 0xf28   : > { %20220 = vst.msk [vmem:[%s32622_s13] sm:$0xff] %vm35344_vm1, %v20188_v40  ;;  %v20126_v58 = vmul.f32 0.2, %v19943_v8  ;;  %vm35359_vm1 = vmmov %vm35343_vm0 }
 0xf29   : > { %v20191_v37 = vadd.f32 %v20159_v50, %v20127_v24  ;;  %v20175_v50 = vld [vmem:[%s27219_s10 + $0x98] sm:$0xff] }
 0xf2a   : > { %v20190_v34 = vadd.f32 %v20158_v4, %v20126_v58  ;;  %v25590_v62 = vpop.f32.mrb[68].mxu0  ;;  %v20174_v4 = vld [vmem:[%s27219_s10 + $0x90] sm:$0xff] }
 0xf2b   : > { %20223 = vst.msk [vmem:[%s32622_s13 + $0x18] sm:$0xff] %vm35345_vm15, %v20191_v37  ;;  %v20129_v30 = vmul.f32 0.2, %v25590_v62  ;;  %v19953_v19 = vpop.f32.mrb[69].mxu0  ;;  %vm35360_vm15 = vmmov %vm35343_vm0 }
 0xf2c   : > { %20222 = vst.msk [vmem:[%s32622_s13 + $0x10] sm:$0xff] %vm35346_vm5, %v20190_v34  ;;  %v20128_v12 = vmul.f32 0.2, %v19953_v19  ;;  %vm35361_vm5 = vmmov %vm35343_vm0 }
 0xf2d   : > { %v20193_v29 = vadd.f32 %v20161_v53, %v20129_v30  ;;  %v20177_v53 = vld [vmem:[%s27219_s10 + $0xa8] sm:$0xff] }
 0xf2e   : > { %v20192_v33 = vadd.f32 %v20160_v60, %v20128_v12  ;;  %v25593_v1 = vpop.f32.mrb[70].mxu0  ;;  %v20176_v60 = vld [vmem:[%s27219_s10 + $0xa0] sm:$0xff] }
 0xf2f   : > { %20225 = vst.msk [vmem:[%s32622_s13 + $0x28] sm:$0xff] %vm35347_vm11, %v20193_v29  ;;  %v20131_v43 = vmul.f32 0.2, %v25593_v1  ;;  %v19963_v2 = vpop.f32.mrb[71].mxu0  ;;  %vm35362_vm11 = vmmov %vm35343_vm0 }
 0xf30   : > { %20224 = vst.msk [vmem:[%s32622_s13 + $0x20] sm:$0xff] %vm35348_vm14, %v20192_v33  ;;  %v20130_v41 = vmul.f32 0.2, %v19963_v2  ;;  %vm35363_vm14 = vmmov %vm35343_vm0 }
 0xf31   : > { %v20195_v20 = vadd.f32 %v20163_v23, %v20131_v43  ;;  %v20179_v23 = vld [vmem:[%s27219_s10 + $0xb8] sm:$0xff] }
 0xf32   : > { %v20194_v45 = vadd.f32 %v20162_v14, %v20130_v41  ;;  %v25596_v36 = vpop.f32.mrb[72].mxu0  ;;  %v20178_v14 = vld [vmem:[%s27219_s10 + $0xb0] sm:$0xff] }
 0xf33   : > { %20227 = vst.msk [vmem:[%s32622_s13 + $0x38] sm:$0xff] %vm35349_vm7, %v20195_v20  ;;  %v20133_v10 = vmul.f32 0.2, %v25596_v36  ;;  %v19973_v51 = vpop.f32.mrb[73].mxu0  ;;  %vm35364_vm7 = vmmov %vm35343_vm0 }
 0xf34   : > { %20226 = vst.msk [vmem:[%s32622_s13 + $0x30] sm:$0xff] %vm35350_vm4, %v20194_v45  ;;  %v20132_v9 = vmul.f32 0.2, %v19973_v51  ;;  %vm35365_vm4 = vmmov %vm35343_vm0 }
 0xf35   : > { %v20197_v25 = vadd.f32 %v20165_v42, %v20133_v10  ;;  %v20181_v42 = vld [vmem:[%s27219_s10 + $0xc8] sm:$0xff] }
 0xf36   : > { %v20196_v31 = vadd.f32 %v20164_v54, %v20132_v9  ;;  %v25599_v32 = vpop.f32.mrb[74].mxu0  ;;  %v20180_v54 = vld [vmem:[%s27219_s10 + $0xc0] sm:$0xff] }
 0xf37   : > { %20229 = vst.msk [vmem:[%s32622_s13 + $0x48] sm:$0xff] %vm35351_vm9, %v20197_v25  ;;  %v20135_v13 = vmul.f32 0.2, %v25599_v32  ;;  %v19983_v46 = vpop.f32.mrb[75].mxu0  ;;  %vm35366_vm9 = vmmov %vm35343_vm0 }
 0xf38   : > { %20228 = vst.msk [vmem:[%s32622_s13 + $0x40] sm:$0xff] %vm35352_vm8, %v20196_v31  ;;  %v20134_v18 = vmul.f32 0.2, %v19983_v46  ;;  %vm35367_vm8 = vmmov %vm35343_vm0 }
 0xf39   : > { %v20199_v22 = vadd.f32 %v20167_v16, %v20135_v13  ;;  %v20183_v16 = vld [vmem:[%s27219_s10 + $0xd8] sm:$0xff] }
 0xf3a   : > { %v20198_v5 = vadd.f32 %v20166_v63, %v20134_v18  ;;  %v25602_v35 = vpop.f32.mrb[76].mxu0  ;;  %v20182_v63 = vld [vmem:[%s27219_s10 + $0xd0] sm:$0xff] }
 0xf3b   : > { %20231 = vst.msk [vmem:[%s32622_s13 + $0x58] sm:$0xff] %vm35353_vm6, %v20199_v22  ;;  %v20137_v47 = vmul.f32 0.2, %v25602_v35  ;;  %v19993_v27 = vpop.f32.mrb[77].mxu0  ;;  %vm35368_vm6 = vmmov %vm35343_vm0 }
 0xf3c   : > { %20230 = vst.msk [vmem:[%s32622_s13 + $0x50] sm:$0xff] %vm35354_vm13, %v20198_v5  ;;  %v20136_v49 = vmul.f32 0.2, %v19993_v27  ;;  %vm35369_vm13 = vmmov %vm35343_vm0 }
 0xf3d   : > { %v20201_v15 = vadd.f32 %v20169_v17, %v20137_v47  ;;  %v20185_v17 = vld [vmem:[%s27219_s10 + $0xe8] sm:$0xff] }
 0xf3e   : > { %v20200_v28 = vadd.f32 %v20168_v48, %v20136_v49  ;;  %v25605_v6 = vpop.f32.mrb[78].mxu0  ;;  %v20184_v48 = vld [vmem:[%s27219_s10 + $0xe0] sm:$0xff] }
 0xf3f   : > { %20233 = vst.msk [vmem:[%s32622_s13 + $0x68] sm:$0xff] %vm35355_vm3, %v20201_v15  ;;  %v20139_v55 = vmul.f32 0.2, %v25605_v6  ;;  %v20003_v39 = vpop.f32.mrb[79].mxu0  ;;  %vm35370_vm3 = vmmov %vm35343_vm0 }
 0xf40   : > { %20232 = vst.msk [vmem:[%s32622_s13 + $0x60] sm:$0xff] %vm35356_vm10, %v20200_v28  ;;  %v20138_v59 = vmul.f32 0.2, %v20003_v39  ;;  %vm35371_vm10 = vmmov %vm35343_vm0 }
 0xf41   : > { %v20203_v57 = vadd.f32 %v20171_v0, %v20139_v55  ;;  %v20187_v0 = vld [vmem:[%s27219_s10 + $0xf8] sm:$0xff] }
 0xf42   : > { %v20202_v44 = vadd.f32 %v20170_v11, %v20138_v59  ;;  %v25608_v26 = vpop.f32.mrb[80].mxu0  ;;  %v20186_v11 = vld [vmem:[%s27219_s10 + $0xf0] sm:$0xff] }
 0xf43   : > { %20235 = vst.msk [vmem:[%s32622_s13 + $0x78] sm:$0xff] %vm35357_vm12, %v20203_v57  ;;  %v20141_v21 = vmul.f32 0.2, %v25608_v26  ;;  %v20013_v3 = vpop.f32.mrb[81].mxu0  ;;  %vm35372_vm12 = vmmov %vm35343_vm0 }
 0xf44   : > { %20234 = vst.msk [vmem:[%s32622_s13 + $0x70] sm:$0xff] %vm35358_vm2, %v20202_v44  ;;  %v20140_v56 = vmul.f32 0.2, %v20013_v3  ;;  %vm35373_vm2 = vmmov %vm35343_vm0 }
 0xf45   : > { %v20205_v61 = vadd.f32 %v20173_v7, %v20141_v21 }
 0xf46   : > { %v20204_v40 = vadd.f32 %v20172_v52, %v20140_v56  ;;  %v25611_v38 = vpop.f32.mrb[82].mxu0 }
 0xf47   : > { %20237 = vst.msk [vmem:[%s32622_s13 + $0x88] sm:$0xff] %vm35343_vm0, %v20205_v61  ;;  %v20143_v24 = vmul.f32 0.2, %v25611_v38  ;;  %v20023_v8 = vpop.f32.mrb[83].mxu0 }
 0xf48   : > { %20236 = vst.msk [vmem:[%s32622_s13 + $0x80] sm:$0xff] %vm35359_vm1, %v20204_v40  ;;  %v20142_v58 = vmul.f32 0.2, %v20023_v8 }
 0xf49   : > { %v20207_v37 = vadd.f32 %v20175_v50, %v20143_v24 }
 0xf4a   : > { %v20206_v34 = vadd.f32 %v20174_v4, %v20142_v58  ;;  %v25614_v62 = vpop.f32.mrb[84].mxu0 }
 0xf4b   : > { %20239 = vst.msk [vmem:[%s32622_s13 + $0x98] sm:$0xff] %vm35360_vm15, %v20207_v37  ;;  %v20145_v30 = vmul.f32 0.2, %v25614_v62  ;;  %v20033_v19 = vpop.f32.mrb[85].mxu0 }
 0xf4c   : > { %20238 = vst.msk [vmem:[%s32622_s13 + $0x90] sm:$0xff] %vm35361_vm5, %v20206_v34  ;;  %v20144_v12 = vmul.f32 0.2, %v20033_v19 }
 0xf4d   : > { %v20209_v29 = vadd.f32 %v20177_v53, %v20145_v30 }
 0xf4e   : > { %v20208_v33 = vadd.f32 %v20176_v60, %v20144_v12  ;;  %v25617_v1 = vpop.f32.mrb[86].mxu0 }
 0xf4f   : > { %20241 = vst.msk [vmem:[%s32622_s13 + $0xa8] sm:$0xff] %vm35362_vm11, %v20209_v29  ;;  %v20147_v43 = vmul.f32 0.2, %v25617_v1  ;;  %v20043_v2 = vpop.f32.mrb[87].mxu0 }
 0xf50   : > { %20240 = vst.msk [vmem:[%s32622_s13 + $0xa0] sm:$0xff] %vm35363_vm14, %v20208_v33  ;;  %v20146_v41 = vmul.f32 0.2, %v20043_v2 }
 0xf51   : > { %v20211_v20 = vadd.f32 %v20179_v23, %v20147_v43 }
 0xf52   : > { %v20210_v45 = vadd.f32 %v20178_v14, %v20146_v41  ;;  %v25620_v36 = vpop.f32.mrb[88].mxu0 }
 0xf53   : > { %20243 = vst.msk [vmem:[%s32622_s13 + $0xb8] sm:$0xff] %vm35364_vm7, %v20211_v20  ;;  %v20149_v10 = vmul.f32 0.2, %v25620_v36  ;;  %v20053_v51 = vpop.f32.mrb[89].mxu0 }
 0xf54   : > { %20242 = vst.msk [vmem:[%s32622_s13 + $0xb0] sm:$0xff] %vm35365_vm4, %v20210_v45  ;;  %v20148_v9 = vmul.f32 0.2, %v20053_v51 }
 0xf55   : > { %v20213_v25 = vadd.f32 %v20181_v42, %v20149_v10 }
 0xf56   : > { %v20212_v31 = vadd.f32 %v20180_v54, %v20148_v9  ;;  %v25623_v32 = vpop.f32.mrb[90].mxu0 }
 0xf57   : > { %20245 = vst.msk [vmem:[%s32622_s13 + $0xc8] sm:$0xff] %vm35366_vm9, %v20213_v25  ;;  %v20151_v13 = vmul.f32 0.2, %v25623_v32  ;;  %v20063_v46 = vpop.f32.mrb[91].mxu0 }
 0xf58   : > { %20244 = vst.msk [vmem:[%s32622_s13 + $0xc0] sm:$0xff] %vm35367_vm8, %v20212_v31  ;;  %v20150_v18 = vmul.f32 0.2, %v20063_v46 }
 0xf59   : > { %v20215_v22 = vadd.f32 %v20183_v16, %v20151_v13 }
 0xf5a   : > { %v20214_v5 = vadd.f32 %v20182_v63, %v20150_v18  ;;  %v25626_v35 = vpop.f32.mrb[92].mxu0 }
 0xf5b   : > { %20247 = vst.msk [vmem:[%s32622_s13 + $0xd8] sm:$0xff] %vm35368_vm6, %v20215_v22  ;;  %v20153_v47 = vmul.f32 0.2, %v25626_v35  ;;  %v20073_v27 = vpop.f32.mrb[93].mxu0 }
 0xf5c   : > { %20246 = vst.msk [vmem:[%s32622_s13 + $0xd0] sm:$0xff] %vm35369_vm13, %v20214_v5  ;;  %v20152_v49 = vmul.f32 0.2, %v20073_v27 }
 0xf5d   : > { %v20217_v15 = vadd.f32 %v20185_v17, %v20153_v47 }
 0xf5e   : > { %v20216_v28 = vadd.f32 %v20184_v48, %v20152_v49  ;;  %v25629_v6 = vpop.f32.mrb[94].mxu0 }
 0xf5f   : > { %20249 = vst.msk [vmem:[%s32622_s13 + $0xe8] sm:$0xff] %vm35370_vm3, %v20217_v15  ;;  %v20155_v55 = vmul.f32 0.2, %v25629_v6  ;;  %v20083_v39 = vpop.f32.mrb[95].mxu0 }
 0xf60   : > { %20248 = vst.msk [vmem:[%s32622_s13 + $0xe0] sm:$0xff] %vm35371_vm10, %v20216_v28  ;;  %v20154_v59 = vmul.f32 0.2, %v20083_v39 }
 0xf61   : > { %v20219_v57 = vadd.f32 %v20187_v0, %v20155_v55 }
 0xf62   : > { %v20218_v44 = vadd.f32 %v20186_v11, %v20154_v59 }
 0xf63   : > { %20251 = vst.msk [vmem:[%s32622_s13 + $0xf8] sm:$0xff] %vm35372_vm12, %v20219_v57 }
 0xf64   : > { %20250 = vst.msk [vmem:[%s32622_s13 + $0xf0] sm:$0xff] %vm35373_vm2, %v20218_v44 }
 0xf65 PF: > { %s16_s21 = sadd.s32 1, %s27059_s21  }
 0xf66   : > { %p13_p4 = scmp.ge.s32.totalorder %s16_s21, 4  }
 0xf68   :  { %15 = sbr.rel (!%p13_p4) target bundleno = 1 (0x1), region = 74 }

</bundles_post_ra>
